<compile_context>
chip_gen: v7x
topology: tpu7x:2x2x1
jax: 0.10.0
libtpu: 0.0.40
codegen_flags: <defaults>
</compile_context>

<pallas_src>
import functools
from dataclasses import dataclass
from typing import Sequence

import numpy as np
import jax
import jax.numpy as jnp
from jax.experimental import pallas as pl
from jax.experimental.pallas import tpu as pltpu

BN_EPS = 1e-5


@dataclass(frozen=True)
class SlatDim:
    cond_dim: int
    attr_dim: int


@dataclass(frozen=True)
class ColumnMeta:
    discrete: bool
    nmode: int


def _round_up(x, m):
    return ((x + m - 1) // m) * m


# ----------------------------- shared math helpers -----------------------------
def _batchnorm_relu(h, gamma, beta):
    """BatchNorm1d training mode (biased batch variance, eps=1e-5, affine) + ReLU.

    Both batch-axis reductions are offloaded to the MXU as ones-vector matmuls
    (bf16 operands, f32 accumulation); variance is two-pass (centered) so there
    is no E[x^2]-mean^2 cancellation.
    """
    n = h.shape[0]
    inv_n = jnp.float32(1.0 / n)
    ones_row = jnp.ones((1, n), jnp.bfloat16)
    mean = jnp.dot(ones_row, h.astype(jnp.bfloat16),
                   preferred_element_type=jnp.float32) * inv_n            # (1, H)
    centered = h - mean
    var = jnp.dot(ones_row, (centered * centered).astype(jnp.bfloat16),
                  preferred_element_type=jnp.float32) * inv_n             # (1, H)
    var = jnp.maximum(var, 0.0)
    hn = centered * jax.lax.rsqrt(var + BN_EPS)
    return jnp.maximum(hn * gamma + beta, 0.0)


def _activate_segments(x, g, tanh_mask, seg_rows, col_idx, has_tanh):
    """Hard gumbel-softmax per disjoint lane span + tanh on continuous columns.

    Fully 2-D: every temporary is (B, P).  The loop over segments is unrolled at
    trace time (nseg is small); col_idx is a precomputed (1, P) f32 lane index.
    Padding lanes belong to no segment and no tanh column, so they come out 0.
    """
    neg = jnp.float32(-1e30)
    big = jnp.float32(1e9)
    noisy = x + g                                                  # (B, P)
    onehot = jnp.zeros_like(x)                                     # (B, P)
    # TODO(synk): for schemas with hundreds of segments, replace this unrolled
    # loop with a (B, S) stat pass + MXU broadcast (seg spans are disjoint).
    for seg_row in seg_rows:                                       # seg_row: (1, P)
        inseg = seg_row > 0.5
        masked = jnp.where(inseg, noisy, neg)                      # (B, P)
        segmax = jnp.max(masked, axis=-1, keepdims=True)           # (B, 1)
        first = jnp.min(jnp.where(masked == segmax, col_idx, big),
                        axis=-1, keepdims=True)                    # (B, 1)
        onehot = onehot + (col_idx == first).astype(jnp.float32)   # (B, P)
    if has_tanh:
        return jnp.where(tanh_mask > 0.5, jnp.tanh(x), onehot)
    return onehot


# --------------------------------- Pallas kernel --------------------------------
def generator_kernel(zc_ref, w1_ref, b1_ref, g1_ref, be1_ref,
                     w2a_ref, w2b_ref, b2_ref, g2_ref, be2_ref,
                     wh_ref, bh_ref, gnoise_ref, tanh_mask_ref, seg_mask_ref,
                     col_idx_ref, x_noact_ref, x_act_ref, *, nseg, has_tanh):
    zc = zc_ref[...]                               # (B, pad_in) f32, zero-padded lanes
    zc_b = zc.astype(jnp.bfloat16)

    # Residual block: Linear -> BN -> ReLU.  The concat([h1, zc]) feeding the next
    # Linear is folded away by splitting w2 into w2a (hidden rows) + w2b (input rows).
    h1 = jnp.dot(zc_b, w1_ref[...], preferred_element_type=jnp.float32) + b1_ref[...]
    h1 = _batchnorm_relu(h1, g1_ref[...], be1_ref[...])

    # gen_blk: Linear -> BN -> ReLU (no lane concat)
    h2 = (jnp.dot(h1.astype(jnp.bfloat16), w2a_ref[...],
                  preferred_element_type=jnp.float32)
          + jnp.dot(zc_b, w2b_ref[...], preferred_element_type=jnp.float32)
          + b2_ref[...])
    s = _batchnorm_relu(h2, g2_ref[...], be2_ref[...])

    # fused per-slat heads; output width padded to a multiple of 128 (lane-dense stores)
    x = jnp.dot(s.astype(jnp.bfloat16), wh_ref[...],
                preferred_element_type=jnp.float32) + bh_ref[...]
    x_noact_ref[...] = x

    seg_rows = [seg_mask_ref[pl.ds(i, 1), :] for i in range(nseg)]
    x_act_ref[...] = _activate_segments(x, gnoise_ref[...], tanh_mask_ref[...],
                                        seg_rows, col_idx_ref[...], has_tanh)


# ----------------------------- mask / param preparation --------------------------
def build_activation_masks(meta: Sequence[ColumnMeta], pad_attr: int):
    tanh = np.zeros((1, pad_attr), np.float32)
    rows = []
    bias = 0
    for m in meta:
        if not m.discrete:
            tanh[0, bias] = 1.0
            bias += 1
        row = np.zeros((pad_attr,), np.float32)
        row[bias:bias + m.nmode] = 1.0
        rows.append(row)
        bias += m.nmode
    return tanh, np.stack(rows), bias


def prepare_params(params, hidden, pad_in, pad_attr):
    # One-time prep: split w2 (removes the lane concat), zero-pad to lane-dense
    # widths, cast matmul operands to bf16 (f32 MXU accumulate keeps accuracy).
    def pad_rows(w, rows):
        return jnp.zeros((rows, w.shape[1]), w.dtype).at[:w.shape[0]].set(w)

    def pad_cols(w, cols):
        return jnp.zeros((w.shape[0], cols), w.dtype).at[:, :w.shape[1]].set(w)

    w2a = params["w2"][:hidden]
    w2b = params["w2"][hidden:]
    return dict(
        w1=pad_rows(params["w1"], pad_in).astype(jnp.bfloat16),
        b1=params["b1"], g1=params["g1"], be1=params["be1"],
        w2a=w2a.astype(jnp.bfloat16),
        w2b=pad_rows(w2b, pad_in).astype(jnp.bfloat16),
        b2=params["b2"], g2=params["g2"], be2=params["be2"],
        wh=pad_cols(params["wh"], pad_attr).astype(jnp.bfloat16),
        bh=pad_cols(params["bh"], pad_attr),
    )


# ----------------------------------- wrapper ------------------------------------
def build_generator(params, meta, in_dim):
    """One-time parameter/mask prep; returns a jitted forward(zc, gnoise).

    prepare_params / build_activation_masks only depend on (params, meta), so they
    run once here; the per-call zero-padding fuses with the pallas_call under jit.
    """
    hidden = params["w1"].shape[1]
    total_attr = params["wh"].shape[1]
    pad_in = _round_up(in_dim, 128)
    pad_attr = _round_up(total_attr, 128)

    prepped = prepare_params(params, hidden, pad_in, pad_attr)
    tanh_np, seg_np, used = build_activation_masks(meta, pad_attr)
    assert used == total_attr
    has_tanh = bool(tanh_np.any())
    tanh_mask = jnp.asarray(tanh_np)
    seg_mask = jnp.asarray(seg_np)
    col_idx = jnp.arange(pad_attr, dtype=jnp.float32)[None, :]
    nseg = seg_mask.shape[0]

    kernel = functools.partial(generator_kernel, nseg=nseg, has_tanh=has_tanh)
    vmem = pl.BlockSpec(memory_space=pltpu.MemorySpace.VMEM)

    @jax.jit
    def forward(zc, gnoise):
        B = zc.shape[0]
        zc_p = jnp.zeros((B, pad_in), jnp.float32).at[:, :in_dim].set(
            zc.astype(jnp.float32))
        g_p = jnp.zeros((B, pad_attr), jnp.float32).at[:, :total_attr].set(
            gnoise.astype(jnp.float32))

        args = (zc_p,
                prepped["w1"], prepped["b1"], prepped["g1"], prepped["be1"],
                prepped["w2a"], prepped["w2b"], prepped["b2"], prepped["g2"],
                prepped["be2"], prepped["wh"], prepped["bh"],
                g_p, tanh_mask, seg_mask, col_idx)

        flops = 2 * B * (pad_in * hidden + hidden * hidden
                         + pad_in * hidden + hidden * pad_attr)
        bytes_acc = sum(int(a.size) * a.dtype.itemsize for a in args) \
            + 2 * B * pad_attr * 4
        # rough resident set: I/O + f32 intermediates (h1/h2/s + 2-D activation temps)
        work_bytes = bytes_acc + 4 * B * hidden * 4 + 4 * B * pad_attr * 4
        # Keep the clamp <= 32 MiB (v7x-safe); tile the batch instead of raising it.
        vmem_limit = int(min(max(2 * work_bytes, 16 << 20), 32 << 20))

        x_noact_p, x_act_p = pl.pallas_call(
            kernel,
            out_shape=(jax.ShapeDtypeStruct((B, pad_attr), jnp.float32),
                       jax.ShapeDtypeStruct((B, pad_attr), jnp.float32)),
            in_specs=[vmem] * len(args),
            out_specs=(vmem, vmem),
            compiler_params=pltpu.CompilerParams(vmem_limit_bytes=vmem_limit),
            cost_estimate=pl.CostEstimate(flops=flops,
                                          transcendentals=B * pad_attr,
                                          bytes_accessed=bytes_acc),
        )(*args)
        return x_act_p[:, :total_attr], x_noact_p[:, :total_attr]

    return forward


# ----------------------- pure-JAX references (sanity checks) ---------------------
def generator_forward_ref(params, zc, gnoise, meta):
    # Same math as the kernel (split matmul, bf16 operands, MXU BN stats, 2-D
    # segment activation) executed by plain XLA — cross-check for the Pallas kernel.
    B, in_dim = zc.shape
    hidden = params["w1"].shape[1]
    total_attr = params["wh"].shape[1]
    pad_in = _round_up(in_dim, 128)
    pad_attr = _round_up(total_attr, 128)
    p = prepare_params(params, hidden, pad_in, pad_attr)
    tanh_np, seg_np, _ = build_activation_masks(meta, pad_attr)
    tanh_mask = jnp.asarray(tanh_np)
    seg_mask = jnp.asarray(seg_np)
    col_idx = jnp.arange(pad_attr, dtype=jnp.float32)[None, :]
    zc_p = jnp.zeros((B, pad_in), jnp.float32).at[:, :in_dim].set(zc)
    g_p = jnp.zeros((B, pad_attr), jnp.float32).at[:, :total_attr].set(gnoise)
    zc_b = zc_p.astype(jnp.bfloat16)
    h1 = jnp.dot(zc_b, p["w1"], preferred_element_type=jnp.float32) + p["b1"]
    h1 = _batchnorm_relu(h1, p["g1"], p["be1"])
    h2 = (jnp.dot(h1.astype(jnp.bfloat16), p["w2a"], preferred_element_type=jnp.float32)
          + jnp.dot(zc_b, p["w2b"], preferred_element_type=jnp.float32) + p["b2"])
    s = _batchnorm_relu(h2, p["g2"], p["be2"])
    x = jnp.dot(s.astype(jnp.bfloat16), p["wh"],
                preferred_element_type=jnp.float32) + p["bh"]
    seg_rows = [seg_mask[i:i + 1, :] for i in range(seg_mask.shape[0])]
    act = _activate_segments(x, g_p, tanh_mask, seg_rows, col_idx,
                             bool(tanh_np.any()))
    return act[:, :total_attr], x[:, :total_attr]


def _activate_torch_style(x, g, meta):
    # Direct transcription of Generator.activate (loop over columns) for checking
    # the vectorized in-kernel activation against the PyTorch semantics.
    parts = []
    bias = 0
    for m in meta:
        if not m.discrete:
            parts.append(jnp.tanh(x[:, bias:bias + 1]))
            bias += 1
        span = m.nmode
        logits = x[:, bias:bias + span] + g[:, bias:bias + span]
        mx = jnp.max(logits, axis=-1, keepdims=True)
        iota = jax.lax.broadcasted_iota(jnp.float32, logits.shape, 1)
        first = jnp.min(jnp.where(logits == mx, iota, 1e9), axis=-1, keepdims=True)
        parts.append((iota == first).astype(jnp.float32))
        bias += span
    return jnp.concatenate(parts, axis=1)


# ------------------------------- parameter setup --------------------------------
def init_params(key, in_dim, hidden, res_out, total_attr):
    def linear(k, fan_in, fan_out):
        kw, kb = jax.random.split(k)
        bound = 1.0 / jnp.sqrt(fan_in)
        w = jax.random.uniform(kw, (fan_in, fan_out), jnp.float32, -bound, bound)
        b = jax.random.uniform(kb, (1, fan_out), jnp.float32, -bound, bound)
        return w, b

    k1, k2, k3 = jax.random.split(key, 3)
    w1, b1 = linear(k1, in_dim, hidden)          # Residual Linear
    w2, b2 = linear(k2, res_out, hidden)         # gen_blk Linear (rows = [hidden | in_dim])
    wh, bh = linear(k3, hidden, total_attr)      # fused per-slat heads
    ones = jnp.ones((1, hidden), jnp.float32)
    zeros = jnp.zeros((1, hidden), jnp.float32)
    return dict(w1=w1, b1=b1, g1=ones, be1=zeros,
                w2=w2, b2=b2, g2=ones, be2=zeros,
                wh=wh, bh=bh)


if __name__ == "__main__":
    # synthetic hyper-params / schema (small feature dims; batch sized so the
    # MXU systolic rows are actually filled)
    latent_dim = 32
    split = [SlatDim(cond_dim=4, attr_dim=8), SlatDim(cond_dim=6, attr_dim=8)]
    meta = [ColumnMeta(discrete=False, nmode=3),   # 1 tanh col + 3 modes
            ColumnMeta(discrete=True,  nmode=4),   # 4 modes
            ColumnMeta(discrete=False, nmode=2),   # 1 tanh col + 2 modes
            ColumnMeta(discrete=True,  nmode=5)]   # 5 modes
    cond_dim = sum(s.cond_dim for s in split)                  # 10
    total_attr = sum(s.attr_dim for s in split)                # 16
    assert total_attr == sum((0 if m.discrete else 1) + m.nmode for m in meta)

    hidden = 256
    in_dim = latent_dim + cond_dim                             # 42
    res_out = hidden + in_dim                                  # 298 (Residual.out_features)
    B = 256

    key = jax.random.PRNGKey(0)
    k_param, k_z, k_c, k_g = jax.random.split(key, 4)
    params = init_params(k_param, in_dim, hidden, res_out, total_attr)

    z = jax.random.normal(k_z, (B, latent_dim), jnp.float32)
    c = jax.random.normal(k_c, (B, cond_dim), jnp.float32)
    zc = jnp.concatenate([z, c], axis=1)
    gnoise = jax.random.gumbel(k_g, (B, total_attr), jnp.float32)

    forward = build_generator(params, meta, in_dim)            # one-time prep + jit
    x_act, x_noact = forward(zc, gnoise)
    jax.block_until_ready((x_act, x_noact))

    assert x_act.shape == (B, total_attr) and x_noact.shape == (B, total_attr)

    # 1) pre-activation output matches the pure-JAX mirror of the kernel math
    ref_act, ref_noact = generator_forward_ref(params, zc, gnoise, meta)
    assert jnp.allclose(x_noact, ref_noact, atol=1e-2, rtol=1e-2)

    # 2) in-kernel vectorized activation matches the PyTorch-style per-column
    #    activate() applied to the kernel's own pre-activation output
    torch_style = _activate_torch_style(x_noact, gnoise, meta)
    assert jnp.allclose(x_act, torch_style, atol=1e-4, rtol=1e-4)

    print("KERNEL_OK")
</pallas_src>

<mosaic_0001>
module attributes {stable_mosaic.version = 11 : i64} {
  func.func @generator_kernel(%arg0: memref<256x128xf32, #tpu.memory_space<vmem>>, %arg1: memref<128x256xbf16, #tpu.memory_space<vmem>>, %arg2: memref<1x256xf32, #tpu.memory_space<vmem>>, %arg3: memref<1x256xf32, #tpu.memory_space<vmem>>, %arg4: memref<1x256xf32, #tpu.memory_space<vmem>>, %arg5: memref<256x256xbf16, #tpu.memory_space<vmem>>, %arg6: memref<128x256xbf16, #tpu.memory_space<vmem>>, %arg7: memref<1x256xf32, #tpu.memory_space<vmem>>, %arg8: memref<1x256xf32, #tpu.memory_space<vmem>>, %arg9: memref<1x256xf32, #tpu.memory_space<vmem>>, %arg10: memref<256x128xbf16, #tpu.memory_space<vmem>>, %arg11: memref<1x128xf32, #tpu.memory_space<vmem>>, %arg12: memref<256x128xf32, #tpu.memory_space<vmem>>, %arg13: memref<1x128xf32, #tpu.memory_space<vmem>>, %arg14: memref<4x128xf32, #tpu.memory_space<vmem>>, %arg15: memref<1x128xf32, #tpu.memory_space<vmem>>, %arg16: memref<256x128xf32, #tpu.memory_space<vmem>>, %arg17: memref<256x128xf32, #tpu.memory_space<vmem>>) attributes {dimension_semantics = [], scalar_prefetch = 0 : i64, scratch_operands = 0 : i64, tpu.core_type = #tpu.core_type<tc>} {
    %c0 = arith.constant 0 : index
    %c0_0 = arith.constant 0 : index
    %0 = vector.load %arg0[%c0, %c0_0] : memref<256x128xf32, #tpu.memory_space<vmem>>, vector<256x128xf32>
    %1 = arith.truncf %0 : vector<256x128xf32> to vector<256x128xbf16>
    %c0_1 = arith.constant 0 : index
    %c0_2 = arith.constant 0 : index
    %2 = vector.load %arg1[%c0_1, %c0_2] : memref<128x256xbf16, #tpu.memory_space<vmem>>, vector<128x256xbf16>
    %cst = arith.constant dense<0.000000e+00> : vector<256x256xf32>
    %3 = tpu.matmul %1, %2, %cst {dimension_numbers = #tpu.dot_dimension_numbers<[1], [0], [0], [1], [0, 0, 1, 1], [], []>} : vector<256x128xbf16>, vector<128x256xbf16>, vector<256x256xf32> -> vector<256x256xf32>
    %c0_3 = arith.constant 0 : index
    %c0_4 = arith.constant 0 : index
    %4 = vector.load %arg2[%c0_3, %c0_4] : memref<1x256xf32, #tpu.memory_space<vmem>>, vector<1x256xf32>
    %5 = vector.broadcast %4 : vector<1x256xf32> to vector<256x256xf32>
    %6 = arith.addf %3, %5 : vector<256x256xf32>
    %c0_5 = arith.constant 0 : index
    %c0_6 = arith.constant 0 : index
    %7 = vector.load %arg3[%c0_5, %c0_6] : memref<1x256xf32, #tpu.memory_space<vmem>>, vector<1x256xf32>
    %c0_7 = arith.constant 0 : index
    %c0_8 = arith.constant 0 : index
    %8 = vector.load %arg4[%c0_7, %c0_8] : memref<1x256xf32, #tpu.memory_space<vmem>>, vector<1x256xf32>
    %cst_9 = arith.constant 1.000000e+00 : bf16
    %9 = vector.broadcast %cst_9 : bf16 to vector<1x256xbf16>
    %10 = arith.truncf %6 : vector<256x256xf32> to vector<256x256xbf16>
    %cst_10 = arith.constant dense<0.000000e+00> : vector<1x256xf32>
    %11 = tpu.matmul %9, %10, %cst_10 {dimension_numbers = #tpu.dot_dimension_numbers<[1], [0], [0], [1], [0, 0, 1, 1], [], []>} : vector<1x256xbf16>, vector<256x256xbf16>, vector<1x256xf32> -> vector<1x256xf32>
    %cst_11 = arith.constant 3.906250e-03 : f32
    %12 = vector.broadcast %cst_11 : f32 to vector<1x256xf32>
    %13 = arith.mulf %11, %12 : vector<1x256xf32>
    %14 = vector.broadcast %13 : vector<1x256xf32> to vector<256x256xf32>
    %15 = arith.subf %6, %14 : vector<256x256xf32>
    %16 = arith.mulf %15, %15 : vector<256x256xf32>
    %17 = arith.truncf %16 : vector<256x256xf32> to vector<256x256xbf16>
    %cst_12 = arith.constant dense<0.000000e+00> : vector<1x256xf32>
    %18 = tpu.matmul %9, %17, %cst_12 {dimension_numbers = #tpu.dot_dimension_numbers<[1], [0], [0], [1], [0, 0, 1, 1], [], []>} : vector<1x256xbf16>, vector<256x256xbf16>, vector<1x256xf32> -> vector<1x256xf32>
    %cst_13 = arith.constant 3.906250e-03 : f32
    %19 = vector.broadcast %cst_13 : f32 to vector<1x256xf32>
    %20 = arith.mulf %18, %19 : vector<1x256xf32>
    %cst_14 = arith.constant 0.000000e+00 : f32
    %21 = vector.broadcast %cst_14 : f32 to vector<1x256xf32>
    %22 = arith.maximumf %20, %21 : vector<1x256xf32>
    %cst_15 = arith.constant 9.99999974E-6 : f32
    %23 = vector.broadcast %cst_15 : f32 to vector<1x256xf32>
    %24 = arith.addf %22, %23 : vector<1x256xf32>
    %25 = math.rsqrt %24 : vector<1x256xf32>
    %26 = vector.broadcast %25 : vector<1x256xf32> to vector<256x256xf32>
    %27 = arith.mulf %15, %26 : vector<256x256xf32>
    %28 = vector.broadcast %7 : vector<1x256xf32> to vector<256x256xf32>
    %29 = arith.mulf %27, %28 : vector<256x256xf32>
    %30 = vector.broadcast %8 : vector<1x256xf32> to vector<256x256xf32>
    %31 = arith.addf %29, %30 : vector<256x256xf32>
    %cst_16 = arith.constant 0.000000e+00 : f32
    %32 = vector.broadcast %cst_16 : f32 to vector<256x256xf32>
    %33 = arith.maximumf %31, %32 : vector<256x256xf32>
    %34 = arith.truncf %33 : vector<256x256xf32> to vector<256x256xbf16>
    %c0_17 = arith.constant 0 : index
    %c0_18 = arith.constant 0 : index
    %35 = vector.load %arg5[%c0_17, %c0_18] : memref<256x256xbf16, #tpu.memory_space<vmem>>, vector<256x256xbf16>
    %cst_19 = arith.constant dense<0.000000e+00> : vector<256x256xf32>
    %36 = tpu.matmul %34, %35, %cst_19 {dimension_numbers = #tpu.dot_dimension_numbers<[1], [0], [0], [1], [0, 0, 1, 1], [], []>} : vector<256x256xbf16>, vector<256x256xbf16>, vector<256x256xf32> -> vector<256x256xf32>
    %c0_20 = arith.constant 0 : index
    %c0_21 = arith.constant 0 : index
    %37 = vector.load %arg6[%c0_20, %c0_21] : memref<128x256xbf16, #tpu.memory_space<vmem>>, vector<128x256xbf16>
    %cst_22 = arith.constant dense<0.000000e+00> : vector<256x256xf32>
    %38 = tpu.matmul %1, %37, %cst_22 {dimension_numbers = #tpu.dot_dimension_numbers<[1], [0], [0], [1], [0, 0, 1, 1], [], []>} : vector<256x128xbf16>, vector<128x256xbf16>, vector<256x256xf32> -> vector<256x256xf32>
    %39 = arith.addf %36, %38 : vector<256x256xf32>
    %c0_23 = arith.constant 0 : index
    %c0_24 = arith.constant 0 : index
    %40 = vector.load %arg7[%c0_23, %c0_24] : memref<1x256xf32, #tpu.memory_space<vmem>>, vector<1x256xf32>
    %41 = vector.broadcast %40 : vector<1x256xf32> to vector<256x256xf32>
    %42 = arith.addf %39, %41 : vector<256x256xf32>
    %c0_25 = arith.constant 0 : index
    %c0_26 = arith.constant 0 : index
    %43 = vector.load %arg8[%c0_25, %c0_26] : memref<1x256xf32, #tpu.memory_space<vmem>>, vector<1x256xf32>
    %c0_27 = arith.constant 0 : index
    %c0_28 = arith.constant 0 : index
    %44 = vector.load %arg9[%c0_27, %c0_28] : memref<1x256xf32, #tpu.memory_space<vmem>>, vector<1x256xf32>
    %cst_29 = arith.constant 1.000000e+00 : bf16
    %45 = vector.broadcast %cst_29 : bf16 to vector<1x256xbf16>
    %46 = arith.truncf %42 : vector<256x256xf32> to vector<256x256xbf16>
    %cst_30 = arith.constant dense<0.000000e+00> : vector<1x256xf32>
    %47 = tpu.matmul %45, %46, %cst_30 {dimension_numbers = #tpu.dot_dimension_numbers<[1], [0], [0], [1], [0, 0, 1, 1], [], []>} : vector<1x256xbf16>, vector<256x256xbf16>, vector<1x256xf32> -> vector<1x256xf32>
    %cst_31 = arith.constant 3.906250e-03 : f32
    %48 = vector.broadcast %cst_31 : f32 to vector<1x256xf32>
    %49 = arith.mulf %47, %48 : vector<1x256xf32>
    %50 = vector.broadcast %49 : vector<1x256xf32> to vector<256x256xf32>
    %51 = arith.subf %42, %50 : vector<256x256xf32>
    %52 = arith.mulf %51, %51 : vector<256x256xf32>
    %53 = arith.truncf %52 : vector<256x256xf32> to vector<256x256xbf16>
    %cst_32 = arith.constant dense<0.000000e+00> : vector<1x256xf32>
    %54 = tpu.matmul %45, %53, %cst_32 {dimension_numbers = #tpu.dot_dimension_numbers<[1], [0], [0], [1], [0, 0, 1, 1], [], []>} : vector<1x256xbf16>, vector<256x256xbf16>, vector<1x256xf32> -> vector<1x256xf32>
    %cst_33 = arith.constant 3.906250e-03 : f32
    %55 = vector.broadcast %cst_33 : f32 to vector<1x256xf32>
    %56 = arith.mulf %54, %55 : vector<1x256xf32>
    %cst_34 = arith.constant 0.000000e+00 : f32
    %57 = vector.broadcast %cst_34 : f32 to vector<1x256xf32>
    %58 = arith.maximumf %56, %57 : vector<1x256xf32>
    %cst_35 = arith.constant 9.99999974E-6 : f32
    %59 = vector.broadcast %cst_35 : f32 to vector<1x256xf32>
    %60 = arith.addf %58, %59 : vector<1x256xf32>
    %61 = math.rsqrt %60 : vector<1x256xf32>
    %62 = vector.broadcast %61 : vector<1x256xf32> to vector<256x256xf32>
    %63 = arith.mulf %51, %62 : vector<256x256xf32>
    %64 = vector.broadcast %43 : vector<1x256xf32> to vector<256x256xf32>
    %65 = arith.mulf %63, %64 : vector<256x256xf32>
    %66 = vector.broadcast %44 : vector<1x256xf32> to vector<256x256xf32>
    %67 = arith.addf %65, %66 : vector<256x256xf32>
    %cst_36 = arith.constant 0.000000e+00 : f32
    %68 = vector.broadcast %cst_36 : f32 to vector<256x256xf32>
    %69 = arith.maximumf %67, %68 : vector<256x256xf32>
    %70 = arith.truncf %69 : vector<256x256xf32> to vector<256x256xbf16>
    %c0_37 = arith.constant 0 : index
    %c0_38 = arith.constant 0 : index
    %71 = vector.load %arg10[%c0_37, %c0_38] : memref<256x128xbf16, #tpu.memory_space<vmem>>, vector<256x128xbf16>
    %cst_39 = arith.constant dense<0.000000e+00> : vector<256x128xf32>
    %72 = tpu.matmul %70, %71, %cst_39 {dimension_numbers = #tpu.dot_dimension_numbers<[1], [0], [0], [1], [0, 0, 1, 1], [], []>} : vector<256x256xbf16>, vector<256x128xbf16>, vector<256x128xf32> -> vector<256x128xf32>
    %c0_40 = arith.constant 0 : index
    %c0_41 = arith.constant 0 : index
    %73 = vector.load %arg11[%c0_40, %c0_41] : memref<1x128xf32, #tpu.memory_space<vmem>>, vector<1x128xf32>
    %74 = vector.broadcast %73 : vector<1x128xf32> to vector<256x128xf32>
    %75 = arith.addf %72, %74 : vector<256x128xf32>
    %c0_42 = arith.constant 0 : index
    %c0_43 = arith.constant 0 : index
    %76 = vector.load %arg16[%c0_42, %c0_43] : memref<256x128xf32, #tpu.memory_space<vmem>>, vector<256x128xf32>
    tpu.vector_store %arg16[%c0_42, %c0_43], %75 {strides = array<i32>} : memref<256x128xf32, #tpu.memory_space<vmem>>, vector<256x128xf32>,
    %c0_44 = arith.constant 0 : index
    %c0_45 = arith.constant 0 : index
    %77 = vector.load %arg14[%c0_44, %c0_45] : memref<4x128xf32, #tpu.memory_space<vmem>>, vector<1x128xf32>
    %c1 = arith.constant 1 : index
    %c0_46 = arith.constant 0 : index
    %78 = vector.load %arg14[%c1, %c0_46] : memref<4x128xf32, #tpu.memory_space<vmem>>, vector<1x128xf32>
    %c2 = arith.constant 2 : index
    %c0_47 = arith.constant 0 : index
    %79 = vector.load %arg14[%c2, %c0_47] : memref<4x128xf32, #tpu.memory_space<vmem>>, vector<1x128xf32>
    %c3 = arith.constant 3 : index
    %c0_48 = arith.constant 0 : index
    %80 = vector.load %arg14[%c3, %c0_48] : memref<4x128xf32, #tpu.memory_space<vmem>>, vector<1x128xf32>
    %c0_49 = arith.constant 0 : index
    %c0_50 = arith.constant 0 : index
    %81 = vector.load %arg12[%c0_49, %c0_50] : memref<256x128xf32, #tpu.memory_space<vmem>>, vector<256x128xf32>
    %c0_51 = arith.constant 0 : index
    %c0_52 = arith.constant 0 : index
    %82 = vector.load %arg13[%c0_51, %c0_52] : memref<1x128xf32, #tpu.memory_space<vmem>>, vector<1x128xf32>
    %c0_53 = arith.constant 0 : index
    %c0_54 = arith.constant 0 : index
    %83 = vector.load %arg15[%c0_53, %c0_54] : memref<1x128xf32, #tpu.memory_space<vmem>>, vector<1x128xf32>
    %84 = arith.addf %75, %81 : vector<256x128xf32>
    %cst_55 = arith.constant 0.000000e+00 : f32
    %85 = vector.broadcast %cst_55 : f32 to vector<256x128xf32>
    %cst_56 = arith.constant 5.000000e-01 : f32
    %86 = vector.broadcast %cst_56 : f32 to vector<1x128xf32>
    %87 = arith.cmpf ogt, %77, %86 : vector<1x128xf32>
    %cst_57 = arith.constant -1.000000e+30 : f32
    %88 = vector.shape_cast %87 : vector<1x128xi1> to vector<1x128xi1>
    %89 = vector.broadcast %88 : vector<1x128xi1> to vector<256x128xi1>
    %90 = vector.broadcast %cst_57 : f32 to vector<256x128xf32>
    %91 = arith.select %89, %84, %90 : vector<256x128xi1>, vector<256x128xf32>
    %cst_58 = arith.constant dense<0xFF800000> : vector<256xf32>
    %92 = vector.multi_reduction <maximumf>, %91, %cst_58 [1] : vector<256x128xf32> to vector<256xf32>
    %93 = vector.shape_cast %92 : vector<256xf32> to vector<256x1xf32>
    %94 = vector.broadcast %93 : vector<256x1xf32> to vector<256x128xf32>
    %95 = arith.cmpf oeq, %91, %94 : vector<256x128xf32>
    %cst_59 = arith.constant 1.000000e+09 : f32
    %96 = vector.shape_cast %83 : vector<1x128xf32> to vector<1x128xf32>
    %97 = vector.broadcast %96 : vector<1x128xf32> to vector<256x128xf32>
    %98 = vector.broadcast %cst_59 : f32 to vector<256x128xf32>
    %99 = arith.select %95, %97, %98 : vector<256x128xi1>, vector<256x128xf32>
    %cst_60 = arith.constant dense<0x7F800000> : vector<256xf32>
    %100 = vector.multi_reduction <minimumf>, %99, %cst_60 [1] : vector<256x128xf32> to vector<256xf32>
    %101 = vector.shape_cast %100 : vector<256xf32> to vector<256x1xf32>
    %102 = vector.broadcast %83 : vector<1x128xf32> to vector<256x128xf32>
    %103 = vector.broadcast %101 : vector<256x1xf32> to vector<256x128xf32>
    %104 = arith.cmpf oeq, %102, %103 : vector<256x128xf32>
    %105 = arith.extui %104 : vector<256x128xi1> to vector<256x128xi32>
    %106 = arith.sitofp %105 : vector<256x128xi32> to vector<256x128xf32>
    %107 = arith.addf %85, %106 : vector<256x128xf32>
    %cst_61 = arith.constant 5.000000e-01 : f32
    %108 = vector.broadcast %cst_61 : f32 to vector<1x128xf32>
    %109 = arith.cmpf ogt, %78, %108 : vector<1x128xf32>
    %cst_62 = arith.constant -1.000000e+30 : f32
    %110 = vector.shape_cast %109 : vector<1x128xi1> to vector<1x128xi1>
    %111 = vector.broadcast %110 : vector<1x128xi1> to vector<256x128xi1>
    %112 = vector.broadcast %cst_62 : f32 to vector<256x128xf32>
    %113 = arith.select %111, %84, %112 : vector<256x128xi1>, vector<256x128xf32>
    %cst_63 = arith.constant dense<0xFF800000> : vector<256xf32>
    %114 = vector.multi_reduction <maximumf>, %113, %cst_63 [1] : vector<256x128xf32> to vector<256xf32>
    %115 = vector.shape_cast %114 : vector<256xf32> to vector<256x1xf32>
    %116 = vector.broadcast %115 : vector<256x1xf32> to vector<256x128xf32>
    %117 = arith.cmpf oeq, %113, %116 : vector<256x128xf32>
    %cst_64 = arith.constant 1.000000e+09 : f32
    %118 = vector.shape_cast %83 : vector<1x128xf32> to vector<1x128xf32>
    %119 = vector.broadcast %118 : vector<1x128xf32> to vector<256x128xf32>
    %120 = vector.broadcast %cst_64 : f32 to vector<256x128xf32>
    %121 = arith.select %117, %119, %120 : vector<256x128xi1>, vector<256x128xf32>
    %cst_65 = arith.constant dense<0x7F800000> : vector<256xf32>
    %122 = vector.multi_reduction <minimumf>, %121, %cst_65 [1] : vector<256x128xf32> to vector<256xf32>
    %123 = vector.shape_cast %122 : vector<256xf32> to vector<256x1xf32>
    %124 = vector.broadcast %83 : vector<1x128xf32> to vector<256x128xf32>
    %125 = vector.broadcast %123 : vector<256x1xf32> to vector<256x128xf32>
    %126 = arith.cmpf oeq, %124, %125 : vector<256x128xf32>
    %127 = arith.extui %126 : vector<256x128xi1> to vector<256x128xi32>
    %128 = arith.sitofp %127 : vector<256x128xi32> to vector<256x128xf32>
    %129 = arith.addf %107, %128 : vector<256x128xf32>
    %cst_66 = arith.constant 5.000000e-01 : f32
    %130 = vector.broadcast %cst_66 : f32 to vector<1x128xf32>
    %131 = arith.cmpf ogt, %79, %130 : vector<1x128xf32>
    %cst_67 = arith.constant -1.000000e+30 : f32
    %132 = vector.shape_cast %131 : vector<1x128xi1> to vector<1x128xi1>
    %133 = vector.broadcast %132 : vector<1x128xi1> to vector<256x128xi1>
    %134 = vector.broadcast %cst_67 : f32 to vector<256x128xf32>
    %135 = arith.select %133, %84, %134 : vector<256x128xi1>, vector<256x128xf32>
    %cst_68 = arith.constant dense<0xFF800000> : vector<256xf32>
    %136 = vector.multi_reduction <maximumf>, %135, %cst_68 [1] : vector<256x128xf32> to vector<256xf32>
    %137 = vector.shape_cast %136 : vector<256xf32> to vector<256x1xf32>
    %138 = vector.broadcast %137 : vector<256x1xf32> to vector<256x128xf32>
    %139 = arith.cmpf oeq, %135, %138 : vector<256x128xf32>
    %cst_69 = arith.constant 1.000000e+09 : f32
    %140 = vector.shape_cast %83 : vector<1x128xf32> to vector<1x128xf32>
    %141 = vector.broadcast %140 : vector<1x128xf32> to vector<256x128xf32>
    %142 = vector.broadcast %cst_69 : f32 to vector<256x128xf32>
    %143 = arith.select %139, %141, %142 : vector<256x128xi1>, vector<256x128xf32>
    %cst_70 = arith.constant dense<0x7F800000> : vector<256xf32>
    %144 = vector.multi_reduction <minimumf>, %143, %cst_70 [1] : vector<256x128xf32> to vector<256xf32>
    %145 = vector.shape_cast %144 : vector<256xf32> to vector<256x1xf32>
    %146 = vector.broadcast %83 : vector<1x128xf32> to vector<256x128xf32>
    %147 = vector.broadcast %145 : vector<256x1xf32> to vector<256x128xf32>
    %148 = arith.cmpf oeq, %146, %147 : vector<256x128xf32>
    %149 = arith.extui %148 : vector<256x128xi1> to vector<256x128xi32>
    %150 = arith.sitofp %149 : vector<256x128xi32> to vector<256x128xf32>
    %151 = arith.addf %129, %150 : vector<256x128xf32>
    %cst_71 = arith.constant 5.000000e-01 : f32
    %152 = vector.broadcast %cst_71 : f32 to vector<1x128xf32>
    %153 = arith.cmpf ogt, %80, %152 : vector<1x128xf32>
    %cst_72 = arith.constant -1.000000e+30 : f32
    %154 = vector.shape_cast %153 : vector<1x128xi1> to vector<1x128xi1>
    %155 = vector.broadcast %154 : vector<1x128xi1> to vector<256x128xi1>
    %156 = vector.broadcast %cst_72 : f32 to vector<256x128xf32>
    %157 = arith.select %155, %84, %156 : vector<256x128xi1>, vector<256x128xf32>
    %cst_73 = arith.constant dense<0xFF800000> : vector<256xf32>
    %158 = vector.multi_reduction <maximumf>, %157, %cst_73 [1] : vector<256x128xf32> to vector<256xf32>
    %159 = vector.shape_cast %158 : vector<256xf32> to vector<256x1xf32>
    %160 = vector.broadcast %159 : vector<256x1xf32> to vector<256x128xf32>
    %161 = arith.cmpf oeq, %157, %160 : vector<256x128xf32>
    %cst_74 = arith.constant 1.000000e+09 : f32
    %162 = vector.shape_cast %83 : vector<1x128xf32> to vector<1x128xf32>
    %163 = vector.broadcast %162 : vector<1x128xf32> to vector<256x128xf32>
    %164 = vector.broadcast %cst_74 : f32 to vector<256x128xf32>
    %165 = arith.select %161, %163, %164 : vector<256x128xi1>, vector<256x128xf32>
    %cst_75 = arith.constant dense<0x7F800000> : vector<256xf32>
    %166 = vector.multi_reduction <minimumf>, %165, %cst_75 [1] : vector<256x128xf32> to vector<256xf32>
    %167 = vector.shape_cast %166 : vector<256xf32> to vector<256x1xf32>
    %168 = vector.broadcast %83 : vector<1x128xf32> to vector<256x128xf32>
    %169 = vector.broadcast %167 : vector<256x1xf32> to vector<256x128xf32>
    %170 = arith.cmpf oeq, %168, %169 : vector<256x128xf32>
    %171 = arith.extui %170 : vector<256x128xi1> to vector<256x128xi32>
    %172 = arith.sitofp %171 : vector<256x128xi32> to vector<256x128xf32>
    %173 = arith.addf %151, %172 : vector<256x128xf32>
    %cst_76 = arith.constant 5.000000e-01 : f32
    %174 = vector.broadcast %cst_76 : f32 to vector<1x128xf32>
    %175 = arith.cmpf ogt, %82, %174 : vector<1x128xf32>
    %176 = math.tanh %75 : vector<256x128xf32>
    %177 = vector.shape_cast %175 : vector<1x128xi1> to vector<1x128xi1>
    %178 = vector.broadcast %177 : vector<1x128xi1> to vector<256x128xi1>
    %179 = arith.select %178, %176, %173 : vector<256x128xi1>, vector<256x128xf32>
    %c0_77 = arith.constant 0 : index
    %c0_78 = arith.constant 0 : index
    %180 = vector.load %arg17[%c0_77, %c0_78] : memref<256x128xf32, #tpu.memory_space<vmem>>, vector<256x128xf32>
    tpu.vector_store %arg17[%c0_77, %c0_78], %179 {strides = array<i32>} : memref<256x128xf32, #tpu.memory_space<vmem>>, vector<256x128xf32>,
    return
  }
}

</mosaic_0001>

<bundles_post_ra>
// kernel: forward.1
= control target key start
LH: loop header
LB: loop body
LE: loop exit
PB: predicated region body
PF: predicated region fallthrough
CT: control target
= control target key end

     0   :  { %v10002_v1 = vmov 0   ;;  %s9982_s1 = inlined_call_operand.vmem [shape: bf16[128,256], index: 1, kind: input, shape index: {}]   ;;  %s9983_s0 = inlined_call_operand.vmem [shape: f32[256,128], index: 0, kind: input, shape index: {}]   ;;  %s9984_s2 = inlined_call_operand.vmem [shape: f32[1,256], index: 2, kind: input, shape index: {}]   ;;  %s9985_s6 = inlined_call_operand.vmem [shape: bf16[128,256], index: 6, kind: input, shape index: {}]   ;;  %s9986_s5 = inlined_call_operand.vmem [shape: bf16[256,256], index: 5, kind: input, shape index: {}]   ;;  %s9987_s3 = inlined_call_operand.vmem [shape: f32[1,256], index: 3, kind: input, shape index: {}, may-alias: {3,8}]   ;;  %s9988_s4 = inlined_call_operand.vmem [shape: f32[1,256], index: 4, kind: input, shape index: {}, may-alias: {4,9}]   ;;  %s9989_s7 = inlined_call_operand.vmem [shape: f32[1,256], index: 7, kind: input, shape index: {}]   ;;  %s9990_s10 = inlined_call_operand.vmem [shape: bf16[256,128], index: 10, kind: input, shape index: {}]   ;;  %s9991_s8 = inlined_call_operand.vmem [shape: f32[1,256], index: 8, kind: input, shape index: {}, may-alias: {3,8}]   ;;  %s9992_s9 = inlined_call_operand.vmem [shape: f32[1,256], index: 9, kind: input, shape index: {}, may-alias: {4,9}]   ;;  %s9993_s14 = inlined_call_operand.vmem [shape: f32[4,128], index: 14, kind: input, shape index: {}]   ;;  %s9994_s11 = inlined_call_operand.vmem [shape: f32[1,128], index: 11, kind: input, shape index: {}]   ;;  %s9995_s12 = inlined_call_operand.vmem [shape: f32[256,128], index: 12, kind: input, shape index: {}]   ;;  %s9996_s16 = inlined_call_operand.vmem [shape: f32[256,128], index: 16, kind: output, shape index: {0}]   ;;  %s9997_s15 = inlined_call_operand.vmem [shape: f32[1,128], index: 15, kind: input, shape index: {}]   ;;  %s9998_s13 = inlined_call_operand.vmem [shape: f32[1,128], index: 13, kind: input, shape index: {}]   ;;  %s9999_s17 = inlined_call_operand.vmem [shape: f32[256,128], index: 17, kind: output, shape index: {1}]  }
   0x1   :  { %10234 = sst [smem:[#allocation131_spill]] %s9982_s1  ;;  %245 = vmatprep.mubr.bf16.mxu0 %v10002_v1 }
   0x2   :  { %10235 = sst [smem:[#allocation132_spill]] %s9983_s0  ;;  %s10236_s26 = sld [smem:[#allocation131_spill]] }
   0x3   :  { %s10237_s30 = sld [smem:[#allocation132_spill]] }
   0x8   :  { %v4720_v0 = vld [vmem:[%s10236_s26 + $0x4] ss:$8 sps:$4 sm:$0xff]   ;;  %v4722_v2 = vld [vmem:[%s10236_s26] ss:$8 sps:$4 sm:$0xff]   ;;  %v4723_v3 = vld [vmem:[%s10236_s26 + $0x14] ss:$8 sps:$4 sm:$0xff]  }
   0x9   :  { %213 = vmatprep.subr.bf16.mxu0 %v4720_v0  ;;  %v4725_v4 = vld [vmem:[%s10236_s26 + $0x10] ss:$8 sps:$4 sm:$0xff]   ;;  %v4726_v5 = vld [vmem:[%s10236_s26 + $0x24] ss:$8 sps:$4 sm:$0xff]   ;;  %v4728_v6 = vld [vmem:[%s10236_s26 + $0x20] ss:$8 sps:$4 sm:$0xff]  }
   0xa   :  { %214 = vmatpush1.bf16.msra.mxu0 %v4722_v2  ;;  %v4729_v7 = vld [vmem:[%s10236_s26 + $0x34] ss:$8 sps:$4 sm:$0xff]   ;;  %v4731_v8 = vld [vmem:[%s10236_s26 + $0x30] ss:$8 sps:$4 sm:$0xff]   ;;  %v4732_v9 = vld [vmem:[%s10236_s26 + $0x44] ss:$8 sps:$4 sm:$0xff]   ;;  %v123_v2 = vlaneseq }
   0xb   :  { %215 = vmatprep.subr.bf16.mxu0 %v4723_v3  ;;  %v4734_v10 = vld [vmem:[%s10236_s26 + $0x40] ss:$8 sps:$4 sm:$0xff]   ;;  %v4735_v11 = vld [vmem:[%s10236_s26 + $0x54] ss:$8 sps:$4 sm:$0xff]   ;;  %v4737_v12 = vld [vmem:[%s10236_s26 + $0x50] ss:$8 sps:$4 sm:$0xff]  }
   0xc   :  { %v4738_v13 = vld [vmem:[%s10236_s26 + $0x64] ss:$8 sps:$4 sm:$0xff]   ;;  %v4740_v14 = vld [vmem:[%s10236_s26 + $0x60] ss:$8 sps:$4 sm:$0xff]   ;;  %v4741_v15 = vld [vmem:[%s10236_s26 + $0x74] ss:$8 sps:$4 sm:$0xff]  }
   0xd   :  { %v4743_v16 = vld [vmem:[%s10236_s26 + $0x70] ss:$8 sps:$4 sm:$0xff]   ;;  %v57_v17 = vld [vmem:[%s10237_s30] sm:$0xff]  ;;  %v58_v18 = vld [vmem:[%s10237_s30 + $0x8] sm:$0xff]  ;;  %v124_v3 = vshrl.u32 %v123_v2, 7 }
   0xe   :  { %216 = vmatpush1.bf16.msra.mxu0 %v4725_v4  ;;  %v5086_v19 = vpack.c.bf16 %v58_v18, %v57_v17  ;;  %v59_v20 = vld [vmem:[%s10237_s30 + $0x10] sm:$0xff]  ;;  %v60_v21 = vld [vmem:[%s10237_s30 + $0x18] sm:$0xff]  ;;  %v61_v23 = vld [vmem:[%s10237_s30 + $0x20] sm:$0xff] }
   0xf   :  { %217 = vmatprep.subr.bf16.mxu0 %v4726_v5  ;;  %v5096_v22 = vpack.c.bf16 %v60_v21, %v59_v20  ;;  %v62_v24 = vld [vmem:[%s10237_s30 + $0x28] sm:$0xff]  ;;  %v63_v26 = vld [vmem:[%s10237_s30 + $0x30] sm:$0xff]  ;;  %v64_v27 = vld [vmem:[%s10237_s30 + $0x38] sm:$0xff]  ;;  %v5240_v4 = vsub.s32 1, %v124_v3 }
  0x10   :  { %v5106_v25 = vpack.c.bf16 %v62_v24, %v61_v23  ;;  %v5116_v28 = vpack.c.bf16 %v64_v27, %v63_v26  ;;  %v65_v29 = vld [vmem:[%s10237_s30 + $0x40] sm:$0xff]  ;;  %v66_v30 = vld [vmem:[%s10237_s30 + $0x48] sm:$0xff]  ;;  %v67_v32 = vld [vmem:[%s10237_s30 + $0x50] sm:$0xff] }
  0x11   :  { %v5126_v31 = vpack.c.bf16 %v66_v30, %v65_v29  ;;  %v68_v33 = vld [vmem:[%s10237_s30 + $0x58] sm:$0xff]  ;;  %v69_v35 = vld [vmem:[%s10237_s30 + $0x60] sm:$0xff]  ;;  %v70_v36 = vld [vmem:[%s10237_s30 + $0x68] sm:$0xff]  ;;  %10246 = vst [vmem:[#allocation10_spill] sm:$0xff] %v5240_v4 }
  0x12   :  { %218 = vmatpush1.bf16.msra.mxu0 %v4728_v6  ;;  %v5136_v34 = vpack.c.bf16 %v68_v33, %v67_v32  ;;  %v5146_v37 = vpack.c.bf16 %v70_v36, %v69_v35  ;;  %v71_v38 = vld [vmem:[%s10237_s30 + $0x70] sm:$0xff]  ;;  %v72_v39 = vld [vmem:[%s10237_s30 + $0x78] sm:$0xff]  ;;  %v73_v41 = vld [vmem:[%s10237_s30 + $0x80] sm:$0xff]  ;;  %v5245_v6 = vsub.s32 0, %v124_v3 }
  0x13   :  { %219 = vmatprep.subr.bf16.mxu0 %v4729_v7  ;;  %v5156_v40 = vpack.c.bf16 %v72_v39, %v71_v38  ;;  %v74_v42 = vld [vmem:[%s10237_s30 + $0x88] sm:$0xff]  ;;  %v75_v44 = vld [vmem:[%s10237_s30 + $0x90] sm:$0xff]  ;;  %v76_v45 = vld [vmem:[%s10237_s30 + $0x98] sm:$0xff] }
  0x14   :  { %v5166_v43 = vpack.c.bf16 %v74_v42, %v73_v41  ;;  %v5176_v46 = vpack.c.bf16 %v76_v45, %v75_v44  ;;  %v77_v47 = vld [vmem:[%s10237_s30 + $0xa0] sm:$0xff]  ;;  %v78_v48 = vld [vmem:[%s10237_s30 + $0xa8] sm:$0xff]  ;;  %v79_v50 = vld [vmem:[%s10237_s30 + $0xb0] sm:$0xff]  ;;  %10247 = vst [vmem:[#allocation11_spill] sm:$0xff] %v5245_v6 }
  0x15   :  { %v5186_v49 = vpack.c.bf16 %v78_v48, %v77_v47  ;;  %v80_v51 = vld [vmem:[%s10237_s30 + $0xb8] sm:$0xff]  ;;  %v81_v53 = vld [vmem:[%s10237_s30 + $0xc0] sm:$0xff]  ;;  %v82_v54 = vld [vmem:[%s10237_s30 + $0xc8] sm:$0xff] }
  0x16   :  { %220 = vmatpush1.bf16.msra.mxu0 %v4731_v8  ;;  %10238 = vst [vmem:[#allocation2_spill] sm:$0xff] %v5166_v43  ;;  %10239 = vst [vmem:[#allocation3_spill] sm:$0xff] %v5176_v46  ;;  %v5196_v52 = vpack.c.bf16 %v80_v51, %v79_v50  ;;  %v5206_v55 = vpack.c.bf16 %v82_v54, %v81_v53  ;;  %v83_v56 = vld [vmem:[%s10237_s30 + $0xd0] sm:$0xff]  ;;  %v84_v57 = vld [vmem:[%s10237_s30 + $0xd8] sm:$0xff] }
  0x17   :  { %221 = vmatprep.subr.bf16.mxu0 %v4732_v9  ;;  %10240 = vst [vmem:[#allocation4_spill] sm:$0xff] %v5186_v49  ;;  %v5216_v58 = vpack.c.bf16 %v84_v57, %v83_v56  ;;  %v85_v59 = vld [vmem:[%s10237_s30 + $0xe0] sm:$0xff]  ;;  %v86_v60 = vld [vmem:[%s10237_s30 + $0xe8] sm:$0xff]  ;;  %v87_v62 = vld [vmem:[%s10237_s30 + $0xf0] sm:$0xff] }
  0x18   :  { %10241 = vst [vmem:[#allocation5_spill] sm:$0xff] %v5196_v52  ;;  %10242 = vst [vmem:[#allocation6_spill] sm:$0xff] %v5206_v55  ;;  %v5226_v61 = vpack.c.bf16 %v86_v60, %v85_v59  ;;  %v88_v63 = vld [vmem:[%s10237_s30 + $0xf8] sm:$0xff]  ;;  %v121_v5 = vld [vmem:[%s9984_s2] sm:$0x3] }
  0x19   :  { %10243 = vst [vmem:[#allocation7_spill] sm:$0xff] %v5216_v58  ;;  %v5236_v0 = vpack.c.bf16 %v88_v63, %v87_v62  ;;  %v5248_v8 = vrot.slane %v121_v5, %v5240_v4  ;;  %v5251_v9 = vrot.slane %v121_v5, %v5245_v6 }
  0x1a   :  { %222 = vmatpush1.bf16.msra.mxu0 %v4734_v10  ;;  %10244 = vst [vmem:[#allocation8_spill] sm:$0xff] %v5226_v61 }
  0x1b   :  { %223 = vmatprep.subr.bf16.mxu0 %v4735_v11  ;;  %10245 = vst [vmem:[#allocation9_spill] sm:$0xff] %v5236_v0 }
  0x1e   :  { %224 = vmatpush1.bf16.msra.mxu0 %v4737_v12  ;;  %v10004_v12 = vmov 1065369472  }
  0x1f   :  { %225 = vmatprep.subr.bf16.mxu0 %v4738_v13  ;;  %472 = vmatprep.mubr.bf16.mxu1 %v10004_v12 }
  0x22   :  { %226 = vmatpush1.bf16.msra.mxu0 %v4740_v14 }
  0x23   :  { %227 = vmatprep.subr.bf16.mxu0 %v4741_v15 }
  0x26   :  { %228 = vmatpush1.bf16.msra.mxu0 %v4743_v16 }
  0x29   :  { %246 = vmatmul.mubr.bf16.vlgmr.msra.gmra.mrb[0].mxu0 %v5086_v19 }
  0x2a   :  { %255 = vmatprep.mubr.bf16.mxu0 %v10002_v1 }
  0x31   :  { %256 = vmatmul.mubr.bf16.gmra.mrb[4].mxu0 %v5096_v22 }
  0x32   :  { %265 = vmatprep.mubr.bf16.mxu0 %v10002_v1 }
  0x39   :  { %266 = vmatmul.mubr.bf16.gmra.mrb[8].mxu0 %v5106_v25 }
  0x3a   :  { %275 = vmatprep.mubr.bf16.mxu0 %v10002_v1 }
  0x41   :  { %276 = vmatmul.mubr.bf16.gmra.mrb[12].mxu0 %v5116_v28 }
  0x42   :  { %285 = vmatprep.mubr.bf16.mxu0 %v10002_v1 }
  0x49   :  { %286 = vmatmul.mubr.bf16.gmra.mrb[16].mxu0 %v5126_v31 }
  0x4a   :  { %295 = vmatprep.mubr.bf16.mxu0 %v10002_v1 }
  0x51   :  { %296 = vmatmul.mubr.bf16.gmra.mrb[20].mxu0 %v5136_v34 }
  0x52   :  { %305 = vmatprep.mubr.bf16.mxu0 %v10002_v1 }
  0x59   :  { %306 = vmatmul.mubr.bf16.gmra.mrb[24].mxu0 %v5146_v37 }
  0x5a   :  { %315 = vmatprep.mubr.bf16.mxu0 %v10002_v1 }
  0x61   :  { %316 = vmatmul.mubr.bf16.gmra.mrb[28].mxu0 %v5156_v40 }
  0x62   :  { %325 = vmatprep.mubr.bf16.mxu0 %v10002_v1 }
  0x69   :  { %326 = vmatmul.mubr.bf16.gmra.mrb[32].mxu0 %v5166_v43 }
  0x6a   :  { %335 = vmatprep.mubr.bf16.mxu0 %v10002_v1 }
  0x71   :  { %336 = vmatmul.mubr.bf16.gmra.mrb[36].mxu0 %v5176_v46 }
  0x72   :  { %345 = vmatprep.mubr.bf16.mxu0 %v10002_v1 }
  0x79   :  { %346 = vmatmul.mubr.bf16.gmra.mrb[40].mxu0 %v5186_v49 }
  0x7a   :  { %355 = vmatprep.mubr.bf16.mxu0 %v10002_v1 }
  0x81   :  { %356 = vmatmul.mubr.bf16.gmra.mrb[44].mxu0 %v5196_v52 }
  0x82   :  { %365 = vmatprep.mubr.bf16.mxu0 %v10002_v1 }
  0x89   :  { %366 = vmatmul.mubr.bf16.gmra.mrb[48].mxu0 %v5206_v55 }
  0x8a   :  { %375 = vmatprep.mubr.bf16.mxu0 %v10002_v1 }
  0x91   :  { %376 = vmatmul.mubr.bf16.gmra.mrb[52].mxu0 %v5216_v58 }
  0x92   :  { %385 = vmatprep.mubr.bf16.mxu0 %v10002_v1 }
  0x99   :  { %386 = vmatmul.mubr.bf16.gmra.mrb[56].mxu0 %v5226_v61 }
  0x9a   :  { %395 = vmatprep.mubr.bf16.mxu0 %v10002_v1 }
  0xa1   :  { %396 = vmatmul.mubr.bf16.gmra.mrb[60].mxu0 %v5236_v0 }
  0xa2   :  { %1178 = vmatprep.mubr.bf16.mxu0 %v10002_v1 }
  0xfc   :  { %v247_v7 = vpop.f32.mrb[0].mxu0 }
  0xfd   :  { %v249_v10 = vpop.f32.mrb[1].mxu0  ;;  %v5264_v17 = vadd.f32 %v247_v7, %v5251_v9 }
  0xfe   :  { %v251_v11 = vpop.f32.mrb[2].mxu0  ;;  %v5258_v15 = vadd.f32 %v249_v10, %v5248_v8 }
  0xff   :  { %v5255_v13 = vadd.f32 %v251_v11, %v5251_v9  ;;  %v253_v14 = vpop.f32.mrb[3].mxu0 }
 0x100   :  { %v5261_v16 = vadd.f32 %v253_v14, %v5248_v8 }
 0x101   :  { %v408_v20 = vpack.c.bf16 %v5255_v13, %v5264_v17 }
 0x102   :  { %v409_v18 = vpack.c.bf16 %v5261_v16, %v5258_v15 }
 0x104   :  { %v257_v21 = vpop.f32.mrb[4].mxu0  ;;  %440 = vmatprep.subr.bf16.mxu1 %v409_v18 }
 0x105   :  { %v259_v23 = vpop.f32.mrb[5].mxu0  ;;  %441 = vmatpush1.bf16.msra.mxu1 %v408_v20  ;;  %v5280_v32 = vadd.f32 %v257_v21, %v5251_v9 }
 0x106   :  { %v261_v24 = vpop.f32.mrb[6].mxu0  ;;  %v5274_v29 = vadd.f32 %v259_v23, %v5248_v8 }
 0x107   :  { %v5271_v26 = vadd.f32 %v261_v24, %v5251_v9  ;;  %v263_v27 = vpop.f32.mrb[7].mxu0 }
 0x108   :  { %v5277_v30 = vadd.f32 %v263_v27, %v5248_v8 }
 0x109   :  { %v410_v35 = vpack.c.bf16 %v5271_v26, %v5280_v32 }
 0x10a   :  { %v411_v33 = vpack.c.bf16 %v5277_v30, %v5274_v29 }
 0x10c   :  { %v267_v36 = vpop.f32.mrb[8].mxu0  ;;  %442 = vmatprep.subr.bf16.mxu1 %v411_v33 }
 0x10d   :  { %v269_v38 = vpop.f32.mrb[9].mxu0  ;;  %443 = vmatpush1.bf16.msra.mxu1 %v410_v35  ;;  %v5296_v47 = vadd.f32 %v267_v36, %v5251_v9 }
 0x10e   :  { %v271_v39 = vpop.f32.mrb[10].mxu0  ;;  %v5290_v44 = vadd.f32 %v269_v38, %v5248_v8 }
 0x10f   :  { %v5287_v41 = vadd.f32 %v271_v39, %v5251_v9  ;;  %v273_v42 = vpop.f32.mrb[11].mxu0 }
 0x110   :  { %v5293_v45 = vadd.f32 %v273_v42, %v5248_v8 }
 0x111   :  { %v412_v50 = vpack.c.bf16 %v5287_v41, %v5296_v47 }
 0x112   :  { %v413_v48 = vpack.c.bf16 %v5293_v45, %v5290_v44 }
 0x114   :  { %v277_v51 = vpop.f32.mrb[12].mxu0  ;;  %444 = vmatprep.subr.bf16.mxu1 %v413_v48 }
 0x115   :  { %v279_v53 = vpop.f32.mrb[13].mxu0  ;;  %445 = vmatpush1.bf16.msra.mxu1 %v412_v50  ;;  %v5312_v62 = vadd.f32 %v277_v51, %v5251_v9 }
 0x116   :  { %v281_v54 = vpop.f32.mrb[14].mxu0  ;;  %v5306_v59 = vadd.f32 %v279_v53, %v5248_v8 }
 0x117   :  { %v5303_v56 = vadd.f32 %v281_v54, %v5251_v9  ;;  %v283_v57 = vpop.f32.mrb[15].mxu0 }
 0x118   :  { %v5309_v60 = vadd.f32 %v283_v57, %v5248_v8 }
 0x119   :  { %v414_v2 = vpack.c.bf16 %v5303_v56, %v5312_v62 }
 0x11a   :  { %v415_v63 = vpack.c.bf16 %v5309_v60, %v5306_v59 }
 0x11c   :  { %v287_v3 = vpop.f32.mrb[16].mxu0  ;;  %446 = vmatprep.subr.bf16.mxu1 %v415_v63 }
 0x11d   :  { %v289_v5 = vpop.f32.mrb[17].mxu0  ;;  %447 = vmatpush1.bf16.msra.mxu1 %v414_v2  ;;  %v5328_v20 = vadd.f32 %v287_v3, %v5251_v9 }
 0x11e   :  { %v291_v7 = vpop.f32.mrb[18].mxu0  ;;  %v5322_v14 = vadd.f32 %v289_v5, %v5248_v8 }
 0x11f   :  { %v5319_v10 = vadd.f32 %v291_v7, %v5251_v9  ;;  %v293_v11 = vpop.f32.mrb[19].mxu0 }
 0x120   :  { %v5325_v18 = vadd.f32 %v293_v11, %v5248_v8 }
 0x121   :  { %v416_v23 = vpack.c.bf16 %v5319_v10, %v5328_v20 }
 0x122   :  { %v417_v21 = vpack.c.bf16 %v5325_v18, %v5322_v14 }
 0x124   :  { %v297_v24 = vpop.f32.mrb[20].mxu0  ;;  %448 = vmatprep.subr.bf16.mxu1 %v417_v21 }
 0x125   :  { %v299_v27 = vpop.f32.mrb[21].mxu0  ;;  %449 = vmatpush1.bf16.msra.mxu1 %v416_v23  ;;  %v5344_v42 = vadd.f32 %v297_v24, %v5251_v9 }
 0x126   :  { %v301_v33 = vpop.f32.mrb[22].mxu0  ;;  %v5338_v38 = vadd.f32 %v299_v27, %v5248_v8 }
 0x127   :  { %v5335_v35 = vadd.f32 %v301_v33, %v5251_v9  ;;  %v303_v36 = vpop.f32.mrb[23].mxu0 }
 0x128   :  { %v5341_v39 = vadd.f32 %v303_v36, %v5248_v8 }
 0x129   :  { %v418_v50 = vpack.c.bf16 %v5335_v35, %v5344_v42 }
 0x12a   :  { %v419_v48 = vpack.c.bf16 %v5341_v39, %v5338_v38 }
 0x12c   :  { %v307_v51 = vpop.f32.mrb[24].mxu0  ;;  %450 = vmatprep.subr.bf16.mxu1 %v419_v48 }
 0x12d   :  { %v309_v53 = vpop.f32.mrb[25].mxu0  ;;  %451 = vmatpush1.bf16.msra.mxu1 %v418_v50  ;;  %v5360_v5 = vadd.f32 %v307_v51, %v5251_v9 }
 0x12e   :  { %v311_v54 = vpop.f32.mrb[26].mxu0  ;;  %v5354_v2 = vadd.f32 %v309_v53, %v5248_v8 }
 0x12f   :  { %v5351_v57 = vadd.f32 %v311_v54, %v5251_v9  ;;  %v313_v63 = vpop.f32.mrb[27].mxu0 }
 0x130   :  { %v5357_v3 = vadd.f32 %v313_v63, %v5248_v8 }
 0x131   :  { %v420_v11 = vpack.c.bf16 %v5351_v57, %v5360_v5 }
 0x132   :  { %v421_v7 = vpack.c.bf16 %v5357_v3, %v5354_v2 }
 0x134   :  { %v317_v21 = vpop.f32.mrb[28].mxu0  ;;  %452 = vmatprep.subr.bf16.mxu1 %v421_v7 }
 0x135   :  { %v319_v23 = vpop.f32.mrb[29].mxu0  ;;  %453 = vmatpush1.bf16.msra.mxu1 %v420_v11  ;;  %v5376_v50 = vadd.f32 %v317_v21, %v5251_v9 }
 0x136   :  { %v321_v24 = vpop.f32.mrb[30].mxu0  ;;  %v5370_v36 = vadd.f32 %v319_v23, %v5248_v8 }
 0x137   :  { %v5367_v27 = vadd.f32 %v321_v24, %v5251_v9  ;;  %v323_v33 = vpop.f32.mrb[31].mxu0 }
 0x138   :  { %v5373_v48 = vadd.f32 %v323_v33, %v5248_v8 }
 0x139   :  { %v422_v53 = vpack.c.bf16 %v5367_v27, %v5376_v50 }
 0x13a   :  { %v423_v51 = vpack.c.bf16 %v5373_v48, %v5370_v36 }
 0x13c   :  { %v327_v54 = vpop.f32.mrb[32].mxu0  ;;  %454 = vmatprep.subr.bf16.mxu1 %v423_v51 }
 0x13d   :  { %v329_v63 = vpop.f32.mrb[33].mxu0  ;;  %455 = vmatpush1.bf16.msra.mxu1 %v422_v53  ;;  %v5392_v33 = vadd.f32 %v327_v54, %v5251_v9 }
 0x13e   :  { %v331_v7 = vpop.f32.mrb[34].mxu0  ;;  %v5386_v24 = vadd.f32 %v329_v63, %v5248_v8 }
 0x13f   :  { %v5383_v11 = vadd.f32 %v331_v7, %v5251_v9  ;;  %v333_v23 = vpop.f32.mrb[35].mxu0 }
 0x140   :  { %v5389_v21 = vadd.f32 %v333_v23, %v5248_v8 }
 0x141   :  { %v424_v51 = vpack.c.bf16 %v5383_v11, %v5392_v33 }
 0x142   :  { %v425_v1 = vpack.c.bf16 %v5389_v21, %v5386_v24 }
 0x144   :  { %v337_v53 = vpop.f32.mrb[36].mxu0  ;;  %456 = vmatprep.subr.bf16.mxu1 %v425_v1 }
 0x145   :  { %v339_v7 = vpop.f32.mrb[37].mxu0  ;;  %457 = vmatpush1.bf16.msra.mxu1 %v424_v51  ;;  %v5408_v0 = vadd.f32 %v337_v53, %v5251_v9 }
 0x146   :  { %v341_v12 = vpop.f32.mrb[38].mxu0  ;;  %v5402_v23 = vadd.f32 %v339_v7, %v5248_v8 }
 0x147   :  { %v5399_v63 = vadd.f32 %v341_v12, %v5251_v9  ;;  %v343_v4 = vpop.f32.mrb[39].mxu0 }
 0x148   :  { %v5405_v54 = vadd.f32 %v343_v4, %v5248_v8 }
 0x149   :  { %v426_v1 = vpack.c.bf16 %v5399_v63, %v5408_v0 }
 0x14a   :  { %v427_v61 = vpack.c.bf16 %v5405_v54, %v5402_v23 }
 0x14c   :  { %v347_v51 = vpop.f32.mrb[40].mxu0  ;;  %458 = vmatprep.subr.bf16.mxu1 %v427_v61 }
 0x14d   :  { %v349_v12 = vpop.f32.mrb[41].mxu0  ;;  %459 = vmatpush1.bf16.msra.mxu1 %v426_v1  ;;  %v5424_v52 = vadd.f32 %v347_v51, %v5251_v9 }
 0x14e   :  { %v351_v58 = vpop.f32.mrb[42].mxu0  ;;  %v5418_v4 = vadd.f32 %v349_v12, %v5248_v8 }
 0x14f   :  { %v5415_v7 = vadd.f32 %v351_v58, %v5251_v9  ;;  %v353_v55 = vpop.f32.mrb[43].mxu0  ;;  %10251 = vst [vmem:[#allocation15_spill] sm:$0xff] %v5424_v52 }
 0x150   :  { %10249 = vst [vmem:[#allocation13_spill] sm:$0xff] %v5418_v4  ;;  %v5421_v53 = vadd.f32 %v353_v55, %v5248_v8 }
 0x151   :  { %10248 = vst [vmem:[#allocation12_spill] sm:$0xff] %v5415_v7  ;;  %v428_v61 = vpack.c.bf16 %v5415_v7, %v5424_v52 }
 0x152   :  { %10250 = vst [vmem:[#allocation14_spill] sm:$0xff] %v5421_v53  ;;  %v429_v49 = vpack.c.bf16 %v5421_v53, %v5418_v4 }
 0x154   :  { %v357_v1 = vpop.f32.mrb[44].mxu0  ;;  %460 = vmatprep.subr.bf16.mxu1 %v429_v49 }
 0x155   :  { %v359_v58 = vpop.f32.mrb[45].mxu0  ;;  %461 = vmatpush1.bf16.msra.mxu1 %v428_v61  ;;  %v5440_v53 = vadd.f32 %v357_v1, %v5251_v9 }
 0x156   :  { %v361_v46 = vpop.f32.mrb[46].mxu0  ;;  %v5434_v55 = vadd.f32 %v359_v58, %v5248_v8 }
 0x157   :  { %v5431_v12 = vadd.f32 %v361_v46, %v5251_v9  ;;  %v363_v43 = vpop.f32.mrb[47].mxu0  ;;  %10255 = vst [vmem:[#allocation19_spill] sm:$0xff] %v5440_v53 }
 0x158   :  { %10253 = vst [vmem:[#allocation17_spill] sm:$0xff] %v5434_v55  ;;  %v5437_v51 = vadd.f32 %v363_v43, %v5248_v8 }
 0x159   :  { %10252 = vst [vmem:[#allocation16_spill] sm:$0xff] %v5431_v12  ;;  %v430_v49 = vpack.c.bf16 %v5431_v12, %v5440_v53 }
 0x15a   :  { %10254 = vst [vmem:[#allocation18_spill] sm:$0xff] %v5437_v51  ;;  %v431_v7 = vpack.c.bf16 %v5437_v51, %v5434_v55 }
 0x15c   :  { %v367_v61 = vpop.f32.mrb[48].mxu0  ;;  %462 = vmatprep.subr.bf16.mxu1 %v431_v7 }
 0x15d   :  { %v369_v46 = vpop.f32.mrb[49].mxu0  ;;  %463 = vmatpush1.bf16.msra.mxu1 %v430_v49  ;;  %v5456_v51 = vadd.f32 %v367_v61, %v5251_v9 }
 0x15e   :  { %v371_v52 = vpop.f32.mrb[50].mxu0  ;;  %v5450_v43 = vadd.f32 %v369_v46, %v5248_v8 }
 0x15f   :  { %v5447_v58 = vadd.f32 %v371_v52, %v5251_v9  ;;  %v373_v4 = vpop.f32.mrb[51].mxu0  ;;  %10259 = vst [vmem:[#allocation23_spill] sm:$0xff] %v5456_v51 }
 0x160   :  { %10257 = vst [vmem:[#allocation21_spill] sm:$0xff] %v5450_v43  ;;  %v5453_v1 = vadd.f32 %v373_v4, %v5248_v8 }
 0x161   :  { %10256 = vst [vmem:[#allocation20_spill] sm:$0xff] %v5447_v58  ;;  %v432_v7 = vpack.c.bf16 %v5447_v58, %v5456_v51 }
 0x162   :  { %10258 = vst [vmem:[#allocation22_spill] sm:$0xff] %v5453_v1  ;;  %v433_v12 = vpack.c.bf16 %v5453_v1, %v5450_v43 }
 0x164   :  { %v377_v49 = vpop.f32.mrb[52].mxu0  ;;  %464 = vmatprep.subr.bf16.mxu1 %v433_v12 }
 0x165   :  { %v379_v52 = vpop.f32.mrb[53].mxu0  ;;  %465 = vmatpush1.bf16.msra.mxu1 %v432_v7  ;;  %v5472_v1 = vadd.f32 %v377_v49, %v5251_v9 }
 0x166   :  { %v381_v53 = vpop.f32.mrb[54].mxu0  ;;  %v5466_v4 = vadd.f32 %v379_v52, %v5248_v8 }
 0x167   :  { %v5463_v46 = vadd.f32 %v381_v53, %v5251_v9  ;;  %v383_v55 = vpop.f32.mrb[55].mxu0  ;;  %10263 = vst [vmem:[#allocation27_spill] sm:$0xff] %v5472_v1 }
 0x168   :  { %10261 = vst [vmem:[#allocation25_spill] sm:$0xff] %v5466_v4  ;;  %v5469_v61 = vadd.f32 %v383_v55, %v5248_v8 }
 0x169   :  { %10260 = vst [vmem:[#allocation24_spill] sm:$0xff] %v5463_v46  ;;  %v434_v12 = vpack.c.bf16 %v5463_v46, %v5472_v1 }
 0x16a   :  { %10262 = vst [vmem:[#allocation26_spill] sm:$0xff] %v5469_v61  ;;  %v435_v58 = vpack.c.bf16 %v5469_v61, %v5466_v4 }
 0x16c   :  { %v387_v7 = vpop.f32.mrb[56].mxu0  ;;  %466 = vmatprep.subr.bf16.mxu1 %v435_v58 }
 0x16d   :  { %v389_v53 = vpop.f32.mrb[57].mxu0  ;;  %467 = vmatpush1.bf16.msra.mxu1 %v434_v12  ;;  %v5488_v61 = vadd.f32 %v387_v7, %v5251_v9 }
 0x16e   :  { %v391_v51 = vpop.f32.mrb[58].mxu0  ;;  %v5482_v55 = vadd.f32 %v389_v53, %v5248_v8 }
 0x16f   :  { %v5479_v52 = vadd.f32 %v391_v51, %v5251_v9  ;;  %v393_v43 = vpop.f32.mrb[59].mxu0 }
 0x170   :  { %v5485_v49 = vadd.f32 %v393_v43, %v5248_v8 }
 0x171   :  { %10264 = vst [vmem:[#allocation28_spill] sm:$0xff] %v5479_v52  ;;  %v436_v58 = vpack.c.bf16 %v5479_v52, %v5488_v61 }
 0x172   :  { %10265 = vst [vmem:[#allocation29_spill] sm:$0xff] %v5485_v49  ;;  %v437_v46 = vpack.c.bf16 %v5485_v49, %v5482_v55 }
 0x174   :  { %v397_v12 = vpop.f32.mrb[60].mxu0  ;;  %468 = vmatprep.subr.bf16.mxu1 %v437_v46 }
 0x175   :  { %v399_v51 = vpop.f32.mrb[61].mxu0  ;;  %469 = vmatpush1.bf16.msra.mxu1 %v436_v58  ;;  %v5504_v49 = vadd.f32 %v397_v12, %v5251_v9  ;;  %v4752_v58 = vld [vmem:[%s9985_s6 + $0x24] ss:$8 sps:$4 sm:$0xff]   ;;  %v4750_v12 = vld [vmem:[%s9985_s6 + $0x20] ss:$8 sps:$4 sm:$0xff]  }
 0x176   :  { %v401_v1 = vpop.f32.mrb[62].mxu0  ;;  %v5498_v43 = vadd.f32 %v399_v51, %v5248_v8  ;;  %v4755_v51 = vld [vmem:[%s9985_s6 + $0x34] ss:$8 sps:$4 sm:$0xff]  }
 0x177   :  { %v5495_v53 = vadd.f32 %v401_v1, %v5251_v9  ;;  %v403_v4 = vpop.f32.mrb[63].mxu0  ;;  %v10267_v1 = vmov 1065369472   ;;  %v4746_v9 = vld [vmem:[%s9985_s6 + $0x4] ss:$8 sps:$4 sm:$0xff]  }
 0x178   :  { %v5501_v7 = vadd.f32 %v403_v4, %v5248_v8  ;;  %v4744_v8 = vld [vmem:[%s9985_s6] ss:$8 sps:$4 sm:$0xff]   ;;  %1146 = vmatprep.subr.bf16.mxu0 %v4746_v9  ;;  %v4747_v4 = vld [vmem:[%s9985_s6 + $0x10] ss:$8 sps:$4 sm:$0xff]  }
 0x179   :  { %10266 = vst [vmem:[#allocation30_spill] sm:$0xff] %v5495_v53  ;;  %v438_v46 = vpack.c.bf16 %v5495_v53, %v5504_v49  ;;  %1147 = vmatpush1.bf16.msra.mxu0 %v4744_v8  ;;  %v4758_v8 = vld [vmem:[%s9985_s6 + $0x44] ss:$8 sps:$4 sm:$0xff]   ;;  %v4756_v9 = vld [vmem:[%s9985_s6 + $0x40] ss:$8 sps:$4 sm:$0xff]  }
 0x17a   :  { %v439_v52 = vpack.c.bf16 %v5501_v7, %v5498_v43  ;;  %v4773_v53 = vld [vmem:[%s9986_s5 + $0x14] ss:$8 sps:$4 sm:$0xff]  }
 0x17c   :  { %470 = vmatprep.subr.bf16.mxu1 %v439_v52  ;;  %v4749_v52 = vld [vmem:[%s9985_s6 + $0x14] ss:$8 sps:$4 sm:$0xff]  }
 0x17d   :  { %471 = vmatpush1.bf16.msra.mxu1 %v438_v46  ;;  %1148 = vmatprep.subr.bf16.mxu0 %v4749_v52  ;;  %v4753_v46 = vld [vmem:[%s9985_s6 + $0x30] ss:$8 sps:$4 sm:$0xff]  }
 0x17e   :  { %1149 = vmatpush1.bf16.msra.mxu0 %v4747_v4  ;;  %v4761_v4 = vld [vmem:[%s9985_s6 + $0x54] ss:$8 sps:$4 sm:$0xff]   ;;  %v4759_v52 = vld [vmem:[%s9985_s6 + $0x50] ss:$8 sps:$4 sm:$0xff]  }
 0x17f   :  { %1150 = vmatprep.subr.bf16.mxu0 %v4752_v58  ;;  %v4764_v58 = vld [vmem:[%s9985_s6 + $0x64] ss:$8 sps:$4 sm:$0xff]  }
 0x180   :  { %473 = vmatmul.mubr.bf16.vlgmr.msra.gmra.mrb[0].mxu1 %v10267_v1 }
 0x181   :  { %683 = vmatprep.mubr.bf16.mxu1 %v10267_v1 }
 0x182   :  { %1151 = vmatpush1.bf16.msra.mxu0 %v4750_v12  ;;  %v4762_v12 = vld [vmem:[%s9985_s6 + $0x60] ss:$8 sps:$4 sm:$0xff]  }
 0x183   :  { %1152 = vmatprep.subr.bf16.mxu0 %v4755_v51  ;;  %v4767_v51 = vld [vmem:[%s9985_s6 + $0x74] ss:$8 sps:$4 sm:$0xff]  }
 0x186   :  { %1153 = vmatpush1.bf16.msra.mxu0 %v4753_v46 }
 0x187   :  { %1154 = vmatprep.subr.bf16.mxu0 %v4758_v8  ;;  %v4765_v8 = vld [vmem:[%s9985_s6 + $0x70] ss:$8 sps:$4 sm:$0xff]  }
 0x18a   :  { %1155 = vmatpush1.bf16.msra.mxu0 %v4756_v9 }
 0x18b   :  { %1156 = vmatprep.subr.bf16.mxu0 %v4761_v4 }
 0x18e   :  { %1157 = vmatpush1.bf16.msra.mxu0 %v4759_v52  ;;  %v4770_v52 = vld [vmem:[%s9986_s5 + $0x4] ss:$8 sps:$4 sm:$0xff]  }
 0x18f   :  { %1158 = vmatprep.subr.bf16.mxu0 %v4764_v58  ;;  %v4768_v58 = vld [vmem:[%s9986_s5] ss:$8 sps:$4 sm:$0xff]  }
 0x192   :  { %1159 = vmatpush1.bf16.msra.mxu0 %v4762_v12  ;;  %v10268_v12 = vmov 0  }
 0x193   :  { %1160 = vmatprep.subr.bf16.mxu0 %v4767_v51  ;;  %v4776_v51 = vld [vmem:[%s9986_s5 + $0x24] ss:$8 sps:$4 sm:$0xff]  }
 0x196   :  { %1161 = vmatpush1.bf16.msra.mxu0 %v4765_v8  ;;  %v4774_v8 = vld [vmem:[%s9986_s5 + $0x20] ss:$8 sps:$4 sm:$0xff]  }
 0x197   :  { %1499 = vmatprep.subr.bf16.mxu0 %v4770_v52  ;;  %v4780_v52 = vld [vmem:[%s9986_s5 + $0x40] ss:$8 sps:$4 sm:$0xff]  }
 0x199   :  { %1179 = vmatmul.mubr.bf16.vlgmr.msra.gmra.mrb[64].mxu0 %v5086_v19  ;;  %v4779_v19 = vld [vmem:[%s9986_s5 + $0x34] ss:$8 sps:$4 sm:$0xff]  }
 0x19a   :  { %1500 = vmatpush1.bf16.msra.mxu0 %v4768_v58  ;;  %1188 = vmatprep.mubr.bf16.mxu0 %v10268_v12 }
 0x19b   :  { %1501 = vmatprep.subr.bf16.mxu0 %v4773_v53  ;;  %v4782_v53 = vld [vmem:[%s9986_s5 + $0x44] ss:$8 sps:$4 sm:$0xff]  }
 0x1a1   :  { %1189 = vmatmul.mubr.bf16.gmra.mrb[68].mxu0 %v5096_v22  ;;  %v4785_v22 = vld [vmem:[%s9986_s5 + $0x54] ss:$8 sps:$4 sm:$0xff]  }
 0x1a2   :  { %1198 = vmatprep.mubr.bf16.mxu0 %v10268_v12 }
 0x1a9   :  { %1199 = vmatmul.mubr.bf16.gmra.mrb[72].mxu0 %v5106_v25  ;;  %v4786_v25 = vld [vmem:[%s9986_s5 + $0x60] ss:$8 sps:$4 sm:$0xff]  }
 0x1aa   :  { %1208 = vmatprep.mubr.bf16.mxu0 %v10268_v12 }
 0x1b1   :  { %1209 = vmatmul.mubr.bf16.gmra.mrb[76].mxu0 %v5116_v28  ;;  %v4789_v28 = vld [vmem:[%s9986_s5 + $0x70] ss:$8 sps:$4 sm:$0xff]  }
 0x1b2   :  { %1218 = vmatprep.mubr.bf16.mxu0 %v10268_v12 }
 0x1b9   :  { %1219 = vmatmul.mubr.bf16.gmra.mrb[80].mxu0 %v5126_v31  ;;  %v4797_v31 = vld [vmem:[%s9986_s5 + $0x94] ss:$8 sps:$4 sm:$0xff]  }
 0x1ba   :  { %1228 = vmatprep.mubr.bf16.mxu0 %v10268_v12 }
 0x1c1   :  { %1229 = vmatmul.mubr.bf16.gmra.mrb[84].mxu0 %v5136_v34 }
 0x1c2   :  { %1238 = vmatprep.mubr.bf16.mxu0 %v10268_v12 }
 0x1c9   :  { %1239 = vmatmul.mubr.bf16.gmra.mrb[88].mxu0 %v5146_v37 }
 0x1ca   :  { %1248 = vmatprep.mubr.bf16.mxu0 %v10268_v12 }
 0x1d1   :  { %1249 = vmatmul.mubr.bf16.gmra.mrb[92].mxu0 %v5156_v40 }
 0x1d2   :  { %1258 = vmatprep.mubr.bf16.mxu0 %v10268_v12 }
 0x253   :  { %v474_v46 = vpop.f32.mrb[0].mxu1 }
 0x254   :  { %v476_v9 = vpop.f32.mrb[1].mxu1 }
 0x255   :  { %v478_v4 = vpop.f32.mrb[2].mxu1  ;;  %v482_v58 = vmul.f32 0.00390625, %v476_v9 }
 0x256   :  { %v479_v1 = vpop.f32.mrb[3].mxu1  ;;  %v4777_v4 = vld [vmem:[%s9986_s5 + $0x30] ss:$8 sps:$4 sm:$0xff]  }
 0x257   :  { %v4771_v1 = vld [vmem:[%s9986_s5 + $0x10] ss:$8 sps:$4 sm:$0xff]  }
 0x258   :  { %1502 = vmatpush1.bf16.msra.mxu0 %v4771_v1  ;;  %v481_v1 = vmul.f32 0.00390625, %v474_v46  ;;  %v4791_v46 = vld [vmem:[%s9986_s5 + $0x74] ss:$8 sps:$4 sm:$0xff]  }
 0x259   :  { %1503 = vmatprep.subr.bf16.mxu0 %v4776_v51  ;;  %v4783_v51 = vld [vmem:[%s9986_s5 + $0x50] ss:$8 sps:$4 sm:$0xff]  }
 0x25a   :  { %v5609_v9 = vrot.slane %v481_v1, %v5245_v6 }
 0x25c   :  { %1504 = vmatpush1.bf16.msra.mxu0 %v4774_v8  ;;  %v4788_v8 = vld [vmem:[%s9986_s5 + $0x64] ss:$8 sps:$4 sm:$0xff]  }
 0x25d   :  { %1505 = vmatprep.subr.bf16.mxu0 %v4779_v19  ;;  %v5606_v19 = vrot.slane %v482_v58, %v5245_v6  ;;  %v5659_v58 = vsub.f32 %v5271_v26, %v5609_v9 }
 0x260   :  { %1506 = vmatpush1.bf16.msra.mxu0 %v4777_v4  ;;  %v5619_v4 = vsub.f32 %v5258_v15, %v5606_v19  ;;  %v5637_v15 = vsub.f32 %v5274_v29, %v5606_v19 }
 0x261   :  { %1507 = vmatprep.subr.bf16.mxu0 %v4782_v53  ;;  %v5623_v53 = vsub.f32 %v5261_v16, %v5606_v19  ;;  %v5641_v16 = vsub.f32 %v5277_v30, %v5606_v19  ;;  %v5655_v30 = vsub.f32 %v5280_v32, %v5609_v9 }
 0x262   :  { %v560_v32 = vmul.f32 %v5637_v15, %v5637_v15 }
 0x263   :  { %10269 = vst [vmem:[#allocation31_spill] sm:$0xff] %v5623_v53  ;;  %10270 = vst [vmem:[#allocation32_spill] sm:$0xff] %v5641_v16  ;;  %v558_v29 = vmul.f32 %v5623_v53, %v5623_v53  ;;  %v562_v26 = vmul.f32 %v5641_v16, %v5641_v16  ;;  %v5691_v16 = vsub.f32 %v5306_v59, %v5606_v19 }
 0x264   :  { %1508 = vmatpush1.bf16.msra.mxu0 %v4780_v52  ;;  %v5628_v52 = vsub.f32 %v5264_v17, %v5609_v9  ;;  %v556_v17 = vmul.f32 %v5619_v4, %v5619_v4 }
 0x265   :  { %1509 = vmatprep.subr.bf16.mxu0 %v4785_v22  ;;  %v5632_v22 = vsub.f32 %v5255_v13, %v5609_v9  ;;  %v4794_v13 = vld [vmem:[%s9986_s5 + $0x84] ss:$8 sps:$4 sm:$0xff]  }
 0x266   :  { %v555_v1 = vmul.f32 %v5628_v52, %v5628_v52  ;;  %v620_v53 = vpack.c.bf16 %v558_v29, %v556_v17  ;;  %v622_v29 = vpack.c.bf16 %v562_v26, %v560_v32 }
 0x268   :  { %1510 = vmatpush1.bf16.msra.mxu0 %v4783_v51  ;;  %v557_v51 = vmul.f32 %v5632_v22, %v5632_v22  ;;  %651 = vmatprep.subr.bf16.mxu1 %v620_v53 }
 0x269   :  { %1511 = vmatprep.subr.bf16.mxu0 %v4788_v8  ;;  %v5667_v8 = vsub.f32 %v5290_v44, %v5606_v19  ;;  %v5683_v44 = vsub.f32 %v5287_v41, %v5609_v9  ;;  %v5703_v41 = vsub.f32 %v5309_v60, %v5606_v19  ;;  %v5719_v60 = vsub.f32 %v5322_v14, %v5606_v19 }
 0x26a   :  { %v568_v14 = vmul.f32 %v5691_v16, %v5691_v16 }
 0x26b   :  { %10272 = vst [vmem:[#allocation34_spill] sm:$0xff] %v5703_v41  ;;  %v564_v59 = vmul.f32 %v5667_v8, %v5667_v8  ;;  %10273 = vst [vmem:[#allocation35_spill] sm:$0xff] %v5719_v60  ;;  %v565_v53 = vmul.f32 %v5683_v44, %v5683_v44  ;;  %v570_v26 = vmul.f32 %v5703_v41, %v5703_v41  ;;  %v10309_v41 = vld [vmem:[#allocation6_spill] sm:$0xff] }
 0x26c   :  { %1512 = vmatpush1.bf16.msra.mxu0 %v4786_v25  ;;  %v5671_v25 = vsub.f32 %v5293_v45, %v5606_v19  ;;  %v4792_v45 = vld [vmem:[%s9986_s5 + $0x80] ss:$8 sps:$4 sm:$0xff]   ;;  %v572_v34 = vmul.f32 %v5719_v60, %v5719_v60 }
 0x26d   :  { %1513 = vmatprep.subr.bf16.mxu0 %v4791_v46  ;;  %v5679_v46 = vsub.f32 %v5296_v47, %v5609_v9  ;;  %v561_v47 = vmul.f32 %v5659_v58, %v5659_v58 }
 0x26e   :  { %10271 = vst [vmem:[#allocation33_spill] sm:$0xff] %v5671_v25  ;;  %v566_v17 = vmul.f32 %v5671_v25, %v5671_v25 }
 0x26f   :  { %v563_v25 = vmul.f32 %v5679_v46, %v5679_v46 }
 0x270   :  { %1514 = vmatpush1.bf16.msra.mxu0 %v4789_v28  ;;  %v559_v28 = vmul.f32 %v5655_v30, %v5655_v30 }
 0x271   :  { %1515 = vmatprep.subr.bf16.mxu0 %v4794_v13  ;;  %v619_v13 = vpack.c.bf16 %v557_v51, %v555_v1  ;;  %v5711_v1 = vsub.f32 %v5312_v62, %v5609_v9  ;;  %v5715_v51 = vsub.f32 %v5303_v56, %v5609_v9  ;;  %v4795_v62 = vld [vmem:[%s9986_s5 + $0x90] ss:$8 sps:$4 sm:$0xff]   ;;  %v5730_v56 = vsub.f32 %v5325_v18, %v5606_v19 }
 0x272   :  { %v621_v32 = vpack.c.bf16 %v561_v47, %v559_v28  ;;  %v4800_v28 = vld [vmem:[%s9986_s5 + $0xa4] ss:$8 sps:$4 sm:$0xff]   ;;  %v5741_v47 = vsub.f32 %v5328_v20, %v5609_v9  ;;  %v5745_v18 = vsub.f32 %v5319_v10, %v5609_v9  ;;  %v4798_v10 = vld [vmem:[%s9986_s5 + $0xa0] ss:$8 sps:$4 sm:$0xff]   ;;  %v5762_v20 = vsub.f32 %v5341_v39, %v5606_v19 }
 0x273   :  { %652 = vmatpush1.bf16.msra.mxu1 %v619_v13  ;;  %10274 = vst [vmem:[#allocation36_spill] sm:$0xff] %v5730_v56  ;;  %v5749_v13 = vsub.f32 %v5338_v38, %v5606_v19  ;;  %v574_v38 = vmul.f32 %v5730_v56, %v5730_v56  ;;  %v5777_v39 = vsub.f32 %v5335_v35, %v5609_v9  ;;  %v10305_v56 = vld [vmem:[#allocation28_spill] sm:$0xff] }
 0x274   :  { %653 = vmatprep.subr.bf16.mxu1 %v622_v29  ;;  %1516 = vmatpush1.bf16.msra.mxu0 %v4792_v45  ;;  %v624_v45 = vpack.c.bf16 %v566_v17, %v564_v59  ;;  %v569_v59 = vmul.f32 %v5715_v51, %v5715_v51  ;;  %v623_v17 = vpack.c.bf16 %v565_v53, %v563_v25  ;;  %v4803_v25 = vld [vmem:[%s9986_s5 + $0xb4] ss:$8 sps:$4 sm:$0xff]  }
 0x275   :  { %1517 = vmatprep.subr.bf16.mxu0 %v4797_v31  ;;  %10275 = vst [vmem:[#allocation37_spill] sm:$0xff] %v5749_v13  ;;  %v567_v31 = vmul.f32 %v5711_v1, %v5711_v1  ;;  %10276 = vst [vmem:[#allocation38_spill] sm:$0xff] %v5762_v20  ;;  %v626_v29 = vpack.c.bf16 %v570_v26, %v568_v14  ;;  %v5773_v53 = vsub.f32 %v5344_v42, %v5609_v9  ;;  %v4801_v42 = vld [vmem:[%s9986_s5 + $0xb0] ss:$8 sps:$4 sm:$0xff]  }
 0x276   :  { %v573_v14 = vmul.f32 %v5745_v18, %v5745_v18  ;;  %v5792_v35 = vsub.f32 %v5357_v3, %v5606_v19  ;;  %v5807_v3 = vsub.f32 %v5351_v57, %v5609_v9  ;;  %v4804_v57 = vld [vmem:[%s9986_s5 + $0xc0] ss:$8 sps:$4 sm:$0xff]   ;;  %v6010_v60 = vsub.f32 %v10305_v56, %v5609_v9 }
 0x277   :  { %654 = vmatpush1.bf16.msra.mxu1 %v621_v32  ;;  %v5781_v32 = vsub.f32 %v5354_v2, %v5606_v19  ;;  %v625_v26 = vpack.c.bf16 %v569_v59, %v567_v31  ;;  %v576_v2 = vmul.f32 %v5749_v13, %v5749_v13  ;;  %v4806_v31 = vld [vmem:[%s9986_s5 + $0xc4] ss:$8 sps:$4 sm:$0xff]   ;;  %v5803_v59 = vsub.f32 %v5360_v5, %v5609_v9 }
 0x278   :  { %655 = vmatprep.subr.bf16.mxu1 %v624_v45  ;;  %1518 = vmatpush1.bf16.msra.mxu0 %v4795_v62  ;;  %v571_v62 = vmul.f32 %v5741_v47, %v5741_v47  ;;  %10278 = vst [vmem:[#allocation40_spill] sm:$0xff] %v5792_v35  ;;  %v578_v45 = vmul.f32 %v5762_v20, %v5762_v20  ;;  %10279 = vst [vmem:[#allocation41_spill] sm:$0xff] %v5807_v3 }
 0x279   :  { %1519 = vmatprep.subr.bf16.mxu0 %v4800_v28  ;;  %10277 = vst [vmem:[#allocation39_spill] sm:$0xff] %v5781_v32  ;;  %v628_v28 = vpack.c.bf16 %v574_v38, %v572_v34  ;;  %v577_v34 = vmul.f32 %v5777_v39, %v5777_v39  ;;  %v5824_v5 = vsub.f32 %v5373_v48, %v5606_v19 }
 0x27a   :  { %v627_v38 = vpack.c.bf16 %v573_v14, %v571_v62  ;;  %v580_v37 = vmul.f32 %v5781_v32, %v5781_v32  ;;  %v5836_v62 = vsub.f32 %v5367_v27, %v5609_v9  ;;  %v5840_v48 = vsub.f32 %v5386_v24, %v5606_v19 }
 0x27b   :  { %656 = vmatpush1.bf16.msra.mxu1 %v623_v17  ;;  %v5811_v17 = vsub.f32 %v5370_v36, %v5606_v19  ;;  %10281 = vst [vmem:[#allocation43_spill] sm:$0xff] %v5824_v5  ;;  %v582_v36 = vmul.f32 %v5792_v35, %v5792_v35  ;;  %v579_v14 = vmul.f32 %v5803_v59, %v5803_v59 }
 0x27c   :  { %657 = vmatprep.subr.bf16.mxu1 %v626_v29  ;;  %1520 = vmatpush1.bf16.msra.mxu0 %v4798_v10  ;;  %v575_v10 = vmul.f32 %v5773_v53, %v5773_v53  ;;  %v630_v29 = vpack.c.bf16 %v578_v45, %v576_v2  ;;  %10283 = vst [vmem:[#allocation45_spill] sm:$0xff] %v5836_v62  ;;  %10284 = vst [vmem:[#allocation46_spill] sm:$0xff] %v5840_v48 }
 0x27d   :  { %1521 = vmatprep.subr.bf16.mxu0 %v4803_v25  ;;  %10280 = vst [vmem:[#allocation42_spill] sm:$0xff] %v5811_v17  ;;  %v5832_v25 = vsub.f32 %v5376_v50, %v5609_v9  ;;  %v5848_v50 = vsub.f32 %v5389_v21, %v5606_v19  ;;  %v584_v27 = vmul.f32 %v5811_v17, %v5811_v17  ;;  %v10298_v17 = vld [vmem:[#allocation20_spill] sm:$0xff] }
 0x27e   :  { %v586_v2 = vmul.f32 %v5824_v5, %v5824_v5  ;;  %v632_v24 = vpack.c.bf16 %v582_v36, %v580_v37  ;;  %v5856_v45 = vsub.f32 %v5392_v33, %v5609_v9  ;;  %v5865_v21 = vsub.f32 %v5402_v23, %v5606_v19 }
 0x27f   :  { %658 = vmatpush1.bf16.msra.mxu1 %v625_v26  ;;  %10282 = vst [vmem:[#allocation44_spill] sm:$0xff] %v5832_v25  ;;  %v581_v26 = vmul.f32 %v5807_v3, %v5807_v3  ;;  %10285 = vst [vmem:[#allocation47_spill] sm:$0xff] %v5848_v50  ;;  %v588_v40 = vmul.f32 %v5840_v48, %v5840_v48  ;;  %v590_v33 = vmul.f32 %v5848_v50, %v5848_v50 }
 0x280   :  { %659 = vmatprep.subr.bf16.mxu1 %v628_v28  ;;  %1522 = vmatpush1.bf16.msra.mxu0 %v4801_v42  ;;  %v629_v42 = vpack.c.bf16 %v577_v34, %v575_v10  ;;  %v5860_v28 = vsub.f32 %v5383_v11, %v5609_v9  ;;  %v585_v10 = vmul.f32 %v5836_v62, %v5836_v62 }
 0x281   :  { %1523 = vmatprep.subr.bf16.mxu0 %v4806_v31  ;;  %v583_v31 = vmul.f32 %v5832_v25, %v5832_v25  ;;  %v631_v34 = vpack.c.bf16 %v581_v26, %v579_v14  ;;  %v5874_v11 = vsub.f32 %v5405_v54, %v5606_v19  ;;  %v634_v23 = vpack.c.bf16 %v586_v2, %v584_v27  ;;  %v10286_v54 = vld [vmem:[#allocation13_spill] sm:$0xff]  ;;  %v10287_v26 = vld [vmem:[#allocation14_spill] sm:$0xff]  ;;  %v10288_v2 = vld [vmem:[#allocation15_spill] sm:$0xff] }
 0x282   :  { %v5890_v37 = vsub.f32 %v10286_v54, %v5606_v19  ;;  %v587_v36 = vmul.f32 %v5856_v45, %v5856_v45  ;;  %v636_v27 = vpack.c.bf16 %v590_v33, %v588_v40  ;;  %v5960_v3 = vsub.f32 %v10298_v17, %v5609_v9 }
 0x283   :  { %660 = vmatpush1.bf16.msra.mxu1 %v627_v38  ;;  %v5882_v38 = vsub.f32 %v5408_v0, %v5609_v9  ;;  %v633_v14 = vpack.c.bf16 %v585_v10, %v583_v31  ;;  %v5898_v0 = vsub.f32 %v10287_v26, %v5606_v19  ;;  %v10290_v31 = vld [vmem:[#allocation2_spill] sm:$0xff]  ;;  %v10291_v10 = vld [vmem:[#allocation17_spill] sm:$0xff] }
 0x284   :  { %661 = vmatprep.subr.bf16.mxu1 %v630_v29  ;;  %1524 = vmatpush1.bf16.msra.mxu0 %v4804_v57  ;;  %v5886_v57 = vsub.f32 %v5399_v63, %v5609_v9  ;;  %v589_v29 = vmul.f32 %v5860_v28, %v5860_v28  ;;  %v592_v63 = vmul.f32 %v5865_v21, %v5865_v21 }
 0x285   :  { %1259 = vmatmul.mubr.bf16.gmra.mrb[96].mxu0 %v10290_v31  ;;  %v5915_v54 = vsub.f32 %v10291_v10, %v5606_v19  ;;  %v591_v26 = vmul.f32 %v5882_v38, %v5882_v38  ;;  %v10293_v10 = vld [vmem:[#allocation19_spill] sm:$0xff] }
 0x286   :  { %v593_v40 = vmul.f32 %v5886_v57, %v5886_v57  ;;  %v635_v33 = vpack.c.bf16 %v589_v29, %v587_v36  ;;  %1268 = vmatprep.mubr.bf16.mxu0 %v10268_v12  ;;  %v5932_v50 = vsub.f32 %v10293_v10, %v5609_v9  ;;  %v10294_v36 = vld [vmem:[#allocation16_spill] sm:$0xff] }
 0x287   :  { %662 = vmatpush1.bf16.msra.mxu1 %v629_v42  ;;  %v594_v42 = vmul.f32 %v5874_v11, %v5874_v11  ;;  %v5936_v29 = vsub.f32 %v10294_v36, %v5609_v9  ;;  %v600_v36 = vmul.f32 %v5915_v54, %v5915_v54 }
 0x288   :  { %663 = vmatprep.subr.bf16.mxu1 %v632_v24  ;;  %v5906_v24 = vsub.f32 %v10288_v2, %v5609_v9  ;;  %v599_v35 = vmul.f32 %v5932_v50, %v5932_v50 }
 0x289   :  { %v638_v31 = vpack.c.bf16 %v594_v42, %v592_v63  ;;  %v637_v42 = vpack.c.bf16 %v593_v40, %v591_v26  ;;  %v10299_v26 = vld [vmem:[#allocation3_spill] sm:$0xff]  ;;  %v10300_v40 = vld [vmem:[#allocation25_spill] sm:$0xff] }
 0x28a   :  { %v595_v62 = vmul.f32 %v5906_v24, %v5906_v24 }
 0x28b   :  { %664 = vmatpush1.bf16.msra.mxu1 %v631_v34  ;;  %v10289_v34 = vld [vmem:[#allocation12_spill] sm:$0xff] }
 0x28c   :  { %665 = vmatprep.subr.bf16.mxu1 %v634_v23  ;;  %v5910_v23 = vsub.f32 %v10289_v34, %v5609_v9  ;;  %v598_v34 = vmul.f32 %v5898_v0, %v5898_v0 }
 0x28d   :  { %1269 = vmatmul.mubr.bf16.gmra.mrb[100].mxu0 %v10299_v26 }
 0x28e   :  { %v597_v63 = vmul.f32 %v5910_v23, %v5910_v23  ;;  %1278 = vmatprep.mubr.bf16.mxu0 %v10268_v12 }
 0x28f   :  { %666 = vmatpush1.bf16.msra.mxu1 %v633_v14  ;;  %v10292_v14 = vld [vmem:[#allocation18_spill] sm:$0xff] }
 0x290   :  { %667 = vmatprep.subr.bf16.mxu1 %v636_v27  ;;  %v5924_v2 = vsub.f32 %v10292_v14, %v5606_v19  ;;  %v596_v27 = vmul.f32 %v5890_v37, %v5890_v37  ;;  %v10295_v14 = vld [vmem:[#allocation21_spill] sm:$0xff] }
 0x291   :  { %v5940_v48 = vsub.f32 %v10295_v14, %v5606_v19  ;;  %v10297_v14 = vld [vmem:[#allocation23_spill] sm:$0xff] }
 0x292   :  { %v640_v25 = vpack.c.bf16 %v598_v34, %v596_v27  ;;  %v5956_v5 = vsub.f32 %v10297_v14, %v5609_v9  ;;  %v601_v27 = vmul.f32 %v5936_v29, %v5936_v29  ;;  %v639_v34 = vpack.c.bf16 %v597_v63, %v595_v62  ;;  %v10303_v62 = vld [vmem:[#allocation24_spill] sm:$0xff] }
 0x293   :  { %668 = vmatpush1.bf16.msra.mxu1 %v635_v33  ;;  %v10296_v33 = vld [vmem:[#allocation22_spill] sm:$0xff]  ;;  %v5986_v63 = vsub.f32 %v10303_v62, %v5609_v9 }
 0x294   :  { %669 = vmatprep.subr.bf16.mxu1 %v638_v31  ;;  %v5948_v10 = vsub.f32 %v10296_v33, %v5606_v19  ;;  %v602_v31 = vmul.f32 %v5924_v2, %v5924_v2  ;;  %v5965_v33 = vsub.f32 %v10300_v40, %v5606_v19  ;;  %v10302_v40 = vld [vmem:[#allocation27_spill] sm:$0xff]  ;;  %v603_v20 = vmul.f32 %v5956_v5, %v5956_v5 }
 0x295   :  { %v5982_v32 = vsub.f32 %v10302_v40, %v5609_v9 }
 0x296   :  { %v606_v14 = vmul.f32 %v5948_v10, %v5948_v10  ;;  %v642_v26 = vpack.c.bf16 %v602_v31, %v600_v36  ;;  %v605_v36 = vmul.f32 %v5960_v3, %v5960_v3  ;;  %v641_v31 = vpack.c.bf16 %v601_v27, %v599_v35  ;;  %v10306_v35 = vld [vmem:[#allocation4_spill] sm:$0xff] }
 0x297   :  { %670 = vmatpush1.bf16.msra.mxu1 %v637_v42  ;;  %v10301_v42 = vld [vmem:[#allocation26_spill] sm:$0xff]  ;;  %v608_v62 = vmul.f32 %v5965_v33, %v5965_v33  ;;  %1279 = vmatmul.mubr.bf16.gmra.mrb[104].mxu0 %v10306_v35  ;;  %v6015_v27 = vsub.f32 %v5498_v43, %v5606_v19 }
 0x298   :  { %671 = vmatprep.subr.bf16.mxu1 %v640_v25  ;;  %v5974_v17 = vsub.f32 %v10301_v42, %v5606_v19  ;;  %v604_v25 = vmul.f32 %v5940_v48, %v5940_v48  ;;  %v5990_v42 = vsub.f32 %v5482_v55, %v5606_v19  ;;  %v6006_v55 = vsub.f32 %v5488_v61, %v5609_v9 }
 0x299   :  { %1288 = vmatprep.mubr.bf16.mxu0 %v10268_v12  ;;  %v6024_v61 = vsub.f32 %v5501_v7, %v5606_v19 }
 0x29a   :  { %v644_v13 = vpack.c.bf16 %v606_v14, %v604_v25  ;;  %v609_v25 = vmul.f32 %v5986_v63, %v5986_v63  ;;  %v643_v14 = vpack.c.bf16 %v605_v36, %v603_v20  ;;  %v612_v56 = vmul.f32 %v5990_v42, %v5990_v42  ;;  %v10307_v20 = vld [vmem:[#allocation30_spill] sm:$0xff] }
 0x29b   :  { %672 = vmatpush1.bf16.msra.mxu1 %v639_v34  ;;  %v10304_v34 = vld [vmem:[#allocation29_spill] sm:$0xff]  ;;  %v6036_v36 = vsub.f32 %v10307_v20, %v5609_v9  ;;  %v611_v7 = vmul.f32 %v6006_v55, %v6006_v55 }
 0x29c   :  { %673 = vmatprep.subr.bf16.mxu1 %v642_v26  ;;  %v5998_v40 = vsub.f32 %v10304_v34, %v5606_v19  ;;  %v610_v26 = vmul.f32 %v5974_v17, %v5974_v17  ;;  %v607_v34 = vmul.f32 %v5982_v32, %v5982_v32  ;;  %v613_v19 = vmul.f32 %v6010_v60, %v6010_v60 }
 0x29e   :  { %v614_v43 = vmul.f32 %v5998_v40, %v5998_v40  ;;  %v645_v35 = vpack.c.bf16 %v609_v25, %v607_v34  ;;  %v647_v20 = vpack.c.bf16 %v613_v19, %v611_v7  ;;  %v10312_v7 = vld [vmem:[#allocation8_spill] sm:$0xff]  ;;  %v10313_v19 = vld [vmem:[#allocation9_spill] sm:$0xff] }
 0x29f   :  { %674 = vmatpush1.bf16.msra.mxu1 %v641_v31  ;;  %v6032_v31 = vsub.f32 %v5504_v49, %v5609_v9 }
 0x2a0   :  { %675 = vmatprep.subr.bf16.mxu1 %v644_v13  ;;  %v646_v13 = vpack.c.bf16 %v610_v26, %v608_v62  ;;  %v616_v62 = vmul.f32 %v6015_v27, %v6015_v27  ;;  %v618_v26 = vmul.f32 %v6024_v61, %v6024_v61  ;;  %v648_v49 = vpack.c.bf16 %v614_v43, %v612_v56  ;;  %v10311_v43 = vld [vmem:[#allocation7_spill] sm:$0xff] }
 0x2a1   :  { %v615_v9 = vmul.f32 %v6032_v31, %v6032_v31  ;;  %v10310_v56 = vmov 1065369472  }
 0x2a2   :  { %v650_v34 = vpack.c.bf16 %v618_v26, %v616_v62  ;;  %v4812_v62 = vld [vmem:[%s9986_s5 + $0xe4] ss:$8 sps:$4 sm:$0xff]   ;;  %v4810_v26 = vld [vmem:[%s9986_s5 + $0xe0] ss:$8 sps:$4 sm:$0xff]  }
 0x2a3   :  { %676 = vmatpush1.bf16.msra.mxu1 %v643_v14  ;;  %v10308_v14 = vld [vmem:[#allocation5_spill] sm:$0xff] }
 0x2a4   :  { %677 = vmatprep.subr.bf16.mxu1 %v646_v13  ;;  %1289 = vmatmul.mubr.bf16.gmra.mrb[108].mxu0 %v10308_v14  ;;  %v617_v13 = vmul.f32 %v6036_v36, %v6036_v36  ;;  %v4813_v14 = vld [vmem:[%s9986_s5 + $0xf0] ss:$8 sps:$4 sm:$0xff]  }
 0x2a5   :  { %1298 = vmatprep.mubr.bf16.mxu0 %v10268_v12 }
 0x2a6   :  { %v649_v25 = vpack.c.bf16 %v617_v13, %v615_v9 }
 0x2a7   :  { %678 = vmatpush1.bf16.msra.mxu1 %v645_v35  ;;  %v4807_v35 = vld [vmem:[%s9986_s5 + $0xd0] ss:$8 sps:$4 sm:$0xff]  }
 0x2a8   :  { %679 = vmatprep.subr.bf16.mxu1 %v648_v49  ;;  %v4815_v49 = vld [vmem:[%s9986_s5 + $0xf4] ss:$8 sps:$4 sm:$0xff]  }
 0x2ab   :  { %680 = vmatpush1.bf16.msra.mxu1 %v647_v20 }
 0x2ac   :  { %681 = vmatprep.subr.bf16.mxu1 %v650_v34  ;;  %1299 = vmatmul.mubr.bf16.gmra.mrb[112].mxu0 %v10309_v41  ;;  %v4809_v41 = vld [vmem:[%s9986_s5 + $0xd4] ss:$8 sps:$4 sm:$0xff]  }
 0x2ad   :  { %1308 = vmatprep.mubr.bf16.mxu0 %v10268_v12  ;;  %1525 = vmatprep.subr.bf16.mxu0 %v4809_v41 }
 0x2ae   :  { %1526 = vmatpush1.bf16.msra.mxu0 %v4807_v35 }
 0x2af   :  { %682 = vmatpush1.bf16.msra.mxu1 %v649_v25  ;;  %1527 = vmatprep.subr.bf16.mxu0 %v4812_v62 }
 0x2b2   :  { %684 = vmatmul.mubr.bf16.vlgmr.msra.gmra.mrb[4].mxu1 %v10310_v56  ;;  %1528 = vmatpush1.bf16.msra.mxu0 %v4810_v26  ;;  %v406_v26 = vld [vmem:[%s9987_s3] sm:$0x3] }
 0x2b3   :  { %1834 = vmatprep.mubr.bf16.mxu1 %v10310_v56  ;;  %1529 = vmatprep.subr.bf16.mxu0 %v4815_v49  ;;  %v6086_v49 = vrot.slane %v406_v26, %v5245_v6 }
 0x2b4   :  { %1309 = vmatmul.mubr.bf16.gmra.mrb[116].mxu0 %v10311_v43 }
 0x2b5   :  { %1318 = vmatprep.mubr.bf16.mxu0 %v10268_v12  ;;  %10314 = vst [vmem:[#allocation13_spill] sm:$0xff] %v6086_v49 }
 0x2b6   :  { %1530 = vmatpush1.bf16.msra.mxu0 %v4813_v14 }
 0x2bc   :  { %1319 = vmatmul.mubr.bf16.gmra.mrb[120].mxu0 %v10312_v7 }
 0x2bd   :  { %1328 = vmatprep.mubr.bf16.mxu0 %v10268_v12 }
 0x2c4   :  { %1329 = vmatmul.mubr.bf16.gmra.mrb[124].mxu0 %v10313_v19 }
 0x385   :  { %v685_v9 = vpop.f32.mrb[4].mxu1 }
 0x386   :  { %v692_v13 = vmul.f32 0.00390625, %v685_v9  ;;  %v687_v20 = vpop.f32.mrb[5].mxu1 }
 0x387   :  { %v689_v34 = vpop.f32.mrb[6].mxu1  ;;  %v693_v19 = vmul.f32 0.00390625, %v687_v20 }
 0x388   :  { %v694_v25 = vmax.f32 %v692_v13, 0.0  ;;  %v690_v43 = vpop.f32.mrb[7].mxu1 }
 0x389   :  { %v695_v41 = vmax.f32 %v693_v19, 0.0 }
 0x38a   :  { %v696_v7 = vadd.f32 1e-05, %v694_v25 }
 0x38b   :  { %v697_v12 = vadd.f32 1e-05, %v695_v41 }
 0x38c   :  { %4832 = vrsqrt.f32 %v696_v7 }
 0x38d   :  { %4834 = vrsqrt.f32 %v697_v12 }
 0x396   :  { %v4833_v35 = vpop.eup %4832 }
 0x397   :  { %v6080_v62 = vrot.slane %v4833_v35, %v5245_v6 }
 0x399   :  { %v708_v14 = vmul.f32 %v6080_v62, %v5628_v52  ;;  %v710_v9 = vmul.f32 %v6080_v62, %v5632_v22  ;;  %v740_v13 = vmul.f32 %v6080_v62, %v5856_v45  ;;  %v742_v20 = vmul.f32 %v6080_v62, %v5860_v28 }
 0x39a   :  { %v744_v34 = vmul.f32 %v6080_v62, %v5882_v38  ;;  %v746_v12 = vmul.f32 %v6080_v62, %v5886_v57  ;;  %v748_v25 = vmul.f32 %v6080_v62, %v5906_v24  ;;  %v750_v52 = vmul.f32 %v6080_v62, %v5910_v23 }
 0x39b   :  { %v752_v22 = vmul.f32 %v6080_v62, %v5932_v50  ;;  %v754_v45 = vmul.f32 %v6080_v62, %v5936_v29  ;;  %v756_v28 = vmul.f32 %v6080_v62, %v5956_v5  ;;  %v758_v38 = vmul.f32 %v6080_v62, %v5960_v3 }
 0x39c   :  { %v760_v57 = vmul.f32 %v6080_v62, %v5982_v32  ;;  %v762_v24 = vmul.f32 %v6080_v62, %v5986_v63  ;;  %v764_v23 = vmul.f32 %v6080_v62, %v6006_v55  ;;  %v766_v50 = vmul.f32 %v6080_v62, %v6010_v60  ;;  %v407_v60 = vld [vmem:[%s9988_s4] sm:$0x3] }
 0x39d   :  { %v768_v29 = vmul.f32 %v6080_v62, %v6032_v31  ;;  %v770_v5 = vmul.f32 %v6080_v62, %v6036_v36  ;;  %v6125_v3 = vmul.f32 %v6086_v49, %v740_v13  ;;  %v6128_v32 = vmul.f32 %v6086_v49, %v742_v20 }
 0x39e   :  { %v6131_v63 = vmul.f32 %v6086_v49, %v744_v34  ;;  %v6134_v55 = vmul.f32 %v6086_v49, %v746_v12  ;;  %v6140_v31 = vmul.f32 %v6086_v49, %v748_v25  ;;  %v6143_v36 = vmul.f32 %v6086_v49, %v750_v52  ;;  %v4835_v52 = vpop.eup %4834 }
 0x39f   :  { %v6146_v43 = vmul.f32 %v6086_v49, %v752_v22  ;;  %v6149_v7 = vmul.f32 %v6086_v49, %v754_v45  ;;  %v6152_v19 = vmul.f32 %v6086_v49, %v756_v28  ;;  %v6155_v41 = vmul.f32 %v6086_v49, %v758_v38 }
 0x3a0   :  { %v6158_v35 = vmul.f32 %v6086_v49, %v760_v57  ;;  %v6161_v13 = vmul.f32 %v6086_v49, %v762_v24  ;;  %v6164_v20 = vmul.f32 %v6086_v49, %v764_v23  ;;  %v6167_v34 = vmul.f32 %v6086_v49, %v766_v50  ;;  %v10319_v23 = vld [vmem:[#allocation10_spill] sm:$0xff] }
 0x3a1   :  { %v6170_v12 = vmul.f32 %v6086_v49, %v768_v29  ;;  %v6173_v25 = vmul.f32 %v6086_v49, %v770_v5  ;;  %v6176_v22 = vrot.slane %v407_v60, %v5245_v6  ;;  %v783_v45 = vmul.f32 %v6086_v49, %v708_v14 }
 0x3a2   :  { %10315 = vst [vmem:[#allocation14_spill] sm:$0xff] %v6164_v20  ;;  %10316 = vst [vmem:[#allocation15_spill] sm:$0xff] %v6167_v34  ;;  %v785_v28 = vmul.f32 %v6086_v49, %v710_v9  ;;  %v712_v38 = vmul.f32 %v6080_v62, %v5655_v30  ;;  %v714_v57 = vmul.f32 %v6080_v62, %v5659_v58 }
 0x3a3   :  { %10317 = vst [vmem:[#allocation12_spill] sm:$0xff] %v6170_v12  ;;  %10318 = vst [vmem:[#allocation2_spill] sm:$0xff] %v6173_v25  ;;  %v716_v24 = vmul.f32 %v6080_v62, %v5679_v46  ;;  %v6187_v50 = vrot.slane %v406_v26, %v10319_v23  ;;  %v718_v29 = vmul.f32 %v6080_v62, %v5683_v44 }
 0x3a4   :  { %v6192_v5 = vrot.slane %v4835_v52, %v5245_v6  ;;  %v6195_v14 = vrot.slane %v407_v60, %v10319_v23  ;;  %v6199_v30 = vmul.f32 %v6080_v62, %v5711_v1  ;;  %v6203_v58 = vmul.f32 %v6080_v62, %v5715_v51  ;;  %v10323_v6 = vld [vmem:[#allocation33_spill] sm:$0xff] }
 0x3a5   :  { %v6207_v46 = vmul.f32 %v6080_v62, %v5741_v47  ;;  %v6210_v44 = vadd.f32 %v6176_v22, %v783_v45  ;;  %v6214_v26 = vmul.f32 %v6080_v62, %v5745_v18  ;;  %v6218_v9 = vmul.f32 %v6080_v62, %v5773_v53  ;;  %v10321_v45 = vld [vmem:[#allocation31_spill] sm:$0xff] }
 0x3a6   :  { %v6222_v1 = vmul.f32 %v6080_v62, %v5777_v39  ;;  %v6225_v51 = vadd.f32 %v6176_v22, %v785_v28  ;;  %v6229_v47 = vmul.f32 %v6080_v62, %v5803_v59  ;;  %v787_v60 = vmul.f32 %v6086_v49, %v712_v38  ;;  %v10322_v38 = vld [vmem:[#allocation32_spill] sm:$0xff] }
 0x3a7   :  { %v789_v18 = vmul.f32 %v6086_v49, %v714_v57  ;;  %v6234_v52 = vmul.f32 %v6086_v49, %v716_v24  ;;  %v6237_v53 = vmul.f32 %v6086_v49, %v718_v29  ;;  %v709_v39 = vmul.f32 %v6192_v5, %v5619_v4 }
 0x3a8   :  { %10320 = vst [vmem:[#allocation17_spill] sm:$0xff] %v6229_v47  ;;  %v711_v28 = vmul.f32 %v6192_v5, %v10321_v45  ;;  %v713_v59 = vmul.f32 %v6192_v5, %v5637_v15  ;;  %v922_v56 = vmax.f32 %v6210_v44, 0.0  ;;  %v715_v57 = vmul.f32 %v6192_v5, %v10322_v38 }
 0x3a9   :  { %v717_v24 = vmul.f32 %v6192_v5, %v5667_v8  ;;  %v719_v29 = vmul.f32 %v6192_v5, %v10323_v6  ;;  %v924_v23 = vmax.f32 %v6225_v51, 0.0  ;;  %v745_v4 = vmul.f32 %v6192_v5, %v5865_v21 }
 0x3aa   :  { %v747_v45 = vmul.f32 %v6192_v5, %v5874_v11  ;;  %v749_v15 = vmul.f32 %v6192_v5, %v5890_v37  ;;  %v751_v44 = vmul.f32 %v6192_v5, %v5898_v0  ;;  %v753_v8 = vmul.f32 %v6192_v5, %v5915_v54 }
 0x3ab   :  { %v755_v6 = vmul.f32 %v6192_v5, %v5924_v2  ;;  %v757_v51 = vmul.f32 %v6192_v5, %v5940_v48  ;;  %v759_v21 = vmul.f32 %v6192_v5, %v5948_v10  ;;  %v761_v11 = vmul.f32 %v6192_v5, %v5965_v33 }
 0x3ac   :  { %v763_v37 = vmul.f32 %v6192_v5, %v5974_v17  ;;  %v765_v0 = vmul.f32 %v6192_v5, %v5990_v42  ;;  %v767_v54 = vmul.f32 %v6192_v5, %v5998_v40  ;;  %v769_v2 = vmul.f32 %v6192_v5, %v6015_v27 }
 0x3ad   :  { %v771_v48 = vmul.f32 %v6192_v5, %v6024_v61  ;;  %v784_v10 = vmul.f32 %v6187_v50, %v709_v39  ;;  %v786_v38 = vmul.f32 %v6187_v50, %v711_v28  ;;  %v788_v33 = vmul.f32 %v6187_v50, %v713_v59 }
 0x3ae   :  { %v790_v17 = vmul.f32 %v6187_v50, %v715_v57  ;;  %v6286_v47 = vmul.f32 %v6187_v50, %v745_v4  ;;  %v6289_v42 = vmul.f32 %v6187_v50, %v747_v45  ;;  %v6292_v40 = vmul.f32 %v6187_v50, %v749_v15 }
 0x3af   :  { %v6295_v27 = vmul.f32 %v6187_v50, %v751_v44  ;;  %v6298_v61 = vmul.f32 %v6187_v50, %v753_v8  ;;  %v6301_v39 = vmul.f32 %v6187_v50, %v755_v6  ;;  %v6304_v28 = vmul.f32 %v6187_v50, %v757_v51 }
 0x3b0   :  { %v6307_v59 = vmul.f32 %v6187_v50, %v759_v21  ;;  %v6310_v57 = vmul.f32 %v6187_v50, %v761_v11  ;;  %v6313_v4 = vmul.f32 %v6187_v50, %v763_v37  ;;  %v6316_v45 = vmul.f32 %v6187_v50, %v765_v0  ;;  %v10326_v37 = vld [vmem:[#allocation34_spill] sm:$0xff] }
 0x3b1   :  { %v6319_v15 = vmul.f32 %v6187_v50, %v767_v54  ;;  %v6322_v44 = vmul.f32 %v6187_v50, %v769_v2  ;;  %v6325_v8 = vmul.f32 %v6187_v50, %v771_v48  ;;  %v859_v6 = vadd.f32 %v6195_v14, %v784_v10 }
 0x3b2   :  { %v861_v51 = vadd.f32 %v6195_v14, %v786_v38  ;;  %v863_v21 = vadd.f32 %v6195_v14, %v788_v33  ;;  %v721_v11 = vmul.f32 %v6192_v5, %v5691_v16  ;;  %v723_v0 = vmul.f32 %v6192_v5, %v10326_v37  ;;  %v10327_v38 = vld [vmem:[#allocation35_spill] sm:$0xff] }
 0x3b3   :  { %10324 = vst [vmem:[#allocation18_spill] sm:$0xff] %v6322_v44  ;;  %10325 = vst [vmem:[#allocation19_spill] sm:$0xff] %v6325_v8  ;;  %v792_v54 = vmul.f32 %v6187_v50, %v717_v24  ;;  %v865_v2 = vadd.f32 %v6195_v14, %v790_v17  ;;  %v794_v25 = vmul.f32 %v6187_v50, %v719_v29  ;;  %v923_v48 = vmax.f32 %v859_v6, 0.0  ;;  %v10328_v44 = vld [vmem:[#allocation36_spill] sm:$0xff] }
 0x3b4   :  { %v925_v12 = vmax.f32 %v861_v51, 0.0  ;;  %v927_v8 = vmax.f32 %v863_v21, 0.0  ;;  %v795_v10 = vmul.f32 %v6086_v49, %v6199_v30  ;;  %v725_v33 = vmul.f32 %v6192_v5, %v10327_v38 }
 0x3b5   :  { %v727_v16 = vmul.f32 %v6192_v5, %v10328_v44  ;;  %v929_v34 = vmax.f32 %v865_v2, 0.0  ;;  %v797_v24 = vmul.f32 %v6086_v49, %v6203_v58  ;;  %v862_v17 = vadd.f32 %v6176_v22, %v787_v60 }
 0x3b6   :  { %v987_v37 = vpack.c.bf16 %v925_v12, %v923_v48  ;;  %v864_v29 = vadd.f32 %v6176_v22, %v789_v18  ;;  %v799_v6 = vmul.f32 %v6086_v49, %v6207_v46  ;;  %v986_v51 = vpack.c.bf16 %v924_v23, %v922_v56  ;;  %v10329_v18 = vld [vmem:[#allocation37_spill] sm:$0xff] }
 0x3b7   :  { %v796_v30 = vmul.f32 %v6187_v50, %v721_v11  ;;  %v798_v21 = vmul.f32 %v6187_v50, %v723_v0  ;;  %v801_v44 = vmul.f32 %v6086_v49, %v6214_v26  ;;  %v989_v2 = vpack.c.bf16 %v929_v34, %v927_v8  ;;  %v10330_v11 = vld [vmem:[#allocation38_spill] sm:$0xff] }
 0x3b8   :  { %1531 = vmatprep.mubr.bf16.mxu0 %v987_v37  ;;  %v867_v58 = vadd.f32 %v6195_v14, %v792_v54  ;;  %v869_v12 = vadd.f32 %v6195_v14, %v794_v25  ;;  %v803_v60 = vmul.f32 %v6086_v49, %v6218_v9  ;;  %v729_v46 = vmul.f32 %v6192_v5, %v10329_v18 }
 0x3b9   :  { %v800_v56 = vmul.f32 %v6187_v50, %v725_v33  ;;  %v802_v23 = vmul.f32 %v6187_v50, %v727_v16  ;;  %1532 = vmatmul.mubr.bf16.vlgmr.msra.gmra.mrb[64].mxu0 %v986_v51  ;;  %v731_v26 = vmul.f32 %v6192_v5, %v10330_v11  ;;  %v926_v34 = vmax.f32 %v862_v17, 0.0  ;;  %v10331_v17 = vld [vmem:[#allocation39_spill] sm:$0xff] }
 0x3ba   :  { %1541 = vmatprep.mubr.bf16.mxu0 %v989_v2  ;;  %v928_v8 = vmax.f32 %v864_v29, 0.0  ;;  %v866_v25 = vadd.f32 %v6176_v22, %v6234_v52  ;;  %v805_v9 = vmul.f32 %v6086_v49, %v6222_v1  ;;  %v868_v0 = vadd.f32 %v6176_v22, %v6237_v53  ;;  %v10332_v53 = vld [vmem:[#allocation40_spill] sm:$0xff] }
 0x3bb   :  { %v871_v54 = vadd.f32 %v6195_v14, %v796_v30  ;;  %v873_v48 = vadd.f32 %v6195_v14, %v798_v21  ;;  %v931_v38 = vmax.f32 %v867_v58, 0.0  ;;  %v933_v33 = vmax.f32 %v869_v12, 0.0 }
 0x3bc   :  { %v870_v16 = vadd.f32 %v6176_v22, %v795_v10  ;;  %v872_v37 = vadd.f32 %v6176_v22, %v797_v24  ;;  %v733_v29 = vmul.f32 %v6192_v5, %v10331_v17  ;;  %v804_v52 = vmul.f32 %v6187_v50, %v729_v46 }
 0x3bd   :  { %v875_v1 = vadd.f32 %v6195_v14, %v800_v56  ;;  %v877_v51 = vadd.f32 %v6195_v14, %v802_v23  ;;  %v735_v30 = vmul.f32 %v6192_v5, %v10332_v53  ;;  %v806_v21 = vmul.f32 %v6187_v50, %v731_v26  ;;  %v10333_v56 = vld [vmem:[#allocation41_spill] sm:$0xff] }
 0x3be   :  { %v988_v2 = vpack.c.bf16 %v928_v8, %v926_v34  ;;  %v930_v58 = vmax.f32 %v866_v25, 0.0  ;;  %v932_v12 = vmax.f32 %v868_v0, 0.0  ;;  %v935_v10 = vmax.f32 %v871_v54, 0.0  ;;  %v10334_v34 = vld [vmem:[#allocation42_spill] sm:$0xff] }
 0x3bf   :  { %v937_v18 = vmax.f32 %v873_v48, 0.0  ;;  %v874_v24 = vadd.f32 %v6176_v22, %v799_v6  ;;  %v991_v11 = vpack.c.bf16 %v933_v33, %v931_v38  ;;  %v934_v17 = vmax.f32 %v870_v16, 0.0  ;;  %v10335_v6 = vld [vmem:[#allocation43_spill] sm:$0xff] }
 0x3c0   :  { %v936_v49 = vmax.f32 %v872_v37, 0.0  ;;  %v876_v46 = vadd.f32 %v6176_v22, %v801_v44  ;;  %v6385_v23 = vmul.f32 %v6080_v62, %v10333_v56  ;;  %v939_v53 = vmax.f32 %v875_v1, 0.0 }
 0x3c1   :  { %1542 = vmatmul.mubr.bf16.gmra.mrb[68].mxu0 %v988_v2  ;;  %v941_v20 = vmax.f32 %v877_v51, 0.0  ;;  %v6388_v26 = vadd.f32 %v6195_v14, %v804_v52  ;;  %v6392_v8 = vmul.f32 %v6192_v5, %v10334_v34  ;;  %v6396_v25 = vmul.f32 %v6192_v5, %v10335_v6 }
 0x3c2   :  { %v808_v44 = vmul.f32 %v6187_v50, %v733_v29  ;;  %1551 = vmatprep.mubr.bf16.mxu0 %v991_v11  ;;  %v6400_v0 = vadd.f32 %v6195_v14, %v806_v21  ;;  %v6403_v54 = vmul.f32 %v6187_v50, %v735_v30  ;;  %v990_v48 = vpack.c.bf16 %v932_v12, %v930_v58 }
 0x3c3   :  { %v993_v38 = vpack.c.bf16 %v937_v18, %v935_v10  ;;  %v938_v33 = vmax.f32 %v874_v24, 0.0  ;;  %v992_v16 = vpack.c.bf16 %v936_v49, %v934_v17  ;;  %v940_v37 = vmax.f32 %v876_v46, 0.0 }
 0x3c4   :  { %v6406_v52 = vadd.f32 %v6176_v22, %v803_v60  ;;  %v6409_v1 = vadd.f32 %v6176_v22, %v805_v9  ;;  %v995_v51 = vpack.c.bf16 %v941_v20, %v939_v53  ;;  %v943_v29 = vmax.f32 %v6388_v26, 0.0 }
 0x3c5   :  { %v890_v21 = vadd.f32 %v6176_v22, %v6125_v3  ;;  %v892_v30 = vadd.f32 %v6176_v22, %v6128_v32  ;;  %v945_v2 = vmax.f32 %v6400_v0, 0.0  ;;  %v6418_v49 = vadd.f32 %v6195_v14, %v808_v44 }
 0x3c6   :  { %v895_v60 = vadd.f32 %v6195_v14, %v6286_v47  ;;  %v897_v9 = vadd.f32 %v6195_v14, %v6289_v42  ;;  %v894_v12 = vadd.f32 %v6176_v22, %v6131_v63  ;;  %v896_v3 = vadd.f32 %v6176_v22, %v6134_v55 }
 0x3c7   :  { %v954_v20 = vmax.f32 %v890_v21, 0.0  ;;  %v956_v58 = vmax.f32 %v892_v30, 0.0  ;;  %v6428_v32 = vpack.c.bf16 %v940_v37, %v938_v33  ;;  %v899_v24 = vadd.f32 %v6195_v14, %v6292_v40 }
 0x3c8   :  { %v959_v10 = vmax.f32 %v895_v60, 0.0  ;;  %v961_v18 = vmax.f32 %v897_v9, 0.0  ;;  %v958_v11 = vmax.f32 %v894_v12, 0.0  ;;  %v960_v42 = vmax.f32 %v896_v3, 0.0 }
 0x3c9   :  { %1552 = vmatmul.mubr.bf16.gmra.mrb[72].mxu0 %v990_v48  ;;  %v6432_v47 = vpack.c.bf16 %v956_v58, %v954_v20  ;;  %v901_v17 = vadd.f32 %v6195_v14, %v6295_v27  ;;  %v963_v46 = vmax.f32 %v899_v24, 0.0  ;;  %v898_v55 = vadd.f32 %v6176_v22, %v6140_v31 }
 0x3ca   :  { %1561 = vmatprep.mubr.bf16.mxu0 %v993_v38  ;;  %v6436_v63 = vpack.c.bf16 %v961_v18, %v959_v10  ;;  %v900_v56 = vadd.f32 %v6176_v22, %v6143_v36  ;;  %v6442_v53 = vpack.c.bf16 %v960_v42, %v958_v11  ;;  %v903_v34 = vadd.f32 %v6195_v14, %v6298_v61 }
 0x3cb   :  { %v965_v40 = vmax.f32 %v901_v17, 0.0  ;;  %v905_v6 = vadd.f32 %v6195_v14, %v6301_v39  ;;  %v962_v27 = vmax.f32 %v898_v55, 0.0  ;;  %v902_v48 = vadd.f32 %v6176_v22, %v6146_v43 }
 0x3cc   :  { %v964_v44 = vmax.f32 %v900_v56, 0.0  ;;  %v904_v31 = vadd.f32 %v6176_v22, %v6149_v7  ;;  %v967_v36 = vmax.f32 %v903_v34, 0.0  ;;  %v907_v37 = vadd.f32 %v6195_v14, %v6304_v28 }
 0x3cd   :  { %v6452_v38 = vpack.c.bf16 %v965_v40, %v963_v46  ;;  %v969_v33 = vmax.f32 %v905_v6, 0.0  ;;  %v966_v61 = vmax.f32 %v902_v48, 0.0  ;;  %v909_v39 = vadd.f32 %v6195_v14, %v6307_v59  ;;  %v10336_v46 = vld [vmem:[#allocation14_spill] sm:$0xff]  ;;  %v10339_v6 = vld [vmem:[#allocation19_spill] sm:$0xff]  ;;  %v10340_v48 = vld [vmem:[#allocation12_spill] sm:$0xff] }
 0x3ce   :  { %v6456_v21 = vpack.c.bf16 %v964_v44, %v962_v27  ;;  %v968_v30 = vmax.f32 %v904_v31, 0.0  ;;  %v971_v43 = vmax.f32 %v907_v37, 0.0  ;;  %v906_v7 = vadd.f32 %v6176_v22, %v6152_v19 }
 0x3cf   :  { %v6460_v60 = vpack.c.bf16 %v969_v33, %v967_v36  ;;  %v908_v9 = vadd.f32 %v6176_v22, %v6155_v41  ;;  %v973_v58 = vmax.f32 %v909_v39, 0.0  ;;  %v911_v28 = vadd.f32 %v6195_v14, %v6310_v57  ;;  %v10341_v36 = vld [vmem:[#allocation2_spill] sm:$0xff] }
 0x3d0   :  { %v6466_v20 = vpack.c.bf16 %v968_v30, %v966_v61  ;;  %v913_v12 = vadd.f32 %v6195_v14, %v6313_v4  ;;  %v970_v59 = vmax.f32 %v906_v7, 0.0  ;;  %v910_v10 = vadd.f32 %v6176_v22, %v6158_v35 }
 0x3d1   :  { %1562 = vmatmul.mubr.bf16.gmra.mrb[76].mxu0 %v992_v16  ;;  %v972_v3 = vmax.f32 %v908_v9, 0.0  ;;  %v912_v19 = vadd.f32 %v6176_v22, %v6161_v13  ;;  %v6476_v41 = vpack.c.bf16 %v973_v58, %v971_v43  ;;  %v975_v18 = vmax.f32 %v911_v28, 0.0 }
 0x3d2   :  { %1571 = vmatprep.mubr.bf16.mxu0 %v995_v51  ;;  %v977_v24 = vmax.f32 %v913_v12, 0.0  ;;  %v915_v57 = vadd.f32 %v6195_v14, %v6316_v45  ;;  %v974_v4 = vmax.f32 %v910_v10, 0.0  ;;  %v917_v42 = vadd.f32 %v6195_v14, %v6319_v15  ;;  %v10337_v51 = vld [vmem:[#allocation15_spill] sm:$0xff]  ;;  %v10338_v45 = vld [vmem:[#allocation18_spill] sm:$0xff] }
 0x3d3   :  { %v6480_v11 = vpack.c.bf16 %v972_v3, %v970_v59  ;;  %v976_v16 = vmax.f32 %v912_v19, 0.0  ;;  %v914_v13 = vadd.f32 %v6176_v22, %v10336_v46  ;;  %v916_v55 = vadd.f32 %v6176_v22, %v10337_v51  ;;  %v10342_v59 = vld [vmem:[#allocation17_spill] sm:$0xff] }
 0x3d4   :  { %v6484_v17 = vpack.c.bf16 %v977_v24, %v975_v18  ;;  %v979_v35 = vmax.f32 %v915_v57, 0.0  ;;  %v981_v40 = vmax.f32 %v917_v42, 0.0  ;;  %v919_v34 = vadd.f32 %v6195_v14, %v10338_v45  ;;  %v10343_v3 = vld [vmem:[#allocation13_spill] sm:$0xff]  ;;  %v10344_v18 = vld [vmem:[#allocation44_spill] sm:$0xff]  ;;  %v10347_v42 = vld [vmem:[#allocation47_spill] sm:$0xff] }
 0x3d5   :  { %v6490_v56 = vpack.c.bf16 %v976_v16, %v974_v4  ;;  %v921_v27 = vadd.f32 %v6195_v14, %v10339_v6  ;;  %v978_v44 = vmax.f32 %v914_v13, 0.0  ;;  %v980_v15 = vmax.f32 %v916_v55, 0.0  ;;  %v10345_v57 = vld [vmem:[#allocation45_spill] sm:$0xff] }
 0x3d6   :  { %v918_v31 = vadd.f32 %v6176_v22, %v10340_v48  ;;  %v920_v33 = vadd.f32 %v6176_v22, %v10341_v36  ;;  %v885_v37 = vadd.f32 %v6195_v14, %v6403_v54  ;;  %v6502_v61 = vpack.c.bf16 %v981_v40, %v979_v35 }
 0x3d7   :  { %v983_v30 = vmax.f32 %v919_v34, 0.0  ;;  %v985_v39 = vmax.f32 %v921_v27, 0.0  ;;  %v997_v43 = vpack.c.bf16 %v945_v2, %v943_v29  ;;  %v1014_v7 = vpack.c.bf16 %v980_v15, %v978_v44 }
 0x3d8   :  { %v982_v9 = vmax.f32 %v918_v31, 0.0  ;;  %v984_v58 = vmax.f32 %v920_v33, 0.0  ;;  %v807_v54 = vmul.f32 %v10343_v3, %v10342_v59  ;;  %v809_v10 = vmul.f32 %v10343_v3, %v6385_v23  ;;  %v10346_v23 = vld [vmem:[#allocation46_spill] sm:$0xff] }
 0x3d9   :  { %1572 = vmatmul.mubr.bf16.gmra.mrb[80].mxu0 %v6428_v32  ;;  %v1017_v28 = vpack.c.bf16 %v985_v39, %v983_v30  ;;  %v942_v19 = vmax.f32 %v6406_v52, 0.0  ;;  %v944_v26 = vmax.f32 %v6409_v1, 0.0  ;;  %v812_v0 = vmul.f32 %v6187_v50, %v6392_v8 }
 0x3da   :  { %1581 = vmatprep.mubr.bf16.mxu0 %v997_v43  ;;  %v1016_v12 = vpack.c.bf16 %v984_v58, %v982_v9  ;;  %v814_v29 = vmul.f32 %v6187_v50, %v6396_v25  ;;  %v947_v2 = vmax.f32 %v6418_v49, 0.0  ;;  %v949_v32 = vmax.f32 %v885_v37, 0.0 }
 0x3db   :  { %v736_v24 = vmul.f32 %v6080_v62, %v10344_v18  ;;  %v738_v4 = vmul.f32 %v6080_v62, %v10345_v57  ;;  %v741_v52 = vmul.f32 %v6192_v5, %v10346_v23  ;;  %v996_v16 = vpack.c.bf16 %v944_v26, %v942_v19 }
 0x3dc   :  { %v882_v1 = vadd.f32 %v6176_v22, %v807_v54  ;;  %v884_v8 = vadd.f32 %v6176_v22, %v809_v10  ;;  %v743_v25 = vmul.f32 %v6192_v5, %v10347_v42  ;;  %v999_v35 = vpack.c.bf16 %v949_v32, %v947_v2 }
 0x3dd   :  { %v887_v49 = vadd.f32 %v6195_v14, %v812_v0  ;;  %v889_v46 = vadd.f32 %v6195_v14, %v814_v29  ;;  %v811_v62 = vmul.f32 %v10343_v3, %v736_v24  ;;  %v813_v13 = vmul.f32 %v10343_v3, %v738_v4 }
 0x3de   :  { %v946_v51 = vmax.f32 %v882_v1, 0.0  ;;  %v948_v55 = vmax.f32 %v884_v8, 0.0  ;;  %v816_v40 = vmul.f32 %v6187_v50, %v741_v52  ;;  %v818_v45 = vmul.f32 %v6187_v50, %v743_v25 }
 0x3df   :  { %v951_v34 = vmax.f32 %v887_v49, 0.0  ;;  %v953_v6 = vmax.f32 %v889_v46, 0.0  ;;  %v886_v27 = vadd.f32 %v6176_v22, %v811_v62  ;;  %v888_v44 = vadd.f32 %v6176_v22, %v813_v13  ;;  %v1692_v22 = vld [vmem:[%s9989_s7] sm:$0x3] }
 0x3e0   :  { %v998_v5 = vpack.c.bf16 %v948_v55, %v946_v51  ;;  %v891_v48 = vadd.f32 %v6195_v14, %v816_v40  ;;  %v893_v31 = vadd.f32 %v6195_v14, %v818_v45 }
 0x3e1   :  { %1582 = vmatmul.mubr.bf16.gmra.mrb[84].mxu0 %v996_v16  ;;  %v1001_v15 = vpack.c.bf16 %v953_v6, %v951_v34  ;;  %v950_v36 = vmax.f32 %v886_v27, 0.0  ;;  %v952_v33 = vmax.f32 %v888_v44, 0.0 }
 0x3e2   :  { %1591 = vmatprep.mubr.bf16.mxu0 %v999_v35  ;;  %v955_v37 = vmax.f32 %v891_v48, 0.0  ;;  %v957_v30 = vmax.f32 %v893_v31, 0.0 }
 0x3e3   :  { %v1000_v39 = vpack.c.bf16 %v952_v33, %v950_v36 }
 0x3e4   :  { %v1003_v50 = vpack.c.bf16 %v957_v30, %v955_v37 }
 0x3e9   :  { %1592 = vmatmul.mubr.bf16.gmra.mrb[88].mxu0 %v998_v5 }
 0x3ea   :  { %1601 = vmatprep.mubr.bf16.mxu0 %v1001_v15 }
 0x3f1   :  { %1602 = vmatmul.mubr.bf16.gmra.mrb[92].mxu0 %v1000_v39 }
 0x3f2   :  { %1611 = vmatprep.mubr.bf16.mxu0 %v1003_v50 }
 0x3f9   :  { %1612 = vmatmul.mubr.bf16.gmra.mrb[96].mxu0 %v6432_v47  ;;  %v10348_v47 = vld [vmem:[#allocation10_spill] sm:$0xff] }
 0x3fa   :  { %1621 = vmatprep.mubr.bf16.mxu0 %v6436_v63  ;;  %v6556_v63 = vrot.slane %v1692_v22, %v10348_v47 }
 0x401   :  { %1622 = vmatmul.mubr.bf16.gmra.mrb[100].mxu0 %v6442_v53  ;;  %v10349_v53 = vld [vmem:[#allocation11_spill] sm:$0xff] }
 0x402   :  { %1631 = vmatprep.mubr.bf16.mxu0 %v6452_v38  ;;  %v6559_v38 = vrot.slane %v1692_v22, %v10349_v53 }
 0x409   :  { %1632 = vmatmul.mubr.bf16.gmra.mrb[104].mxu0 %v6456_v21 }
 0x40a   :  { %1641 = vmatprep.mubr.bf16.mxu0 %v6460_v60 }
 0x411   :  { %1642 = vmatmul.mubr.bf16.gmra.mrb[108].mxu0 %v6466_v20 }
 0x412   :  { %1651 = vmatprep.mubr.bf16.mxu0 %v6476_v41 }
 0x419   :  { %1652 = vmatmul.mubr.bf16.gmra.mrb[112].mxu0 %v6480_v11 }
 0x41a   :  { %1661 = vmatprep.mubr.bf16.mxu0 %v6484_v17 }
 0x421   :  { %1662 = vmatmul.mubr.bf16.gmra.mrb[116].mxu0 %v6490_v56 }
 0x422   :  { %1671 = vmatprep.mubr.bf16.mxu0 %v6502_v61 }
 0x429   :  { %1672 = vmatmul.mubr.bf16.gmra.mrb[120].mxu0 %v1014_v7 }
 0x42a   :  { %1681 = vmatprep.mubr.bf16.mxu0 %v1017_v28 }
 0x431   :  { %1682 = vmatmul.mubr.bf16.gmra.mrb[124].mxu0 %v1016_v12 }
 0x48c   :  { %v1533_v14 = vpop.f32.mrb[64].mxu0 }
 0x48d   :  { %v1535_v21 = vpop.f32.mrb[65].mxu0  ;;  %v6571_v56 = vadd.f32 %v6559_v38, %v1533_v14 }
 0x48e   :  { %v1537_v60 = vpop.f32.mrb[66].mxu0  ;;  %v6565_v11 = vadd.f32 %v6556_v63, %v1535_v21 }
 0x48f   :  { %v6562_v20 = vadd.f32 %v6559_v38, %v1537_v60  ;;  %v1539_v41 = vpop.f32.mrb[67].mxu0 }
 0x490   :  { %v6568_v17 = vadd.f32 %v6556_v63, %v1539_v41 }
 0x491   :  { %v1770_v43 = vpack.c.bf16 %v6562_v20, %v6571_v56 }
 0x492   :  { %v1771_v61 = vpack.c.bf16 %v6568_v17, %v6565_v11 }
 0x494   :  { %v1543_v7 = vpop.f32.mrb[68].mxu0  ;;  %1802 = vmatprep.subr.bf16.mxu1 %v1771_v61 }
 0x495   :  { %v1545_v9 = vpop.f32.mrb[69].mxu0  ;;  %1803 = vmatpush1.bf16.msra.mxu1 %v1770_v43  ;;  %v6587_v54 = vadd.f32 %v6559_v38, %v1543_v7 }
 0x496   :  { %v1547_v58 = vpop.f32.mrb[70].mxu0  ;;  %v6581_v59 = vadd.f32 %v6556_v63, %v1545_v9 }
 0x497   :  { %v6578_v28 = vadd.f32 %v6559_v38, %v1547_v58  ;;  %v1549_v12 = vpop.f32.mrb[71].mxu0 }
 0x498   :  { %v6584_v3 = vadd.f32 %v6556_v63, %v1549_v12 }
 0x499   :  { %v1772_v19 = vpack.c.bf16 %v6578_v28, %v6587_v54 }
 0x49a   :  { %v1773_v10 = vpack.c.bf16 %v6584_v3, %v6581_v59 }
 0x49c   :  { %v1553_v26 = vpop.f32.mrb[72].mxu0  ;;  %1804 = vmatprep.subr.bf16.mxu1 %v1773_v10 }
 0x49d   :  { %v1555_v0 = vpop.f32.mrb[73].mxu0  ;;  %1805 = vmatpush1.bf16.msra.mxu1 %v1772_v19  ;;  %v6603_v57 = vadd.f32 %v6559_v38, %v1553_v26 }
 0x49e   :  { %v1557_v29 = vpop.f32.mrb[74].mxu0  ;;  %v6597_v18 = vadd.f32 %v6556_v63, %v1555_v0 }
 0x49f   :  { %v6594_v2 = vadd.f32 %v6559_v38, %v1557_v29  ;;  %v1559_v32 = vpop.f32.mrb[75].mxu0 }
 0x4a0   :  { %v6600_v24 = vadd.f32 %v6556_v63, %v1559_v32 }
 0x4a1   :  { %v1774_v23 = vpack.c.bf16 %v6594_v2, %v6603_v57 }
 0x4a2   :  { %v1775_v4 = vpack.c.bf16 %v6600_v24, %v6597_v18 }
 0x4a4   :  { %v1563_v52 = vpop.f32.mrb[76].mxu0  ;;  %1806 = vmatprep.subr.bf16.mxu1 %v1775_v4 }
 0x4a5   :  { %v1565_v16 = vpop.f32.mrb[77].mxu0  ;;  %1807 = vmatpush1.bf16.msra.mxu1 %v1774_v23  ;;  %v6619_v49 = vadd.f32 %v6559_v38, %v1563_v52 }
 0x4a6   :  { %v1567_v1 = vpop.f32.mrb[78].mxu0  ;;  %v6613_v25 = vadd.f32 %v6556_v63, %v1565_v16 }
 0x4a7   :  { %v6610_v8 = vadd.f32 %v6559_v38, %v1567_v1  ;;  %v1569_v42 = vpop.f32.mrb[79].mxu0 }
 0x4a8   :  { %v6616_v35 = vadd.f32 %v6556_v63, %v1569_v42 }
 0x4a9   :  { %v1776_v62 = vpack.c.bf16 %v6610_v8, %v6619_v49 }
 0x4aa   :  { %v1777_v46 = vpack.c.bf16 %v6616_v35, %v6613_v25 }
 0x4ac   :  { %v1573_v13 = vpop.f32.mrb[80].mxu0  ;;  %1808 = vmatprep.subr.bf16.mxu1 %v1777_v46 }
 0x4ad   :  { %v1575_v51 = vpop.f32.mrb[81].mxu0  ;;  %1809 = vmatpush1.bf16.msra.mxu1 %v1776_v62  ;;  %v6635_v5 = vadd.f32 %v6559_v38, %v1573_v13 }
 0x4ae   :  { %v1577_v55 = vpop.f32.mrb[82].mxu0  ;;  %v6629_v34 = vadd.f32 %v6556_v63, %v1575_v51 }
 0x4af   :  { %v6626_v40 = vadd.f32 %v6559_v38, %v1577_v55  ;;  %v1579_v45 = vpop.f32.mrb[83].mxu0 }
 0x4b0   :  { %v6632_v6 = vadd.f32 %v6556_v63, %v1579_v45 }
 0x4b1   :  { %v1778_v44 = vpack.c.bf16 %v6626_v40, %v6635_v5 }
 0x4b2   :  { %v1779_v27 = vpack.c.bf16 %v6632_v6, %v6629_v34 }
 0x4b4   :  { %v1583_v15 = vpop.f32.mrb[84].mxu0  ;;  %1810 = vmatprep.subr.bf16.mxu1 %v1779_v27 }
 0x4b5   :  { %v1585_v48 = vpop.f32.mrb[85].mxu0  ;;  %1811 = vmatpush1.bf16.msra.mxu1 %v1778_v44  ;;  %v6651_v39 = vadd.f32 %v6559_v38, %v1583_v15 }
 0x4b6   :  { %v1587_v31 = vpop.f32.mrb[86].mxu0  ;;  %v6645_v37 = vadd.f32 %v6556_v63, %v1585_v48 }
 0x4b7   :  { %v6642_v36 = vadd.f32 %v6559_v38, %v1587_v31  ;;  %v1589_v33 = vpop.f32.mrb[87].mxu0 }
 0x4b8   :  { %v6648_v30 = vadd.f32 %v6556_v63, %v1589_v33 }
 0x4b9   :  { %v1780_v22 = vpack.c.bf16 %v6642_v36, %v6651_v39 }
 0x4ba   :  { %v1781_v50 = vpack.c.bf16 %v6648_v30, %v6645_v37 }
 0x4bc   :  { %v1593_v14 = vpop.f32.mrb[88].mxu0  ;;  %1812 = vmatprep.subr.bf16.mxu1 %v1781_v50 }
 0x4bd   :  { %v1595_v21 = vpop.f32.mrb[89].mxu0  ;;  %1813 = vmatpush1.bf16.msra.mxu1 %v1780_v22  ;;  %v6667_v9 = vadd.f32 %v6559_v38, %v1593_v14 }
 0x4be   :  { %v1597_v60 = vpop.f32.mrb[90].mxu0  ;;  %v6661_v43 = vadd.f32 %v6556_v63, %v1595_v21 }
 0x4bf   :  { %v6658_v41 = vadd.f32 %v6559_v38, %v1597_v60  ;;  %v1599_v61 = vpop.f32.mrb[91].mxu0 }
 0x4c0   :  { %v6664_v7 = vadd.f32 %v6556_v63, %v1599_v61 }
 0x4c1   :  { %v1782_v12 = vpack.c.bf16 %v6658_v41, %v6667_v9 }
 0x4c2   :  { %v1783_v58 = vpack.c.bf16 %v6664_v7, %v6661_v43 }
 0x4c4   :  { %v1603_v10 = vpop.f32.mrb[92].mxu0  ;;  %1814 = vmatprep.subr.bf16.mxu1 %v1783_v58 }
 0x4c5   :  { %v1605_v19 = vpop.f32.mrb[93].mxu0  ;;  %1815 = vmatpush1.bf16.msra.mxu1 %v1782_v12  ;;  %v6683_v23 = vadd.f32 %v6559_v38, %v1603_v10 }
 0x4c6   :  { %v1607_v26 = vpop.f32.mrb[94].mxu0  ;;  %v6677_v32 = vadd.f32 %v6556_v63, %v1605_v19 }
 0x4c7   :  { %v6674_v0 = vadd.f32 %v6559_v38, %v1607_v26  ;;  %v1609_v29 = vpop.f32.mrb[95].mxu0 }
 0x4c8   :  { %v6680_v4 = vadd.f32 %v6556_v63, %v1609_v29 }
 0x4c9   :  { %v1784_v16 = vpack.c.bf16 %v6674_v0, %v6683_v23 }
 0x4ca   :  { %v1785_v52 = vpack.c.bf16 %v6680_v4, %v6677_v32 }
 0x4cc   :  { %v1613_v1 = vpop.f32.mrb[96].mxu0  ;;  %1816 = vmatprep.subr.bf16.mxu1 %v1785_v52 }
 0x4cd   :  { %v1615_v42 = vpop.f32.mrb[97].mxu0  ;;  %1817 = vmatpush1.bf16.msra.mxu1 %v1784_v16  ;;  %v6699_v45 = vadd.f32 %v6559_v38, %v1613_v1 }
 0x4ce   :  { %v1617_v46 = vpop.f32.mrb[98].mxu0  ;;  %v6693_v51 = vadd.f32 %v6556_v63, %v1615_v42 }
 0x4cf   :  { %v6690_v62 = vadd.f32 %v6559_v38, %v1617_v46  ;;  %v1619_v13 = vpop.f32.mrb[99].mxu0 }
 0x4d0   :  { %v6696_v55 = vadd.f32 %v6556_v63, %v1619_v13 }
 0x4d1   :  { %v1786_v44 = vpack.c.bf16 %v6690_v62, %v6699_v45 }
 0x4d2   :  { %v1787_v27 = vpack.c.bf16 %v6696_v55, %v6693_v51 }
 0x4d4   :  { %v1623_v15 = vpop.f32.mrb[100].mxu0  ;;  %1818 = vmatprep.subr.bf16.mxu1 %v1787_v27 }
 0x4d5   :  { %v1625_v48 = vpop.f32.mrb[101].mxu0  ;;  %1819 = vmatpush1.bf16.msra.mxu1 %v1786_v44  ;;  %v6715_v21 = vadd.f32 %v6559_v38, %v1623_v15 }
 0x4d6   :  { %v1627_v31 = vpop.f32.mrb[102].mxu0  ;;  %v6709_v22 = vadd.f32 %v6556_v63, %v1625_v48 }
 0x4d7   :  { %v6706_v33 = vadd.f32 %v6559_v38, %v1627_v31  ;;  %v1629_v50 = vpop.f32.mrb[103].mxu0 }
 0x4d8   :  { %v6712_v14 = vadd.f32 %v6556_v63, %v1629_v50 }
 0x4d9   :  { %v1788_v61 = vpack.c.bf16 %v6706_v33, %v6715_v21 }
 0x4da   :  { %v1789_v60 = vpack.c.bf16 %v6712_v14, %v6709_v22 }
 0x4dc   :  { %v1633_v58 = vpop.f32.mrb[104].mxu0  ;;  %1820 = vmatprep.subr.bf16.mxu1 %v1789_v60 }
 0x4dd   :  { %v1635_v12 = vpop.f32.mrb[105].mxu0  ;;  %1821 = vmatpush1.bf16.msra.mxu1 %v1788_v61  ;;  %v6731_v16 = vadd.f32 %v6559_v38, %v1633_v58 }
 0x4de   :  { %v1637_v10 = vpop.f32.mrb[106].mxu0  ;;  %v6725_v29 = vadd.f32 %v6556_v63, %v1635_v12 }
 0x4df   :  { %v6722_v19 = vadd.f32 %v6559_v38, %v1637_v10  ;;  %v1639_v26 = vpop.f32.mrb[107].mxu0 }
 0x4e0   :  { %v6728_v52 = vadd.f32 %v6556_v63, %v1639_v26 }
 0x4e1   :  { %v1790_v42 = vpack.c.bf16 %v6722_v19, %v6731_v16 }
 0x4e2   :  { %v1791_v1 = vpack.c.bf16 %v6728_v52, %v6725_v29 }
 0x4e4   :  { %v1643_v46 = vpop.f32.mrb[108].mxu0  ;;  %1822 = vmatprep.subr.bf16.mxu1 %v1791_v1 }
 0x4e5   :  { %v1645_v13 = vpop.f32.mrb[109].mxu0  ;;  %1823 = vmatpush1.bf16.msra.mxu1 %v1790_v42  ;;  %v6747_v50 = vadd.f32 %v6559_v38, %v1643_v46 }
 0x4e6   :  { %v1647_v27 = vpop.f32.mrb[110].mxu0  ;;  %v6741_v48 = vadd.f32 %v6556_v63, %v1645_v13 }
 0x4e7   :  { %v6738_v44 = vadd.f32 %v6559_v38, %v1647_v27  ;;  %v1649_v15 = vpop.f32.mrb[111].mxu0 }
 0x4e8   :  { %v6744_v31 = vadd.f32 %v6556_v63, %v1649_v15 }
 0x4e9   :  { %v1792_v61 = vpack.c.bf16 %v6738_v44, %v6747_v50 }
 0x4ea   :  { %v1793_v60 = vpack.c.bf16 %v6744_v31, %v6741_v48 }
 0x4ec   :  { %v1653_v58 = vpop.f32.mrb[112].mxu0  ;;  %1824 = vmatprep.subr.bf16.mxu1 %v1793_v60 }
 0x4ed   :  { %v1655_v12 = vpop.f32.mrb[113].mxu0  ;;  %1825 = vmatpush1.bf16.msra.mxu1 %v1792_v61  ;;  %v6763_v13 = vadd.f32 %v6559_v38, %v1653_v58 }
 0x4ee   :  { %v1657_v10 = vpop.f32.mrb[114].mxu0  ;;  %v6757_v42 = vadd.f32 %v6556_v63, %v1655_v12 }
 0x4ef   :  { %v6754_v26 = vadd.f32 %v6559_v38, %v1657_v10  ;;  %v1659_v1 = vpop.f32.mrb[115].mxu0  ;;  %10353 = vst [vmem:[#allocation23_spill] sm:$0xff] %v6763_v13 }
 0x4f0   :  { %10351 = vst [vmem:[#allocation21_spill] sm:$0xff] %v6757_v42  ;;  %v6760_v46 = vadd.f32 %v6556_v63, %v1659_v1 }
 0x4f1   :  { %10350 = vst [vmem:[#allocation16_spill] sm:$0xff] %v6754_v26  ;;  %v1794_v15 = vpack.c.bf16 %v6754_v26, %v6763_v13 }
 0x4f2   :  { %10352 = vst [vmem:[#allocation22_spill] sm:$0xff] %v6760_v46  ;;  %v1795_v27 = vpack.c.bf16 %v6760_v46, %v6757_v42 }
 0x4f4   :  { %v1663_v60 = vpop.f32.mrb[116].mxu0  ;;  %1826 = vmatprep.subr.bf16.mxu1 %v1795_v27 }
 0x4f5   :  { %v1665_v61 = vpop.f32.mrb[117].mxu0  ;;  %1827 = vmatpush1.bf16.msra.mxu1 %v1794_v15  ;;  %v6779_v46 = vadd.f32 %v6559_v38, %v1663_v60 }
 0x4f6   :  { %v1667_v10 = vpop.f32.mrb[118].mxu0  ;;  %v6773_v1 = vadd.f32 %v6556_v63, %v1665_v61 }
 0x4f7   :  { %v6770_v12 = vadd.f32 %v6559_v38, %v1667_v10  ;;  %v1669_v47 = vpop.f32.mrb[119].mxu0  ;;  %10357 = vst [vmem:[#allocation26_spill] sm:$0xff] %v6779_v46 }
 0x4f8   :  { %10355 = vst [vmem:[#allocation3_spill] sm:$0xff] %v6773_v1  ;;  %v6776_v58 = vadd.f32 %v6556_v63, %v1669_v47 }
 0x4f9   :  { %10354 = vst [vmem:[#allocation20_spill] sm:$0xff] %v6770_v12  ;;  %v1796_v27 = vpack.c.bf16 %v6770_v12, %v6779_v46 }
 0x4fa   :  { %10356 = vst [vmem:[#allocation25_spill] sm:$0xff] %v6776_v58  ;;  %v1797_v26 = vpack.c.bf16 %v6776_v58, %v6773_v1 }
 0x4fc   :  { %v1673_v15 = vpop.f32.mrb[120].mxu0  ;;  %1828 = vmatprep.subr.bf16.mxu1 %v1797_v26 }
 0x4fd   :  { %v1675_v10 = vpop.f32.mrb[121].mxu0  ;;  %1829 = vmatpush1.bf16.msra.mxu1 %v1796_v27  ;;  %v6795_v58 = vadd.f32 %v6559_v38, %v1673_v15 }
 0x4fe   :  { %v1677_v13 = vpop.f32.mrb[122].mxu0  ;;  %v6789_v47 = vadd.f32 %v6556_v63, %v1675_v10 }
 0x4ff   :  { %v6786_v61 = vadd.f32 %v6559_v38, %v1677_v13  ;;  %v1679_v42 = vpop.f32.mrb[123].mxu0  ;;  %10361 = vst [vmem:[#allocation28_spill] sm:$0xff] %v6795_v58 }
 0x500   :  { %10359 = vst [vmem:[#allocation24_spill] sm:$0xff] %v6789_v47  ;;  %v6792_v60 = vadd.f32 %v6556_v63, %v1679_v42 }
 0x501   :  { %10358 = vst [vmem:[#allocation27_spill] sm:$0xff] %v6786_v61  ;;  %v1798_v26 = vpack.c.bf16 %v6786_v61, %v6795_v58 }
 0x502   :  { %10360 = vst [vmem:[#allocation29_spill] sm:$0xff] %v6792_v60  ;;  %v1799_v12 = vpack.c.bf16 %v6792_v60, %v6789_v47 }
 0x504   :  { %v1683_v27 = vpop.f32.mrb[124].mxu0  ;;  %1830 = vmatprep.subr.bf16.mxu1 %v1799_v12 }
 0x505   :  { %v1685_v13 = vpop.f32.mrb[125].mxu0  ;;  %1831 = vmatpush1.bf16.msra.mxu1 %v1798_v26  ;;  %v6811_v60 = vadd.f32 %v6559_v38, %v1683_v27 }
 0x506   :  { %v1687_v46 = vpop.f32.mrb[126].mxu0  ;;  %v6805_v42 = vadd.f32 %v6556_v63, %v1685_v13 }
 0x507   :  { %v6802_v10 = vadd.f32 %v6559_v38, %v1687_v46  ;;  %v1689_v1 = vpop.f32.mrb[127].mxu0  ;;  %v10362_v46 = vmov 1065369472  }
 0x508   :  { %v6808_v15 = vadd.f32 %v6556_v63, %v1689_v1 }
 0x509   :  { %v1800_v12 = vpack.c.bf16 %v6802_v10, %v6811_v60 }
 0x50a   :  { %v1801_v61 = vpack.c.bf16 %v6808_v15, %v6805_v42 }
 0x50c   :  { %1832 = vmatprep.subr.bf16.mxu1 %v1801_v61 }
 0x50d   :  { %1833 = vmatpush1.bf16.msra.mxu1 %v1800_v12 }
 0x510   :  { %1835 = vmatmul.mubr.bf16.vlgmr.msra.gmra.mrb[8].mxu1 %v10362_v46 }
 0x511   :  { %2045 = vmatprep.mubr.bf16.mxu1 %v10362_v46 }
 0x5e3   :  { %v1836_v26 = vpop.f32.mrb[8].mxu1 }
 0x5e4   :  { %v1838_v13 = vpop.f32.mrb[9].mxu1  ;;  %v1843_v47 = vmul.f32 0.00390625, %v1836_v26 }
 0x5e5   :  { %v1840_v58 = vpop.f32.mrb[10].mxu1  ;;  %v1844_v1 = vmul.f32 0.00390625, %v1838_v13 }
 0x5e6   :  { %v1841_v63 = vpop.f32.mrb[11].mxu1  ;;  %v6823_v27 = vrot.slane %v1843_v47, %v10349_v53 }
 0x5e7   :  { %v6820_v38 = vrot.slane %v1844_v1, %v10349_v53 }
 0x5e8   :  { %v6835_v58 = vsub.f32 %v6571_v56, %v6823_v27  ;;  %v6839_v26 = vsub.f32 %v6562_v20, %v6823_v27  ;;  %v6855_v56 = vsub.f32 %v6587_v54, %v6823_v27  ;;  %v6859_v20 = vsub.f32 %v6578_v28, %v6823_v27 }
 0x5e9   :  { %v6827_v61 = vsub.f32 %v6565_v11, %v6820_v38  ;;  %v6831_v12 = vsub.f32 %v6568_v17, %v6820_v38  ;;  %v6843_v47 = vsub.f32 %v6581_v59, %v6820_v38  ;;  %v6847_v11 = vsub.f32 %v6584_v3, %v6820_v38 }
 0x5ea   :  { %10365 = vst [vmem:[#allocation5_spill] sm:$0xff] %v6839_v26  ;;  %v1917_v59 = vmul.f32 %v6835_v58, %v6835_v58  ;;  %v1919_v3 = vmul.f32 %v6839_v26, %v6839_v26  ;;  %v6867_v63 = vsub.f32 %v6597_v18, %v6820_v38  ;;  %v6871_v1 = vsub.f32 %v6600_v24, %v6820_v38 }
 0x5eb   :  { %10363 = vst [vmem:[#allocation4_spill] sm:$0xff] %v6827_v61  ;;  %10364 = vst [vmem:[#allocation30_spill] sm:$0xff] %v6831_v12  ;;  %v1918_v17 = vmul.f32 %v6827_v61, %v6827_v61  ;;  %v1920_v13 = vmul.f32 %v6831_v12, %v6831_v12  ;;  %v1922_v54 = vmul.f32 %v6843_v47, %v6843_v47 }
 0x5ec   :  { %10366 = vst [vmem:[#allocation6_spill] sm:$0xff] %v6843_v47  ;;  %10367 = vst [vmem:[#allocation7_spill] sm:$0xff] %v6847_v11  ;;  %v1924_v28 = vmul.f32 %v6847_v11, %v6847_v11  ;;  %v6879_v12 = vsub.f32 %v6603_v57, %v6823_v27  ;;  %v6883_v61 = vsub.f32 %v6594_v2, %v6823_v27 }
 0x5ed   :  { %v1982_v18 = vpack.c.bf16 %v1920_v13, %v1918_v17  ;;  %v6887_v26 = vsub.f32 %v6613_v25, %v6820_v38  ;;  %v1921_v24 = vmul.f32 %v6855_v56, %v6855_v56  ;;  %v1923_v47 = vmul.f32 %v6859_v20, %v6859_v20 }
 0x5ee   :  { %v1981_v11 = vpack.c.bf16 %v1919_v3, %v1917_v59  ;;  %v6895_v57 = vsub.f32 %v6616_v35, %v6820_v38  ;;  %v1926_v2 = vmul.f32 %v6867_v63, %v6867_v63  ;;  %v1928_v17 = vmul.f32 %v6871_v1, %v6871_v1 }
 0x5ef   :  { %2013 = vmatprep.subr.bf16.mxu1 %v1982_v18  ;;  %v1984_v25 = vpack.c.bf16 %v1924_v28, %v1922_v54  ;;  %v6903_v13 = vsub.f32 %v6619_v49, %v6823_v27  ;;  %v6907_v59 = vsub.f32 %v6610_v8, %v6823_v27  ;;  %v6911_v35 = vsub.f32 %v6629_v34, %v6820_v38 }
 0x5f0   :  { %2014 = vmatpush1.bf16.msra.mxu1 %v1981_v11  ;;  %v1925_v3 = vmul.f32 %v6879_v12, %v6879_v12  ;;  %v1927_v54 = vmul.f32 %v6883_v61, %v6883_v61  ;;  %v1983_v11 = vpack.c.bf16 %v1923_v47, %v1921_v24  ;;  %v6919_v49 = vsub.f32 %v6632_v6, %v6820_v38 }
 0x5f1   :  { %2015 = vmatprep.subr.bf16.mxu1 %v1984_v25  ;;  %v1930_v8 = vmul.f32 %v6887_v26, %v6887_v26  ;;  %v1932_v28 = vmul.f32 %v6895_v57, %v6895_v57  ;;  %v1986_v18 = vpack.c.bf16 %v1928_v17, %v1926_v2  ;;  %v6927_v34 = vsub.f32 %v6635_v5, %v6823_v27 }
 0x5f2   :  { %10368 = vst [vmem:[#allocation8_spill] sm:$0xff] %v6919_v49  ;;  %v6931_v25 = vsub.f32 %v6626_v40, %v6823_v27  ;;  %v6935_v6 = vsub.f32 %v6645_v37, %v6820_v38  ;;  %v1929_v47 = vmul.f32 %v6903_v13, %v6903_v13  ;;  %v1931_v24 = vmul.f32 %v6907_v59, %v6907_v59 }
 0x5f3   :  { %v1985_v2 = vpack.c.bf16 %v1927_v54, %v1925_v3  ;;  %v6943_v5 = vsub.f32 %v6648_v30, %v6820_v38  ;;  %v1934_v40 = vmul.f32 %v6911_v35, %v6911_v35  ;;  %v1936_v17 = vmul.f32 %v6919_v49, %v6919_v49 }
 0x5f4   :  { %2016 = vmatpush1.bf16.msra.mxu1 %v1983_v11  ;;  %10369 = vst [vmem:[#allocation9_spill] sm:$0xff] %v6935_v6  ;;  %v1988_v11 = vpack.c.bf16 %v1932_v28, %v1930_v8  ;;  %v6951_v37 = vsub.f32 %v6651_v39, %v6823_v27  ;;  %v6959_v30 = vsub.f32 %v6661_v43, %v6820_v38 }
 0x5f5   :  { %2017 = vmatprep.subr.bf16.mxu1 %v1986_v18  ;;  %10370 = vst [vmem:[#allocation31_spill] sm:$0xff] %v6943_v5  ;;  %v6955_v18 = vsub.f32 %v6642_v36, %v6823_v27  ;;  %v1933_v3 = vmul.f32 %v6927_v34, %v6927_v34  ;;  %v1935_v54 = vmul.f32 %v6931_v25, %v6931_v25 }
 0x5f6   :  { %10371 = vst [vmem:[#allocation32_spill] sm:$0xff] %v6959_v30  ;;  %v1987_v8 = vpack.c.bf16 %v1931_v24, %v1929_v47  ;;  %v6967_v39 = vsub.f32 %v6664_v7, %v6820_v38  ;;  %v1938_v36 = vmul.f32 %v6935_v6, %v6935_v6  ;;  %v1940_v28 = vmul.f32 %v6943_v5, %v6943_v5  ;;  %v10391_v6 = vld [vmem:[#allocation27_spill] sm:$0xff] }
 0x5f7   :  { %v6975_v43 = vsub.f32 %v6667_v9, %v6823_v27  ;;  %v6983_v7 = vsub.f32 %v6677_v32, %v6820_v38  ;;  %v1937_v47 = vmul.f32 %v6951_v37, %v6951_v37  ;;  %v1939_v24 = vmul.f32 %v6955_v18, %v6955_v18 }
 0x5f8   :  { %2018 = vmatpush1.bf16.msra.mxu1 %v1985_v2  ;;  %10372 = vst [vmem:[#allocation33_spill] sm:$0xff] %v6967_v39  ;;  %v1990_v2 = vpack.c.bf16 %v1936_v17, %v1934_v40  ;;  %v1989_v40 = vpack.c.bf16 %v1935_v54, %v1933_v3  ;;  %v6991_v9 = vsub.f32 %v6680_v4, %v6820_v38 }
 0x5f9   :  { %2019 = vmatprep.subr.bf16.mxu1 %v1988_v11  ;;  %v6979_v11 = vsub.f32 %v6658_v41, %v6823_v27  ;;  %10374 = vst [vmem:[#allocation35_spill] sm:$0xff] %v6983_v7  ;;  %v1942_v41 = vmul.f32 %v6959_v30, %v6959_v30  ;;  %v1944_v17 = vmul.f32 %v6967_v39, %v6967_v39 }
 0x5fa   :  { %10375 = vst [vmem:[#allocation36_spill] sm:$0xff] %v6991_v9  ;;  %v6999_v32 = vsub.f32 %v6683_v23, %v6823_v27  ;;  %v7007_v4 = vsub.f32 %v6693_v51, %v6820_v38  ;;  %v1941_v3 = vmul.f32 %v6975_v43, %v6975_v43  ;;  %v7015_v23 = vsub.f32 %v6696_v55, %v6820_v38 }
 0x5fb   :  { %10373 = vst [vmem:[#allocation34_spill] sm:$0xff] %v6979_v11  ;;  %v1943_v54 = vmul.f32 %v6979_v11, %v6979_v11  ;;  %v7023_v51 = vsub.f32 %v6699_v45, %v6823_v27  ;;  %v7031_v55 = vsub.f32 %v6709_v22, %v6820_v38  ;;  %v7039_v45 = vsub.f32 %v6712_v14, %v6820_v38  ;;  %v10387_v11 = vld [vmem:[#allocation20_spill] sm:$0xff] }
 0x5fc   :  { %2020 = vmatpush1.bf16.msra.mxu1 %v1987_v8  ;;  %v1992_v8 = vpack.c.bf16 %v1940_v28, %v1938_v36  ;;  %10376 = vst [vmem:[#allocation37_spill] sm:$0xff] %v6999_v32  ;;  %10378 = vst [vmem:[#allocation39_spill] sm:$0xff] %v7007_v4  ;;  %v1991_v36 = vpack.c.bf16 %v1939_v24, %v1937_v47  ;;  %v1948_v28 = vmul.f32 %v6991_v9, %v6991_v9 }
 0x5fd   :  { %2021 = vmatprep.subr.bf16.mxu1 %v1990_v2  ;;  %v7003_v2 = vsub.f32 %v6674_v0, %v6823_v27  ;;  %10379 = vst [vmem:[#allocation40_spill] sm:$0xff] %v7015_v23  ;;  %v1946_v0 = vmul.f32 %v6983_v7, %v6983_v7  ;;  %v1945_v47 = vmul.f32 %v6999_v32, %v6999_v32 }
 0x5fe   :  { %v7047_v22 = vsub.f32 %v6715_v21, %v6823_v27  ;;  %v7055_v14 = vsub.f32 %v6725_v29, %v6820_v38  ;;  %v7063_v21 = vsub.f32 %v6728_v52, %v6820_v38  ;;  %v7071_v29 = vsub.f32 %v6731_v16, %v6823_v27 }
 0x5ff   :  { %10377 = vst [vmem:[#allocation38_spill] sm:$0xff] %v7003_v2  ;;  %v1947_v24 = vmul.f32 %v7003_v2, %v7003_v2  ;;  %v7079_v52 = vsub.f32 %v6741_v48, %v6820_v38  ;;  %v7087_v16 = vsub.f32 %v6744_v31, %v6820_v38  ;;  %v7095_v48 = vsub.f32 %v6747_v50, %v6823_v27  ;;  %v10380_v31 = vld [vmem:[#allocation21_spill] sm:$0xff]  ;;  %v10383_v2 = vld [vmem:[#allocation16_spill] sm:$0xff] }
 0x600   :  { %2022 = vmatpush1.bf16.msra.mxu1 %v1989_v40  ;;  %v1994_v40 = vpack.c.bf16 %v1944_v17, %v1942_v41  ;;  %v1993_v41 = vpack.c.bf16 %v1943_v54, %v1941_v3  ;;  %v1952_v17 = vmul.f32 %v7015_v23, %v7015_v23  ;;  %v1949_v3 = vmul.f32 %v7023_v51, %v7023_v51 }
 0x601   :  { %2023 = vmatprep.subr.bf16.mxu1 %v1992_v8  ;;  %v7027_v8 = vsub.f32 %v6690_v62, %v6823_v27  ;;  %v1950_v62 = vmul.f32 %v7007_v4, %v7007_v4  ;;  %v7123_v32 = vsub.f32 %v10383_v2, %v6823_v27  ;;  %v7147_v39 = vsub.f32 %v10387_v11, %v6823_v27 }
 0x602   :  { %v7171_v49 = vsub.f32 %v10391_v6, %v6823_v27 }
 0x603   :  { %v1951_v54 = vmul.f32 %v7027_v8, %v7027_v8 }
 0x604   :  { %2024 = vmatpush1.bf16.msra.mxu1 %v1991_v36  ;;  %v1996_v36 = vpack.c.bf16 %v1948_v28, %v1946_v0  ;;  %v1995_v0 = vpack.c.bf16 %v1947_v24, %v1945_v47  ;;  %v1956_v28 = vmul.f32 %v7039_v45, %v7039_v45  ;;  %v1953_v47 = vmul.f32 %v7047_v22, %v7047_v22 }
 0x605   :  { %2025 = vmatprep.subr.bf16.mxu1 %v1994_v40  ;;  %v7051_v40 = vsub.f32 %v6706_v33, %v6823_v27  ;;  %v1954_v33 = vmul.f32 %v7031_v55, %v7031_v55 }
 0x607   :  { %v1955_v24 = vmul.f32 %v7051_v40, %v7051_v40 }
 0x608   :  { %2026 = vmatpush1.bf16.msra.mxu1 %v1993_v41  ;;  %v1998_v41 = vpack.c.bf16 %v1952_v17, %v1950_v62  ;;  %v1997_v62 = vpack.c.bf16 %v1951_v54, %v1949_v3  ;;  %v1960_v17 = vmul.f32 %v7063_v21, %v7063_v21  ;;  %v7103_v3 = vsub.f32 %v10380_v31, %v6820_v38  ;;  %v10382_v31 = vld [vmem:[#allocation23_spill] sm:$0xff] }
 0x609   :  { %2027 = vmatprep.subr.bf16.mxu1 %v1996_v36  ;;  %v7075_v36 = vsub.f32 %v6722_v19, %v6823_v27  ;;  %v1958_v19 = vmul.f32 %v7055_v14, %v7055_v14  ;;  %v1957_v54 = vmul.f32 %v7071_v29, %v7071_v29  ;;  %v7119_v4 = vsub.f32 %v10382_v31, %v6823_v27 }
 0x60a   :  { %v1966_v2 = vmul.f32 %v7103_v3, %v7103_v3 }
 0x60b   :  { %v2002_v23 = vpack.c.bf16 %v1960_v17, %v1958_v19 }
 0x60c   :  { %2028 = vmatpush1.bf16.msra.mxu1 %v1995_v0  ;;  %v2000_v0 = vpack.c.bf16 %v1956_v28, %v1954_v33  ;;  %v1959_v33 = vmul.f32 %v7075_v36, %v7075_v36  ;;  %v1999_v28 = vpack.c.bf16 %v1955_v24, %v1953_v47  ;;  %v10384_v47 = vld [vmem:[#allocation3_spill] sm:$0xff] }
 0x60d   :  { %2029 = vmatprep.subr.bf16.mxu1 %v1998_v41  ;;  %v7099_v41 = vsub.f32 %v6738_v44, %v6823_v27  ;;  %v1962_v44 = vmul.f32 %v7079_v52, %v7079_v52  ;;  %v7127_v24 = vsub.f32 %v10384_v47, %v6820_v38  ;;  %v10386_v47 = vld [vmem:[#allocation26_spill] sm:$0xff] }
 0x60e   :  { %v2001_v17 = vpack.c.bf16 %v1959_v33, %v1957_v54  ;;  %v7143_v7 = vsub.f32 %v10386_v47, %v6823_v27  ;;  %v10388_v54 = vld [vmem:[#allocation24_spill] sm:$0xff] }
 0x60f   :  { %v1963_v19 = vmul.f32 %v7099_v41, %v7099_v41  ;;  %v7151_v33 = vsub.f32 %v10388_v54, %v6820_v38  ;;  %v1970_v11 = vmul.f32 %v7127_v24, %v7127_v24  ;;  %v10390_v54 = vld [vmem:[#allocation28_spill] sm:$0xff] }
 0x610   :  { %2030 = vmatpush1.bf16.msra.mxu1 %v1997_v62  ;;  %v10381_v62 = vld [vmem:[#allocation22_spill] sm:$0xff]  ;;  %v7167_v5 = vsub.f32 %v10390_v54, %v6823_v27 }
 0x611   :  { %2031 = vmatprep.subr.bf16.mxu1 %v2000_v0  ;;  %v7111_v50 = vsub.f32 %v10381_v62, %v6820_v38  ;;  %v1964_v0 = vmul.f32 %v7087_v16, %v7087_v16  ;;  %v1961_v62 = vmul.f32 %v7095_v48, %v7095_v48  ;;  %v1974_v6 = vmul.f32 %v7151_v33, %v7151_v33 }
 0x613   :  { %v2004_v9 = vpack.c.bf16 %v1964_v0, %v1962_v44  ;;  %v1967_v44 = vmul.f32 %v7123_v32, %v7123_v32  ;;  %v2003_v0 = vpack.c.bf16 %v1963_v19, %v1961_v62  ;;  %v7175_v62 = vsub.f32 %v6805_v42, %v6820_v38 }
 0x614   :  { %2032 = vmatpush1.bf16.msra.mxu1 %v1999_v28  ;;  %v10385_v28 = vld [vmem:[#allocation25_spill] sm:$0xff]  ;;  %v1969_v19 = vmul.f32 %v7143_v7, %v7143_v7  ;;  %v7191_v42 = vsub.f32 %v6811_v60, %v6823_v27 }
 0x615   :  { %2033 = vmatprep.subr.bf16.mxu1 %v2002_v23  ;;  %v7135_v31 = vsub.f32 %v10385_v28, %v6820_v38  ;;  %v1968_v23 = vmul.f32 %v7111_v50, %v7111_v50  ;;  %v1965_v28 = vmul.f32 %v7119_v4, %v7119_v4 }
 0x617   :  { %v2006_v30 = vpack.c.bf16 %v1968_v23, %v1966_v2  ;;  %v1971_v2 = vmul.f32 %v7147_v39, %v7147_v39  ;;  %v2005_v23 = vpack.c.bf16 %v1967_v44, %v1965_v28  ;;  %v7195_v28 = vsub.f32 %v6802_v10, %v6823_v27 }
 0x618   :  { %2034 = vmatpush1.bf16.msra.mxu1 %v2001_v17  ;;  %v10389_v17 = vld [vmem:[#allocation29_spill] sm:$0xff]  ;;  %v1977_v10 = vmul.f32 %v7191_v42, %v7191_v42 }
 0x619   :  { %2035 = vmatprep.subr.bf16.mxu1 %v2004_v9  ;;  %v7159_v47 = vsub.f32 %v10389_v17, %v6820_v38  ;;  %v1972_v9 = vmul.f32 %v7135_v31, %v7135_v31  ;;  %v2007_v44 = vpack.c.bf16 %v1971_v2, %v1969_v19  ;;  %v1979_v27 = vmul.f32 %v7195_v28, %v7195_v28  ;;  %v4816_v2 = vld [vmem:[%s9990_s10 + $0x40] sm:$0xff]  }
 0x61b   :  { %v2008_v17 = vpack.c.bf16 %v1972_v9, %v1970_v11  ;;  %v1978_v11 = vmul.f32 %v7175_v62, %v7175_v62  ;;  %v2011_v19 = vpack.c.bf16 %v1979_v27, %v1977_v10  ;;  %v4827_v10 = vld [vmem:[%s9990_s10 + $0x28] sm:$0xff]   ;;  %v4828_v27 = vld [vmem:[%s9990_s10 + $0x70] sm:$0xff]  }
 0x61c   :  { %2036 = vmatpush1.bf16.msra.mxu1 %v2003_v0  ;;  %v7183_v0 = vsub.f32 %v6808_v15, %v6820_v38  ;;  %v1973_v15 = vmul.f32 %v7167_v5, %v7167_v5  ;;  %v1975_v38 = vmul.f32 %v7171_v49, %v7171_v49 }
 0x61d   :  { %2037 = vmatprep.subr.bf16.mxu1 %v2006_v30  ;;  %v1976_v30 = vmul.f32 %v7159_v47, %v7159_v47 }
 0x61e   :  { %v1980_v9 = vmul.f32 %v7183_v0, %v7183_v0  ;;  %v2009_v54 = vpack.c.bf16 %v1975_v38, %v1973_v15  ;;  %v4821_v15 = vld [vmem:[%s9990_s10 + $0x10] sm:$0xff]   ;;  %v4822_v38 = vld [vmem:[%s9990_s10 + $0x58] sm:$0xff]  }
 0x61f   :  { %v2010_v60 = vpack.c.bf16 %v1976_v30, %v1974_v6  ;;  %v4817_v6 = vld [vmem:[%s9990_s10] sm:$0xff]   ;;  %v4818_v30 = vld [vmem:[%s9990_s10 + $0x48] sm:$0xff]  }
 0x620   :  { %2038 = vmatpush1.bf16.msra.mxu1 %v2005_v23  ;;  %v2012_v23 = vpack.c.bf16 %v1980_v9, %v1978_v11  ;;  %v4824_v11 = vld [vmem:[%s9990_s10 + $0x60] sm:$0xff]  }
 0x621   :  { %2039 = vmatprep.subr.bf16.mxu1 %v2008_v17  ;;  %v4819_v17 = vld [vmem:[%s9990_s10 + $0x8] sm:$0xff]   ;;  %v4825_v9 = vld [vmem:[%s9990_s10 + $0x20] sm:$0xff]  }
 0x624   :  { %2040 = vmatpush1.bf16.msra.mxu1 %v2007_v44  ;;  %v4823_v44 = vld [vmem:[%s9990_s10 + $0x18] sm:$0xff]  }
 0x625   :  { %2041 = vmatprep.subr.bf16.mxu1 %v2010_v60  ;;  %v4826_v60 = vld [vmem:[%s9990_s10 + $0x68] sm:$0xff]  }
 0x628   :  { %2042 = vmatpush1.bf16.msra.mxu1 %v2009_v54  ;;  %v4829_v54 = vld [vmem:[%s9990_s10 + $0x30] sm:$0xff]  }
 0x629   :  { %2043 = vmatprep.subr.bf16.mxu1 %v2012_v23  ;;  %v4830_v23 = vld [vmem:[%s9990_s10 + $0x78] sm:$0xff]  }
 0x62c   :  { %2044 = vmatpush1.bf16.msra.mxu1 %v2011_v19  ;;  %v4831_v19 = vld [vmem:[%s9990_s10 + $0x38] sm:$0xff]  }
 0x62d   :  { %4541 = vmatprep.subr.bf16.mxu1 %v4816_v2 }
 0x62f   :  { %2046 = vmatmul.mubr.bf16.vlgmr.msra.gmra.mrb[12].mxu1 %v10362_v46  ;;  %v4820_v46 = vld [vmem:[%s9990_s10 + $0x50] sm:$0xff]  }
 0x630   :  { %4542 = vmatpush3.bf16.msra.mxu1 %v4817_v6 }
 0x631   :  { %4543 = vmatprep.subr.bf16.mxu1 %v4818_v30 }
 0x634   :  { %4544 = vmatpush3.bf16.msra.mxu1 %v4819_v17 }
 0x635   :  { %4545 = vmatprep.subr.bf16.mxu1 %v4820_v46 }
 0x638   :  { %4546 = vmatpush3.bf16.msra.mxu1 %v4821_v15 }
 0x639   :  { %4547 = vmatprep.subr.bf16.mxu1 %v4822_v38 }
 0x63c   :  { %4548 = vmatpush3.bf16.msra.mxu1 %v4823_v44 }
 0x63d   :  { %4549 = vmatprep.subr.bf16.mxu1 %v4824_v11 }
 0x640   :  { %4550 = vmatpush3.bf16.msra.mxu1 %v4825_v9 }
 0x641   :  { %4551 = vmatprep.subr.bf16.mxu1 %v4826_v60 }
 0x644   :  { %4552 = vmatpush3.bf16.msra.mxu1 %v4827_v10 }
 0x645   :  { %4553 = vmatprep.subr.bf16.mxu1 %v4828_v27  ;;  %v1768_v27 = vld [vmem:[%s9991_s8] sm:$0x3] }
 0x648   :  { %4554 = vmatpush3.bf16.msra.mxu1 %v4829_v54  ;;  %v7265_v54 = vrot.slane %v1768_v27, %v10349_v53 }
 0x649   :  { %4555 = vmatprep.subr.bf16.mxu1 %v4830_v23 }
 0x64a   :  { %10392 = vst [vmem:[#allocation41_spill] sm:$0xff] %v7265_v54 }
 0x64c   :  { %4556 = vmatpush3.bf16.msra.mxu1 %v4831_v19  ;;  %v10393_v19 = vld [vmem:[#allocation5_spill] sm:$0xff] }
 0x702   :  { %v2047_v2 = vpop.f32.mrb[12].mxu1 }
 0x703   :  { %v2054_v6 = vmul.f32 0.00390625, %v2047_v2  ;;  %v2049_v30 = vpop.f32.mrb[13].mxu1 }
 0x704   :  { %v2051_v17 = vpop.f32.mrb[14].mxu1  ;;  %v2055_v44 = vmul.f32 0.00390625, %v2049_v30 }
 0x705   :  { %v2056_v46 = vmax.f32 %v2054_v6, 0.0  ;;  %v2052_v15 = vpop.f32.mrb[15].mxu1 }
 0x706   :  { %v2057_v11 = vmax.f32 %v2055_v44, 0.0 }
 0x707   :  { %v2058_v38 = vadd.f32 1e-05, %v2056_v46 }
 0x708   :  { %v2059_v60 = vadd.f32 1e-05, %v2057_v11 }
 0x709   :  { %4836 = vrsqrt.f32 %v2058_v38 }
 0x70a   :  { %4838 = vrsqrt.f32 %v2059_v60 }
 0x713   :  { %v4837_v9 = vpop.eup %4836 }
 0x714   :  { %v7259_v10 = vrot.slane %v4837_v9, %v10349_v53 }
 0x716   :  { %v2070_v23 = vmul.f32 %v7259_v10, %v6835_v58  ;;  %v2072_v2 = vmul.f32 %v7259_v10, %v10393_v19  ;;  %v2102_v6 = vmul.f32 %v7259_v10, %v7023_v51  ;;  %v2104_v30 = vmul.f32 %v7259_v10, %v7027_v8 }
 0x717   :  { %v2106_v17 = vmul.f32 %v7259_v10, %v7047_v22  ;;  %v2108_v46 = vmul.f32 %v7259_v10, %v7051_v40  ;;  %v2110_v15 = vmul.f32 %v7259_v10, %v7071_v29  ;;  %v2112_v58 = vmul.f32 %v7259_v10, %v7075_v36 }
 0x718   :  { %v2114_v38 = vmul.f32 %v7259_v10, %v7095_v48  ;;  %v2116_v51 = vmul.f32 %v7259_v10, %v7099_v41  ;;  %v2118_v8 = vmul.f32 %v7259_v10, %v7119_v4  ;;  %v2120_v22 = vmul.f32 %v7259_v10, %v7123_v32 }
 0x719   :  { %v2122_v40 = vmul.f32 %v7259_v10, %v7143_v7  ;;  %v2124_v29 = vmul.f32 %v7259_v10, %v7147_v39  ;;  %v2126_v36 = vmul.f32 %v7259_v10, %v7167_v5  ;;  %v2128_v48 = vmul.f32 %v7259_v10, %v7171_v49  ;;  %v1769_v49 = vld [vmem:[%s9992_s9] sm:$0x3] }
 0x71a   :  { %v2130_v41 = vmul.f32 %v7259_v10, %v7191_v42  ;;  %v2132_v4 = vmul.f32 %v7259_v10, %v7195_v28  ;;  %v7304_v32 = vmul.f32 %v7265_v54, %v2102_v6  ;;  %v7307_v7 = vmul.f32 %v7265_v54, %v2104_v30 }
 0x71b   :  { %v7310_v39 = vmul.f32 %v7265_v54, %v2106_v17  ;;  %v7313_v5 = vmul.f32 %v7265_v54, %v2108_v46  ;;  %v7319_v42 = vmul.f32 %v7265_v54, %v2110_v15  ;;  %v7322_v28 = vmul.f32 %v7265_v54, %v2112_v58  ;;  %v4839_v58 = vpop.eup %4838 }
 0x71c   :  { %v7325_v44 = vmul.f32 %v7265_v54, %v2114_v38  ;;  %v7328_v11 = vmul.f32 %v7265_v54, %v2116_v51  ;;  %v7331_v9 = vmul.f32 %v7265_v54, %v2118_v8  ;;  %v7334_v60 = vmul.f32 %v7265_v54, %v2120_v22 }
 0x71d   :  { %v7337_v19 = vmul.f32 %v7265_v54, %v2122_v40  ;;  %v7340_v6 = vmul.f32 %v7265_v54, %v2124_v29  ;;  %v7343_v30 = vmul.f32 %v7265_v54, %v2126_v36  ;;  %v7346_v17 = vmul.f32 %v7265_v54, %v2128_v48  ;;  %v10398_v36 = vld [vmem:[#allocation10_spill] sm:$0xff] }
 0x71e   :  { %v7349_v46 = vmul.f32 %v7265_v54, %v2130_v41  ;;  %v7352_v15 = vmul.f32 %v7265_v54, %v2132_v4  ;;  %v7355_v38 = vrot.slane %v1769_v49, %v10349_v53  ;;  %v2145_v51 = vmul.f32 %v7265_v54, %v2070_v23 }
 0x71f   :  { %10394 = vst [vmem:[#allocation42_spill] sm:$0xff] %v7343_v30  ;;  %10395 = vst [vmem:[#allocation43_spill] sm:$0xff] %v7346_v17  ;;  %v2074_v8 = vmul.f32 %v7259_v10, %v6855_v56  ;;  %v2076_v22 = vmul.f32 %v7259_v10, %v6859_v20  ;;  %v2078_v40 = vmul.f32 %v7259_v10, %v6879_v12 }
 0x720   :  { %10396 = vst [vmem:[#allocation14_spill] sm:$0xff] %v7349_v46  ;;  %10397 = vst [vmem:[#allocation15_spill] sm:$0xff] %v7352_v15  ;;  %v2080_v29 = vmul.f32 %v7259_v10, %v6883_v61  ;;  %v7367_v48 = vrot.slane %v1768_v27, %v10398_v36  ;;  %v2147_v41 = vmul.f32 %v7265_v54, %v2072_v2 }
 0x721   :  { %v7371_v4 = vrot.slane %v4839_v58, %v10349_v53  ;;  %v7374_v23 = vrot.slane %v1769_v49, %v10398_v36  ;;  %v7378_v56 = vmul.f32 %v7259_v10, %v6903_v13  ;;  %v7382_v12 = vmul.f32 %v7259_v10, %v6907_v59  ;;  %v10401_v36 = vld [vmem:[#allocation30_spill] sm:$0xff] }
 0x722   :  { %v7386_v61 = vmul.f32 %v7259_v10, %v6927_v34  ;;  %v7389_v20 = vadd.f32 %v7355_v38, %v2145_v51  ;;  %v7393_v27 = vmul.f32 %v7259_v10, %v6931_v25  ;;  %v7397_v2 = vmul.f32 %v7259_v10, %v6951_v37  ;;  %v10400_v51 = vld [vmem:[#allocation4_spill] sm:$0xff]  ;;  %v10402_v53 = vld [vmem:[#allocation6_spill] sm:$0xff] }
 0x723   :  { %v7401_v13 = vmul.f32 %v7259_v10, %v6955_v18  ;;  %v7405_v59 = vmul.f32 %v7259_v10, %v6975_v43  ;;  %v2149_v34 = vmul.f32 %v7265_v54, %v2074_v8  ;;  %v2151_v49 = vmul.f32 %v7265_v54, %v2076_v22 }
 0x724   :  { %v7410_v58 = vmul.f32 %v7265_v54, %v2078_v40  ;;  %v7413_v25 = vmul.f32 %v7265_v54, %v2080_v29  ;;  %v7416_v37 = vadd.f32 %v7355_v38, %v2147_v41  ;;  %v2071_v18 = vmul.f32 %v7371_v4, %v10400_v51 }
 0x725   :  { %10399 = vst [vmem:[#allocation18_spill] sm:$0xff] %v7405_v59  ;;  %v2073_v43 = vmul.f32 %v7371_v4, %v10401_v36  ;;  %v2075_v8 = vmul.f32 %v7371_v4, %v10402_v53  ;;  %v2284_v22 = vmax.f32 %v7389_v20, 0.0  ;;  %v10403_v59 = vld [vmem:[#allocation7_spill] sm:$0xff]  ;;  %v2079_v29 = vmul.f32 %v7371_v4, %v6867_v63 }
 0x726   :  { %v2077_v40 = vmul.f32 %v7371_v4, %v10403_v59  ;;  %v2081_v41 = vmul.f32 %v7371_v4, %v6871_v1  ;;  %v2107_v51 = vmul.f32 %v7371_v4, %v7031_v55  ;;  %v2109_v36 = vmul.f32 %v7371_v4, %v7039_v45 }
 0x727   :  { %v2111_v53 = vmul.f32 %v7371_v4, %v7055_v14  ;;  %v2113_v20 = vmul.f32 %v7371_v4, %v7063_v21  ;;  %v2115_v59 = vmul.f32 %v7371_v4, %v7079_v52  ;;  %v2117_v63 = vmul.f32 %v7371_v4, %v7087_v16 }
 0x728   :  { %v2119_v1 = vmul.f32 %v7371_v4, %v7103_v3  ;;  %v2121_v55 = vmul.f32 %v7371_v4, %v7111_v50  ;;  %v2123_v45 = vmul.f32 %v7371_v4, %v7127_v24  ;;  %v2125_v14 = vmul.f32 %v7371_v4, %v7135_v31 }
 0x729   :  { %v2127_v21 = vmul.f32 %v7371_v4, %v7151_v33  ;;  %v2129_v52 = vmul.f32 %v7371_v4, %v7159_v47  ;;  %v2131_v16 = vmul.f32 %v7371_v4, %v7175_v62  ;;  %v2133_v3 = vmul.f32 %v7371_v4, %v7183_v0 }
 0x72a   :  { %v2146_v50 = vmul.f32 %v7367_v48, %v2071_v18  ;;  %v2148_v15 = vmul.f32 %v7367_v48, %v2073_v43  ;;  %v2150_v24 = vmul.f32 %v7367_v48, %v2075_v8  ;;  %v2152_v31 = vmul.f32 %v7367_v48, %v2077_v40 }
 0x72b   :  { %v7464_v46 = vmul.f32 %v7367_v48, %v2107_v51  ;;  %v7467_v33 = vmul.f32 %v7367_v48, %v2109_v36  ;;  %v7470_v47 = vmul.f32 %v7367_v48, %v2111_v53  ;;  %v7473_v62 = vmul.f32 %v7367_v48, %v2113_v20 }
 0x72c   :  { %v7476_v0 = vmul.f32 %v7367_v48, %v2115_v59  ;;  %v7479_v18 = vmul.f32 %v7367_v48, %v2117_v63  ;;  %v7482_v43 = vmul.f32 %v7367_v48, %v2119_v1  ;;  %v7485_v8 = vmul.f32 %v7367_v48, %v2121_v55 }
 0x72d   :  { %v7488_v40 = vmul.f32 %v7367_v48, %v2123_v45  ;;  %v7491_v51 = vmul.f32 %v7367_v48, %v2125_v14  ;;  %v7494_v36 = vmul.f32 %v7367_v48, %v2127_v21  ;;  %v7497_v53 = vmul.f32 %v7367_v48, %v2129_v52 }
 0x72e   :  { %v7500_v20 = vmul.f32 %v7367_v48, %v2131_v16  ;;  %v7503_v59 = vmul.f32 %v7367_v48, %v2133_v3  ;;  %v2286_v63 = vmax.f32 %v7416_v37, 0.0  ;;  %v2221_v1 = vadd.f32 %v7374_v23, %v2146_v50 }
 0x72f   :  { %v2223_v55 = vadd.f32 %v7374_v23, %v2148_v15  ;;  %v2225_v45 = vadd.f32 %v7374_v23, %v2150_v24  ;;  %v2083_v14 = vmul.f32 %v7371_v4, %v6887_v26  ;;  %v2085_v21 = vmul.f32 %v7371_v4, %v6895_v57  ;;  %v10406_v24 = vld [vmem:[#allocation8_spill] sm:$0xff] }
 0x730   :  { %10404 = vst [vmem:[#allocation19_spill] sm:$0xff] %v7500_v20  ;;  %10405 = vst [vmem:[#allocation12_spill] sm:$0xff] %v7503_v59  ;;  %v2154_v52 = vmul.f32 %v7367_v48, %v2079_v29  ;;  %v2227_v16 = vadd.f32 %v7374_v23, %v2152_v31  ;;  %v2156_v3 = vmul.f32 %v7367_v48, %v2081_v41  ;;  %v2285_v59 = vmax.f32 %v2221_v1, 0.0 }
 0x731   :  { %v2287_v37 = vmax.f32 %v2223_v55, 0.0  ;;  %v2289_v20 = vmax.f32 %v2225_v45, 0.0  ;;  %v2157_v15 = vmul.f32 %v7265_v54, %v7378_v56  ;;  %v2087_v50 = vmul.f32 %v7371_v4, %v6911_v35 }
 0x732   :  { %v2089_v26 = vmul.f32 %v7371_v4, %v10406_v24  ;;  %v2291_v17 = vmax.f32 %v2227_v16, 0.0  ;;  %v2159_v57 = vmul.f32 %v7265_v54, %v7382_v12  ;;  %v2224_v31 = vadd.f32 %v7355_v38, %v2149_v34 }
 0x733   :  { %v2349_v29 = vpack.c.bf16 %v2287_v37, %v2285_v59  ;;  %v2226_v41 = vadd.f32 %v7355_v38, %v2151_v49  ;;  %v2161_v1 = vmul.f32 %v7265_v54, %v7386_v61  ;;  %v2158_v56 = vmul.f32 %v7367_v48, %v2083_v14  ;;  %v10407_v49 = vld [vmem:[#allocation9_spill] sm:$0xff] }
 0x734   :  { %v2160_v55 = vmul.f32 %v7367_v48, %v2085_v21  ;;  %v2348_v35 = vpack.c.bf16 %v2286_v63, %v2284_v22  ;;  %v2163_v45 = vmul.f32 %v7265_v54, %v7393_v27  ;;  %v2351_v16 = vpack.c.bf16 %v2291_v17, %v2289_v20  ;;  %v10408_v22 = vld [vmem:[#allocation31_spill] sm:$0xff] }
 0x735   :  { %2547 = vmatprep.mubr.bf16.mxu1 %v2349_v29  ;;  %v2229_v12 = vadd.f32 %v7374_v23, %v2154_v52  ;;  %v2231_v59 = vadd.f32 %v7374_v23, %v2156_v3  ;;  %v2165_v34 = vmul.f32 %v7265_v54, %v7397_v2  ;;  %v2091_v61 = vmul.f32 %v7371_v4, %v10407_v49 }
 0x736   :  { %v2162_v14 = vmul.f32 %v7367_v48, %v2087_v50  ;;  %v2164_v21 = vmul.f32 %v7367_v48, %v2089_v26  ;;  %2548 = vmatmul.mubr.bf16.vlgmr.msra.gmra.mrb[16].mxu1 %v2348_v35  ;;  %v2093_v27 = vmul.f32 %v7371_v4, %v10408_v22  ;;  %v2288_v17 = vmax.f32 %v2224_v31, 0.0  ;;  %v10409_v31 = vld [vmem:[#allocation32_spill] sm:$0xff] }
 0x737   :  { %2555 = vmatprep.mubr.bf16.mxu1 %v2351_v16  ;;  %v2290_v20 = vmax.f32 %v2226_v41, 0.0  ;;  %v2228_v63 = vadd.f32 %v7355_v38, %v7410_v58  ;;  %v2167_v2 = vmul.f32 %v7265_v54, %v7401_v13  ;;  %v2230_v52 = vadd.f32 %v7355_v38, %v7413_v25  ;;  %v10410_v25 = vld [vmem:[#allocation33_spill] sm:$0xff] }
 0x738   :  { %v2233_v3 = vadd.f32 %v7374_v23, %v2158_v56  ;;  %v2235_v37 = vadd.f32 %v7374_v23, %v2160_v55  ;;  %v2293_v50 = vmax.f32 %v2229_v12, 0.0  ;;  %v2295_v24 = vmax.f32 %v2231_v59, 0.0 }
 0x739   :  { %v2232_v26 = vadd.f32 %v7355_v38, %v2157_v15  ;;  %v2234_v29 = vadd.f32 %v7355_v38, %v2159_v57  ;;  %v2095_v41 = vmul.f32 %v7371_v4, %v10409_v31  ;;  %v2166_v58 = vmul.f32 %v7367_v48, %v2091_v61 }
 0x73a   :  { %v2237_v13 = vadd.f32 %v7374_v23, %v2162_v14  ;;  %v2239_v35 = vadd.f32 %v7374_v23, %v2164_v21  ;;  %v2097_v56 = vmul.f32 %v7371_v4, %v10410_v25  ;;  %v2168_v55 = vmul.f32 %v7367_v48, %v2093_v27  ;;  %v10411_v14 = vld [vmem:[#allocation34_spill] sm:$0xff] }
 0x73b   :  { %v2350_v16 = vpack.c.bf16 %v2290_v20, %v2288_v17  ;;  %v2292_v12 = vmax.f32 %v2228_v63, 0.0  ;;  %v2294_v59 = vmax.f32 %v2230_v52, 0.0  ;;  %v2297_v15 = vmax.f32 %v2233_v3, 0.0  ;;  %v10412_v17 = vld [vmem:[#allocation35_spill] sm:$0xff] }
 0x73c   :  { %v2299_v49 = vmax.f32 %v2235_v37, 0.0  ;;  %v2236_v57 = vadd.f32 %v7355_v38, %v2161_v1  ;;  %v2353_v22 = vpack.c.bf16 %v2295_v24, %v2293_v50  ;;  %v2296_v31 = vmax.f32 %v2232_v26, 0.0  ;;  %v10413_v1 = vld [vmem:[#allocation36_spill] sm:$0xff] }
 0x73d   :  { %v2298_v54 = vmax.f32 %v2234_v29, 0.0  ;;  %v2238_v61 = vadd.f32 %v7355_v38, %v2163_v45  ;;  %v7564_v21 = vmul.f32 %v7259_v10, %v10411_v14  ;;  %v2301_v25 = vmax.f32 %v2237_v13, 0.0 }
 0x73e   :  { %2556 = vmatmul.mubr.bf16.gmra.mrb[20].mxu1 %v2350_v16  ;;  %v2303_v30 = vmax.f32 %v2239_v35, 0.0  ;;  %v7567_v27 = vadd.f32 %v7374_v23, %v2166_v58  ;;  %v7571_v20 = vmul.f32 %v7371_v4, %v10412_v17  ;;  %v7575_v63 = vmul.f32 %v7371_v4, %v10413_v1 }
 0x73f   :  { %v2170_v45 = vmul.f32 %v7367_v48, %v2095_v41  ;;  %2563 = vmatprep.mubr.bf16.mxu1 %v2353_v22  ;;  %v7579_v52 = vadd.f32 %v7374_v23, %v2168_v55  ;;  %v7582_v3 = vmul.f32 %v7367_v48, %v2097_v56  ;;  %v2352_v37 = vpack.c.bf16 %v2294_v59, %v2292_v12 }
 0x740   :  { %v2355_v50 = vpack.c.bf16 %v2299_v49, %v2297_v15  ;;  %v2300_v24 = vmax.f32 %v2236_v57, 0.0  ;;  %v2354_v26 = vpack.c.bf16 %v2298_v54, %v2296_v31  ;;  %v2302_v29 = vmax.f32 %v2238_v61, 0.0 }
 0x741   :  { %v7585_v58 = vadd.f32 %v7355_v38, %v2165_v34  ;;  %v7588_v13 = vadd.f32 %v7355_v38, %v2167_v2  ;;  %v2357_v35 = vpack.c.bf16 %v2303_v30, %v2301_v25  ;;  %v2305_v41 = vmax.f32 %v7567_v27, 0.0 }
 0x742   :  { %v2252_v55 = vadd.f32 %v7355_v38, %v7304_v32  ;;  %v2254_v56 = vadd.f32 %v7355_v38, %v7307_v7  ;;  %v2307_v16 = vmax.f32 %v7579_v52, 0.0  ;;  %v7597_v54 = vadd.f32 %v7374_v23, %v2170_v45 }
 0x743   :  { %v2257_v34 = vadd.f32 %v7374_v23, %v7464_v46  ;;  %v2259_v2 = vadd.f32 %v7374_v23, %v7467_v33  ;;  %v2256_v59 = vadd.f32 %v7355_v38, %v7310_v39  ;;  %v2258_v32 = vadd.f32 %v7355_v38, %v7313_v5 }
 0x744   :  { %v2316_v30 = vmax.f32 %v2252_v55, 0.0  ;;  %v2318_v12 = vmax.f32 %v2254_v56, 0.0  ;;  %v7607_v7 = vpack.c.bf16 %v2302_v29, %v2300_v24  ;;  %v2261_v57 = vadd.f32 %v7374_v23, %v7470_v47 }
 0x745   :  { %v2321_v15 = vmax.f32 %v2257_v34, 0.0  ;;  %v2323_v49 = vmax.f32 %v2259_v2, 0.0  ;;  %v2320_v22 = vmax.f32 %v2256_v59, 0.0  ;;  %v2322_v33 = vmax.f32 %v2258_v32, 0.0 }
 0x746   :  { %2564 = vmatmul.mubr.bf16.gmra.mrb[24].mxu1 %v2352_v37  ;;  %v7611_v46 = vpack.c.bf16 %v2318_v12, %v2316_v30  ;;  %v2263_v31 = vadd.f32 %v7374_v23, %v7473_v62  ;;  %v2325_v61 = vmax.f32 %v2261_v57, 0.0  ;;  %v2260_v5 = vadd.f32 %v7355_v38, %v7319_v42 }
 0x747   :  { %2571 = vmatprep.mubr.bf16.mxu1 %v2355_v50  ;;  %v7615_v39 = vpack.c.bf16 %v2323_v49, %v2321_v15  ;;  %v2262_v14 = vadd.f32 %v7355_v38, %v7322_v28  ;;  %v7621_v25 = vpack.c.bf16 %v2322_v33, %v2320_v22  ;;  %v2265_v17 = vadd.f32 %v7374_v23, %v7476_v0 }
 0x748   :  { %v2327_v47 = vmax.f32 %v2263_v31, 0.0  ;;  %v2267_v1 = vadd.f32 %v7374_v23, %v7479_v18  ;;  %v2324_v62 = vmax.f32 %v2260_v5, 0.0  ;;  %v2264_v37 = vadd.f32 %v7355_v38, %v7325_v44 }
 0x749   :  { %v2326_v45 = vmax.f32 %v2262_v14, 0.0  ;;  %v2266_v42 = vadd.f32 %v7355_v38, %v7328_v11  ;;  %v2329_v28 = vmax.f32 %v2265_v17, 0.0  ;;  %v2269_v29 = vadd.f32 %v7374_v23, %v7482_v43 }
 0x74a   :  { %v7631_v50 = vpack.c.bf16 %v2327_v47, %v2325_v61  ;;  %v2331_v24 = vmax.f32 %v2267_v1, 0.0  ;;  %v2328_v0 = vmax.f32 %v2264_v37, 0.0  ;;  %v2271_v18 = vadd.f32 %v7374_v23, %v7485_v8  ;;  %v10414_v61 = vld [vmem:[#allocation42_spill] sm:$0xff]  ;;  %v10417_v1 = vld [vmem:[#allocation12_spill] sm:$0xff] }
 0x74b   :  { %v7635_v55 = vpack.c.bf16 %v2326_v45, %v2324_v62  ;;  %v2330_v56 = vmax.f32 %v2266_v42, 0.0  ;;  %v2333_v44 = vmax.f32 %v2269_v29, 0.0  ;;  %v2268_v11 = vadd.f32 %v7355_v38, %v7331_v9  ;;  %v10418_v37 = vld [vmem:[#allocation14_spill] sm:$0xff] }
 0x74c   :  { %v7639_v34 = vpack.c.bf16 %v2331_v24, %v2329_v28  ;;  %v2270_v2 = vadd.f32 %v7355_v38, %v7334_v60  ;;  %v2335_v12 = vmax.f32 %v2271_v18, 0.0  ;;  %v2273_v43 = vadd.f32 %v7374_v23, %v7488_v40  ;;  %v10419_v28 = vld [vmem:[#allocation15_spill] sm:$0xff] }
 0x74d   :  { %v7645_v30 = vpack.c.bf16 %v2330_v56, %v2328_v0  ;;  %v2275_v59 = vadd.f32 %v7374_v23, %v7491_v51  ;;  %v2332_v8 = vmax.f32 %v2268_v11, 0.0  ;;  %v2272_v15 = vadd.f32 %v7355_v38, %v7337_v19 }
 0x74e   :  { %2572 = vmatmul.mubr.bf16.gmra.mrb[28].mxu1 %v2354_v26  ;;  %v2334_v32 = vmax.f32 %v2270_v2, 0.0  ;;  %v2274_v9 = vadd.f32 %v7355_v38, %v7340_v6  ;;  %v7655_v60 = vpack.c.bf16 %v2335_v12, %v2333_v44  ;;  %v2337_v49 = vmax.f32 %v2273_v43, 0.0 }
 0x74f   :  { %2579 = vmatprep.mubr.bf16.mxu1 %v2357_v35  ;;  %v2339_v57 = vmax.f32 %v2275_v59, 0.0  ;;  %v2277_v40 = vadd.f32 %v7374_v23, %v7494_v36  ;;  %v2336_v51 = vmax.f32 %v2272_v15, 0.0  ;;  %v2279_v33 = vadd.f32 %v7374_v23, %v7497_v53  ;;  %v10415_v35 = vld [vmem:[#allocation43_spill] sm:$0xff] }
 0x750   :  { %v7659_v22 = vpack.c.bf16 %v2334_v32, %v2332_v8  ;;  %v2338_v26 = vmax.f32 %v2274_v9, 0.0  ;;  %v2276_v6 = vadd.f32 %v7355_v38, %v10414_v61  ;;  %v2278_v5 = vadd.f32 %v7355_v38, %v10415_v35  ;;  %v10416_v36 = vld [vmem:[#allocation19_spill] sm:$0xff]  ;;  %v10420_v8 = vld [vmem:[#allocation18_spill] sm:$0xff]  ;;  %v10421_v32 = vld [vmem:[#allocation41_spill] sm:$0xff] }
 0x751   :  { %v7663_v31 = vpack.c.bf16 %v2339_v57, %v2337_v49  ;;  %v2341_v19 = vmax.f32 %v2277_v40, 0.0  ;;  %v2343_v47 = vmax.f32 %v2279_v33, 0.0  ;;  %v2281_v17 = vadd.f32 %v7374_v23, %v10416_v36  ;;  %v10422_v49 = vld [vmem:[#allocation37_spill] sm:$0xff]  ;;  %v10423_v40 = vld [vmem:[#allocation38_spill] sm:$0xff]  ;;  %v10425_v33 = vld [vmem:[#allocation40_spill] sm:$0xff] }
 0x752   :  { %v7669_v14 = vpack.c.bf16 %v2338_v26, %v2336_v51  ;;  %v2283_v62 = vadd.f32 %v7374_v23, %v10417_v1  ;;  %v2340_v45 = vmax.f32 %v2276_v6, 0.0  ;;  %v2342_v53 = vmax.f32 %v2278_v5, 0.0 }
 0x753   :  { %v2280_v42 = vadd.f32 %v7355_v38, %v10418_v37  ;;  %v2282_v24 = vadd.f32 %v7355_v38, %v10419_v28  ;;  %v2247_v29 = vadd.f32 %v7374_v23, %v7582_v3  ;;  %v7681_v0 = vpack.c.bf16 %v2343_v47, %v2341_v19 }
 0x754   :  { %v2345_v56 = vmax.f32 %v2281_v17, 0.0  ;;  %v2347_v18 = vmax.f32 %v2283_v62, 0.0  ;;  %v2359_v44 = vpack.c.bf16 %v2307_v16, %v2305_v41  ;;  %v2376_v11 = vpack.c.bf16 %v2342_v53, %v2340_v45 }
 0x755   :  { %v2344_v2 = vmax.f32 %v2280_v42, 0.0  ;;  %v2346_v12 = vmax.f32 %v2282_v24, 0.0  ;;  %v2169_v3 = vmul.f32 %v10421_v32, %v10420_v8  ;;  %v2171_v15 = vmul.f32 %v10421_v32, %v7564_v21  ;;  %v10424_v21 = vld [vmem:[#allocation39_spill] sm:$0xff] }
 0x756   :  { %2580 = vmatmul.mubr.bf16.gmra.mrb[32].mxu1 %v7607_v7  ;;  %v2379_v43 = vpack.c.bf16 %v2347_v18, %v2345_v56  ;;  %v2304_v9 = vmax.f32 %v7585_v58, 0.0  ;;  %v2306_v27 = vmax.f32 %v7588_v13, 0.0  ;;  %v2174_v52 = vmul.f32 %v7367_v48, %v7571_v20  ;;  %v2713_v8 = vld [vmem:[%s9995_s12 + $0x8] sm:$0xff] }
 0x757   :  { %2587 = vmatprep.mubr.bf16.mxu1 %v2359_v44  ;;  %v2378_v59 = vpack.c.bf16 %v2346_v12, %v2344_v2  ;;  %v2176_v41 = vmul.f32 %v7367_v48, %v7575_v63  ;;  %v2309_v16 = vmax.f32 %v7597_v54, 0.0  ;;  %v2311_v7 = vmax.f32 %v2247_v29, 0.0  ;;  %v2712_v2 = vld [vmem:[%s9995_s12] sm:$0xff] }
 0x758   :  { %v2098_v57 = vmul.f32 %v7259_v10, %v10422_v49  ;;  %v2100_v51 = vmul.f32 %v7259_v10, %v10423_v40  ;;  %v2103_v58 = vmul.f32 %v7371_v4, %v10424_v21  ;;  %v2358_v26 = vpack.c.bf16 %v2306_v27, %v2304_v9 }
 0x759   :  { %v2244_v13 = vadd.f32 %v7355_v38, %v2169_v3  ;;  %v2246_v20 = vadd.f32 %v7355_v38, %v2171_v15  ;;  %v2105_v63 = vmul.f32 %v7371_v4, %v10425_v33  ;;  %v2361_v19 = vpack.c.bf16 %v2311_v7, %v2309_v16 }
 0x75a   :  { %v2249_v54 = vadd.f32 %v7374_v23, %v2174_v52  ;;  %v2251_v61 = vadd.f32 %v7374_v23, %v2176_v41  ;;  %v2173_v10 = vmul.f32 %v10421_v32, %v2098_v57  ;;  %v2175_v6 = vmul.f32 %v10421_v32, %v2100_v51 }
 0x75b   :  { %v2308_v35 = vmax.f32 %v2244_v13, 0.0  ;;  %v2310_v5 = vmax.f32 %v2246_v20, 0.0  ;;  %v2178_v47 = vmul.f32 %v7367_v48, %v2103_v58  ;;  %v2180_v36 = vmul.f32 %v7367_v48, %v2105_v63 }
 0x75c   :  { %v2313_v17 = vmax.f32 %v2249_v54, 0.0  ;;  %v2315_v1 = vmax.f32 %v2251_v61, 0.0  ;;  %v2248_v62 = vadd.f32 %v7355_v38, %v2173_v10  ;;  %v2250_v45 = vadd.f32 %v7355_v38, %v2175_v6  ;;  %v2711_v38 = vld [vmem:[%s9993_s14 + $0x3] sm:$0x1]  ;;  %v8851_v54 = vld [vmem:[%s9997_s15] ss:$0 sm:$0xff] }
 0x75d   :  { %v2360_v4 = vpack.c.bf16 %v2310_v5, %v2308_v35  ;;  %v2253_v37 = vadd.f32 %v7374_v23, %v2178_v47  ;;  %v2255_v42 = vadd.f32 %v7374_v23, %v2180_v36  ;;  %v2708_v23 = vld [vmem:[%s9993_s14] sm:$0x1]  ;;  %vm3861_vm0 = vcmp.gt.f32.partialorder %v2711_v38, 0.5 }
 0x75e   :  { %2588 = vmatmul.mubr.bf16.gmra.mrb[36].mxu1 %v2358_v26  ;;  %v2363_v53 = vpack.c.bf16 %v2315_v1, %v2313_v17  ;;  %v2312_v28 = vmax.f32 %v2248_v62, 0.0  ;;  %v2314_v24 = vmax.f32 %v2250_v45, 0.0  ;;  %vm2778_vm1 = vcmp.gt.f32.partialorder %v2708_v23, 0.5 }
 0x75f   :  { %2595 = vmatprep.mubr.bf16.mxu1 %v2361_v19  ;;  %v2317_v29 = vmax.f32 %v2253_v37, 0.0  ;;  %v2319_v56 = vmax.f32 %v2255_v42, 0.0  ;;  %v2714_v19 = vld [vmem:[%s9995_s12 + $0x10] sm:$0xff]  ;;  %v2715_v37 = vld [vmem:[%s9995_s12 + $0x18] sm:$0xff] }
 0x760   :  { %v2362_v18 = vpack.c.bf16 %v2314_v24, %v2312_v28 }
 0x761   :  { %v2365_v48 = vpack.c.bf16 %v2319_v56, %v2317_v29 }
 0x766   :  { %2596 = vmatmul.mubr.bf16.gmra.mrb[40].mxu1 %v2360_v4 }
 0x767   :  { %2603 = vmatprep.mubr.bf16.mxu1 %v2363_v53 }
 0x76e   :  { %2604 = vmatmul.mubr.bf16.gmra.mrb[44].mxu1 %v2362_v18 }
 0x76f   :  { %2611 = vmatprep.mubr.bf16.mxu1 %v2365_v48 }
 0x776   :  { %2612 = vmatmul.mubr.bf16.gmra.mrb[48].mxu1 %v7611_v46  ;;  %v2709_v46 = vld [vmem:[%s9993_s14 + $0x1] sm:$0x1] }
 0x777   :  { %2619 = vmatprep.mubr.bf16.mxu1 %v7615_v39  ;;  %v10426_v39 = vmov 0   ;;  %vm3143_vm2 = vcmp.gt.f32.partialorder %v2709_v46, 0.5 }
 0x77e   :  { %2620 = vmatmul.mubr.bf16.gmra.mrb[52].mxu1 %v7621_v25  ;;  %v3862_v25 = vsel %vm3861_vm0, 1, %v10426_v39 }
 0x77f   :  { %2627 = vmatprep.mubr.bf16.mxu1 %v7631_v50  ;;  %v2779_v50 = vsel %vm2778_vm1, 1, %v10426_v39 }
 0x786   :  { %2628 = vmatmul.mubr.bf16.gmra.mrb[56].mxu1 %v7635_v55 }
 0x787   :  { %2635 = vmatprep.mubr.bf16.mxu1 %v7639_v34  ;;  %v2710_v34 = vld [vmem:[%s9993_s14 + $0x2] sm:$0x1] }
 0x788   :  { %vm3502_vm3 = vcmp.gt.f32.partialorder %v2710_v34, 0.5 }
 0x789   :  { %v3503_v52 = vsel %vm3502_vm3, 1, %v10426_v39 }
 0x78e   :  { %2636 = vmatmul.mubr.bf16.gmra.mrb[60].mxu1 %v7645_v30  ;;  %v7748_v30 = vld [vmem:[%s9994_s11] ss:$0 sm:$0xff] }
 0x78f   :  { %2643 = vmatprep.mubr.bf16.mxu1 %v7655_v60 }
 0x796   :  { %2644 = vmatmul.mubr.bf16.gmra.mrb[64].mxu1 %v7659_v22  ;;  %v10427_v22 = vld [vmem:[#allocation11_spill] sm:$0xff] }
 0x797   :  { %2651 = vmatprep.mubr.bf16.mxu1 %v7663_v31  ;;  %v3866_v31 = vrot.slane %v3862_v25, %v10427_v22  ;;  %v3507_v51 = vrot.slane %v3503_v52, %v10427_v22 }
 0x799   :  { %vm7760_vm4 = vcmp.eq.s32.totalorder %v3866_v31, 1  ;;  %vm7806_vm7 = vcmp.eq.s32.totalorder %v3507_v51, 1 }
 0x79e   :  { %2652 = vmatmul.mubr.bf16.gmra.mrb[68].mxu1 %v7669_v14  ;;  %v2783_v14 = vrot.slane %v2779_v50, %v10427_v22 }
 0x79f   :  { %2659 = vmatprep.mubr.bf16.mxu1 %v7681_v0 }
 0x7a0   :  { %vm7764_vm5 = vcmp.eq.s32.totalorder %v2783_v14, 1 }
 0x7a6   :  { %2660 = vmatmul.mubr.bf16.gmra.mrb[72].mxu1 %v2376_v11  ;;  %v3144_v11 = vsel %vm3143_vm2, 1, %v10426_v39 }
 0x7a7   :  { %2667 = vmatprep.mubr.bf16.mxu1 %v2379_v43  ;;  %v3148_v15 = vrot.slane %v3144_v11, %v10427_v22 }
 0x7a9   :  { %vm7787_vm6 = vcmp.eq.s32.totalorder %v3148_v15, 1 }
 0x7ae   :  { %2668 = vmatmul.mubr.bf16.gmra.mrb[76].mxu1 %v2378_v59 }
 0x809   :  { %v4557_v55 = vpop.f32.mrb[16].mxu1 }
 0x80a   :  { %v4558_v60 = vpop.f32.mrb[17].mxu1 }
 0x80b   :  { %v4559_v0 = vadd.f32 %v4558_v60, %v4557_v55  ;;  %v4560_v44 = vpop.f32.mrb[18].mxu1 }
 0x80c   :  { %v4561_v12 = vpop.f32.mrb[19].mxu1 }
 0x80d   :  { %v2550_v43 = vadd.f32 %v4559_v0, %v7748_v30  ;;  %v4562_v59 = vadd.f32 %v4561_v12, %v4560_v44  ;;  %v2716_v0 = vld [vmem:[%s9995_s12 + $0x20] sm:$0xff] }
 0x80f   :  { %2676 = vst [vmem:[%s9996_s16] sm:$0xff] %v2550_v43  ;;  %v2746_v9 = vadd.f32 %v2712_v2, %v2550_v43  ;;  %v2553_v27 = vadd.f32 %v4562_v59, %v7748_v30 }
 0x811   :  { %2677 = vst [vmem:[%s9996_s16 + $0x8] sm:$0xff] %v2553_v27  ;;  %v2747_v41 = vadd.f32 %v2713_v8, %v2553_v27  ;;  %v4563_v16 = vpop.f32.mrb[20].mxu1  ;;  %v7779_v7 = vsel %vm7760_vm4, %v2746_v9, -1e+30  ;;  %v7783_v49 = vsel %vm7764_vm5, %v2746_v9, -1e+30 }
 0x812   :  { %v4564_v57 = vpop.f32.mrb[21].mxu1  ;;  %3900 = vmax.xlane.f32.xlu1 %v7779_v7  ;;  %2817 = vmax.xlane.f32.xlu0 %v7783_v49  ;;  %v7799_v63 = vsel %vm7787_vm6, %v2746_v9, -1e+30  ;;  %v7823_v5 = vsel %vm7806_vm7, %v2746_v9, -1e+30  ;;  %v2717_v27 = vld [vmem:[%s9995_s12 + $0x28] sm:$0xff] }
 0x813   :  { %v4565_v21 = vadd.f32 %v4564_v57, %v4563_v16  ;;  %v4566_v58 = vpop.f32.mrb[22].mxu1  ;;  %v7795_v33 = vsel %vm7787_vm6, %v2747_v41, -1e+30  ;;  %v7819_v35 = vsel %vm7806_vm7, %v2747_v41, -1e+30 }
 0x814   :  { %v4567_v26 = vpop.f32.mrb[23].mxu1  ;;  %v7834_v53 = vsel %vm7764_vm5, %v2747_v41, -1e+30  ;;  %v7854_v56 = vsel %vm7760_vm4, %v2747_v41, -1e+30 }
 0x815   :  { %v2558_v13 = vadd.f32 %v4565_v21, %v7748_v30  ;;  %v4568_v20 = vadd.f32 %v4567_v26, %v4566_v58 }
 0x816   :  { %3184 = vmax.xlane.f32.xlu1 %v7795_v33  ;;  %3182 = vmax.xlane.f32.xlu0 %v7799_v63 }
 0x817   :  { %2678 = vst [vmem:[%s9996_s16 + $0x10] sm:$0xff] %v2558_v13  ;;  %v2561_v61 = vadd.f32 %v4568_v20, %v7748_v30  ;;  %v2748_v10 = vadd.f32 %v2714_v19, %v2558_v13 }
 0x819   :  { %2679 = vst [vmem:[%s9996_s16 + $0x18] sm:$0xff] %v2561_v61  ;;  %v4569_v6 = vpop.f32.mrb[24].mxu1  ;;  %v7830_v45 = vsel %vm7764_vm5, %v2748_v10, -1e+30  ;;  %v2749_v28 = vadd.f32 %v2715_v37, %v2561_v61  ;;  %v7850_v29 = vsel %vm7760_vm4, %v2748_v10, -1e+30 }
 0x81a   :  { %v4570_v47 = vpop.f32.mrb[25].mxu1  ;;  %3543 = vmax.xlane.f32.xlu1 %v7819_v35  ;;  %3541 = vmax.xlane.f32.xlu0 %v7823_v5  ;;  %v7865_v55 = vsel %vm7787_vm6, %v2748_v10, -1e+30  ;;  %v7882_v14 = vsel %vm7806_vm7, %v2748_v10, -1e+30 }
 0x81b   :  { %v4571_v36 = vadd.f32 %v4570_v47, %v4569_v6  ;;  %v4572_v17 = vpop.f32.mrb[26].mxu1  ;;  %v7861_v50 = vsel %vm7764_vm5, %v2749_v28, -1e+30  ;;  %v7878_v31 = vsel %vm7787_vm6, %v2749_v28, -1e+30 }
 0x81c   :  { %v4573_v1 = vpop.f32.mrb[27].mxu1  ;;  %v7891_v43 = vsel %vm7806_vm7, %v2749_v28, -1e+30  ;;  %v7898_v9 = vsel %vm7760_vm4, %v2749_v28, -1e+30 }
 0x81d   :  { %v2566_v4 = vadd.f32 %v4571_v36, %v7748_v30  ;;  %v4574_v62 = vadd.f32 %v4573_v1, %v4572_v17  ;;  %v2718_v1 = vld [vmem:[%s9995_s12 + $0x30] sm:$0xff] }
 0x81e   :  { %2821 = vmax.xlane.f32.xlu1 %v7830_v45  ;;  %2819 = vmax.xlane.f32.xlu0 %v7834_v53 }
 0x81f   :  { %2680 = vst [vmem:[%s9996_s16 + $0x20] sm:$0xff] %v2566_v4  ;;  %v2569_v42 = vadd.f32 %v4574_v62, %v7748_v30  ;;  %v2750_v59 = vadd.f32 %v2716_v0, %v2566_v4 }
 0x821   :  { %2681 = vst [vmem:[%s9996_s16 + $0x28] sm:$0xff] %v2569_v42  ;;  %v4575_v24 = vpop.f32.mrb[28].mxu1  ;;  %v2751_v41 = vadd.f32 %v2717_v27, %v2569_v42  ;;  %v7918_v57 = vsel %vm7760_vm4, %v2750_v59, -1e+30  ;;  %v7922_v51 = vsel %vm7764_vm5, %v2750_v59, -1e+30 }
 0x822   :  { %v4576_v18 = vpop.f32.mrb[29].mxu1  ;;  %3904 = vmax.xlane.f32.xlu1 %v7850_v29  ;;  %3902 = vmax.xlane.f32.xlu0 %v7854_v56  ;;  %10436 = vst [vmem:[#allocation2_spill] sm:$0xff] %v7918_v57  ;;  %v7935_v10 = vsel %vm7787_vm6, %v2750_v59, -1e+30  ;;  %v7956_v17 = vsel %vm7806_vm7, %v2750_v59, -1e+30 }
 0x823   :  { %v4577_v48 = vadd.f32 %v4576_v18, %v4575_v24  ;;  %v4578_v38 = vpop.f32.mrb[30].mxu1  ;;  %v7931_v61 = vsel %vm7764_vm5, %v2751_v41, -1e+30  ;;  %v7952_v36 = vsel %vm7787_vm6, %v2751_v41, -1e+30 }
 0x824   :  { %v4579_v23 = vpop.f32.mrb[31].mxu1  ;;  %v7965_v28 = vsel %vm7806_vm7, %v2751_v41, -1e+30 }
 0x825   :  { %v2574_v46 = vadd.f32 %v4577_v48, %v7748_v30  ;;  %v4580_v25 = vadd.f32 %v4579_v23, %v4578_v38  ;;  %v7972_v38 = vsel %vm7760_vm4, %v2751_v41, -1e+30  ;;  %v2719_v23 = vld [vmem:[%s9995_s12 + $0x38] sm:$0xff] }
 0x826   :  { %2823 = vmax.xlane.f32.xlu1 %v7861_v50  ;;  %3186 = vmax.xlane.f32.xlu0 %v7865_v55  ;;  %10437 = vst [vmem:[#allocation17_spill] sm:$0xff] %v7972_v38 }
 0x827   :  { %2682 = vst [vmem:[%s9996_s16 + $0x30] sm:$0xff] %v2574_v46  ;;  %v2577_v34 = vadd.f32 %v4580_v25, %v7748_v30  ;;  %v2752_v24 = vadd.f32 %v2718_v1, %v2574_v46 }
 0x829   :  { %2683 = vst [vmem:[%s9996_s16 + $0x38] sm:$0xff] %v2577_v34  ;;  %v4581_v60 = vpop.f32.mrb[32].mxu1  ;;  %v2753_v25 = vadd.f32 %v2719_v23, %v2577_v34  ;;  %v7992_v0 = vsel %vm7760_vm4, %v2752_v24, -1e+30  ;;  %v8009_v41 = vsel %vm7787_vm6, %v2752_v24, -1e+30 }
 0x82a   :  { %v4582_v44 = vpop.f32.mrb[33].mxu1  ;;  %3188 = vmax.xlane.f32.xlu1 %v7878_v31  ;;  %3545 = vmax.xlane.f32.xlu0 %v7882_v14  ;;  %10438 = vst [vmem:[#allocation13_spill] sm:$0xff] %v7992_v0  ;;  %10441 = vst [vmem:[#allocation46_spill] sm:$0xff] %v8009_v41  ;;  %v2721_v23 = vld [vmem:[%s9995_s12 + $0x48] sm:$0xff] }
 0x82b   :  { %v4583_v11 = vadd.f32 %v4582_v44, %v4581_v60  ;;  %v4584_v2 = vpop.f32.mrb[34].mxu1  ;;  %v7996_v44 = vsel %vm7764_vm5, %v2752_v24, -1e+30  ;;  %v8005_v27 = vsel %vm7764_vm5, %v2753_v25, -1e+30 }
 0x82c   :  { %v4585_v12 = vpop.f32.mrb[35].mxu1  ;;  %10439 = vst [vmem:[#allocation44_spill] sm:$0xff] %v7996_v44  ;;  %10440 = vst [vmem:[#allocation45_spill] sm:$0xff] %v8005_v27 }
 0x82d   :  { %v7894_v8 = vadd.f32 %v4583_v11, %v7748_v30  ;;  %v4586_v15 = vadd.f32 %v4585_v12, %v4584_v2 }
 0x82e   :  { %3547 = vmax.xlane.f32.xlu1 %v7891_v43  ;;  %3906 = vmax.xlane.f32.xlu0 %v7898_v9 }
 0x82f   :  { %2684 = vst [vmem:[%s9996_s16 + $0x40] sm:$0xff] %v7894_v8  ;;  %v7910_v52 = vadd.f32 %v4586_v15, %v7748_v30 }
 0x831   :  { %2685 = vst [vmem:[%s9996_s16 + $0x48] sm:$0xff] %v7910_v52  ;;  %v4587_v16 = vpop.f32.mrb[36].mxu1 }
 0x832   :  { %v4588_v21 = vpop.f32.mrb[37].mxu1  ;;  %3908 = vmax.xlane.f32.xlu1 %v7918_v57  ;;  %2825 = vmax.xlane.f32.xlu0 %v7922_v51 }
 0x833   :  { %v4589_v58 = vadd.f32 %v4588_v21, %v4587_v16  ;;  %v4590_v26 = vpop.f32.mrb[38].mxu1 }
 0x834   :  { %v4591_v13 = vpop.f32.mrb[39].mxu1 }
 0x835   :  { %v7927_v20 = vadd.f32 %v4589_v58, %v7748_v30  ;;  %v4592_v19 = vadd.f32 %v4591_v13, %v4590_v26  ;;  %v8026_v58 = vsel %vm7787_vm6, %v2753_v25, -1e+30  ;;  %v8030_v26 = vsel %vm7806_vm7, %v2752_v24, -1e+30  ;;  %v2720_v13 = vld [vmem:[%s9995_s12 + $0x40] sm:$0xff] }
 0x836   :  { %2827 = vmax.xlane.f32.xlu1 %v7931_v61  ;;  %3190 = vmax.xlane.f32.xlu0 %v7935_v10  ;;  %10442 = vst [vmem:[#allocation47_spill] sm:$0xff] %v8026_v58  ;;  %10443 = vst [vmem:[#allocation21_spill] sm:$0xff] %v8030_v26 }
 0x837   :  { %2686 = vst [vmem:[%s9996_s16 + $0x50] sm:$0xff] %v7927_v20  ;;  %v7944_v6 = vadd.f32 %v4592_v19, %v7748_v30 }
 0x839   :  { %2687 = vst [vmem:[%s9996_s16 + $0x58] sm:$0xff] %v7944_v6  ;;  %v4593_v47 = vpop.f32.mrb[40].mxu1 }
 0x83a   :  { %v4594_v4 = vpop.f32.mrb[41].mxu1  ;;  %3192 = vmax.xlane.f32.xlu1 %v7952_v36  ;;  %3549 = vmax.xlane.f32.xlu0 %v7956_v17 }
 0x83b   :  { %v4595_v62 = vadd.f32 %v4594_v4, %v4593_v47  ;;  %v4596_v37 = vpop.f32.mrb[42].mxu1 }
 0x83c   :  { %v4597_v42 = vpop.f32.mrb[43].mxu1 }
 0x83d   :  { %v7968_v18 = vadd.f32 %v4595_v62, %v7748_v30  ;;  %v4598_v48 = vadd.f32 %v4597_v42, %v4596_v37  ;;  %v8039_v62 = vsel %vm7806_vm7, %v2753_v25, -1e+30  ;;  %v2754_v37 = vadd.f32 %v2720_v13, %v7894_v8 }
 0x83e   :  { %3551 = vmax.xlane.f32.xlu1 %v7965_v28  ;;  %3910 = vmax.xlane.f32.xlu0 %v7972_v38  ;;  %10444 = vst [vmem:[#allocation22_spill] sm:$0xff] %v8039_v62  ;;  %v2736_v38 = vld [vmem:[%s9995_s12 + $0xc0] sm:$0xff] }
 0x83f   :  { %2688 = vst [vmem:[%s9996_s16 + $0x60] sm:$0xff] %v7968_v18  ;;  %v7984_v46 = vadd.f32 %v4598_v48, %v7748_v30  ;;  %v8047_v48 = vsel %vm7760_vm4, %v2753_v25, -1e+30 }
 0x840   :  { %10445 = vst [vmem:[#allocation23_spill] sm:$0xff] %v8047_v48 }
 0x841   :  { %2689 = vst [vmem:[%s9996_s16 + $0x68] sm:$0xff] %v7984_v46  ;;  %v4599_v60 = vpop.f32.mrb[44].mxu1 }
 0x842   :  { %v4600_v11 = vpop.f32.mrb[45].mxu1  ;;  %3912 = vmax.xlane.f32.xlu1 %v7992_v0  ;;  %2829 = vmax.xlane.f32.xlu0 %v7996_v44 }
 0x843   :  { %v4601_v34 = vadd.f32 %v4600_v11, %v4599_v60  ;;  %v4602_v2 = vpop.f32.mrb[46].mxu1  ;;  %v2755_v60 = vadd.f32 %v2721_v23, %v7910_v52  ;;  %v8068_v11 = vsel %vm7760_vm4, %v2754_v37, -1e+30  ;;  %v8106_v23 = vsel %vm7806_vm7, %v2754_v37, -1e+30 }
 0x844   :  { %v4603_v12 = vpop.f32.mrb[47].mxu1  ;;  %10446 = vst [vmem:[#allocation16_spill] sm:$0xff] %v8068_v11  ;;  %10451 = vst [vmem:[#allocation24_spill] sm:$0xff] %v8106_v23 }
 0x845   :  { %v8001_v59 = vadd.f32 %v4601_v34, %v7748_v30  ;;  %v4604_v15 = vadd.f32 %v4603_v12, %v4602_v2  ;;  %v8072_v34 = vsel %vm7764_vm5, %v2754_v37, -1e+30 }
 0x846   :  { %2831 = vmax.xlane.f32.xlu1 %v8005_v27  ;;  %3194 = vmax.xlane.f32.xlu0 %v8009_v41  ;;  %10447 = vst [vmem:[#allocation3_spill] sm:$0xff] %v8072_v34 }
 0x847   :  { %2690 = vst [vmem:[%s9996_s16 + $0x70] sm:$0xff] %v8001_v59  ;;  %v8018_v16 = vadd.f32 %v4604_v15, %v7748_v30 }
 0x849   :  { %2691 = vst [vmem:[%s9996_s16 + $0x78] sm:$0xff] %v8018_v16  ;;  %v4605_v21 = vpop.f32.mrb[48].mxu1 }
 0x84a   :  { %v4606_v19 = vpop.f32.mrb[49].mxu1  ;;  %3196 = vmax.xlane.f32.xlu1 %v8026_v58  ;;  %3553 = vmax.xlane.f32.xlu0 %v8030_v26 }
 0x84b   :  { %v4607_v47 = vadd.f32 %v4606_v19, %v4605_v21  ;;  %v4608_v1 = vpop.f32.mrb[50].mxu1  ;;  %v8081_v19 = vsel %vm7764_vm5, %v2755_v60, -1e+30 }
 0x84c   :  { %v4609_v4 = vpop.f32.mrb[51].mxu1  ;;  %10448 = vst [vmem:[#allocation25_spill] sm:$0xff] %v8081_v19 }
 0x84d   :  { %v8043_v42 = vadd.f32 %v4607_v47, %v7748_v30  ;;  %v4610_v24 = vadd.f32 %v4609_v4, %v4608_v1  ;;  %v8085_v47 = vsel %vm7787_vm6, %v2754_v37, -1e+30 }
 0x84e   :  { %3555 = vmax.xlane.f32.xlu1 %v8039_v62  ;;  %3914 = vmax.xlane.f32.xlu0 %v8047_v48  ;;  %10449 = vst [vmem:[#allocation26_spill] sm:$0xff] %v8085_v47  ;;  %v2734_v62 = vld [vmem:[%s9995_s12 + $0xb0] sm:$0xff] }
 0x84f   :  { %2692 = vst [vmem:[%s9996_s16 + $0x80] sm:$0xff] %v8043_v42  ;;  %v8059_v8 = vadd.f32 %v4610_v24, %v7748_v30  ;;  %v8102_v24 = vsel %vm7787_vm6, %v2755_v60, -1e+30 }
 0x850   :  { %10450 = vst [vmem:[#allocation20_spill] sm:$0xff] %v8102_v24 }
 0x851   :  { %2693 = vst [vmem:[%s9996_s16 + $0x88] sm:$0xff] %v8059_v8  ;;  %v4611_v25 = vpop.f32.mrb[52].mxu1 }
 0x852   :  { %v4612_v2 = vpop.f32.mrb[53].mxu1  ;;  %3916 = vmax.xlane.f32.xlu1 %v8068_v11  ;;  %2833 = vmax.xlane.f32.xlu0 %v8072_v34  ;;  %v8123_v11 = vsel %vm7760_vm4, %v2755_v60, -1e+30 }
 0x853   :  { %v4613_v52 = vadd.f32 %v4612_v2, %v4611_v25  ;;  %v4614_v12 = vpop.f32.mrb[54].mxu1  ;;  %v2722_v25 = vld [vmem:[%s9995_s12 + $0x50] sm:$0xff]  ;;  %10453 = vst [vmem:[#allocation28_spill] sm:$0xff] %v8123_v11 }
 0x854   :  { %v4615_v15 = vpop.f32.mrb[55].mxu1  ;;  %v2756_v22 = vadd.f32 %v2722_v25, %v7927_v20 }
 0x855   :  { %v8077_v21 = vadd.f32 %v4613_v52, %v7748_v30  ;;  %v4616_v13 = vadd.f32 %v4615_v15, %v4614_v12 }
 0x856   :  { %2835 = vmax.xlane.f32.xlu1 %v8081_v19  ;;  %3198 = vmax.xlane.f32.xlu0 %v8085_v47 }
 0x857   :  { %2694 = vst [vmem:[%s9996_s16 + $0x90] sm:$0xff] %v8077_v21  ;;  %v8094_v1 = vadd.f32 %v4616_v13, %v7748_v30  ;;  %v8115_v13 = vsel %vm7806_vm7, %v2755_v60, -1e+30 }
 0x858   :  { %10452 = vst [vmem:[#allocation29_spill] sm:$0xff] %v8115_v13 }
 0x859   :  { %2695 = vst [vmem:[%s9996_s16 + $0x98] sm:$0xff] %v8094_v1  ;;  %v4617_v4 = vpop.f32.mrb[56].mxu1 }
 0x85a   :  { %v4618_v2 = vpop.f32.mrb[57].mxu1  ;;  %3200 = vmax.xlane.f32.xlu1 %v8102_v24  ;;  %3557 = vmax.xlane.f32.xlu0 %v8106_v23  ;;  %v8161_v23 = vsel %vm7787_vm6, %v2756_v22, -1e+30 }
 0x85b   :  { %v4619_v52 = vadd.f32 %v4618_v2, %v4617_v4  ;;  %v4620_v12 = vpop.f32.mrb[58].mxu1  ;;  %v2723_v4 = vld [vmem:[%s9995_s12 + $0x58] sm:$0xff]  ;;  %v8144_v2 = vsel %vm7760_vm4, %v2756_v22, -1e+30  ;;  %10457 = vst [vmem:[#allocation4_spill] sm:$0xff] %v8161_v23 }
 0x85c   :  { %v4621_v15 = vpop.f32.mrb[59].mxu1  ;;  %v2757_v25 = vadd.f32 %v2723_v4, %v7944_v6  ;;  %10454 = vst [vmem:[#allocation27_spill] sm:$0xff] %v8144_v2 }
 0x85d   :  { %v8119_v37 = vadd.f32 %v4619_v52, %v7748_v30  ;;  %v4622_v39 = vadd.f32 %v4621_v15, %v4620_v12  ;;  %v8148_v52 = vsel %vm7764_vm5, %v2756_v22, -1e+30 }
 0x85e   :  { %3559 = vmax.xlane.f32.xlu1 %v8115_v13  ;;  %3918 = vmax.xlane.f32.xlu0 %v8123_v11  ;;  %10455 = vst [vmem:[#allocation5_spill] sm:$0xff] %v8148_v52  ;;  %v8157_v13 = vsel %vm7764_vm5, %v2757_v25, -1e+30  ;;  %v8199_v19 = vsel %vm7760_vm4, %v2757_v25, -1e+30 }
 0x85f   :  { %2696 = vst [vmem:[%s9996_s16 + $0xa0] sm:$0xff] %v8119_v37  ;;  %v8135_v20 = vadd.f32 %v4622_v39, %v7748_v30  ;;  %10456 = vst [vmem:[#allocation10_spill] sm:$0xff] %v8157_v13 }
 0x860   :  { %10461 = vst [vmem:[#allocation8_spill] sm:$0xff] %v8199_v19 }
 0x861   :  { %2697 = vst [vmem:[%s9996_s16 + $0xa8] sm:$0xff] %v8135_v20  ;;  %v4623_v60 = vpop.f32.mrb[60].mxu1 }
 0x862   :  { %v4624_v12 = vpop.f32.mrb[61].mxu1  ;;  %3920 = vmax.xlane.f32.xlu1 %v8144_v2  ;;  %2837 = vmax.xlane.f32.xlu0 %v8148_v52  ;;  %v8191_v52 = vsel %vm7806_vm7, %v2757_v25, -1e+30 }
 0x863   :  { %v4625_v39 = vadd.f32 %v4624_v12, %v4623_v60  ;;  %v4626_v6 = vpop.f32.mrb[62].mxu1  ;;  %10460 = vst [vmem:[#allocation7_spill] sm:$0xff] %v8191_v52 }
 0x864   :  { %v4627_v15 = vpop.f32.mrb[63].mxu1 }
 0x865   :  { %v8153_v4 = vadd.f32 %v4625_v39, %v7748_v30  ;;  %v4628_v11 = vadd.f32 %v4627_v15, %v4626_v6  ;;  %v8178_v39 = vsel %vm7787_vm6, %v2757_v25, -1e+30  ;;  %v8182_v6 = vsel %vm7806_vm7, %v2756_v22, -1e+30  ;;  %v2724_v15 = vld [vmem:[%s9995_s12 + $0x60] sm:$0xff] }
 0x866   :  { %2839 = vmax.xlane.f32.xlu1 %v8157_v13  ;;  %3202 = vmax.xlane.f32.xlu0 %v8161_v23  ;;  %10458 = vst [vmem:[#allocation30_spill] sm:$0xff] %v8178_v39  ;;  %10459 = vst [vmem:[#allocation6_spill] sm:$0xff] %v8182_v6  ;;  %v2758_v24 = vadd.f32 %v2724_v15, %v7968_v18 }
 0x867   :  { %2698 = vst [vmem:[%s9996_s16 + $0xb0] sm:$0xff] %v8153_v4  ;;  %v8170_v60 = vadd.f32 %v4628_v11, %v7748_v30  ;;  %v2768_v26 = vadd.f32 %v2734_v62, %v8153_v4 }
 0x868   :  { %v8220_v25 = vsel %vm7760_vm4, %v2758_v24, -1e+30 }
 0x869   :  { %2699 = vst [vmem:[%s9996_s16 + $0xb8] sm:$0xff] %v8170_v60  ;;  %v4629_v12 = vpop.f32.mrb[64].mxu1  ;;  %10462 = vst [vmem:[#allocation9_spill] sm:$0xff] %v8220_v25  ;;  %v8538_v4 = vsel %vm7760_vm4, %v2768_v26, -1e+30 }
 0x86a   :  { %v4630_v11 = vpop.f32.mrb[65].mxu1  ;;  %3204 = vmax.xlane.f32.xlu1 %v8178_v39  ;;  %3561 = vmax.xlane.f32.xlu0 %v8182_v6  ;;  %v8237_v6 = vsel %vm7787_vm6, %v2758_v24, -1e+30  ;;  %10503 = vst [vmem:[#allocation70_spill] sm:$0xff] %v8538_v4  ;;  %v8570_v44 = vsel %vm7806_vm7, %v2768_v26, -1e+30 }
 0x86b   :  { %v4631_v2 = vadd.f32 %v4630_v11, %v4629_v12  ;;  %v4632_v23 = vpop.f32.mrb[66].mxu1  ;;  %v2725_v12 = vld [vmem:[%s9995_s12 + $0x68] sm:$0xff]  ;;  %10465 = vst [vmem:[#allocation33_spill] sm:$0xff] %v8237_v6  ;;  %10508 = vst [vmem:[#allocation75_spill] sm:$0xff] %v8570_v44 }
 0x86c   :  { %v4633_v13 = vpop.f32.mrb[67].mxu1 }
 0x86d   :  { %v8195_v22 = vadd.f32 %v4631_v2, %v7748_v30  ;;  %v4634_v47 = vadd.f32 %v4633_v13, %v4632_v23  ;;  %v2759_v23 = vadd.f32 %v2725_v12, %v7984_v46  ;;  %v8224_v2 = vsel %vm7764_vm5, %v2758_v24, -1e+30 }
 0x86e   :  { %3563 = vmax.xlane.f32.xlu1 %v8191_v52  ;;  %3922 = vmax.xlane.f32.xlu0 %v8199_v19  ;;  %10463 = vst [vmem:[#allocation31_spill] sm:$0xff] %v8224_v2 }
 0x86f   :  { %2700 = vst [vmem:[%s9996_s16 + $0xc0] sm:$0xff] %v8195_v22  ;;  %v8211_v18 = vadd.f32 %v4634_v47, %v7748_v30  ;;  %v8233_v52 = vsel %vm7764_vm5, %v2759_v23, -1e+30  ;;  %v8275_v48 = vsel %vm7760_vm4, %v2759_v23, -1e+30  ;;  %v2770_v57 = vadd.f32 %v2736_v38, %v8195_v22 }
 0x870   :  { %10464 = vst [vmem:[#allocation32_spill] sm:$0xff] %v8233_v52  ;;  %10469 = vst [vmem:[#allocation42_spill] sm:$0xff] %v8275_v48 }
 0x871   :  { %2701 = vst [vmem:[%s9996_s16 + $0xc8] sm:$0xff] %v8211_v18  ;;  %v4635_v13 = vpop.f32.mrb[68].mxu1  ;;  %v8602_v22 = vsel %vm7760_vm4, %v2770_v57, -1e+30 }
 0x872   :  { %v4636_v15 = vpop.f32.mrb[69].mxu1  ;;  %3924 = vmax.xlane.f32.xlu1 %v8220_v25  ;;  %2841 = vmax.xlane.f32.xlu0 %v8224_v2  ;;  %v8267_v2 = vsel %vm7806_vm7, %v2759_v23, -1e+30  ;;  %10513 = vst [vmem:[#allocation80_spill] sm:$0xff] %v8602_v22 }
 0x873   :  { %v4637_v46 = vadd.f32 %v4636_v15, %v4635_v13  ;;  %v4638_v47 = vpop.f32.mrb[70].mxu1  ;;  %10468 = vst [vmem:[#allocation36_spill] sm:$0xff] %v8267_v2 }
 0x874   :  { %v4639_v11 = vpop.f32.mrb[71].mxu1 }
 0x875   :  { %v8229_v12 = vadd.f32 %v4637_v46, %v7748_v30  ;;  %v4640_v19 = vadd.f32 %v4639_v11, %v4638_v47  ;;  %v8254_v46 = vsel %vm7787_vm6, %v2759_v23, -1e+30  ;;  %v8258_v47 = vsel %vm7806_vm7, %v2758_v24, -1e+30  ;;  %v2726_v11 = vld [vmem:[%s9995_s12 + $0x70] sm:$0xff] }
 0x876   :  { %2843 = vmax.xlane.f32.xlu1 %v8233_v52  ;;  %3206 = vmax.xlane.f32.xlu0 %v8237_v6  ;;  %10466 = vst [vmem:[#allocation34_spill] sm:$0xff] %v8254_v46  ;;  %10467 = vst [vmem:[#allocation35_spill] sm:$0xff] %v8258_v47  ;;  %v2760_v39 = vadd.f32 %v2726_v11, %v8001_v59 }
 0x877   :  { %2702 = vst [vmem:[%s9996_s16 + $0xd0] sm:$0xff] %v8229_v12  ;;  %v8246_v13 = vadd.f32 %v4640_v19, %v7748_v30 }
 0x878   :  { %v8296_v23 = vsel %vm7760_vm4, %v2760_v39, -1e+30 }
 0x879   :  { %2703 = vst [vmem:[%s9996_s16 + $0xd8] sm:$0xff] %v8246_v13  ;;  %v4641_v15 = vpop.f32.mrb[72].mxu1  ;;  %10470 = vst [vmem:[#allocation43_spill] sm:$0xff] %v8296_v23 }
 0x87a   :  { %v4642_v19 = vpop.f32.mrb[73].mxu1  ;;  %3208 = vmax.xlane.f32.xlu1 %v8254_v46  ;;  %3565 = vmax.xlane.f32.xlu0 %v8258_v47  ;;  %v8313_v47 = vsel %vm7787_vm6, %v2760_v39, -1e+30 }
 0x87b   :  { %v4643_v25 = vadd.f32 %v4642_v19, %v4641_v15  ;;  %v4644_v6 = vpop.f32.mrb[74].mxu1  ;;  %v2727_v15 = vld [vmem:[%s9995_s12 + $0x78] sm:$0xff]  ;;  %10473 = vst [vmem:[#allocation14_spill] sm:$0xff] %v8313_v47 }
 0x87c   :  { %v4645_v52 = vpop.f32.mrb[75].mxu1 }
 0x87d   :  { %v8271_v24 = vadd.f32 %v4643_v25, %v7748_v30  ;;  %v4646_v34 = vadd.f32 %v4645_v52, %v4644_v6  ;;  %v2761_v52 = vadd.f32 %v2727_v15, %v8018_v16  ;;  %v8300_v25 = vsel %vm7764_vm5, %v2760_v39, -1e+30 }
 0x87e   :  { %3567 = vmax.xlane.f32.xlu1 %v8267_v2  ;;  %3926 = vmax.xlane.f32.xlu0 %v8275_v48  ;;  %10471 = vst [vmem:[#allocation19_spill] sm:$0xff] %v8300_v25 }
 0x87f   :  { %2704 = vst [vmem:[%s9996_s16 + $0xe0] sm:$0xff] %v8271_v24  ;;  %v8287_v59 = vadd.f32 %v4646_v34, %v7748_v30  ;;  %v8309_v2 = vsel %vm7764_vm5, %v2761_v52, -1e+30 }
 0x880   :  { %10472 = vst [vmem:[#allocation12_spill] sm:$0xff] %v8309_v2 }
 0x881   :  { %2705 = vst [vmem:[%s9996_s16 + $0xe8] sm:$0xff] %v8287_v59  ;;  %v4647_v6 = vpop.f32.mrb[76].mxu1 }
 0x882   :  { %v4648_v11 = vpop.f32.mrb[77].mxu1  ;;  %3928 = vmax.xlane.f32.xlu1 %v8296_v23  ;;  %2845 = vmax.xlane.f32.xlu0 %v8300_v25 }
 0x883   :  { %v4649_v16 = vadd.f32 %v4648_v11, %v4647_v6  ;;  %v4650_v34 = vpop.f32.mrb[78].mxu1  ;;  %v8330_v11 = vsel %vm7787_vm6, %v2761_v52, -1e+30 }
 0x884   :  { %v4651_v19 = vpop.f32.mrb[79].mxu1  ;;  %10474 = vst [vmem:[#allocation15_spill] sm:$0xff] %v8330_v11 }
 0x885   :  { %v8305_v15 = vadd.f32 %v4649_v16, %v7748_v30  ;;  %v4652_v48 = vadd.f32 %v4651_v19, %v4650_v34  ;;  %v8334_v16 = vsel %vm7806_vm7, %v2760_v39, -1e+30  ;;  %v2728_v34 = vld [vmem:[%s9995_s12 + $0x80] sm:$0xff]  ;;  %v8348_v19 = vsel %vm7760_vm4, %v2761_v52, -1e+30  ;;  %v2729_v39 = vld [vmem:[%s9995_s12 + $0x88] sm:$0xff] }
 0x886   :  { %2847 = vmax.xlane.f32.xlu1 %v8309_v2  ;;  %3210 = vmax.xlane.f32.xlu0 %v8313_v47  ;;  %10475 = vst [vmem:[#allocation18_spill] sm:$0xff] %v8334_v16  ;;  %10477 = vst [vmem:[#allocation37_spill] sm:$0xff] %v8348_v19  ;;  %v2763_v23 = vadd.f32 %v2729_v39, %v8059_v8 }
 0x887   :  { %2706 = vst [vmem:[%s9996_s16 + $0xf0] sm:$0xff] %v8305_v15  ;;  %v8322_v6 = vadd.f32 %v4652_v48, %v7748_v30  ;;  %v2762_v30 = vadd.f32 %v2728_v34, %v8043_v42  ;;  %v8344_v48 = vsel %vm7806_vm7, %v2761_v52, -1e+30 }
 0x888   :  { %10476 = vst [vmem:[#allocation41_spill] sm:$0xff] %v8344_v48  ;;  %v8368_v52 = vsel %vm7764_vm5, %v2763_v23, -1e+30  ;;  %v8378_v8 = vsel %vm7787_vm6, %v2763_v23, -1e+30 }
 0x889   :  { %2707 = vst [vmem:[%s9996_s16 + $0xf8] sm:$0xff] %v8322_v6  ;;  %v8358_v42 = vsel %vm7760_vm4, %v2762_v30, -1e+30  ;;  %v8362_v34 = vsel %vm7764_vm5, %v2762_v30, -1e+30  ;;  %10480 = vst [vmem:[#allocation40_spill] sm:$0xff] %v8368_v52 }
 0x88a   :  { %3212 = vmax.xlane.f32.xlu1 %v8330_v11  ;;  %3569 = vmax.xlane.f32.xlu0 %v8334_v16  ;;  %10478 = vst [vmem:[#allocation38_spill] sm:$0xff] %v8358_v42  ;;  %10479 = vst [vmem:[#allocation39_spill] sm:$0xff] %v8362_v34  ;;  %v8382_v39 = vsel %vm7806_vm7, %v2762_v30, -1e+30  ;;  %v2732_v11 = vld [vmem:[%s9995_s12 + $0xa0] sm:$0xff] }
 0x88b   :  { %10482 = vst [vmem:[#allocation49_spill] sm:$0xff] %v8378_v8  ;;  %10483 = vst [vmem:[#allocation50_spill] sm:$0xff] %v8382_v39  ;;  %v2766_v47 = vadd.f32 %v2732_v11, %v8119_v37 }
 0x88d   :  { %v8474_v11 = vsel %vm7760_vm4, %v2766_v47, -1e+30  ;;  %v8506_v0 = vsel %vm7806_vm7, %v2766_v47, -1e+30 }
 0x88e   :  { %3571 = vmax.xlane.f32.xlu1 %v8344_v48  ;;  %3930 = vmax.xlane.f32.xlu0 %v8348_v19  ;;  %v8372_v19 = vsel %vm7787_vm6, %v2762_v30, -1e+30  ;;  %v2731_v30 = vld [vmem:[%s9995_s12 + $0x98] sm:$0xff]  ;;  %10494 = vst [vmem:[#allocation61_spill] sm:$0xff] %v8474_v11  ;;  %10499 = vst [vmem:[#allocation66_spill] sm:$0xff] %v8506_v0 }
 0x88f   :  { %10481 = vst [vmem:[#allocation48_spill] sm:$0xff] %v8372_v19 }
 0x892   :  { %3932 = vmax.xlane.f32.xlu1 %v8358_v42  ;;  %2849 = vmax.xlane.f32.xlu0 %v8362_v34  ;;  %v2730_v42 = vld [vmem:[%s9995_s12 + $0x90] sm:$0xff]  ;;  %v8396_v34 = vsel %vm7760_vm4, %v2763_v23, -1e+30 }
 0x893   :  { %10485 = vst [vmem:[#allocation52_spill] sm:$0xff] %v8396_v34 }
 0x896   :  { %2851 = vmax.xlane.f32.xlu1 %v8368_v52  ;;  %3214 = vmax.xlane.f32.xlu0 %v8372_v19  ;;  %v2764_v52 = vadd.f32 %v2730_v42, %v8077_v21  ;;  %v8392_v19 = vsel %vm7806_vm7, %v2763_v23, -1e+30  ;;  %v2765_v21 = vadd.f32 %v2731_v30, %v8094_v1 }
 0x897   :  { %10484 = vst [vmem:[#allocation51_spill] sm:$0xff] %v8392_v19 }
 0x898   :  { %v8410_v42 = vsel %vm7760_vm4, %v2764_v52, -1e+30  ;;  %v8414_v23 = vsel %vm7764_vm5, %v2764_v52, -1e+30  ;;  %v8424_v48 = vsel %vm7764_vm5, %v2765_v21, -1e+30 }
 0x899   :  { %10486 = vst [vmem:[#allocation53_spill] sm:$0xff] %v8410_v42  ;;  %10487 = vst [vmem:[#allocation54_spill] sm:$0xff] %v8414_v23  ;;  %v8428_v1 = vsel %vm7787_vm6, %v2764_v52, -1e+30  ;;  %v8442_v16 = vsel %vm7806_vm7, %v2764_v52, -1e+30 }
 0x89a   :  { %3216 = vmax.xlane.f32.xlu1 %v8378_v8  ;;  %3573 = vmax.xlane.f32.xlu0 %v8382_v39  ;;  %10488 = vst [vmem:[#allocation55_spill] sm:$0xff] %v8424_v48  ;;  %10489 = vst [vmem:[#allocation56_spill] sm:$0xff] %v8428_v1  ;;  %v8456_v2 = vsel %vm7806_vm7, %v2765_v21, -1e+30  ;;  %v8460_v52 = vsel %vm7760_vm4, %v2765_v21, -1e+30 }
 0x89b   :  { %10491 = vst [vmem:[#allocation58_spill] sm:$0xff] %v8442_v16  ;;  %10492 = vst [vmem:[#allocation59_spill] sm:$0xff] %v8456_v2 }
 0x89c   :  { %10493 = vst [vmem:[#allocation60_spill] sm:$0xff] %v8460_v52 }
 0x89e   :  { %3575 = vmax.xlane.f32.xlu1 %v8392_v19  ;;  %3934 = vmax.xlane.f32.xlu0 %v8396_v34 }
 0x89f   :  { %v8403_v8 = vpop.xlane.xlu1 %3900  ;;  %v8405_v39 = vpop.xlane.xlu0 %2817 }
 0x8a0   :  { %vm2881_vm8 = vcmp.eq.f32.partialorder %v7783_v49, %v8405_v39  ;;  %vm3964_vm14 = vcmp.eq.f32.partialorder %v7779_v7, %v8403_v8 }
 0x8a1   :  { %v2919_v49 = vsel %vm2881_vm8, %v8851_v54, 1e+09 }
 0x8a2   :  { %3936 = vmax.xlane.f32.xlu1 %v8410_v42  ;;  %2853 = vmax.xlane.f32.xlu0 %v8414_v23  ;;  %v8438_v23 = vsel %vm7787_vm6, %v2765_v21, -1e+30  ;;  %v8478_v21 = vsel %vm7764_vm5, %v2766_v47, -1e+30 }
 0x8a3   :  { %v8418_v19 = vpop.xlane.xlu1 %3184  ;;  %v8420_v34 = vpop.xlane.xlu0 %3182  ;;  %10490 = vst [vmem:[#allocation57_spill] sm:$0xff] %v8438_v23  ;;  %10495 = vst [vmem:[#allocation62_spill] sm:$0xff] %v8478_v21 }
 0x8a4   :  { %vm3247_vm10 = vcmp.eq.f32.partialorder %v7795_v33, %v8418_v19  ;;  %vm3246_vm11 = vcmp.eq.f32.partialorder %v7799_v63, %v8420_v34 }
 0x8a5   :  { %v3279_v39 = vsel %vm3247_vm10, %v8851_v54, 1e+09 }
 0x8a6   :  { %2855 = vmax.xlane.f32.xlu1 %v8424_v48  ;;  %3218 = vmax.xlane.f32.xlu0 %v8428_v1 }
 0x8a7   :  { %v8432_v30 = vpop.xlane.xlu1 %3543  ;;  %v8434_v42 = vpop.xlane.xlu0 %3541 }
 0x8a8   :  { %vm3606_vm12 = vcmp.eq.f32.partialorder %v7819_v35, %v8432_v30  ;;  %vm3605_vm13 = vcmp.eq.f32.partialorder %v7823_v5, %v8434_v42  ;;  %v3996_v30 = vsel %vm3964_vm14, %v8851_v54, 1e+09 }
 0x8a9   :  { %v3638_v19 = vsel %vm3606_vm12, %v8851_v54, 1e+09  ;;  %v3637_v34 = vsel %vm3605_vm13, %v8851_v54, 1e+09 }
 0x8aa   :  { %3220 = vmax.xlane.f32.xlu1 %v8438_v23  ;;  %3577 = vmax.xlane.f32.xlu0 %v8442_v16  ;;  %v2733_v23 = vld [vmem:[%s9995_s12 + $0xa8] sm:$0xff] }
 0x8ab   :  { %v8449_v1 = vpop.xlane.xlu1 %2821  ;;  %v8451_v48 = vpop.xlane.xlu0 %2819  ;;  %v2767_v37 = vadd.f32 %v2733_v23, %v8135_v20  ;;  %v8492_v20 = vsel %vm7787_vm6, %v2766_v47, -1e+30 }
 0x8ac   :  { %10497 = vst [vmem:[#allocation64_spill] sm:$0xff] %v8492_v20  ;;  %vm2882_vm9 = vcmp.eq.f32.partialorder %v7834_v53, %v8451_v48  ;;  %vm2883_vm0 = vcmp.eq.f32.partialorder %v7830_v45, %v8449_v1 }
 0x8ad   :  { %v8488_v46 = vsel %vm7764_vm5, %v2767_v37, -1e+30  ;;  %v8520_v58 = vsel %vm7806_vm7, %v2767_v37, -1e+30  ;;  %v8524_v47 = vsel %vm7760_vm4, %v2767_v37, -1e+30 }
 0x8ae   :  { %3579 = vmax.xlane.f32.xlu1 %v8456_v2  ;;  %3938 = vmax.xlane.f32.xlu0 %v8460_v52  ;;  %10496 = vst [vmem:[#allocation63_spill] sm:$0xff] %v8488_v46  ;;  %10500 = vst [vmem:[#allocation67_spill] sm:$0xff] %v8520_v58  ;;  %v2921_v8 = vsel %vm2883_vm0, %v8851_v54, 1e+09 }
 0x8af   :  { %v8467_v16 = vpop.xlane.xlu1 %3904  ;;  %v8469_v25 = vpop.xlane.xlu0 %3902  ;;  %10501 = vst [vmem:[#allocation68_spill] sm:$0xff] %v8524_v47 }
 0x8b0   :  { %vm3965_vm15 = vcmp.eq.f32.partialorder %v7854_v56, %v8469_v25 }
 0x8b1   :  { %v3997_v42 = vsel %vm3965_vm15, %v8851_v54, 1e+09 }
 0x8b2   :  { %3940 = vmax.xlane.f32.xlu1 %v8474_v11  ;;  %2857 = vmax.xlane.f32.xlu0 %v8478_v21  ;;  %v8502_v21 = vsel %vm7787_vm6, %v2767_v37, -1e+30  ;;  %v8542_v37 = vsel %vm7764_vm5, %v2768_v26, -1e+30 }
 0x8b3   :  { %v8482_v2 = vpop.xlane.xlu1 %2823  ;;  %v8484_v52 = vpop.xlane.xlu0 %3186  ;;  %10498 = vst [vmem:[#allocation65_spill] sm:$0xff] %v8502_v21  ;;  %10504 = vst [vmem:[#allocation71_spill] sm:$0xff] %v8542_v37 }
 0x8b4   :  { %vm2884_vm1 = vcmp.eq.f32.partialorder %v7861_v50, %v8482_v2  ;;  %vm3248_vm2 = vcmp.eq.f32.partialorder %v7865_v55, %v8484_v52 }
 0x8b5   :  { %v2922_v25 = vsel %vm2884_vm1, %v8851_v54, 1e+09  ;;  %v3280_v1 = vsel %vm3248_vm2, %v8851_v54, 1e+09 }
 0x8b6   :  { %2859 = vmax.xlane.f32.xlu1 %v8488_v46  ;;  %3222 = vmax.xlane.f32.xlu0 %v8492_v20 }
 0x8b7   :  { %v8496_v23 = vpop.xlane.xlu1 %3188  ;;  %v8498_v11 = vpop.xlane.xlu0 %3545 }
 0x8b8   :  { %vm3249_vm3 = vcmp.eq.f32.partialorder %v7878_v31, %v8496_v23 }
 0x8b9   :  { %v3281_v2 = vsel %vm3249_vm3, %v8851_v54, 1e+09 }
 0x8ba   :  { %3224 = vmax.xlane.f32.xlu1 %v8502_v21  ;;  %3581 = vmax.xlane.f32.xlu0 %v8506_v0  ;;  %v2735_v21 = vld [vmem:[%s9995_s12 + $0xb8] sm:$0xff] }
 0x8bb   :  { %v8513_v20 = vpop.xlane.xlu1 %3547  ;;  %v8515_v46 = vpop.xlane.xlu0 %3906  ;;  %v2769_v62 = vadd.f32 %v2735_v21, %v8170_v60  ;;  %v8556_v60 = vsel %vm7787_vm6, %v2768_v26, -1e+30 }
 0x8bc   :  { %10506 = vst [vmem:[#allocation73_spill] sm:$0xff] %v8556_v60 }
 0x8bd   :  { %v8552_v27 = vsel %vm7764_vm5, %v2769_v62, -1e+30  ;;  %v8588_v26 = vsel %vm7760_vm4, %v2769_v62, -1e+30 }
 0x8be   :  { %3583 = vmax.xlane.f32.xlu1 %v8520_v58  ;;  %3942 = vmax.xlane.f32.xlu0 %v8524_v47  ;;  %10505 = vst [vmem:[#allocation72_spill] sm:$0xff] %v8552_v27  ;;  %10511 = vst [vmem:[#allocation78_spill] sm:$0xff] %v8588_v26 }
 0x8bf   :  { %v8531_v0 = vpop.xlane.xlu1 %3908  ;;  %v8533_v41 = vpop.xlane.xlu0 %2825 }
 0x8c0   :  { %10502 = vst [vmem:[#allocation69_spill] sm:$0xff] %v8531_v0  ;;  %v8584_v0 = vsel %vm7806_vm7, %v2769_v62, -1e+30  ;;  %vm2885_vm8 = vcmp.eq.f32.partialorder %v7922_v51, %v8533_v41 }
 0x8c1   :  { %10510 = vst [vmem:[#allocation77_spill] sm:$0xff] %v8584_v0 }
 0x8c2   :  { %3944 = vmax.xlane.f32.xlu1 %v8538_v4  ;;  %2861 = vmax.xlane.f32.xlu0 %v8542_v37  ;;  %v8566_v37 = vsel %vm7787_vm6, %v2769_v62, -1e+30  ;;  %v8606_v62 = vsel %vm7764_vm5, %v2770_v57, -1e+30 }
 0x8c3   :  { %v8546_v58 = vpop.xlane.xlu1 %2827  ;;  %v8548_v47 = vpop.xlane.xlu0 %3190  ;;  %10507 = vst [vmem:[#allocation74_spill] sm:$0xff] %v8566_v37  ;;  %10514 = vst [vmem:[#allocation81_spill] sm:$0xff] %v8606_v62 }
 0x8c4   :  { %vm3250_vm10 = vcmp.eq.f32.partialorder %v7935_v10, %v8548_v47 }
 0x8c6   :  { %2863 = vmax.xlane.f32.xlu1 %v8552_v27  ;;  %3226 = vmax.xlane.f32.xlu0 %v8556_v60 }
 0x8c7   :  { %v8560_v21 = vpop.xlane.xlu1 %3192  ;;  %v8562_v4 = vpop.xlane.xlu0 %3549 }
 0x8c8   :  { %vm3609_vm12 = vcmp.eq.f32.partialorder %v7956_v17, %v8562_v4 }
 0x8ca   :  { %3228 = vmax.xlane.f32.xlu1 %v8566_v37  ;;  %3585 = vmax.xlane.f32.xlu0 %v8570_v44  ;;  %v2737_v37 = vld [vmem:[%s9995_s12 + $0xc8] sm:$0xff] }
 0x8cb   :  { %v8577_v60 = vpop.xlane.xlu1 %3551  ;;  %v8579_v27 = vpop.xlane.xlu0 %3910  ;;  %v2771_v38 = vadd.f32 %v2737_v37, %v8211_v18  ;;  %v8620_v18 = vsel %vm7787_vm6, %v2770_v57, -1e+30 }
 0x8cc   :  { %10509 = vst [vmem:[#allocation76_spill] sm:$0xff] %v8579_v27  ;;  %10518 = vst [vmem:[#allocation85_spill] sm:$0xff] %v8620_v18  ;;  %vm3610_vm13 = vcmp.eq.f32.partialorder %v7965_v28, %v8577_v60 }
 0x8cd   :  { %v3642_v47 = vsel %vm3610_vm13, %v8851_v54, 1e+09 }
 0x8ce   :  { %3587 = vmax.xlane.f32.xlu1 %v8584_v0  ;;  %3946 = vmax.xlane.f32.xlu0 %v8588_v26 }
 0x8cf   :  { %v8595_v44 = vpop.xlane.xlu1 %3912  ;;  %v8597_v27 = vpop.xlane.xlu0 %2829 }
 0x8d0   :  { %10512 = vst [vmem:[#allocation79_spill] sm:$0xff] %v8595_v44  ;;  %v8616_v44 = vsel %vm7764_vm5, %v2771_v38, -1e+30 }
 0x8d1   :  { %10517 = vst [vmem:[#allocation84_spill] sm:$0xff] %v8616_v44 }
 0x8d2   :  { %3948 = vmax.xlane.f32.xlu1 %v8602_v22  ;;  %2865 = vmax.xlane.f32.xlu0 %v8606_v62  ;;  %v8630_v62 = vsel %vm7787_vm6, %v2771_v38, -1e+30 }
 0x8d3   :  { %v8610_v0 = vpop.xlane.xlu1 %2831  ;;  %v8612_v26 = vpop.xlane.xlu0 %3194  ;;  %10521 = vst [vmem:[#allocation88_spill] sm:$0xff] %v8630_v62 }
 0x8d4   :  { %10515 = vst [vmem:[#allocation82_spill] sm:$0xff] %v8610_v0  ;;  %10516 = vst [vmem:[#allocation83_spill] sm:$0xff] %v8612_v26  ;;  %v8634_v26 = vsel %vm7806_vm7, %v2770_v57, -1e+30  ;;  %v2738_v0 = vld [vmem:[%s9995_s12 + $0xd0] sm:$0xff] }
 0x8d5   :  { %10522 = vst [vmem:[#allocation89_spill] sm:$0xff] %v8634_v26  ;;  %v8652_v57 = vsel %vm7760_vm4, %v2771_v38, -1e+30 }
 0x8d6   :  { %2867 = vmax.xlane.f32.xlu1 %v8616_v44  ;;  %3230 = vmax.xlane.f32.xlu0 %v8620_v18  ;;  %10525 = vst [vmem:[#allocation92_spill] sm:$0xff] %v8652_v57 }
 0x8d7   :  { %v8624_v37 = vpop.xlane.xlu1 %3196  ;;  %v8626_v22 = vpop.xlane.xlu0 %3553 }
 0x8d8   :  { %10519 = vst [vmem:[#allocation86_spill] sm:$0xff] %v8624_v37  ;;  %10520 = vst [vmem:[#allocation87_spill] sm:$0xff] %v8626_v22  ;;  %v2772_v22 = vadd.f32 %v2738_v0, %v8229_v12  ;;  %v8648_v37 = vsel %vm7806_vm7, %v2771_v38, -1e+30 }
 0x8d9   :  { %10524 = vst [vmem:[#allocation91_spill] sm:$0xff] %v8648_v37 }
 0x8da   :  { %3232 = vmax.xlane.f32.xlu1 %v8630_v62  ;;  %3589 = vmax.xlane.f32.xlu0 %v8634_v26  ;;  %v2739_v62 = vld [vmem:[%s9995_s12 + $0xd8] sm:$0xff]  ;;  %v8666_v12 = vsel %vm7760_vm4, %v2772_v22, -1e+30  ;;  %v8670_v38 = vsel %vm7764_vm5, %v2772_v22, -1e+30 }
 0x8db   :  { %v8641_v18 = vpop.xlane.xlu1 %3555  ;;  %v8643_v44 = vpop.xlane.xlu0 %3914  ;;  %v2773_v0 = vadd.f32 %v2739_v62, %v8246_v13  ;;  %10527 = vst [vmem:[#allocation94_spill] sm:$0xff] %v8666_v12  ;;  %10528 = vst [vmem:[#allocation95_spill] sm:$0xff] %v8670_v38  ;;  %v8684_v13 = vsel %vm7787_vm6, %v2772_v22, -1e+30 }
 0x8dc   :  { %10523 = vst [vmem:[#allocation90_spill] sm:$0xff] %v8643_v44  ;;  %10532 = vst [vmem:[#allocation99_spill] sm:$0xff] %v8684_v13 }
 0x8de   :  { %3591 = vmax.xlane.f32.xlu1 %v8648_v37  ;;  %3950 = vmax.xlane.f32.xlu0 %v8652_v57 }
 0x8df   :  { %v8659_v26 = vpop.xlane.xlu1 %3916  ;;  %v8661_v44 = vpop.xlane.xlu0 %2833 }
 0x8e0   :  { %10526 = vst [vmem:[#allocation93_spill] sm:$0xff] %v8659_v26  ;;  %v8680_v26 = vsel %vm7764_vm5, %v2773_v0, -1e+30 }
 0x8e1   :  { %10531 = vst [vmem:[#allocation98_spill] sm:$0xff] %v8680_v26 }
 0x8e2   :  { %3952 = vmax.xlane.f32.xlu1 %v8666_v12  ;;  %2869 = vmax.xlane.f32.xlu0 %v8670_v38  ;;  %v8694_v38 = vsel %vm7787_vm6, %v2773_v0, -1e+30 }
 0x8e3   :  { %v8674_v37 = vpop.xlane.xlu1 %2835  ;;  %v8676_v57 = vpop.xlane.xlu0 %3198  ;;  %10535 = vst [vmem:[#allocation102_spill] sm:$0xff] %v8694_v38 }
 0x8e4   :  { %10529 = vst [vmem:[#allocation96_spill] sm:$0xff] %v8674_v37  ;;  %10530 = vst [vmem:[#allocation97_spill] sm:$0xff] %v8676_v57  ;;  %v8698_v57 = vsel %vm7806_vm7, %v2772_v22, -1e+30  ;;  %v2740_v37 = vld [vmem:[%s9995_s12 + $0xe0] sm:$0xff] }
 0x8e5   :  { %10536 = vst [vmem:[#allocation103_spill] sm:$0xff] %v8698_v57  ;;  %v8716_v22 = vsel %vm7760_vm4, %v2773_v0, -1e+30 }
 0x8e6   :  { %2871 = vmax.xlane.f32.xlu1 %v8680_v26  ;;  %3234 = vmax.xlane.f32.xlu0 %v8684_v13  ;;  %10539 = vst [vmem:[#allocation106_spill] sm:$0xff] %v8716_v22 }
 0x8e7   :  { %v8688_v62 = vpop.xlane.xlu1 %3200  ;;  %v8690_v12 = vpop.xlane.xlu0 %3557 }
 0x8e8   :  { %10533 = vst [vmem:[#allocation100_spill] sm:$0xff] %v8688_v62  ;;  %10534 = vst [vmem:[#allocation101_spill] sm:$0xff] %v8690_v12  ;;  %v2774_v12 = vadd.f32 %v2740_v37, %v8271_v24  ;;  %v8712_v62 = vsel %vm7806_vm7, %v2773_v0, -1e+30 }
 0x8e9   :  { %10538 = vst [vmem:[#allocation105_spill] sm:$0xff] %v8712_v62 }
 0x8ea   :  { %3236 = vmax.xlane.f32.xlu1 %v8694_v38  ;;  %3593 = vmax.xlane.f32.xlu0 %v8698_v57  ;;  %v2741_v38 = vld [vmem:[%s9995_s12 + $0xe8] sm:$0xff]  ;;  %v8730_v37 = vsel %vm7760_vm4, %v2774_v12, -1e+30  ;;  %v8734_v0 = vsel %vm7764_vm5, %v2774_v12, -1e+30 }
 0x8eb   :  { %v8705_v13 = vpop.xlane.xlu1 %3559  ;;  %v8707_v26 = vpop.xlane.xlu0 %3918  ;;  %v2775_v24 = vadd.f32 %v2741_v38, %v8287_v59  ;;  %10541 = vst [vmem:[#allocation108_spill] sm:$0xff] %v8730_v37  ;;  %10542 = vst [vmem:[#allocation109_spill] sm:$0xff] %v8734_v0  ;;  %v8748_v59 = vsel %vm7787_vm6, %v2774_v12, -1e+30 }
 0x8ec   :  { %10537 = vst [vmem:[#allocation104_spill] sm:$0xff] %v8707_v26  ;;  %10546 = vst [vmem:[#allocation113_spill] sm:$0xff] %v8748_v59 }
 0x8ee   :  { %3595 = vmax.xlane.f32.xlu1 %v8712_v62  ;;  %3954 = vmax.xlane.f32.xlu0 %v8716_v22 }
 0x8ef   :  { %v8723_v57 = vpop.xlane.xlu1 %3920  ;;  %v8725_v26 = vpop.xlane.xlu0 %2837 }
 0x8f0   :  { %10540 = vst [vmem:[#allocation107_spill] sm:$0xff] %v8723_v57  ;;  %v8744_v57 = vsel %vm7764_vm5, %v2775_v24, -1e+30 }
 0x8f1   :  { %10545 = vst [vmem:[#allocation112_spill] sm:$0xff] %v8744_v57 }
 0x8f2   :  { %3956 = vmax.xlane.f32.xlu1 %v8730_v37  ;;  %2873 = vmax.xlane.f32.xlu0 %v8734_v0  ;;  %v8758_v0 = vsel %vm7787_vm6, %v2775_v24, -1e+30 }
 0x8f3   :  { %v8738_v62 = vpop.xlane.xlu1 %2839  ;;  %v8740_v22 = vpop.xlane.xlu0 %3202  ;;  %10549 = vst [vmem:[#allocation116_spill] sm:$0xff] %v8758_v0 }
 0x8f4   :  { %10543 = vst [vmem:[#allocation110_spill] sm:$0xff] %v8738_v62  ;;  %10544 = vst [vmem:[#allocation111_spill] sm:$0xff] %v8740_v22  ;;  %v8762_v22 = vsel %vm7806_vm7, %v2774_v12, -1e+30  ;;  %v2742_v62 = vld [vmem:[%s9995_s12 + $0xf0] sm:$0xff] }
 0x8f5   :  { %10550 = vst [vmem:[#allocation117_spill] sm:$0xff] %v8762_v22  ;;  %v8780_v12 = vsel %vm7760_vm4, %v2775_v24, -1e+30 }
 0x8f6   :  { %2875 = vmax.xlane.f32.xlu1 %v8744_v57  ;;  %3238 = vmax.xlane.f32.xlu0 %v8748_v59  ;;  %10553 = vst [vmem:[#allocation120_spill] sm:$0xff] %v8780_v12 }
 0x8f7   :  { %v8752_v38 = vpop.xlane.xlu1 %3204  ;;  %v8754_v37 = vpop.xlane.xlu0 %3561 }
 0x8f8   :  { %10547 = vst [vmem:[#allocation114_spill] sm:$0xff] %v8752_v38  ;;  %10548 = vst [vmem:[#allocation115_spill] sm:$0xff] %v8754_v37  ;;  %v2776_v37 = vadd.f32 %v2742_v62, %v8305_v15  ;;  %v8776_v38 = vsel %vm7806_vm7, %v2775_v24, -1e+30 }
 0x8f9   :  { %10552 = vst [vmem:[#allocation119_spill] sm:$0xff] %v8776_v38 }
 0x8fa   :  { %3240 = vmax.xlane.f32.xlu1 %v8758_v0  ;;  %3597 = vmax.xlane.f32.xlu0 %v8762_v22  ;;  %v2743_v0 = vld [vmem:[%s9995_s12 + $0xf8] sm:$0xff]  ;;  %v8794_v62 = vsel %vm7760_vm4, %v2776_v37, -1e+30  ;;  %v8798_v24 = vsel %vm7764_vm5, %v2776_v37, -1e+30 }
 0x8fb   :  { %v8769_v59 = vpop.xlane.xlu1 %3563  ;;  %v8771_v57 = vpop.xlane.xlu0 %3922  ;;  %v2777_v15 = vadd.f32 %v2743_v0, %v8322_v6  ;;  %10555 = vst [vmem:[#allocation122_spill] sm:$0xff] %v8794_v62  ;;  %10556 = vst [vmem:[#allocation123_spill] sm:$0xff] %v8798_v24  ;;  %v8812_v6 = vsel %vm7787_vm6, %v2776_v37, -1e+30  ;;  %v8826_v3 = vsel %vm7806_vm7, %v2776_v37, -1e+30 }
 0x8fc   :  { %10551 = vst [vmem:[#allocation118_spill] sm:$0xff] %v8771_v57  ;;  %10559 = vst [vmem:[#allocation126_spill] sm:$0xff] %v8812_v6 }
 0x8fd   :  { %10561 = vst [vmem:[#allocation128_spill] sm:$0xff] %v8826_v3  ;;  %v8840_v40 = vsel %vm7760_vm4, %v2777_v15, -1e+30  ;;  %vm3607_vm4 = vcmp.eq.f32.partialorder %v7882_v14, %v8498_v11 }
 0x8fe   :  { %3599 = vmax.xlane.f32.xlu1 %v8776_v38  ;;  %3958 = vmax.xlane.f32.xlu0 %v8780_v12  ;;  %10563 = vst [vmem:[#allocation130_spill] sm:$0xff] %v8840_v40  ;;  %v3639_v23 = vsel %vm3607_vm4, %v8851_v54, 1e+09 }
 0x8ff   :  { %v8787_v22 = vpop.xlane.xlu1 %3924  ;;  %v8789_v57 = vpop.xlane.xlu0 %2841 }
 0x900   :  { %10554 = vst [vmem:[#allocation121_spill] sm:$0xff] %v8787_v22  ;;  %v8808_v22 = vsel %vm7764_vm5, %v2777_v15, -1e+30  ;;  %vm3608_vm5 = vcmp.eq.f32.partialorder %v7891_v43, %v8513_v20 }
 0x901   :  { %10558 = vst [vmem:[#allocation125_spill] sm:$0xff] %v8808_v22  ;;  %v3640_v52 = vsel %vm3608_vm5, %v8851_v54, 1e+09 }
 0x902   :  { %3960 = vmax.xlane.f32.xlu1 %v8794_v62  ;;  %2877 = vmax.xlane.f32.xlu0 %v8798_v24  ;;  %v8822_v24 = vsel %vm7787_vm6, %v2777_v15, -1e+30  ;;  %vm3966_vm6 = vcmp.eq.f32.partialorder %v7850_v29, %v8467_v16  ;;  %v2923_v16 = vsel %vm2885_vm8, %v8851_v54, 1e+09 }
 0x903   :  { %v8802_v38 = vpop.xlane.xlu1 %2843  ;;  %v8804_v12 = vpop.xlane.xlu0 %3206  ;;  %10560 = vst [vmem:[#allocation127_spill] sm:$0xff] %v8822_v24  ;;  %v3998_v20 = vsel %vm3966_vm6, %v8851_v54, 1e+09 }
 0x904   :  { %10557 = vst [vmem:[#allocation124_spill] sm:$0xff] %v8804_v12 }
 0x906   :  { %2879 = vmax.xlane.f32.xlu1 %v8808_v22  ;;  %3242 = vmax.xlane.f32.xlu0 %v8812_v6  ;;  %v8836_v6 = vsel %vm7806_vm7, %v2777_v15, -1e+30  ;;  %v2920_v15 = vsel %vm2882_vm9, %v8851_v54, 1e+09  ;;  %vm3967_vm7 = vcmp.eq.f32.partialorder %v7898_v9, %v8515_v46  ;;  %vm2886_vm9 = vcmp.eq.f32.partialorder %v7931_v61, %v8546_v58 }
 0x907   :  { %v8816_v0 = vpop.xlane.xlu1 %3208  ;;  %v8818_v62 = vpop.xlane.xlu0 %3565  ;;  %10562 = vst [vmem:[#allocation129_spill] sm:$0xff] %v8836_v6  ;;  %v3999_v11 = vsel %vm3967_vm7, %v8851_v54, 1e+09  ;;  %v2924_v46 = vsel %vm2886_vm9, %v8851_v54, 1e+09 }
 0x908   :  { %v3282_v58 = vsel %vm3250_vm10, %v8851_v54, 1e+09 }
 0x90a   :  { %3244 = vmax.xlane.f32.xlu1 %v8822_v24  ;;  %3601 = vmax.xlane.f32.xlu0 %v8826_v3  ;;  %v10606_v3 = vld [vmem:[#allocation7_spill] sm:$0xff]  ;;  %v10609_v24 = vld [vmem:[#allocation118_spill] sm:$0xff] }
 0x90b   :  { %v8830_v12 = vpop.xlane.xlu1 %3567  ;;  %v8832_v22 = vpop.xlane.xlu0 %3926 }
 0x90e   :  { %3603 = vmax.xlane.f32.xlu1 %v8836_v6  ;;  %3962 = vmax.xlane.f32.xlu0 %v8840_v40  ;;  %v3278_v40 = vsel %vm3246_vm11, %v8851_v54, 1e+09  ;;  %vm3251_vm11 = vcmp.eq.f32.partialorder %v7952_v36, %v8560_v21  ;;  %v3641_v21 = vsel %vm3609_vm12, %v8851_v54, 1e+09  ;;  %v10603_v6 = vld [vmem:[#allocation30_spill] sm:$0xff] }
 0x90f   :  { %v8853_v37 = vpop.xlane.xlu1 %3928  ;;  %v8855_v32 = vpop.xlane.xlu0 %2845  ;;  %v3283_v41 = vsel %vm3251_vm11, %v8851_v54, 1e+09 }
 0x912   :  { %2953 = vmin.xlane.f32.xlu1 %v2920_v15  ;;  %2951 = vmin.xlane.f32.xlu0 %v2919_v49  ;;  %v10565_v15 = vld [vmem:[#allocation2_spill] sm:$0xff]  ;;  %v10566_v49 = vld [vmem:[#allocation76_spill] sm:$0xff] }
 0x913   :  { %v8863_v53 = vpop.xlane.xlu1 %2847  ;;  %v8865_v48 = vpop.xlane.xlu0 %3210 }
 0x916   :  { %3312 = vmin.xlane.f32.xlu1 %v3279_v39  ;;  %3310 = vmin.xlane.f32.xlu0 %v3278_v40  ;;  %v10564_v40 = vld [vmem:[#allocation69_spill] sm:$0xff] }
 0x917   :  { %v8873_v33 = vpop.xlane.xlu1 %3212  ;;  %v8875_v63 = vpop.xlane.xlu0 %3569  ;;  %vm3968_vm14 = vcmp.eq.f32.partialorder %v10565_v15, %v10564_v40  ;;  %v10567_v39 = vld [vmem:[#allocation17_spill] sm:$0xff] }
 0x918   :  { %vm3969_vm15 = vcmp.eq.f32.partialorder %v10567_v39, %v10566_v49  ;;  %v4000_v60 = vsel %vm3968_vm14, %v8851_v54, 1e+09  ;;  %v10578_v39 = vld [vmem:[#allocation79_spill] sm:$0xff] }
 0x919   :  { %v4001_v4 = vsel %vm3969_vm15, %v8851_v54, 1e+09 }
 0x91a   :  { %3671 = vmin.xlane.f32.xlu1 %v3638_v19  ;;  %3669 = vmin.xlane.f32.xlu0 %v3637_v34  ;;  %v10568_v19 = vld [vmem:[#allocation44_spill] sm:$0xff]  ;;  %v10569_v34 = vld [vmem:[#allocation82_spill] sm:$0xff] }
 0x91b   :  { %v8883_v35 = vpop.xlane.xlu1 %3571  ;;  %v8885_v5 = vpop.xlane.xlu0 %3930  ;;  %vm2887_vm0 = vcmp.eq.f32.partialorder %v10568_v19, %v8597_v27  ;;  %v10581_v19 = vld [vmem:[#allocation23_spill] sm:$0xff] }
 0x91e   :  { %4030 = vmin.xlane.f32.xlu1 %v3997_v42  ;;  %4028 = vmin.xlane.f32.xlu0 %v3996_v30  ;;  %v10570_v42 = vld [vmem:[#allocation45_spill] sm:$0xff] }
 0x91f   :  { %v8893_v7 = vpop.xlane.xlu1 %3932  ;;  %v8895_v56 = vpop.xlane.xlu0 %2849  ;;  %vm2888_vm1 = vcmp.eq.f32.partialorder %v10570_v42, %v10569_v34 }
 0x922   :  { %2957 = vmin.xlane.f32.xlu1 %v2922_v25  ;;  %2955 = vmin.xlane.f32.xlu0 %v2921_v8  ;;  %v2926_v8 = vsel %vm2888_vm1, %v8851_v54, 1e+09 }
 0x923   :  { %v8903_v45 = vpop.xlane.xlu1 %2851  ;;  %v8905_v50 = vpop.xlane.xlu0 %3214 }
 0x926   :  { %3316 = vmin.xlane.f32.xlu1 %v3281_v2  ;;  %3314 = vmin.xlane.f32.xlu0 %v3280_v1  ;;  %v2925_v2 = vsel %vm2887_vm0, %v8851_v54, 1e+09  ;;  %v10571_v1 = vld [vmem:[#allocation83_spill] sm:$0xff] }
 0x927   :  { %v8913_v55 = vpop.xlane.xlu1 %3216  ;;  %v8915_v31 = vpop.xlane.xlu0 %3573 }
 0x92a   :  { %3675 = vmin.xlane.f32.xlu1 %v3640_v52  ;;  %3673 = vmin.xlane.f32.xlu0 %v3639_v23  ;;  %v10572_v52 = vld [vmem:[#allocation46_spill] sm:$0xff] }
 0x92b   :  { %v8923_v14 = vpop.xlane.xlu1 %3575  ;;  %v8925_v43 = vpop.xlane.xlu0 %3934  ;;  %vm3252_vm2 = vcmp.eq.f32.partialorder %v10572_v52, %v10571_v1  ;;  %v10573_v23 = vld [vmem:[#allocation86_spill] sm:$0xff]  ;;  %v10583_v1 = vld [vmem:[#allocation96_spill] sm:$0xff]  ;;  %v10584_v52 = vld [vmem:[#allocation25_spill] sm:$0xff] }
 0x92c   :  { %vm2890_vm9 = vcmp.eq.f32.partialorder %v10584_v52, %v10583_v1 }
 0x92e   :  { %4034 = vmin.xlane.f32.xlu1 %v3999_v11  ;;  %4032 = vmin.xlane.f32.xlu0 %v3998_v20  ;;  %v10574_v11 = vld [vmem:[#allocation47_spill] sm:$0xff] }
 0x92f   :  { %v8933_v29 = vpop.xlane.xlu1 %3936  ;;  %v8935_v9 = vpop.xlane.xlu0 %2853  ;;  %vm3253_vm3 = vcmp.eq.f32.partialorder %v10574_v11, %v10573_v23 }
 0x932   :  { %2961 = vmin.xlane.f32.xlu1 %v2924_v46  ;;  %2959 = vmin.xlane.f32.xlu0 %v2923_v16  ;;  %v3285_v46 = vsel %vm3253_vm3, %v8851_v54, 1e+09  ;;  %v3284_v16 = vsel %vm3252_vm2, %v8851_v54, 1e+09 }
 0x933   :  { %v8943_v51 = vpop.xlane.xlu1 %2855  ;;  %v8945_v61 = vpop.xlane.xlu0 %3218 }
 0x936   :  { %3320 = vmin.xlane.f32.xlu1 %v3283_v41  ;;  %3318 = vmin.xlane.f32.xlu0 %v3282_v58  ;;  %v10575_v41 = vld [vmem:[#allocation87_spill] sm:$0xff]  ;;  %v10576_v58 = vld [vmem:[#allocation21_spill] sm:$0xff] }
 0x937   :  { %v8953_v10 = vpop.xlane.xlu1 %3220  ;;  %v8955_v36 = vpop.xlane.xlu0 %3577  ;;  %vm3611_vm4 = vcmp.eq.f32.partialorder %v10576_v58, %v10575_v41  ;;  %v10585_v41 = vld [vmem:[#allocation97_spill] sm:$0xff]  ;;  %v10586_v58 = vld [vmem:[#allocation26_spill] sm:$0xff] }
 0x938   :  { %v3643_v49 = vsel %vm3611_vm4, %v8851_v54, 1e+09  ;;  %vm3254_vm10 = vcmp.eq.f32.partialorder %v10586_v58, %v10585_v41  ;;  %v10594_v41 = vld [vmem:[#allocation104_spill] sm:$0xff] }
 0x939   :  { %v10595_v58 = vld [vmem:[#allocation28_spill] sm:$0xff] }
 0x93a   :  { %3679 = vmin.xlane.f32.xlu1 %v3642_v47  ;;  %3677 = vmin.xlane.f32.xlu0 %v3641_v21  ;;  %v10577_v47 = vld [vmem:[#allocation22_spill] sm:$0xff]  ;;  %vm3973_vm15 = vcmp.eq.f32.partialorder %v10595_v58, %v10594_v41  ;;  %v10601_v41 = vld [vmem:[#allocation4_spill] sm:$0xff] }
 0x93b   :  { %v8963_v17 = vpop.xlane.xlu1 %3579  ;;  %v8965_v28 = vpop.xlane.xlu0 %3938  ;;  %vm3612_vm5 = vcmp.eq.f32.partialorder %v10577_v47, %v8641_v18  ;;  %v10587_v47 = vld [vmem:[#allocation100_spill] sm:$0xff]  ;;  %v10602_v58 = vld [vmem:[#allocation114_spill] sm:$0xff] }
 0x93c   :  { %v3644_v15 = vsel %vm3612_vm5, %v8851_v54, 1e+09  ;;  %vm3257_vm3 = vcmp.eq.f32.partialorder %v10603_v6, %v10602_v58  ;;  %vm3616_vm5 = vcmp.eq.f32.partialorder %v10606_v3, %v8769_v59  ;;  %v10608_v58 = vld [vmem:[#allocation27_spill] sm:$0xff] }
 0x93e   :  { %4038 = vmin.xlane.f32.xlu1 %v4001_v4  ;;  %4036 = vmin.xlane.f32.xlu0 %v4000_v60  ;;  %v10579_v4 = vld [vmem:[#allocation13_spill] sm:$0xff]  ;;  %v10580_v60 = vld [vmem:[#allocation90_spill] sm:$0xff] }
 0x93f   :  { %v8973_v30 = vpop.xlane.xlu1 %3940  ;;  %v8975_v25 = vpop.xlane.xlu0 %2857  ;;  %vm3970_vm6 = vcmp.eq.f32.partialorder %v10579_v4, %v10578_v39  ;;  %vm3971_vm7 = vcmp.eq.f32.partialorder %v10581_v19, %v10580_v60  ;;  %v3286_v4 = vsel %vm3254_vm10, %v8851_v54, 1e+09  ;;  %v10589_v60 = vld [vmem:[#allocation101_spill] sm:$0xff]  ;;  %v10590_v19 = vld [vmem:[#allocation24_spill] sm:$0xff] }
 0x940   :  { %v4003_v42 = vsel %vm3971_vm7, %v8851_v54, 1e+09  ;;  %vm3613_vm12 = vcmp.eq.f32.partialorder %v10590_v19, %v10589_v60  ;;  %v10597_v60 = vld [vmem:[#allocation110_spill] sm:$0xff] }
 0x941   :  { %v3645_v52 = vsel %vm3613_vm12, %v8851_v54, 1e+09  ;;  %v10598_v19 = vld [vmem:[#allocation10_spill] sm:$0xff] }
 0x942   :  { %2965 = vmin.xlane.f32.xlu1 %v2926_v8  ;;  %2963 = vmin.xlane.f32.xlu0 %v2925_v2  ;;  %v4002_v8 = vsel %vm3970_vm6, %v8851_v54, 1e+09  ;;  %v10582_v2 = vld [vmem:[#allocation3_spill] sm:$0xff]  ;;  %vm2892_vm1 = vcmp.eq.f32.partialorder %v10598_v19, %v10597_v60  ;;  %v10605_v19 = vld [vmem:[#allocation6_spill] sm:$0xff] }
 0x943   :  { %v8983_v27 = vpop.xlane.xlu1 %2859  ;;  %v8985_v20 = vpop.xlane.xlu0 %3222  ;;  %vm2889_vm8 = vcmp.eq.f32.partialorder %v10582_v2, %v8661_v44  ;;  %v10604_v60 = vld [vmem:[#allocation115_spill] sm:$0xff] }
 0x944   :  { %vm3615_vm4 = vcmp.eq.f32.partialorder %v10605_v19, %v10604_v60  ;;  %v10613_v19 = vld [vmem:[#allocation32_spill] sm:$0xff] }
 0x946   :  { %3324 = vmin.xlane.f32.xlu1 %v3285_v46  ;;  %3322 = vmin.xlane.f32.xlu0 %v3284_v16  ;;  %v2928_v46 = vsel %vm2890_vm9, %v8851_v54, 1e+09  ;;  %v2927_v16 = vsel %vm2889_vm8, %v8851_v54, 1e+09  ;;  %vm2894_vm9 = vcmp.eq.f32.partialorder %v10613_v19, %v8802_v38  ;;  %v10619_v19 = vld [vmem:[#allocation36_spill] sm:$0xff] }
 0x947   :  { %v8993_v21 = vpop.xlane.xlu1 %3224  ;;  %v8995_v40 = vpop.xlane.xlu0 %3581 }
 0x94a   :  { %3683 = vmin.xlane.f32.xlu1 %v3644_v15  ;;  %3681 = vmin.xlane.f32.xlu0 %v3643_v49  ;;  %v10588_v15 = vld [vmem:[#allocation20_spill] sm:$0xff] }
 0x94b   :  { %v9003_v34 = vpop.xlane.xlu1 %3583  ;;  %v9005_v18 = vpop.xlane.xlu0 %3942  ;;  %vm3255_vm11 = vcmp.eq.f32.partialorder %v10588_v15, %v10587_v47  ;;  %v4005_v15 = vsel %vm3973_vm15, %v8851_v54, 1e+09 }
 0x94c   :  { %v3287_v39 = vsel %vm3255_vm11, %v8851_v54, 1e+09 }
 0x94e   :  { %4042 = vmin.xlane.f32.xlu1 %v4003_v42  ;;  %4040 = vmin.xlane.f32.xlu0 %v4002_v8  ;;  %v10591_v42 = vld [vmem:[#allocation29_spill] sm:$0xff] }
 0x94f   :  { %v9013_v23 = vpop.xlane.xlu1 %3944  ;;  %v9015_v11 = vpop.xlane.xlu0 %2861  ;;  %vm3614_vm13 = vcmp.eq.f32.partialorder %v10591_v42, %v8705_v13 }
 0x950   :  { %v3646_v1 = vsel %vm3614_vm13, %v8851_v54, 1e+09  ;;  %vm3618_vm13 = vcmp.eq.f32.partialorder %v10619_v19, %v8830_v12  ;;  %v10624_v19 = vld [vmem:[#allocation12_spill] sm:$0xff] }
 0x952   :  { %2969 = vmin.xlane.f32.xlu1 %v2928_v46  ;;  %2967 = vmin.xlane.f32.xlu0 %v2927_v16  ;;  %v10592_v46 = vld [vmem:[#allocation93_spill] sm:$0xff]  ;;  %v10593_v16 = vld [vmem:[#allocation16_spill] sm:$0xff] }
 0x953   :  { %v9023_v44 = vpop.xlane.xlu1 %2863  ;;  %v9025_v49 = vpop.xlane.xlu0 %3226  ;;  %vm3972_vm14 = vcmp.eq.f32.partialorder %v10593_v16, %v10592_v46  ;;  %v10600_v16 = vld [vmem:[#allocation111_spill] sm:$0xff] }
 0x954   :  { %vm3256_vm2 = vcmp.eq.f32.partialorder %v10601_v41, %v10600_v16  ;;  %v10607_v41 = vld [vmem:[#allocation107_spill] sm:$0xff] }
 0x955   :  { %vm3974_vm6 = vcmp.eq.f32.partialorder %v10608_v58, %v10607_v41  ;;  %v10616_v58 = vld [vmem:[#allocation33_spill] sm:$0xff] }
 0x956   :  { %3328 = vmin.xlane.f32.xlu1 %v3287_v39  ;;  %3326 = vmin.xlane.f32.xlu0 %v3286_v4  ;;  %v4004_v39 = vsel %vm3972_vm14, %v8851_v54, 1e+09  ;;  %v10596_v4 = vld [vmem:[#allocation5_spill] sm:$0xff] }
 0x957   :  { %v9033_v8 = vpop.xlane.xlu1 %3228  ;;  %v9035_v2 = vpop.xlane.xlu0 %3585  ;;  %vm2891_vm0 = vcmp.eq.f32.partialorder %v10596_v4, %v8725_v26  ;;  %v3288_v4 = vsel %vm3256_vm2, %v8851_v54, 1e+09 }
 0x958   :  { %v2929_v46 = vsel %vm2891_vm0, %v8851_v54, 1e+09 }
 0x95a   :  { %3687 = vmin.xlane.f32.xlu1 %v3646_v1  ;;  %3685 = vmin.xlane.f32.xlu0 %v3645_v52  ;;  %v2930_v52 = vsel %vm2892_vm1, %v8851_v54, 1e+09  ;;  %vm2896_vm1 = vcmp.eq.f32.partialorder %v10624_v19, %v8863_v53  ;;  %v10628_v19 = vld [vmem:[#allocation41_spill] sm:$0xff] }
 0x95b   :  { %v9043_v47 = vpop.xlane.xlu1 %3587  ;;  %v9045_v13 = vpop.xlane.xlu0 %3946 }
 0x95e   :  { %4046 = vmin.xlane.f32.xlu1 %v4005_v15  ;;  %4044 = vmin.xlane.f32.xlu0 %v4004_v39  ;;  %v3289_v39 = vsel %vm3257_vm3, %v8851_v54, 1e+09 }
 0x95f   :  { %v9053_v42 = vpop.xlane.xlu1 %3948  ;;  %v9055_v1 = vpop.xlane.xlu0 %2865 }
 0x960   :  { %10599 = vst [vmem:[#allocation69_spill] sm:$0xff] %v9053_v42  ;;  %v10610_v42 = vld [vmem:[#allocation8_spill] sm:$0xff] }
 0x961   :  { %vm3975_vm7 = vcmp.eq.f32.partialorder %v10610_v42, %v10609_v24  ;;  %v2932_v42 = vsel %vm2894_vm9, %v8851_v54, 1e+09 }
 0x962   :  { %2973 = vmin.xlane.f32.xlu1 %v2930_v52  ;;  %2971 = vmin.xlane.f32.xlu0 %v2929_v46  ;;  %v3648_v52 = vsel %vm3616_vm5, %v8851_v54, 1e+09  ;;  %v3647_v46 = vsel %vm3615_vm4, %v8851_v54, 1e+09  ;;  %v4007_v3 = vsel %vm3975_vm7, %v8851_v54, 1e+09  ;;  %vm3620_vm5 = vcmp.eq.f32.partialorder %v10628_v19, %v8883_v35 }
 0x963   :  { %v9063_v26 = vpop.xlane.xlu1 %2867  ;;  %v9065_v15 = vpop.xlane.xlu0 %3230  ;;  %v10632_v19 = vld [vmem:[#allocation40_spill] sm:$0xff] }
 0x964   :  { %vm2898_vm9 = vcmp.eq.f32.partialorder %v10632_v19, %v8903_v45  ;;  %v10637_v19 = vld [vmem:[#allocation51_spill] sm:$0xff] }
 0x966   :  { %3332 = vmin.xlane.f32.xlu1 %v3289_v39  ;;  %3330 = vmin.xlane.f32.xlu0 %v3288_v4  ;;  %v4006_v39 = vsel %vm3974_vm6, %v8851_v54, 1e+09  ;;  %v10612_v4 = vld [vmem:[#allocation31_spill] sm:$0xff] }
 0x967   :  { %v9073_v16 = vpop.xlane.xlu1 %3232  ;;  %v9075_v6 = vpop.xlane.xlu0 %3589  ;;  %vm2893_vm8 = vcmp.eq.f32.partialorder %v10612_v4, %v8789_v57  ;;  %v10618_v4 = vld [vmem:[#allocation35_spill] sm:$0xff] }
 0x968   :  { %vm3617_vm12 = vcmp.eq.f32.partialorder %v10618_v4, %v8818_v62  ;;  %v10623_v4 = vld [vmem:[#allocation19_spill] sm:$0xff] }
 0x969   :  { %vm2895_vm0 = vcmp.eq.f32.partialorder %v10623_v4, %v8855_v32  ;;  %v10627_v4 = vld [vmem:[#allocation18_spill] sm:$0xff] }
 0x96a   :  { %3691 = vmin.xlane.f32.xlu1 %v3648_v52  ;;  %3689 = vmin.xlane.f32.xlu0 %v3647_v46  ;;  %v2931_v52 = vsel %vm2893_vm8, %v8851_v54, 1e+09  ;;  %v10615_v46 = vld [vmem:[#allocation124_spill] sm:$0xff]  ;;  %vm3619_vm4 = vcmp.eq.f32.partialorder %v10627_v4, %v8875_v63  ;;  %v10631_v4 = vld [vmem:[#allocation39_spill] sm:$0xff] }
 0x96b   :  { %v9083_v60 = vpop.xlane.xlu1 %3591  ;;  %v9085_v59 = vpop.xlane.xlu0 %3950  ;;  %vm3258_vm10 = vcmp.eq.f32.partialorder %v10616_v58, %v10615_v46  ;;  %v10621_v58 = vld [vmem:[#allocation9_spill] sm:$0xff]  ;;  %vm2897_vm8 = vcmp.eq.f32.partialorder %v10631_v4, %v8895_v56  ;;  %v10636_v4 = vld [vmem:[#allocation50_spill] sm:$0xff] }
 0x96c   :  { %10611 = vst [vmem:[#allocation2_spill] sm:$0xff] %v9085_v59  ;;  %v10617_v59 = vld [vmem:[#allocation34_spill] sm:$0xff] }
 0x96d   :  { %vm3259_vm11 = vcmp.eq.f32.partialorder %v10617_v59, %v8816_v0  ;;  %v3650_v59 = vsel %vm3618_vm13, %v8851_v54, 1e+09  ;;  %vm3622_vm13 = vcmp.eq.f32.partialorder %v10637_v19, %v8923_v14  ;;  %v10643_v19 = vld [vmem:[#allocation55_spill] sm:$0xff] }
 0x96e   :  { %4050 = vmin.xlane.f32.xlu1 %v4007_v3  ;;  %4048 = vmin.xlane.f32.xlu0 %v4006_v39  ;;  %v3291_v3 = vsel %vm3259_vm11, %v8851_v54, 1e+09  ;;  %v3290_v39 = vsel %vm3258_vm10, %v8851_v54, 1e+09 }
 0x96f   :  { %v9093_v41 = vpop.xlane.xlu1 %3952  ;;  %v9095_v24 = vpop.xlane.xlu0 %2869 }
 0x970   :  { %10614 = vst [vmem:[#allocation76_spill] sm:$0xff] %v9093_v41  ;;  %v10622_v41 = vld [vmem:[#allocation42_spill] sm:$0xff] }
 0x971   :  { %vm3977_vm15 = vcmp.eq.f32.partialorder %v10622_v41, %v8832_v22  ;;  %v2934_v41 = vsel %vm2896_vm1, %v8851_v54, 1e+09  ;;  %vm2900_vm1 = vcmp.eq.f32.partialorder %v10643_v19, %v8943_v51  ;;  %v4904_v51 = vld [vmem:[%s9996_s16] sm:$0xff]  ;;  %v10646_v19 = vmov 0  }
 0x972   :  { %2977 = vmin.xlane.f32.xlu1 %v2932_v42  ;;  %2975 = vmin.xlane.f32.xlu0 %v2931_v52  ;;  %v3649_v42 = vsel %vm3617_vm12, %v8851_v54, 1e+09  ;;  %v10620_v52 = vld [vmem:[#allocation121_spill] sm:$0xff]  ;;  %vm3621_vm12 = vcmp.eq.f32.partialorder %v10636_v4, %v8915_v31  ;;  %v10642_v4 = vld [vmem:[#allocation54_spill] sm:$0xff]  ;;  %4840 = vtanh.f32 %v4904_v51 }
 0x973   :  { %v9103_v57 = vpop.xlane.xlu1 %2871  ;;  %v9105_v38 = vpop.xlane.xlu0 %3234  ;;  %vm3976_vm14 = vcmp.eq.f32.partialorder %v10621_v58, %v10620_v52  ;;  %v10626_v58 = vld [vmem:[#allocation15_spill] sm:$0xff]  ;;  %v10649_v51 = vld [vmem:[#allocation53_spill] sm:$0xff] }
 0x974   :  { %vm3261_vm3 = vcmp.eq.f32.partialorder %v10626_v58, %v8873_v33  ;;  %v10630_v58 = vld [vmem:[#allocation37_spill] sm:$0xff] }
 0x975   :  { %vm3979_vm7 = vcmp.eq.f32.partialorder %v10630_v58, %v8885_v5  ;;  %v10635_v58 = vld [vmem:[#allocation49_spill] sm:$0xff] }
 0x976   :  { %3336 = vmin.xlane.f32.xlu1 %v3291_v3  ;;  %3334 = vmin.xlane.f32.xlu0 %v3290_v39  ;;  %v4009_v3 = vsel %vm3977_vm15, %v8851_v54, 1e+09  ;;  %v4008_v39 = vsel %vm3976_vm14, %v8851_v54, 1e+09  ;;  %vm3263_vm11 = vcmp.eq.f32.partialorder %v10635_v58, %v8913_v55  ;;  %v10639_v58 = vld [vmem:[#allocation52_spill] sm:$0xff] }
 0x977   :  { %v9113_v46 = vpop.xlane.xlu1 %3236  ;;  %v9115_v0 = vpop.xlane.xlu0 %3593  ;;  %vm3981_vm15 = vcmp.eq.f32.partialorder %v10639_v58, %v8925_v43  ;;  %v10644_v58 = vld [vmem:[#allocation56_spill] sm:$0xff] }
 0x97a   :  { %3695 = vmin.xlane.f32.xlu1 %v3650_v59  ;;  %3693 = vmin.xlane.f32.xlu0 %v3649_v42  ;;  %v2933_v59 = vsel %vm2895_vm0, %v8851_v54, 1e+09  ;;  %v10625_v42 = vld [vmem:[#allocation14_spill] sm:$0xff]  ;;  %vm2899_vm0 = vcmp.eq.f32.partialorder %v10642_v4, %v8935_v9  ;;  %v10645_v9 = vld [vmem:[#allocation57_spill] sm:$0xff]  ;;  %v4905_v4 = vld [vmem:[%s9996_s16 + $0x8] sm:$0xff] }
 0x97b   :  { %v9123_v62 = vpop.xlane.xlu1 %3595  ;;  %v9125_v12 = vpop.xlane.xlu0 %3954  ;;  %vm3260_vm2 = vcmp.eq.f32.partialorder %v10625_v42, %v8865_v48  ;;  %v10629_v42 = vld [vmem:[#allocation43_spill] sm:$0xff]  ;;  %4842 = vtanh.f32 %v4905_v4 }
 0x97c   :  { %vm3978_vm6 = vcmp.eq.f32.partialorder %v10629_v42, %v8853_v37  ;;  %v10634_v42 = vld [vmem:[#allocation48_spill] sm:$0xff] }
 0x97d   :  { %vm3262_vm10 = vcmp.eq.f32.partialorder %v10634_v42, %v8905_v50  ;;  %v10638_v42 = vld [vmem:[#allocation38_spill] sm:$0xff] }
 0x97e   :  { %4054 = vmin.xlane.f32.xlu1 %v4009_v3  ;;  %4052 = vmin.xlane.f32.xlu0 %v4008_v39  ;;  %v3293_v3 = vsel %vm3261_vm3, %v8851_v54, 1e+09  ;;  %v3292_v39 = vsel %vm3260_vm2, %v8851_v54, 1e+09  ;;  %vm3980_vm14 = vcmp.eq.f32.partialorder %v10638_v42, %v8893_v7  ;;  %v2744_v7 = vld [vmem:[%s9998_s13] sm:$0x1]  ;;  %vm3264_vm3 = vcmp.eq.f32.partialorder %v10644_v58, %v8945_v61 }
 0x97f   :  { %v9133_v52 = vpop.xlane.xlu1 %3956  ;;  %v9135_v22 = vpop.xlane.xlu0 %2873  ;;  %v2937_v42 = vsel %vm2899_vm0, %v8851_v54, 1e+09  ;;  %vm4220_vm2 = vcmp.gt.f32.partialorder %v2744_v7, 0.5  ;;  %v10647_v7 = vld [vmem:[#allocation58_spill] sm:$0xff] }
 0x982   :  { %2981 = vmin.xlane.f32.xlu1 %v2934_v41  ;;  %2979 = vmin.xlane.f32.xlu0 %v2933_v59  ;;  %v3652_v41 = vsel %vm3620_vm5, %v8851_v54, 1e+09  ;;  %v3651_v59 = vsel %vm3619_vm4, %v8851_v54, 1e+09  ;;  %vm3265_vm4 = vcmp.eq.f32.partialorder %v10645_v9, %v8953_v10  ;;  %v4253_v10 = vsel %vm4220_vm2, 1, %v10646_v19 }
 0x983   :  { %v9143_v32 = vpop.xlane.xlu1 %2875  ;;  %v9145_v53 = vpop.xlane.xlu0 %3238  ;;  %v3296_v9 = vsel %vm3264_vm3, %v8851_v54, 1e+09 }
 0x986   :  { %3340 = vmin.xlane.f32.xlu1 %v3293_v3  ;;  %3338 = vmin.xlane.f32.xlu0 %v3292_v39  ;;  %v4011_v3 = vsel %vm3979_vm7, %v8851_v54, 1e+09  ;;  %v4010_v39 = vsel %vm3978_vm6, %v8851_v54, 1e+09  ;;  %vm3623_vm7 = vcmp.eq.f32.partialorder %v10647_v7, %v8955_v36 }
 0x987   :  { %v9153_v48 = vpop.xlane.xlu1 %3240  ;;  %v9155_v33 = vpop.xlane.xlu0 %3597 }
 0x98a   :  { %3699 = vmin.xlane.f32.xlu1 %v3652_v41  ;;  %3697 = vmin.xlane.f32.xlu0 %v3651_v59  ;;  %v2936_v41 = vsel %vm2898_vm9, %v8851_v54, 1e+09  ;;  %v2935_v59 = vsel %vm2897_vm8, %v8851_v54, 1e+09 }
 0x98b   :  { %v9163_v63 = vpop.xlane.xlu1 %3599  ;;  %v9165_v35 = vpop.xlane.xlu0 %3958 }
 0x98e   :  { %4058 = vmin.xlane.f32.xlu1 %v4011_v3  ;;  %4056 = vmin.xlane.f32.xlu0 %v4010_v39  ;;  %v3295_v3 = vsel %vm3263_vm11, %v8851_v54, 1e+09  ;;  %v3294_v39 = vsel %vm3262_vm10, %v8851_v54, 1e+09  ;;  %vm3982_vm11 = vcmp.eq.f32.partialorder %v10649_v51, %v8933_v29 }
 0x98f   :  { %v9173_v37 = vpop.xlane.xlu1 %3960  ;;  %v9175_v5 = vpop.xlane.xlu0 %2877 }
 0x990   :  { %10633 = vst [vmem:[#allocation17_spill] sm:$0xff] %v9173_v37  ;;  %v10650_v37 = vld [vmem:[#allocation11_spill] sm:$0xff] }
 0x992   :  { %2985 = vmin.xlane.f32.xlu1 %v2936_v41  ;;  %2983 = vmin.xlane.f32.xlu0 %v2935_v59  ;;  %v3654_v41 = vsel %vm3622_vm13, %v8851_v54, 1e+09  ;;  %v3653_v59 = vsel %vm3621_vm12, %v8851_v54, 1e+09 }
 0x993   :  { %v9183_v56 = vpop.xlane.xlu1 %2879  ;;  %v9185_v45 = vpop.xlane.xlu0 %3242 }
 0x996   :  { %3344 = vmin.xlane.f32.xlu1 %v3295_v3  ;;  %3342 = vmin.xlane.f32.xlu0 %v3294_v39  ;;  %v4013_v3 = vsel %vm3981_vm15, %v8851_v54, 1e+09  ;;  %v4012_v39 = vsel %vm3980_vm14, %v8851_v54, 1e+09 }
 0x997   :  { %v9193_v50 = vpop.xlane.xlu1 %3244  ;;  %v9195_v55 = vpop.xlane.xlu0 %3601 }
 0x99a   :  { %3703 = vmin.xlane.f32.xlu1 %v3654_v41  ;;  %3701 = vmin.xlane.f32.xlu0 %v3653_v59  ;;  %v2938_v59 = vsel %vm2900_vm1, %v8851_v54, 1e+09 }
 0x99b   :  { %v9203_v31 = vpop.xlane.xlu1 %3603  ;;  %v9205_v14 = vpop.xlane.xlu0 %3962 }
 0x99c   :  { %10640 = vst [vmem:[#allocation44_spill] sm:$0xff] %v9203_v31  ;;  %10641 = vst [vmem:[#allocation82_spill] sm:$0xff] %v9205_v14  ;;  %v4257_v31 = vrot.slane %v4253_v10, %v10650_v37 }
 0x99e   :  { %4062 = vmin.xlane.f32.xlu1 %v4013_v3  ;;  %4060 = vmin.xlane.f32.xlu0 %v4012_v39  ;;  %vm9263_vm15 = vcmp.eq.s32.totalorder %v4257_v31, 1  ;;  %v10655_v31 = vmov 0.0  }
 0x99f   :  { %v2954_v43 = vpop.xlane.xlu1 %2953  ;;  %v2952_v41 = vpop.xlane.xlu0 %2951 }
 0x9a0   :  { %vm3016_vm9 = vcmp.eq.f32.partialorder %v8851_v54, %v2954_v43  ;;  %vm3015_vm10 = vcmp.eq.f32.partialorder %v8851_v54, %v2952_v41  ;;  %v3655_v43 = vsel %vm3623_vm7, %v8851_v54, 1e+09 }
 0x9a2   :  { %2989 = vmin.xlane.f32.xlu1 %v2938_v59  ;;  %2987 = vmin.xlane.f32.xlu0 %v2937_v42  ;;  %v10648_v59 = vld [vmem:[#allocation59_spill] sm:$0xff]  ;;  %v3297_v42 = vsel %vm3265_vm4, %v8851_v54, 1e+09 }
 0x9a3   :  { %v3313_v3 = vpop.xlane.xlu1 %3312  ;;  %v3311_v39 = vpop.xlane.xlu0 %3310  ;;  %vm3624_vm8 = vcmp.eq.f32.partialorder %v10648_v59, %v8963_v17  ;;  %v4014_v59 = vsel %vm3982_vm11, %v8851_v54, 1e+09 }
 0x9a4   :  { %vm3375_vm5 = vcmp.eq.f32.partialorder %v8851_v54, %v3313_v3  ;;  %vm3374_vm6 = vcmp.eq.f32.partialorder %v8851_v54, %v3311_v39  ;;  %v10232_v3 = vmov 0.0   ;;  %v3656_v61 = vsel %vm3624_vm8, %v8851_v54, 1e+09 }
 0x9a5   :  { %v4446_v39 = vsel %vm3375_vm5, 1.0, %v10232_v3  ;;  %v4445_v4 = vsel %vm3374_vm6, 1.0, %v10232_v3  ;;  %v4414_v41 = vsel %vm3016_vm9, 1.0, %v10232_v3  ;;  %v4413_v58 = vsel %vm3015_vm10, 1.0, %v10232_v3 }
 0x9a6   :  { %3348 = vmin.xlane.f32.xlu1 %v3297_v42  ;;  %3346 = vmin.xlane.f32.xlu0 %v3296_v9  ;;  %v3471_v42 = vadd.f32 %v4446_v39, %v4414_v41  ;;  %v3470_v9 = vadd.f32 %v4445_v4, %v4413_v58  ;;  %v4841_v39 = vpop.eup %4840  ;;  %v10654_v4 = vld [vmem:[#allocation62_spill] sm:$0xff]  ;;  %v10656_v41 = vld [vmem:[#allocation63_spill] sm:$0xff] }
 0x9a7   :  { %v3672_v19 = vpop.xlane.xlu1 %3671  ;;  %v3670_v14 = vpop.xlane.xlu0 %3669  ;;  %vm2901_vm2 = vcmp.eq.f32.partialorder %v10654_v4, %v8975_v25  ;;  %vm2902_vm3 = vcmp.eq.f32.partialorder %v10656_v41, %v8983_v27  ;;  %v4907_v25 = vld [vmem:[%s9996_s16 + $0x18] sm:$0xff] }
 0x9a8   :  { %vm3734_vm12 = vcmp.eq.f32.partialorder %v8851_v54, %v3672_v19  ;;  %vm3733_vm13 = vcmp.eq.f32.partialorder %v8851_v54, %v3670_v14  ;;  %v10651_v14 = vld [vmem:[#allocation60_spill] sm:$0xff]  ;;  %v4843_v51 = vpop.eup %4842  ;;  %v2939_v27 = vsel %vm2901_vm2, %v8851_v54, 1e+09 }
 0x9a9   :  { %v4478_v37 = vsel %vm3734_vm12, 1.0, %v10232_v3  ;;  %v4477_v10 = vsel %vm3733_vm13, 1.0, %v10232_v3  ;;  %vm3983_vm14 = vcmp.eq.f32.partialorder %v10651_v14, %v8965_v28  ;;  %v2940_v28 = vsel %vm2902_vm3, %v8851_v54, 1e+09  ;;  %v10658_v14 = vld [vmem:[#allocation65_spill] sm:$0xff] }
 0x9aa   :  { %3707 = vmin.xlane.f32.xlu1 %v3656_v61  ;;  %3705 = vmin.xlane.f32.xlu0 %v3655_v43  ;;  %v3830_v19 = vadd.f32 %v4478_v37, %v3471_v42  ;;  %v3829_v3 = vadd.f32 %v4477_v10, %v3470_v9  ;;  %v4015_v29 = vsel %vm3983_vm14, %v8851_v54, 1e+09  ;;  %vm3267_vm5 = vcmp.eq.f32.partialorder %v10658_v14, %v8993_v21  ;;  %v10660_v21 = vld [vmem:[#allocation67_spill] sm:$0xff] }
 0x9ab   :  { %v4031_v36 = vpop.xlane.xlu1 %4030  ;;  %v4029_v7 = vpop.xlane.xlu0 %4028  ;;  %vm3626_vm9 = vcmp.eq.f32.partialorder %v10660_v21, %v9003_v34 }
 0x9ac   :  { %vm4093_vm0 = vcmp.eq.f32.partialorder %v8851_v54, %v4031_v36  ;;  %vm4092_vm1 = vcmp.eq.f32.partialorder %v8851_v54, %v4029_v7  ;;  %v4906_v7 = vld [vmem:[%s9996_s16 + $0x10] sm:$0xff]  ;;  %v3658_v34 = vsel %vm3626_vm9, %v8851_v54, 1e+09 }
 0x9ad   :  { %v4510_v61 = vsel %vm4093_vm0, 1.0, %v10655_v31  ;;  %v4509_v43 = vsel %vm4092_vm1, 1.0, %v10655_v31  ;;  %4844 = vtanh.f32 %v4906_v7 }
 0x9ae   :  { %v4189_v58 = vadd.f32 %v4510_v61, %v3830_v19  ;;  %v4188_v37 = vadd.f32 %v4509_v43, %v3829_v3  ;;  %4066 = vmin.xlane.f32.xlu1 %v4015_v29  ;;  %4064 = vmin.xlane.f32.xlu0 %v4014_v59  ;;  %v10657_v3 = vld [vmem:[#allocation64_spill] sm:$0xff]  ;;  %4846 = vtanh.f32 %v4907_v25  ;;  %v10661_v61 = vld [vmem:[#allocation61_spill] sm:$0xff]  ;;  %v10663_v25 = vld [vmem:[#allocation71_spill] sm:$0xff] }
 0x9af   :  { %v2958_v10 = vpop.xlane.xlu1 %2957  ;;  %v2956_v42 = vpop.xlane.xlu0 %2955  ;;  %vm3266_vm4 = vcmp.eq.f32.partialorder %v10657_v3, %v8985_v20  ;;  %v10659_v20 = vld [vmem:[#allocation66_spill] sm:$0xff]  ;;  %vm3984_vm12 = vcmp.eq.f32.partialorder %v10661_v61, %v8973_v30  ;;  %vm2903_vm3 = vcmp.eq.f32.partialorder %v10663_v25, %v9015_v11  ;;  %v4909_v11 = vld [vmem:[%s9996_s16 + $0x28] sm:$0xff] }
 0x9b0   :  { %v4260_v9 = vsel %vm9263_vm15, %v4843_v51, %v4189_v58  ;;  %v4259_v36 = vsel %vm9263_vm15, %v4841_v39, %v4188_v37  ;;  %vm3625_vm8 = vcmp.eq.f32.partialorder %v10659_v20, %v8995_v40  ;;  %v3299_v39 = vsel %vm3267_vm5, %v8851_v54, 1e+09 }
 0x9b1   :  { %4292 = vst [vmem:[%s9999_s17 + $0x8] sm:$0xff] %v4260_v9  ;;  %4291 = vst [vmem:[%s9999_s17] sm:$0xff] %v4259_v36  ;;  %v3298_v4 = vsel %vm3266_vm4, %v8851_v54, 1e+09  ;;  %vm3018_vm10 = vcmp.eq.f32.partialorder %v8851_v54, %v2958_v10  ;;  %vm3017_vm11 = vcmp.eq.f32.partialorder %v8851_v54, %v2956_v42  ;;  %v3657_v58 = vsel %vm3625_vm8, %v8851_v54, 1e+09  ;;  %v10662_v36 = vld [vmem:[#allocation68_spill] sm:$0xff] }
 0x9b2   :  { %2993 = vmin.xlane.f32.xlu1 %v2940_v28  ;;  %2991 = vmin.xlane.f32.xlu0 %v2939_v27  ;;  %v4416_v37 = vsel %vm3018_vm10, 1.0, %v10655_v31  ;;  %v4415_v10 = vsel %vm3017_vm11, 1.0, %v10655_v31  ;;  %vm3985_vm0 = vcmp.eq.f32.partialorder %v10662_v36, %v9005_v18  ;;  %v4016_v40 = vsel %vm3984_vm12, %v8851_v54, 1e+09 }
 0x9b3   :  { %v3317_v59 = vpop.xlane.xlu1 %3316  ;;  %v3315_v19 = vpop.xlane.xlu0 %3314  ;;  %v4017_v30 = vsel %vm3985_vm0, %v8851_v54, 1e+09 }
 0x9b4   :  { %vm3377_vm6 = vcmp.eq.f32.partialorder %v8851_v54, %v3317_v59  ;;  %vm3376_vm7 = vcmp.eq.f32.partialorder %v8851_v54, %v3315_v19 }
 0x9b5   :  { %v4448_v43 = vsel %vm3377_vm6, 1.0, %v10655_v31  ;;  %v4447_v29 = vsel %vm3376_vm7, 1.0, %v10655_v31 }
 0x9b6   :  { %3352 = vmin.xlane.f32.xlu1 %v3299_v39  ;;  %3350 = vmin.xlane.f32.xlu0 %v3298_v4  ;;  %v3473_v28 = vadd.f32 %v4448_v43, %v4416_v37  ;;  %v3472_v27 = vadd.f32 %v4447_v29, %v4415_v10  ;;  %v10664_v4 = vld [vmem:[#allocation72_spill] sm:$0xff]  ;;  %v10666_v37 = vld [vmem:[#allocation74_spill] sm:$0xff] }
 0x9b7   :  { %v3676_v51 = vpop.xlane.xlu1 %3675  ;;  %v3674_v41 = vpop.xlane.xlu0 %3673  ;;  %vm2904_vm4 = vcmp.eq.f32.partialorder %v10664_v4, %v9023_v44  ;;  %v2941_v44 = vsel %vm2903_vm3, %v8851_v54, 1e+09  ;;  %vm3269_vm6 = vcmp.eq.f32.partialorder %v10666_v37, %v9033_v8  ;;  %v4908_v10 = vld [vmem:[%s9996_s16 + $0x20] sm:$0xff]  ;;  %v10668_v8 = vld [vmem:[#allocation77_spill] sm:$0xff]  ;;  %v10672_v37 = vld [vmem:[#allocation84_spill] sm:$0xff] }
 0x9b8   :  { %vm3736_vm13 = vcmp.eq.f32.partialorder %v8851_v54, %v3676_v51  ;;  %vm3735_vm14 = vcmp.eq.f32.partialorder %v8851_v54, %v3674_v41  ;;  %v4845_v19 = vpop.eup %4844  ;;  %v2942_v18 = vsel %vm2904_vm4, %v8851_v54, 1e+09  ;;  %4848 = vtanh.f32 %v4908_v10 }
 0x9b9   :  { %v4480_v42 = vsel %vm3736_vm13, 1.0, %v10655_v31  ;;  %v4479_v9 = vsel %vm3735_vm14, 1.0, %v10655_v31  ;;  %v4847_v39 = vpop.eup %4846  ;;  %4850 = vtanh.f32 %v4909_v11  ;;  %vm3628_vm10 = vcmp.eq.f32.partialorder %v10668_v8, %v9043_v47 }
 0x9ba   :  { %3711 = vmin.xlane.f32.xlu1 %v3658_v34  ;;  %3709 = vmin.xlane.f32.xlu0 %v3657_v58  ;;  %v3832_v7 = vadd.f32 %v4480_v42, %v3473_v28  ;;  %v3831_v59 = vadd.f32 %v4479_v9, %v3472_v27  ;;  %v10665_v58 = vld [vmem:[#allocation73_spill] sm:$0xff]  ;;  %v3301_v36 = vsel %vm3269_vm6, %v8851_v54, 1e+09  ;;  %v10669_v27 = vld [vmem:[#allocation70_spill] sm:$0xff]  ;;  %v3660_v47 = vsel %vm3628_vm10, %v8851_v54, 1e+09 }
 0x9bb   :  { %v4035_v3 = vpop.xlane.xlu1 %4034  ;;  %v4033_v14 = vpop.xlane.xlu0 %4032  ;;  %vm3268_vm5 = vcmp.eq.f32.partialorder %v10665_v58, %v9025_v49  ;;  %v10667_v49 = vld [vmem:[#allocation75_spill] sm:$0xff]  ;;  %vm3986_vm13 = vcmp.eq.f32.partialorder %v10669_v27, %v9013_v23  ;;  %v4910_v27 = vld [vmem:[%s9996_s16 + $0x30] sm:$0xff] }
 0x9bc   :  { %vm4095_vm1 = vcmp.eq.f32.partialorder %v8851_v54, %v4035_v3  ;;  %vm4094_vm2 = vcmp.eq.f32.partialorder %v8851_v54, %v4033_v14  ;;  %vm3627_vm9 = vcmp.eq.f32.partialorder %v10667_v49, %v9035_v2  ;;  %v3300_v28 = vsel %vm3268_vm5, %v8851_v54, 1e+09 }
 0x9bd   :  { %v4512_v20 = vsel %vm4095_vm1, 1.0, %v10655_v31  ;;  %v4511_v21 = vsel %vm4094_vm2, 1.0, %v10655_v31  ;;  %v4018_v2 = vsel %vm3986_vm13, %v8851_v54, 1e+09  ;;  %vm2906_vm5 = vcmp.eq.f32.partialorder %v10672_v37, %v9063_v26  ;;  %v10681_v37 = vld [vmem:[#allocation95_spill] sm:$0xff] }
 0x9be   :  { %v4191_v61 = vadd.f32 %v4512_v20, %v3832_v7  ;;  %v4190_v43 = vadd.f32 %v4511_v21, %v3831_v59  ;;  %4070 = vmin.xlane.f32.xlu1 %v4017_v30  ;;  %4068 = vmin.xlane.f32.xlu0 %v4016_v40  ;;  %v3659_v59 = vsel %vm3627_vm9, %v8851_v54, 1e+09  ;;  %v10670_v30 = vld [vmem:[#allocation78_spill] sm:$0xff]  ;;  %4852 = vtanh.f32 %v4910_v27 }
 0x9bf   :  { %v2962_v29 = vpop.xlane.xlu1 %2961  ;;  %v2960_v51 = vpop.xlane.xlu0 %2959  ;;  %vm3987_vm1 = vcmp.eq.f32.partialorder %v10670_v30, %v9045_v13  ;;  %v2944_v13 = vsel %vm2906_vm5, %v8851_v54, 1e+09  ;;  %vm2907_vm5 = vcmp.eq.f32.partialorder %v10681_v37, %v9095_v24  ;;  %v4914_v24 = vld [vmem:[%s9996_s16 + $0x48] sm:$0xff] }
 0x9c0   :  { %v4262_v41 = vsel %vm9263_vm15, %v4847_v39, %v4191_v61  ;;  %v4261_v34 = vsel %vm9263_vm15, %v4845_v19, %v4190_v43  ;;  %vm3020_vm11 = vcmp.eq.f32.partialorder %v8851_v54, %v2962_v29  ;;  %vm3019_vm12 = vcmp.eq.f32.partialorder %v8851_v54, %v2960_v51 }
 0x9c1   :  { %4294 = vst [vmem:[%s9999_s17 + $0x18] sm:$0xff] %v4262_v41  ;;  %4293 = vst [vmem:[%s9999_s17 + $0x10] sm:$0xff] %v4261_v34  ;;  %v4418_v19 = vsel %vm3020_vm11, 1.0, %v10655_v31  ;;  %v4417_v25 = vsel %vm3019_vm12, 1.0, %v10655_v31  ;;  %v10671_v34 = vld [vmem:[#allocation81_spill] sm:$0xff] }
 0x9c2   :  { %2997 = vmin.xlane.f32.xlu1 %v2942_v18  ;;  %2995 = vmin.xlane.f32.xlu0 %v2941_v44  ;;  %v4849_v41 = vpop.eup %4848  ;;  %vm2905_vm4 = vcmp.eq.f32.partialorder %v10671_v34, %v9055_v1  ;;  %v4019_v23 = vsel %vm3987_vm1, %v8851_v54, 1e+09  ;;  %v4911_v1 = vld [vmem:[%s9996_s16 + $0x38] sm:$0xff] }
 0x9c3   :  { %v3321_v42 = vpop.xlane.xlu1 %3320  ;;  %v3319_v9 = vpop.xlane.xlu0 %3318  ;;  %v2943_v26 = vsel %vm2905_vm4, %v8851_v54, 1e+09  ;;  %4854 = vtanh.f32 %v4911_v1  ;;  %v10684_v1 = vld [vmem:[#allocation102_spill] sm:$0xff] }
 0x9c4   :  { %vm3379_vm7 = vcmp.eq.f32.partialorder %v8851_v54, %v3321_v42  ;;  %vm3378_vm8 = vcmp.eq.f32.partialorder %v8851_v54, %v3319_v9  ;;  %v4851_v58 = vpop.eup %4850 }
 0x9c5   :  { %v4450_v3 = vsel %vm3379_vm7, 1.0, %v10655_v31  ;;  %v4449_v14 = vsel %vm3378_vm8, 1.0, %v10655_v31 }
 0x9c6   :  { %3356 = vmin.xlane.f32.xlu1 %v3301_v36  ;;  %3354 = vmin.xlane.f32.xlu0 %v3300_v28  ;;  %v3475_v39 = vadd.f32 %v4450_v3, %v4418_v19  ;;  %v3474_v4 = vadd.f32 %v4449_v14, %v4417_v25  ;;  %v10673_v36 = vld [vmem:[#allocation85_spill] sm:$0xff]  ;;  %v10674_v28 = vld [vmem:[#allocation88_spill] sm:$0xff] }
 0x9c7   :  { %v3680_v40 = vpop.xlane.xlu1 %3679  ;;  %v3678_v7 = vpop.xlane.xlu0 %3677  ;;  %vm3270_vm6 = vcmp.eq.f32.partialorder %v10673_v36, %v9065_v15  ;;  %vm3271_vm7 = vcmp.eq.f32.partialorder %v10674_v28, %v9073_v16  ;;  %v10675_v15 = vld [vmem:[#allocation89_spill] sm:$0xff]  ;;  %v10676_v16 = vld [vmem:[#allocation91_spill] sm:$0xff] }
 0x9c8   :  { %vm3738_vm14 = vcmp.eq.f32.partialorder %v8851_v54, %v3680_v40  ;;  %vm3737_vm0 = vcmp.eq.f32.partialorder %v8851_v54, %v3678_v7  ;;  %vm3629_vm10 = vcmp.eq.f32.partialorder %v10675_v15, %v9075_v6  ;;  %vm3630_vm11 = vcmp.eq.f32.partialorder %v10676_v16, %v9083_v60  ;;  %v9463_v60 = vld [vmem:[%s9997_s15] ss:$0 sm:$0xff] }
 0x9c9   :  { %v4482_v20 = vsel %vm3738_vm14, 1.0, %v10655_v31  ;;  %v4481_v21 = vsel %vm3737_vm0, 1.0, %v10655_v31  ;;  %v3303_v40 = vsel %vm3271_vm7, %v8851_v54, 1e+09  ;;  %v3302_v7 = vsel %vm3270_vm6, %v8851_v54, 1e+09 }
 0x9ca   :  { %3715 = vmin.xlane.f32.xlu1 %v3660_v47  ;;  %3713 = vmin.xlane.f32.xlu0 %v3659_v59  ;;  %v3834_v29 = vadd.f32 %v4482_v20, %v3475_v39  ;;  %v3833_v51 = vadd.f32 %v4481_v21, %v3474_v4  ;;  %v10677_v47 = vld [vmem:[#allocation69_spill] sm:$0xff]  ;;  %v10678_v59 = vld [vmem:[#allocation80_spill] sm:$0xff]  ;;  %v3662_v30 = vsel %vm3630_vm11, %v9463_v60, 1e+09  ;;  %v3661_v39 = vsel %vm3629_vm10, %v9463_v60, 1e+09 }
 0x9cb   :  { %v4039_v61 = vpop.xlane.xlu1 %4038  ;;  %v4037_v43 = vpop.xlane.xlu0 %4036  ;;  %vm3988_vm14 = vcmp.eq.f32.partialorder %v10678_v59, %v10677_v47  ;;  %v4913_v15 = vld [vmem:[%s9996_s16 + $0x40] sm:$0xff]  ;;  %v10687_v59 = vld [vmem:[#allocation76_spill] sm:$0xff] }
 0x9cc   :  { %vm4097_vm2 = vcmp.eq.f32.partialorder %v8851_v54, %v4039_v61  ;;  %vm4096_vm3 = vcmp.eq.f32.partialorder %v8851_v54, %v4037_v43  ;;  %v4020_v6 = vsel %vm3988_vm14, %v9463_v60, 1e+09  ;;  %4856 = vtanh.f32 %v4913_v15 }
 0x9cd   :  { %v4514_v18 = vsel %vm4097_vm2, 1.0, %v10655_v31  ;;  %v4513_v44 = vsel %vm4096_vm3, 1.0, %v10655_v31  ;;  %4858 = vtanh.f32 %v4914_v24 }
 0x9ce   :  { %v4193_v10 = vadd.f32 %v4514_v18, %v3834_v29  ;;  %v4192_v42 = vadd.f32 %v4513_v44, %v3833_v51  ;;  %4074 = vmin.xlane.f32.xlu1 %v4019_v23  ;;  %4072 = vmin.xlane.f32.xlu0 %v4018_v2  ;;  %v10679_v2 = vld [vmem:[#allocation2_spill] sm:$0xff]  ;;  %v10680_v29 = vld [vmem:[#allocation92_spill] sm:$0xff] }
 0x9cf   :  { %v2966_v9 = vpop.xlane.xlu1 %2965  ;;  %v2964_v11 = vpop.xlane.xlu0 %2963  ;;  %vm3989_vm2 = vcmp.eq.f32.partialorder %v10680_v29, %v10679_v2  ;;  %v10689_v2 = vld [vmem:[#allocation106_spill] sm:$0xff] }
 0x9d0   :  { %v4264_v49 = vsel %vm9263_vm15, %v4851_v58, %v4193_v10  ;;  %v4263_v8 = vsel %vm9263_vm15, %v4849_v41, %v4192_v42  ;;  %vm3022_vm12 = vcmp.eq.f32.partialorder %v8851_v54, %v2966_v9  ;;  %vm3021_vm13 = vcmp.eq.f32.partialorder %v8851_v54, %v2964_v11  ;;  %v4853_v58 = vpop.eup %4852 }
 0x9d1   :  { %4296 = vst [vmem:[%s9999_s17 + $0x28] sm:$0xff] %v4264_v49  ;;  %4295 = vst [vmem:[%s9999_s17 + $0x20] sm:$0xff] %v4263_v8  ;;  %v4420_v4 = vsel %vm3022_vm12, 1.0, %v10655_v31  ;;  %v4419_v61 = vsel %vm3021_vm13, 1.0, %v10655_v31  ;;  %v4021_v9 = vsel %vm3989_vm2, %v9463_v60, 1e+09  ;;  %v4855_v11 = vpop.eup %4854 }
 0x9d2   :  { %3001 = vmin.xlane.f32.xlu1 %v2944_v13  ;;  %2999 = vmin.xlane.f32.xlu0 %v2943_v26  ;;  %v10682_v49 = vld [vmem:[#allocation98_spill] sm:$0xff] }
 0x9d3   :  { %v3325_v3 = vpop.xlane.xlu1 %3324  ;;  %v3323_v14 = vpop.xlane.xlu0 %3322  ;;  %vm2908_vm6 = vcmp.eq.f32.partialorder %v10682_v49, %v9103_v57 }
 0x9d4   :  { %vm3381_vm8 = vcmp.eq.f32.partialorder %v8851_v54, %v3325_v3  ;;  %vm3380_vm9 = vcmp.eq.f32.partialorder %v8851_v54, %v3323_v14  ;;  %v2946_v57 = vsel %vm2908_vm6, %v9463_v60, 1e+09  ;;  %v2945_v3 = vsel %vm2907_vm5, %v9463_v60, 1e+09  ;;  %v10683_v14 = vld [vmem:[#allocation99_spill] sm:$0xff] }
 0x9d5   :  { %v4452_v19 = vsel %vm3381_vm8, 1.0, %v10655_v31  ;;  %v4451_v25 = vsel %vm3380_vm9, 1.0, %v10655_v31  ;;  %vm3272_vm7 = vcmp.eq.f32.partialorder %v10683_v14, %v9105_v38  ;;  %vm3273_vm8 = vcmp.eq.f32.partialorder %v10684_v1, %v9113_v46  ;;  %v10685_v38 = vld [vmem:[#allocation103_spill] sm:$0xff]  ;;  %v10686_v46 = vld [vmem:[#allocation105_spill] sm:$0xff] }
 0x9d6   :  { %3360 = vmin.xlane.f32.xlu1 %v3303_v40  ;;  %3358 = vmin.xlane.f32.xlu0 %v3302_v7  ;;  %v3477_v51 = vadd.f32 %v4452_v19, %v4420_v4  ;;  %v3476_v41 = vadd.f32 %v4451_v25, %v4419_v61  ;;  %vm3631_vm11 = vcmp.eq.f32.partialorder %v10685_v38, %v9115_v0  ;;  %v3305_v7 = vsel %vm3273_vm8, %v9463_v60, 1e+09  ;;  %v10688_v19 = vld [vmem:[#allocation94_spill] sm:$0xff] }
 0x9d7   :  { %v3684_v20 = vpop.xlane.xlu1 %3683  ;;  %v3682_v21 = vpop.xlane.xlu0 %3681  ;;  %vm3632_vm12 = vcmp.eq.f32.partialorder %v10686_v46, %v9123_v62  ;;  %v3304_v47 = vsel %vm3272_vm7, %v9463_v60, 1e+09 }
 0x9d8   :  { %vm3740_vm0 = vcmp.eq.f32.partialorder %v8851_v54, %v3684_v20  ;;  %vm3739_vm1 = vcmp.eq.f32.partialorder %v8851_v54, %v3682_v21  ;;  %v3664_v62 = vsel %vm3632_vm12, %v9463_v60, 1e+09 }
 0x9d9   :  { %v4484_v43 = vsel %vm3740_vm0, 1.0, %v10655_v31  ;;  %v4483_v54 = vsel %vm3739_vm1, 1.0, %v10655_v31  ;;  %vm3990_vm0 = vcmp.eq.f32.partialorder %v10688_v19, %v10687_v59 }
 0x9da   :  { %3719 = vmin.xlane.f32.xlu1 %v3662_v30  ;;  %3717 = vmin.xlane.f32.xlu0 %v3661_v39  ;;  %v3836_v44 = vadd.f32 %v4484_v43, %v3477_v51  ;;  %v3835_v23 = vadd.f32 %v4483_v54, %v3476_v41  ;;  %v3663_v39 = vsel %vm3631_vm11, %v9463_v60, 1e+09  ;;  %v4022_v0 = vsel %vm3990_vm0, %v9463_v60, 1e+09 }
 0x9db   :  { %v4043_v34 = vpop.xlane.xlu1 %4042  ;;  %v4041_v18 = vpop.xlane.xlu0 %4040 }
 0x9dc   :  { %vm4099_vm3 = vcmp.eq.f32.partialorder %v9463_v60, %v4043_v34  ;;  %vm4098_vm4 = vcmp.eq.f32.partialorder %v9463_v60, %v4041_v18 }
 0x9dd   :  { %v4516_v10 = vsel %vm4099_vm3, 1.0, %v10655_v31  ;;  %v4515_v42 = vsel %vm4098_vm4, 1.0, %v10655_v31  ;;  %vm3991_vm3 = vcmp.eq.f32.partialorder %v10689_v2, %v9125_v12 }
 0x9de   :  { %v4195_v8 = vadd.f32 %v4516_v10, %v3836_v44  ;;  %v4194_v13 = vadd.f32 %v4515_v42, %v3835_v23  ;;  %4078 = vmin.xlane.f32.xlu1 %v4021_v9  ;;  %4076 = vmin.xlane.f32.xlu0 %v4020_v6  ;;  %v4857_v44 = vpop.eup %4856  ;;  %v10690_v23 = vld [vmem:[#allocation109_spill] sm:$0xff]  ;;  %v4023_v10 = vsel %vm3991_vm3, %v9463_v60, 1e+09  ;;  %v10691_v9 = vld [vmem:[#allocation112_spill] sm:$0xff] }
 0x9df   :  { %v2970_v26 = vpop.xlane.xlu1 %2969  ;;  %v2968_v36 = vpop.xlane.xlu0 %2967  ;;  %vm2909_vm6 = vcmp.eq.f32.partialorder %v10690_v23, %v9135_v22  ;;  %vm2910_vm7 = vcmp.eq.f32.partialorder %v10691_v9, %v9143_v32  ;;  %v4916_v22 = vld [vmem:[%s9996_s16 + $0x58] sm:$0xff] }
 0x9e0   :  { %v4266_v28 = vsel %vm9263_vm15, %v4855_v11, %v4195_v8  ;;  %v4265_v27 = vsel %vm9263_vm15, %v4853_v58, %v4194_v13  ;;  %vm3024_vm13 = vcmp.eq.f32.partialorder %v9463_v60, %v2970_v26  ;;  %vm3023_vm14 = vcmp.eq.f32.partialorder %v9463_v60, %v2968_v36  ;;  %v4859_v42 = vpop.eup %4858 }
 0x9e1   :  { %4298 = vst [vmem:[%s9999_s17 + $0x38] sm:$0xff] %v4266_v28  ;;  %4297 = vst [vmem:[%s9999_s17 + $0x30] sm:$0xff] %v4265_v27  ;;  %v4422_v4 = vsel %vm3024_vm13, 1.0, %v10655_v31  ;;  %v4421_v61 = vsel %vm3023_vm14, 1.0, %v10655_v31  ;;  %v2948_v12 = vsel %vm2910_vm7, %v9463_v60, 1e+09 }
 0x9e2   :  { %3005 = vmin.xlane.f32.xlu1 %v2946_v57  ;;  %3003 = vmin.xlane.f32.xlu0 %v2945_v3  ;;  %v2947_v32 = vsel %vm2909_vm6, %v9463_v60, 1e+09  ;;  %v10692_v28 = vld [vmem:[#allocation113_spill] sm:$0xff]  ;;  %v10693_v27 = vld [vmem:[#allocation116_spill] sm:$0xff] }
 0x9e3   :  { %v3329_v16 = vpop.xlane.xlu1 %3328  ;;  %v3327_v40 = vpop.xlane.xlu0 %3326  ;;  %vm3274_vm8 = vcmp.eq.f32.partialorder %v10692_v28, %v9145_v53  ;;  %v4915_v57 = vld [vmem:[%s9996_s16 + $0x50] sm:$0xff]  ;;  %v10694_v53 = vld [vmem:[#allocation117_spill] sm:$0xff] }
 0x9e4   :  { %vm3383_vm9 = vcmp.eq.f32.partialorder %v9463_v60, %v3329_v16  ;;  %vm3382_vm10 = vcmp.eq.f32.partialorder %v9463_v60, %v3327_v40  ;;  %4860 = vtanh.f32 %v4915_v57  ;;  %vm3633_vm12 = vcmp.eq.f32.partialorder %v10694_v53, %v9155_v33  ;;  %v10696_v16 = vld [vmem:[#allocation108_spill] sm:$0xff] }
 0x9e5   :  { %v4454_v25 = vsel %vm3383_vm9, 1.0, %v10655_v31  ;;  %v4453_v20 = vsel %vm3382_vm10, 1.0, %v10655_v31  ;;  %vm3275_vm9 = vcmp.eq.f32.partialorder %v10693_v27, %v9153_v48  ;;  %4862 = vtanh.f32 %v4916_v22  ;;  %v10695_v48 = vld [vmem:[#allocation119_spill] sm:$0xff] }
 0x9e6   :  { %3364 = vmin.xlane.f32.xlu1 %v3305_v7  ;;  %3362 = vmin.xlane.f32.xlu0 %v3304_v47  ;;  %v3479_v29 = vadd.f32 %v4454_v25, %v4422_v4  ;;  %v3478_v51 = vadd.f32 %v4453_v20, %v4421_v61  ;;  %vm3634_vm13 = vcmp.eq.f32.partialorder %v10695_v48, %v9163_v63  ;;  %v3307_v1 = vsel %vm3275_vm9, %v9463_v60, 1e+09  ;;  %v10697_v20 = vld [vmem:[#allocation120_spill] sm:$0xff]  ;;  %v10707_v48 = vld [vmem:[#allocation82_spill] sm:$0xff] }
 0x9e7   :  { %v3688_v21 = vpop.xlane.xlu1 %3687  ;;  %v3686_v30 = vpop.xlane.xlu0 %3685  ;;  %v3306_v15 = vsel %vm3274_vm8, %v9463_v60, 1e+09  ;;  %v3666_v63 = vsel %vm3634_vm13, %v9463_v60, 1e+09  ;;  %v3665_v7 = vsel %vm3633_vm12, %v9463_v60, 1e+09 }
 0x9e8   :  { %vm3742_vm1 = vcmp.eq.f32.partialorder %v9463_v60, %v3688_v21  ;;  %vm3741_vm2 = vcmp.eq.f32.partialorder %v9463_v60, %v3686_v30 }
 0x9e9   :  { %v4486_v43 = vsel %vm3742_vm1, 1.0, %v10655_v31  ;;  %v4485_v54 = vsel %vm3741_vm2, 1.0, %v10655_v31  ;;  %vm3992_vm1 = vcmp.eq.f32.partialorder %v10696_v16, %v9133_v52 }
 0x9ea   :  { %3723 = vmin.xlane.f32.xlu1 %v3664_v62  ;;  %3721 = vmin.xlane.f32.xlu0 %v3663_v39  ;;  %v3838_v18 = vadd.f32 %v4486_v43, %v3479_v29  ;;  %v3837_v6 = vadd.f32 %v4485_v54, %v3478_v51  ;;  %v4024_v33 = vsel %vm3992_vm1, %v9463_v60, 1e+09  ;;  %v10698_v54 = vld [vmem:[#allocation123_spill] sm:$0xff] }
 0x9eb   :  { %v4047_v41 = vpop.xlane.xlu1 %4046  ;;  %v4045_v34 = vpop.xlane.xlu0 %4044  ;;  %vm2911_vm7 = vcmp.eq.f32.partialorder %v10698_v54, %v9175_v5  ;;  %v4918_v5 = vld [vmem:[%s9996_s16 + $0x68] sm:$0xff] }
 0x9ec   :  { %vm4101_vm4 = vcmp.eq.f32.partialorder %v9463_v60, %v4047_v41  ;;  %vm4100_vm5 = vcmp.eq.f32.partialorder %v9463_v60, %v4045_v34  ;;  %v10699_v41 = vld [vmem:[#allocation125_spill] sm:$0xff] }
 0x9ed   :  { %v4518_v58 = vsel %vm4101_vm4, 1.0, %v10655_v31  ;;  %v4517_v37 = vsel %vm4100_vm5, 1.0, %v10655_v31  ;;  %vm3993_vm4 = vcmp.eq.f32.partialorder %v10697_v20, %v9165_v35  ;;  %vm2912_vm8 = vcmp.eq.f32.partialorder %v10699_v41, %v9183_v56 }
 0x9ee   :  { %v4197_v11 = vadd.f32 %v4518_v58, %v3838_v18  ;;  %v4196_v49 = vadd.f32 %v4517_v37, %v3837_v6  ;;  %4082 = vmin.xlane.f32.xlu1 %v4023_v10  ;;  %4080 = vmin.xlane.f32.xlu0 %v4022_v0  ;;  %v4861_v43 = vpop.eup %4860  ;;  %v4025_v52 = vsel %vm3993_vm4, %v9463_v60, 1e+09  ;;  %v2950_v35 = vsel %vm2912_vm8, %v9463_v60, 1e+09  ;;  %v10700_v58 = vld [vmem:[#allocation126_spill] sm:$0xff]  ;;  %v10701_v37 = vld [vmem:[#allocation127_spill] sm:$0xff] }
 0x9ef   :  { %v2974_v8 = vpop.xlane.xlu1 %2973  ;;  %v2972_v13 = vpop.xlane.xlu0 %2971  ;;  %v2949_v56 = vsel %vm2911_vm7, %v9463_v60, 1e+09  ;;  %vm3276_vm9 = vcmp.eq.f32.partialorder %v10700_v58, %v9185_v45  ;;  %v4917_v10 = vld [vmem:[%s9996_s16 + $0x60] sm:$0xff]  ;;  %v10702_v45 = vld [vmem:[#allocation128_spill] sm:$0xff] }
 0x9f0   :  { %v4268_v26 = vsel %vm9263_vm15, %v4859_v42, %v4197_v11  ;;  %v4267_v36 = vsel %vm9263_vm15, %v4857_v44, %v4196_v49  ;;  %vm3026_vm14 = vcmp.eq.f32.partialorder %v9463_v60, %v2974_v8  ;;  %vm3025_vm0 = vcmp.eq.f32.partialorder %v9463_v60, %v2972_v13  ;;  %v4863_v51 = vpop.eup %4862  ;;  %v10704_v11 = vld [vmem:[#allocation129_spill] sm:$0xff] }
 0x9f1   :  { %4300 = vst [vmem:[%s9999_s17 + $0x48] sm:$0xff] %v4268_v26  ;;  %4299 = vst [vmem:[%s9999_s17 + $0x40] sm:$0xff] %v4267_v36  ;;  %v4424_v47 = vsel %vm3026_vm14, 1.0, %v10655_v31  ;;  %v4423_v59 = vsel %vm3025_vm0, 1.0, %v10655_v31  ;;  %4864 = vtanh.f32 %v4917_v10  ;;  %vm3635_vm13 = vcmp.eq.f32.partialorder %v10702_v45, %v9195_v55  ;;  %v10705_v13 = vld [vmem:[#allocation17_spill] sm:$0xff]  ;;  %v10706_v26 = vld [vmem:[#allocation122_spill] sm:$0xff] }
 0x9f2   :  { %3009 = vmin.xlane.f32.xlu1 %v2948_v12  ;;  %3007 = vmin.xlane.f32.xlu0 %v2947_v32  ;;  %4866 = vtanh.f32 %v4918_v5  ;;  %v3308_v8 = vsel %vm3276_vm9, %v9463_v60, 1e+09  ;;  %v3667_v57 = vsel %vm3635_vm13, %v9463_v60, 1e+09 }
 0x9f3   :  { %v3333_v3 = vpop.xlane.xlu1 %3332  ;;  %v3331_v14 = vpop.xlane.xlu0 %3330 }
 0x9f4   :  { %vm3385_vm10 = vcmp.eq.f32.partialorder %v9463_v60, %v3333_v3  ;;  %vm3384_vm11 = vcmp.eq.f32.partialorder %v9463_v60, %v3331_v14 }
 0x9f5   :  { %v4456_v40 = vsel %vm3385_vm10, 1.0, %v10655_v31  ;;  %v4455_v24 = vsel %vm3384_vm11, 1.0, %v10655_v31  ;;  %vm3277_vm10 = vcmp.eq.f32.partialorder %v10701_v37, %v9193_v50  ;;  %v10703_v50 = vld [vmem:[#allocation44_spill] sm:$0xff] }
 0x9f6   :  { %3368 = vmin.xlane.f32.xlu1 %v3307_v1  ;;  %3366 = vmin.xlane.f32.xlu0 %v3306_v15  ;;  %v3481_v21 = vadd.f32 %v4456_v40, %v4424_v47  ;;  %v3480_v30 = vadd.f32 %v4455_v24, %v4423_v59  ;;  %vm3636_vm14 = vcmp.eq.f32.partialorder %v10704_v11, %v10703_v50  ;;  %v3309_v49 = vsel %vm3277_vm10, %v9463_v60, 1e+09  ;;  %v10708_v1 = vld [vmem:[#allocation130_spill] sm:$0xff] }
 0x9f7   :  { %v3692_v38 = vpop.xlane.xlu1 %3691  ;;  %v3690_v46 = vpop.xlane.xlu0 %3689  ;;  %v3668_v27 = vsel %vm3636_vm14, %v9463_v60, 1e+09 }
 0x9f8   :  { %vm3744_vm2 = vcmp.eq.f32.partialorder %v9463_v60, %v3692_v38  ;;  %vm3743_vm3 = vcmp.eq.f32.partialorder %v9463_v60, %v3690_v46 }
 0x9f9   :  { %v4488_v19 = vsel %vm3744_vm2, 1.0, %v10655_v31  ;;  %v4487_v25 = vsel %vm3743_vm3, 1.0, %v10655_v31  ;;  %vm3994_vm2 = vcmp.eq.f32.partialorder %v10706_v26, %v10705_v13  ;;  %v4921_v26 = vld [vmem:[%s9996_s16 + $0x80] sm:$0xff] }
 0x9fa   :  { %3727 = vmin.xlane.f32.xlu1 %v3666_v63  ;;  %3725 = vmin.xlane.f32.xlu0 %v3665_v7  ;;  %v3840_v4 = vadd.f32 %v4488_v19, %v3481_v21  ;;  %v3839_v61 = vadd.f32 %v4487_v25, %v3480_v30  ;;  %v4026_v59 = vsel %vm3994_vm2, %v9463_v60, 1e+09 }
 0x9fb   :  { %v4051_v62 = vpop.xlane.xlu1 %4050  ;;  %v4049_v39 = vpop.xlane.xlu0 %4048 }
 0x9fc   :  { %vm4103_vm5 = vcmp.eq.f32.partialorder %v9463_v60, %v4051_v62  ;;  %vm4102_vm6 = vcmp.eq.f32.partialorder %v9463_v60, %v4049_v39  ;;  %v4865_v46 = vpop.eup %4864 }
 0x9fd   :  { %v4520_v2 = vsel %vm4103_vm5, 1.0, %v10655_v31  ;;  %v4519_v29 = vsel %vm4102_vm6, 1.0, %v10655_v31  ;;  %vm3995_vm5 = vcmp.eq.f32.partialorder %v10708_v1, %v10707_v48  ;;  %v4867_v19 = vpop.eup %4866 }
 0x9fe   :  { %v4199_v34 = vadd.f32 %v4520_v2, %v3840_v4  ;;  %v4198_v0 = vadd.f32 %v4519_v29, %v3839_v61  ;;  %4086 = vmin.xlane.f32.xlu1 %v4025_v52  ;;  %4084 = vmin.xlane.f32.xlu0 %v4024_v33  ;;  %v4027_v47 = vsel %vm3995_vm5, %v9463_v60, 1e+09  ;;  %v4919_v61 = vld [vmem:[%s9996_s16 + $0x70] sm:$0xff] }
 0x9ff   :  { %v2978_v18 = vpop.xlane.xlu1 %2977  ;;  %v2976_v6 = vpop.xlane.xlu0 %2975  ;;  %4868 = vtanh.f32 %v4919_v61 }
 0xa00   :  { %v4270_v44 = vsel %vm9263_vm15, %v4863_v51, %v4199_v34  ;;  %v4269_v23 = vsel %vm9263_vm15, %v4861_v43, %v4198_v0  ;;  %vm3028_vm0 = vcmp.eq.f32.partialorder %v9463_v60, %v2978_v18  ;;  %vm3027_vm1 = vcmp.eq.f32.partialorder %v9463_v60, %v2976_v6  ;;  %v4920_v43 = vld [vmem:[%s9996_s16 + $0x78] sm:$0xff] }
 0xa01   :  { %4302 = vst [vmem:[%s9999_s17 + $0x58] sm:$0xff] %v4270_v44  ;;  %4301 = vst [vmem:[%s9999_s17 + $0x50] sm:$0xff] %v4269_v23  ;;  %v4426_v3 = vsel %vm3028_vm0, 1.0, %v10655_v31  ;;  %v4425_v14 = vsel %vm3027_vm1, 1.0, %v10655_v31  ;;  %4870 = vtanh.f32 %v4920_v43 }
 0xa02   :  { %3013 = vmin.xlane.f32.xlu1 %v2950_v35  ;;  %3011 = vmin.xlane.f32.xlu0 %v2949_v56  ;;  %4872 = vtanh.f32 %v4921_v26 }
 0xa03   :  { %v3337_v42 = vpop.xlane.xlu1 %3336  ;;  %v3335_v9 = vpop.xlane.xlu0 %3334 }
 0xa04   :  { %vm3387_vm11 = vcmp.eq.f32.partialorder %v9463_v60, %v3337_v42  ;;  %vm3386_vm12 = vcmp.eq.f32.partialorder %v9463_v60, %v3335_v9 }
 0xa05   :  { %v4458_v36 = vsel %vm3387_vm11, 1.0, %v10655_v31  ;;  %v4457_v12 = vsel %vm3386_vm12, 1.0, %v10655_v31 }
 0xa06   :  { %3372 = vmin.xlane.f32.xlu1 %v3309_v49  ;;  %3370 = vmin.xlane.f32.xlu0 %v3308_v8  ;;  %v3483_v15 = vadd.f32 %v4458_v36, %v4426_v3  ;;  %v3482_v16 = vadd.f32 %v4457_v12, %v4425_v14  ;;  %v4922_v36 = vld [vmem:[%s9996_s16 + $0x88] sm:$0xff] }
 0xa07   :  { %v3696_v32 = vpop.xlane.xlu1 %3695  ;;  %v3694_v28 = vpop.xlane.xlu0 %3693  ;;  %4874 = vtanh.f32 %v4922_v36 }
 0xa08   :  { %vm3746_vm3 = vcmp.eq.f32.partialorder %v9463_v60, %v3696_v32  ;;  %vm3745_vm4 = vcmp.eq.f32.partialorder %v9463_v60, %v3694_v28 }
 0xa09   :  { %v4490_v22 = vsel %vm3746_vm3, 1.0, %v10655_v31  ;;  %v4489_v53 = vsel %vm3745_vm4, 1.0, %v10655_v31  ;;  %v4869_v10 = vpop.eup %4868 }
 0xa0a   :  { %3731 = vmin.xlane.f32.xlu1 %v3668_v27  ;;  %3729 = vmin.xlane.f32.xlu0 %v3667_v57  ;;  %v3842_v38 = vadd.f32 %v4490_v22, %v3483_v15  ;;  %v3841_v55 = vadd.f32 %v4489_v53, %v3482_v16 }
 0xa0b   :  { %v4055_v40 = vpop.xlane.xlu1 %4054  ;;  %v4053_v24 = vpop.xlane.xlu0 %4052 }
 0xa0c   :  { %vm4105_vm6 = vcmp.eq.f32.partialorder %v9463_v60, %v4055_v40  ;;  %vm4104_vm7 = vcmp.eq.f32.partialorder %v9463_v60, %v4053_v24  ;;  %v4871_v5 = vpop.eup %4870 }
 0xa0d   :  { %v4522_v63 = vsel %vm4105_vm6, 1.0, %v10655_v31  ;;  %v4521_v7 = vsel %vm4104_vm7, 1.0, %v10655_v31 }
 0xa0e   :  { %v4201_v25 = vadd.f32 %v4522_v63, %v3842_v38  ;;  %v4200_v20 = vadd.f32 %v4521_v7, %v3841_v55  ;;  %4090 = vmin.xlane.f32.xlu1 %v4027_v47  ;;  %4088 = vmin.xlane.f32.xlu0 %v4026_v59  ;;  %v4873_v55 = vpop.eup %4872 }
 0xa0f   :  { %v2982_v21 = vpop.xlane.xlu1 %2981  ;;  %v2980_v30 = vpop.xlane.xlu0 %2979 }
 0xa10   :  { %v4272_v62 = vsel %vm9263_vm15, %v4867_v19, %v4201_v25  ;;  %v4271_v39 = vsel %vm9263_vm15, %v4865_v46, %v4200_v20  ;;  %vm3030_vm10 = vcmp.eq.f32.partialorder %v9463_v60, %v2982_v21  ;;  %vm3029_vm11 = vcmp.eq.f32.partialorder %v9463_v60, %v2980_v30  ;;  %v4923_v30 = vld [vmem:[%s9996_s16 + $0x90] sm:$0xff] }
 0xa11   :  { %4304 = vst [vmem:[%s9999_s17 + $0x68] sm:$0xff] %v4272_v62  ;;  %4303 = vst [vmem:[%s9999_s17 + $0x60] sm:$0xff] %v4271_v39  ;;  %v4428_v51 = vsel %vm3030_vm10, 1.0, %v10655_v31  ;;  %v4427_v41 = vsel %vm3029_vm11, 1.0, %v10655_v31  ;;  %v4875_v7 = vpop.eup %4874  ;;  %4876 = vtanh.f32 %v4923_v30  ;;  %v4924_v62 = vld [vmem:[%s9996_s16 + $0x98] sm:$0xff] }
 0xa12   :  { %4878 = vtanh.f32 %v4924_v62 }
 0xa13   :  { %v3341_v33 = vpop.xlane.xlu1 %3340  ;;  %v3339_v4 = vpop.xlane.xlu0 %3338 }
 0xa14   :  { %vm3389_vm8 = vcmp.eq.f32.partialorder %v9463_v60, %v3341_v33  ;;  %vm3388_vm9 = vcmp.eq.f32.partialorder %v9463_v60, %v3339_v4 }
 0xa15   :  { %v4460_v54 = vsel %vm3389_vm8, 1.0, %v10655_v31  ;;  %v4459_v2 = vsel %vm3388_vm9, 1.0, %v10655_v31 }
 0xa16   :  { %v3485_v18 = vadd.f32 %v4460_v54, %v4428_v51  ;;  %v3484_v6 = vadd.f32 %v4459_v2, %v4427_v41 }
 0xa17   :  { %v3700_v29 = vpop.xlane.xlu1 %3699  ;;  %v3698_v52 = vpop.xlane.xlu0 %3697 }
 0xa18   :  { %vm3748_vm12 = vcmp.eq.f32.partialorder %v9463_v60, %v3700_v29  ;;  %vm3747_vm13 = vcmp.eq.f32.partialorder %v9463_v60, %v3698_v52 }
 0xa19   :  { %v4492_v34 = vsel %vm3748_vm12, 1.0, %v10655_v31  ;;  %v4491_v0 = vsel %vm3747_vm13, 1.0, %v10655_v31 }
 0xa1a   :  { %v3844_v35 = vadd.f32 %v4492_v34, %v3485_v18  ;;  %v3843_v56 = vadd.f32 %v4491_v0, %v3484_v6 }
 0xa1b   :  { %v4059_v44 = vpop.xlane.xlu1 %4058  ;;  %v4057_v23 = vpop.xlane.xlu0 %4056 }
 0xa1c   :  { %vm4107_vm14 = vcmp.eq.f32.partialorder %v9463_v60, %v4059_v44  ;;  %vm4106_vm0 = vcmp.eq.f32.partialorder %v9463_v60, %v4057_v23  ;;  %v4877_v23 = vpop.eup %4876 }
 0xa1d   :  { %v4524_v58 = vsel %vm4107_vm14, 1.0, %v10655_v31  ;;  %v4523_v37 = vsel %vm4106_vm0, 1.0, %v10655_v31 }
 0xa1e   :  { %v4203_v42 = vadd.f32 %v4524_v58, %v3844_v35  ;;  %v4202_v9 = vadd.f32 %v4523_v37, %v3843_v56  ;;  %v4879_v58 = vpop.eup %4878 }
 0xa1f   :  { %v2986_v45 = vpop.xlane.xlu1 %2985  ;;  %v2984_v50 = vpop.xlane.xlu0 %2983 }
 0xa20   :  { %v4274_v11 = vsel %vm9263_vm15, %v4871_v5, %v4203_v42  ;;  %v4273_v49 = vsel %vm9263_vm15, %v4869_v10, %v4202_v9  ;;  %vm3032_vm3 = vcmp.eq.f32.partialorder %v9463_v60, %v2986_v45  ;;  %vm3031_vm4 = vcmp.eq.f32.partialorder %v9463_v60, %v2984_v50  ;;  %v4925_v50 = vld [vmem:[%s9996_s16 + $0xa0] sm:$0xff] }
 0xa21   :  { %4306 = vst [vmem:[%s9999_s17 + $0x78] sm:$0xff] %v4274_v11  ;;  %4305 = vst [vmem:[%s9999_s17 + $0x70] sm:$0xff] %v4273_v49  ;;  %v4430_v57 = vsel %vm3032_vm3, 1.0, %v10655_v31  ;;  %v4429_v3 = vsel %vm3031_vm4, 1.0, %v10655_v31  ;;  %4880 = vtanh.f32 %v4925_v50  ;;  %v4926_v11 = vld [vmem:[%s9996_s16 + $0xa8] sm:$0xff] }
 0xa22   :  { %4882 = vtanh.f32 %v4926_v11 }
 0xa23   :  { %v3345_v8 = vpop.xlane.xlu1 %3344  ;;  %v3343_v13 = vpop.xlane.xlu0 %3342 }
 0xa24   :  { %vm3391_vm1 = vcmp.eq.f32.partialorder %v9463_v60, %v3345_v8  ;;  %vm3390_vm2 = vcmp.eq.f32.partialorder %v9463_v60, %v3343_v13 }
 0xa25   :  { %v4462_v12 = vsel %vm3391_vm1, 1.0, %v10655_v31  ;;  %v4461_v32 = vsel %vm3390_vm2, 1.0, %v10655_v31 }
 0xa26   :  { %v3487_v53 = vadd.f32 %v4462_v12, %v4430_v57  ;;  %v3486_v48 = vadd.f32 %v4461_v32, %v4429_v3 }
 0xa27   :  { %v3704_v28 = vpop.xlane.xlu1 %3703  ;;  %v3702_v27 = vpop.xlane.xlu0 %3701 }
 0xa28   :  { %vm3750_vm5 = vcmp.eq.f32.partialorder %v9463_v60, %v3704_v28  ;;  %vm3749_vm6 = vcmp.eq.f32.partialorder %v9463_v60, %v3702_v27 }
 0xa29   :  { %v4494_v14 = vsel %vm3750_vm5, 1.0, %v10655_v31  ;;  %v4493_v22 = vsel %vm3749_vm6, 1.0, %v10655_v31 }
 0xa2a   :  { %v3846_v16 = vadd.f32 %v4494_v14, %v3487_v53  ;;  %v3845_v40 = vadd.f32 %v4493_v22, %v3486_v48 }
 0xa2b   :  { %v4063_v1 = vpop.xlane.xlu1 %4062  ;;  %v4061_v15 = vpop.xlane.xlu0 %4060 }
 0xa2c   :  { %vm4109_vm7 = vcmp.eq.f32.partialorder %v9463_v60, %v4063_v1  ;;  %vm4108_vm8 = vcmp.eq.f32.partialorder %v9463_v60, %v4061_v15  ;;  %v4881_v15 = vpop.eup %4880 }
 0xa2d   :  { %v4526_v24 = vsel %vm4109_vm7, 1.0, %v10655_v31  ;;  %v4525_v38 = vsel %vm4108_vm8, 1.0, %v10655_v31 }
 0xa2e   :  { %v4205_v46 = vadd.f32 %v4526_v24, %v3846_v16  ;;  %v4204_v63 = vadd.f32 %v4525_v38, %v3845_v40  ;;  %v4883_v24 = vpop.eup %4882 }
 0xa2f   :  { %v2990_v47 = vpop.xlane.xlu1 %2989  ;;  %v2988_v59 = vpop.xlane.xlu0 %2987 }
 0xa30   :  { %v4276_v19 = vsel %vm9263_vm15, %v4875_v7, %v4205_v46  ;;  %v4275_v25 = vsel %vm9263_vm15, %v4873_v55, %v4204_v63  ;;  %vm3034_vm11 = vcmp.eq.f32.partialorder %v9463_v60, %v2990_v47  ;;  %vm3033_vm12 = vcmp.eq.f32.partialorder %v9463_v60, %v2988_v59  ;;  %v4927_v59 = vld [vmem:[%s9996_s16 + $0xb0] sm:$0xff] }
 0xa31   :  { %4308 = vst [vmem:[%s9999_s17 + $0x88] sm:$0xff] %v4276_v19  ;;  %4307 = vst [vmem:[%s9999_s17 + $0x80] sm:$0xff] %v4275_v25  ;;  %v4432_v43 = vsel %vm3034_vm11, 1.0, %v10655_v31  ;;  %v4431_v54 = vsel %vm3033_vm12, 1.0, %v10655_v31  ;;  %4884 = vtanh.f32 %v4927_v59  ;;  %v4928_v19 = vld [vmem:[%s9996_s16 + $0xb8] sm:$0xff] }
 0xa32   :  { %4886 = vtanh.f32 %v4928_v19 }
 0xa33   :  { %v3349_v20 = vpop.xlane.xlu1 %3348  ;;  %v3347_v21 = vpop.xlane.xlu0 %3346 }
 0xa34   :  { %vm3393_vm9 = vcmp.eq.f32.partialorder %v9463_v60, %v3349_v20  ;;  %vm3392_vm10 = vcmp.eq.f32.partialorder %v9463_v60, %v3347_v21 }
 0xa35   :  { %v4464_v39 = vsel %vm3393_vm9, 1.0, %v10655_v31  ;;  %v4463_v33 = vsel %vm3392_vm10, 1.0, %v10655_v31 }
 0xa36   :  { %v3489_v52 = vadd.f32 %v4464_v39, %v4432_v43  ;;  %v3488_v51 = vadd.f32 %v4463_v33, %v4431_v54 }
 0xa37   :  { %v3708_v4 = vpop.xlane.xlu1 %3707  ;;  %v3706_v61 = vpop.xlane.xlu0 %3705 }
 0xa38   :  { %vm3752_vm13 = vcmp.eq.f32.partialorder %v9463_v60, %v3708_v4  ;;  %vm3751_vm14 = vcmp.eq.f32.partialorder %v9463_v60, %v3706_v61 }
 0xa39   :  { %v4496_v2 = vsel %vm3752_vm13, 1.0, %v10655_v31  ;;  %v4495_v29 = vsel %vm3751_vm14, 1.0, %v10655_v31 }
 0xa3a   :  { %v3848_v0 = vadd.f32 %v4496_v2, %v3489_v52  ;;  %v3847_v18 = vadd.f32 %v4495_v29, %v3488_v51 }
 0xa3b   :  { %v4067_v41 = vpop.xlane.xlu1 %4066  ;;  %v4065_v34 = vpop.xlane.xlu0 %4064 }
 0xa3c   :  { %vm4111_vm0 = vcmp.eq.f32.partialorder %v9463_v60, %v4067_v41  ;;  %vm4110_vm1 = vcmp.eq.f32.partialorder %v9463_v60, %v4065_v34  ;;  %v4885_v34 = vpop.eup %4884 }
 0xa3d   :  { %v4528_v6 = vsel %vm4111_vm0, 1.0, %v10655_v31  ;;  %v4527_v44 = vsel %vm4110_vm1, 1.0, %v10655_v31 }
 0xa3e   :  { %v4207_v35 = vadd.f32 %v4528_v6, %v3848_v0  ;;  %v4206_v56 = vadd.f32 %v4527_v44, %v3847_v18  ;;  %v4887_v6 = vpop.eup %4886 }
 0xa3f   :  { %v2994_v37 = vpop.xlane.xlu1 %2993  ;;  %v2992_v10 = vpop.xlane.xlu0 %2991 }
 0xa40   :  { %v4278_v42 = vsel %vm9263_vm15, %v4879_v58, %v4207_v35  ;;  %v4277_v9 = vsel %vm9263_vm15, %v4877_v23, %v4206_v56  ;;  %vm3036_vm4 = vcmp.eq.f32.partialorder %v9463_v60, %v2994_v37  ;;  %vm3035_vm5 = vcmp.eq.f32.partialorder %v9463_v60, %v2992_v10  ;;  %v4929_v10 = vld [vmem:[%s9996_s16 + $0xc0] sm:$0xff] }
 0xa41   :  { %4310 = vst [vmem:[%s9999_s17 + $0x98] sm:$0xff] %v4278_v42  ;;  %4309 = vst [vmem:[%s9999_s17 + $0x90] sm:$0xff] %v4277_v9  ;;  %v4434_v36 = vsel %vm3036_vm4, 1.0, %v10655_v31  ;;  %v4433_v12 = vsel %vm3035_vm5, 1.0, %v10655_v31  ;;  %4888 = vtanh.f32 %v4929_v10  ;;  %v4930_v42 = vld [vmem:[%s9996_s16 + $0xc8] sm:$0xff] }
 0xa42   :  { %4890 = vtanh.f32 %v4930_v42 }
 0xa43   :  { %v3353_v5 = vpop.xlane.xlu1 %3352  ;;  %v3351_v45 = vpop.xlane.xlu0 %3350 }
 0xa44   :  { %vm3395_vm2 = vcmp.eq.f32.partialorder %v9463_v60, %v3353_v5  ;;  %vm3394_vm3 = vcmp.eq.f32.partialorder %v9463_v60, %v3351_v45 }
 0xa45   :  { %v4466_v49 = vsel %vm3395_vm2, 1.0, %v10655_v31  ;;  %v4465_v8 = vsel %vm3394_vm3, 1.0, %v10655_v31 }
 0xa46   :  { %v3491_v27 = vadd.f32 %v4466_v49, %v4434_v36  ;;  %v3490_v57 = vadd.f32 %v4465_v8, %v4433_v12 }
 0xa47   :  { %v3712_v13 = vpop.xlane.xlu1 %3711  ;;  %v3710_v26 = vpop.xlane.xlu0 %3709 }
 0xa48   :  { %vm3754_vm6 = vcmp.eq.f32.partialorder %v9463_v60, %v3712_v13  ;;  %vm3753_vm7 = vcmp.eq.f32.partialorder %v9463_v60, %v3710_v26 }
 0xa49   :  { %v4498_v32 = vsel %vm3754_vm6, 1.0, %v10655_v31  ;;  %v4497_v28 = vsel %vm3753_vm7, 1.0, %v10655_v31 }
 0xa4a   :  { %v3850_v22 = vadd.f32 %v4498_v32, %v3491_v27  ;;  %v3849_v53 = vadd.f32 %v4497_v28, %v3490_v57 }
 0xa4b   :  { %v4071_v3 = vpop.xlane.xlu1 %4070  ;;  %v4069_v14 = vpop.xlane.xlu0 %4068 }
 0xa4c   :  { %vm4113_vm8 = vcmp.eq.f32.partialorder %v9463_v60, %v4071_v3  ;;  %vm4112_vm9 = vcmp.eq.f32.partialorder %v9463_v60, %v4069_v14  ;;  %v4889_v14 = vpop.eup %4888 }
 0xa4d   :  { %v4530_v48 = vsel %vm4113_vm8, 1.0, %v10655_v31  ;;  %v4529_v1 = vsel %vm4112_vm9, 1.0, %v10655_v31 }
 0xa4e   :  { %v4209_v16 = vadd.f32 %v4530_v48, %v3850_v22  ;;  %v4208_v40 = vadd.f32 %v4529_v1, %v3849_v53  ;;  %v4891_v48 = vpop.eup %4890 }
 0xa4f   :  { %v2998_v38 = vpop.xlane.xlu1 %2997  ;;  %v2996_v55 = vpop.xlane.xlu0 %2995 }
 0xa50   :  { %v4280_v46 = vsel %vm9263_vm15, %v4883_v24, %v4209_v16  ;;  %v4279_v63 = vsel %vm9263_vm15, %v4881_v15, %v4208_v40  ;;  %vm3038_vm12 = vcmp.eq.f32.partialorder %v9463_v60, %v2998_v38  ;;  %vm3037_vm13 = vcmp.eq.f32.partialorder %v9463_v60, %v2996_v55  ;;  %v4931_v55 = vld [vmem:[%s9996_s16 + $0xd0] sm:$0xff] }
 0xa51   :  { %4312 = vst [vmem:[%s9999_s17 + $0xa8] sm:$0xff] %v4280_v46  ;;  %4311 = vst [vmem:[%s9999_s17 + $0xa0] sm:$0xff] %v4279_v63  ;;  %v4436_v62 = vsel %vm3038_vm12, 1.0, %v10655_v31  ;;  %v4435_v39 = vsel %vm3037_vm13, 1.0, %v10655_v31  ;;  %4892 = vtanh.f32 %v4931_v55  ;;  %v4932_v46 = vld [vmem:[%s9996_s16 + $0xd8] sm:$0xff] }
 0xa52   :  { %4894 = vtanh.f32 %v4932_v46 }
 0xa53   :  { %v3357_v7 = vpop.xlane.xlu1 %3356  ;;  %v3355_v47 = vpop.xlane.xlu0 %3354 }
 0xa54   :  { %vm3397_vm10 = vcmp.eq.f32.partialorder %v9463_v60, %v3357_v7  ;;  %vm3396_vm11 = vcmp.eq.f32.partialorder %v9463_v60, %v3355_v47 }
 0xa55   :  { %v4468_v25 = vsel %vm3397_vm10, 1.0, %v10655_v31  ;;  %v4467_v20 = vsel %vm3396_vm11, 1.0, %v10655_v31 }
 0xa56   :  { %v3493_v61 = vadd.f32 %v4468_v25, %v4436_v62  ;;  %v3492_v43 = vadd.f32 %v4467_v20, %v4435_v39 }
 0xa57   :  { %v3716_v21 = vpop.xlane.xlu1 %3715  ;;  %v3714_v30 = vpop.xlane.xlu0 %3713 }
 0xa58   :  { %vm3756_vm14 = vcmp.eq.f32.partialorder %v9463_v60, %v3716_v21  ;;  %vm3755_vm0 = vcmp.eq.f32.partialorder %v9463_v60, %v3714_v30 }
 0xa59   :  { %v4500_v33 = vsel %vm3756_vm14, 1.0, %v10655_v31  ;;  %v4499_v4 = vsel %vm3755_vm0, 1.0, %v10655_v31 }
 0xa5a   :  { %v3852_v29 = vadd.f32 %v4500_v33, %v3493_v61  ;;  %v3851_v52 = vadd.f32 %v4499_v4, %v3492_v43 }
 0xa5b   :  { %v4075_v54 = vpop.xlane.xlu1 %4074  ;;  %v4073_v2 = vpop.xlane.xlu0 %4072 }
 0xa5c   :  { %vm4115_vm1 = vcmp.eq.f32.partialorder %v9463_v60, %v4075_v54  ;;  %vm4114_vm2 = vcmp.eq.f32.partialorder %v9463_v60, %v4073_v2  ;;  %v4893_v2 = vpop.eup %4892 }
 0xa5d   :  { %v4532_v51 = vsel %vm4115_vm1, 1.0, %v10655_v31  ;;  %v4531_v41 = vsel %vm4114_vm2, 1.0, %v10655_v31 }
 0xa5e   :  { %v4211_v0 = vadd.f32 %v4532_v51, %v3852_v29  ;;  %v4210_v18 = vadd.f32 %v4531_v41, %v3851_v52  ;;  %v4895_v51 = vpop.eup %4894 }
 0xa5f   :  { %v3002_v44 = vpop.xlane.xlu1 %3001  ;;  %v3000_v23 = vpop.xlane.xlu0 %2999 }
 0xa60   :  { %v4282_v35 = vsel %vm9263_vm15, %v4887_v6, %v4211_v0  ;;  %v4281_v56 = vsel %vm9263_vm15, %v4885_v34, %v4210_v18  ;;  %vm3040_vm5 = vcmp.eq.f32.partialorder %v9463_v60, %v3002_v44  ;;  %vm3039_vm6 = vcmp.eq.f32.partialorder %v9463_v60, %v3000_v23  ;;  %v4933_v23 = vld [vmem:[%s9996_s16 + $0xe0] sm:$0xff] }
 0xa61   :  { %4314 = vst [vmem:[%s9999_s17 + $0xb8] sm:$0xff] %v4282_v35  ;;  %4313 = vst [vmem:[%s9999_s17 + $0xb0] sm:$0xff] %v4281_v56  ;;  %v4438_v11 = vsel %vm3040_vm5, 1.0, %v10655_v31  ;;  %v4437_v49 = vsel %vm3039_vm6, 1.0, %v10655_v31  ;;  %4896 = vtanh.f32 %v4933_v23  ;;  %v4934_v35 = vld [vmem:[%s9996_s16 + $0xe8] sm:$0xff] }
 0xa62   :  { %4898 = vtanh.f32 %v4934_v35 }
 0xa63   :  { %v3361_v58 = vpop.xlane.xlu1 %3360  ;;  %v3359_v37 = vpop.xlane.xlu0 %3358 }
 0xa64   :  { %vm3399_vm3 = vcmp.eq.f32.partialorder %v9463_v60, %v3361_v58  ;;  %vm3398_vm4 = vcmp.eq.f32.partialorder %v9463_v60, %v3359_v37 }
 0xa65   :  { %v4470_v9 = vsel %vm3399_vm3, 1.0, %v10655_v31  ;;  %v4469_v5 = vsel %vm3398_vm4, 1.0, %v10655_v31 }
 0xa66   :  { %v3495_v26 = vadd.f32 %v4470_v9, %v4438_v11  ;;  %v3494_v36 = vadd.f32 %v4469_v5, %v4437_v49 }
 0xa67   :  { %v3720_v45 = vpop.xlane.xlu1 %3719  ;;  %v3718_v50 = vpop.xlane.xlu0 %3717 }
 0xa68   :  { %vm3758_vm7 = vcmp.eq.f32.partialorder %v9463_v60, %v3720_v45  ;;  %vm3757_vm8 = vcmp.eq.f32.partialorder %v9463_v60, %v3718_v50 }
 0xa69   :  { %v4502_v8 = vsel %vm3758_vm7, 1.0, %v10655_v31  ;;  %v4501_v13 = vsel %vm3757_vm8, 1.0, %v10655_v31 }
 0xa6a   :  { %v3854_v28 = vadd.f32 %v4502_v8, %v3495_v26  ;;  %v3853_v27 = vadd.f32 %v4501_v13, %v3494_v36 }
 0xa6b   :  { %v4079_v12 = vpop.xlane.xlu1 %4078  ;;  %v4077_v32 = vpop.xlane.xlu0 %4076 }
 0xa6c   :  { %vm4117_vm9 = vcmp.eq.f32.partialorder %v9463_v60, %v4079_v12  ;;  %vm4116_vm10 = vcmp.eq.f32.partialorder %v9463_v60, %v4077_v32  ;;  %v4897_v32 = vpop.eup %4896 }
 0xa6d   :  { %v4534_v57 = vsel %vm4117_vm9, 1.0, %v10655_v31  ;;  %v4533_v3 = vsel %vm4116_vm10, 1.0, %v10655_v31 }
 0xa6e   :  { %v4213_v22 = vadd.f32 %v4534_v57, %v3854_v28  ;;  %v4212_v53 = vadd.f32 %v4533_v3, %v3853_v27  ;;  %v4899_v57 = vpop.eup %4898 }
 0xa6f   :  { %v3006_v1 = vpop.xlane.xlu1 %3005  ;;  %v3004_v15 = vpop.xlane.xlu0 %3003 }
 0xa70   :  { %v4284_v16 = vsel %vm9263_vm15, %v4891_v48, %v4213_v22  ;;  %v4283_v40 = vsel %vm9263_vm15, %v4889_v14, %v4212_v53  ;;  %vm3042_vm13 = vcmp.eq.f32.partialorder %v9463_v60, %v3006_v1  ;;  %vm3041_vm14 = vcmp.eq.f32.partialorder %v9463_v60, %v3004_v15  ;;  %v4935_v1 = vld [vmem:[%s9996_s16 + $0xf0] sm:$0xff]  ;;  %v4936_v15 = vld [vmem:[%s9997_s15] ss:$0 sm:$0xff] }
 0xa71   :  { %4316 = vst [vmem:[%s9999_s17 + $0xc8] sm:$0xff] %v4284_v16  ;;  %4315 = vst [vmem:[%s9999_s17 + $0xc0] sm:$0xff] %v4283_v40  ;;  %v4440_v19 = vsel %vm3042_vm13, 1.0, %v10655_v31  ;;  %v4439_v25 = vsel %vm3041_vm14, 1.0, %v10655_v31  ;;  %4900 = vtanh.f32 %v4935_v1  ;;  %v4937_v16 = vld [vmem:[%s9996_s16 + $0xf8] sm:$0xff] }
 0xa72   :  { %4902 = vtanh.f32 %v4937_v16 }
 0xa73   :  { %v3365_v24 = vpop.xlane.xlu1 %3364  ;;  %v3363_v38 = vpop.xlane.xlu0 %3362 }
 0xa74   :  { %vm3401_vm11 = vcmp.eq.f32.partialorder %v9463_v60, %v3365_v24  ;;  %vm3400_vm12 = vcmp.eq.f32.partialorder %v9463_v60, %v3363_v38 }
 0xa75   :  { %v4472_v63 = vsel %vm3401_vm11, 1.0, %v10655_v31  ;;  %v4471_v7 = vsel %vm3400_vm12, 1.0, %v10655_v31 }
 0xa76   :  { %v3497_v30 = vadd.f32 %v4472_v63, %v4440_v19  ;;  %v3496_v62 = vadd.f32 %v4471_v7, %v4439_v25 }
 0xa77   :  { %v3724_v47 = vpop.xlane.xlu1 %3723  ;;  %v3722_v59 = vpop.xlane.xlu0 %3721 }
 0xa78   :  { %vm3760_vm0 = vcmp.eq.f32.partialorder %v9463_v60, %v3724_v47  ;;  %vm3759_vm1 = vcmp.eq.f32.partialorder %v9463_v60, %v3722_v59 }
 0xa79   :  { %v4504_v20 = vsel %vm3760_vm0, 1.0, %v10655_v31  ;;  %v4503_v21 = vsel %vm3759_vm1, 1.0, %v10655_v31 }
 0xa7a   :  { %v3856_v4 = vadd.f32 %v4504_v20, %v3497_v30  ;;  %v3855_v61 = vadd.f32 %v4503_v21, %v3496_v62 }
 0xa7b   :  { %v4083_v39 = vpop.xlane.xlu1 %4082  ;;  %v4081_v33 = vpop.xlane.xlu0 %4080 }
 0xa7c   :  { %vm4119_vm2 = vcmp.eq.f32.partialorder %v9463_v60, %v4083_v39  ;;  %vm4118_vm3 = vcmp.eq.f32.partialorder %v9463_v60, %v4081_v33  ;;  %v4901_v33 = vpop.eup %4900 }
 0xa7d   :  { %v4536_v43 = vsel %vm4119_vm2, 1.0, %v10655_v31  ;;  %v4535_v54 = vsel %vm4118_vm3, 1.0, %v10655_v31 }
 0xa7e   :  { %v4215_v29 = vadd.f32 %v4536_v43, %v3856_v4  ;;  %v4214_v52 = vadd.f32 %v4535_v54, %v3855_v61  ;;  %v4903_v43 = vpop.eup %4902 }
 0xa7f   :  { %v3010_v41 = vpop.xlane.xlu1 %3009  ;;  %v3008_v34 = vpop.xlane.xlu0 %3007 }
 0xa80   :  { %v4286_v0 = vsel %vm9263_vm15, %v4895_v51, %v4215_v29  ;;  %v4285_v18 = vsel %vm9263_vm15, %v4893_v2, %v4214_v52  ;;  %vm3044_vm6 = vcmp.eq.f32.partialorder %v9463_v60, %v3010_v41  ;;  %vm3043_vm7 = vcmp.eq.f32.partialorder %v9463_v60, %v3008_v34 }
 0xa81   :  { %4318 = vst [vmem:[%s9999_s17 + $0xd8] sm:$0xff] %v4286_v0  ;;  %4317 = vst [vmem:[%s9999_s17 + $0xd0] sm:$0xff] %v4285_v18  ;;  %v4442_v42 = vsel %vm3044_vm6, 1.0, %v10655_v31  ;;  %v4441_v9 = vsel %vm3043_vm7, 1.0, %v10655_v31 }
 0xa83   :  { %v3369_v6 = vpop.xlane.xlu1 %3368  ;;  %v3367_v44 = vpop.xlane.xlu0 %3366 }
 0xa84   :  { %vm3403_vm4 = vcmp.eq.f32.partialorder %v9463_v60, %v3369_v6  ;;  %vm3402_vm5 = vcmp.eq.f32.partialorder %v9463_v60, %v3367_v44 }
 0xa85   :  { %v4474_v56 = vsel %vm3403_vm4, 1.0, %v10655_v31  ;;  %v4473_v58 = vsel %vm3402_vm5, 1.0, %v10655_v31 }
 0xa86   :  { %v3499_v50 = vadd.f32 %v4474_v56, %v4442_v42  ;;  %v3498_v11 = vadd.f32 %v4473_v58, %v4441_v9 }
 0xa87   :  { %v3728_v37 = vpop.xlane.xlu1 %3727  ;;  %v3726_v10 = vpop.xlane.xlu0 %3725 }
 0xa88   :  { %vm3762_vm8 = vcmp.eq.f32.partialorder %v9463_v60, %v3728_v37  ;;  %vm3761_vm9 = vcmp.eq.f32.partialorder %v9463_v60, %v3726_v10 }
 0xa89   :  { %v4506_v5 = vsel %vm3762_vm8, 1.0, %v10655_v31  ;;  %v4505_v45 = vsel %vm3761_vm9, 1.0, %v10655_v31 }
 0xa8a   :  { %v3858_v13 = vadd.f32 %v4506_v5, %v3499_v50  ;;  %v3857_v26 = vadd.f32 %v4505_v45, %v3498_v11 }
 0xa8b   :  { %v4087_v49 = vpop.xlane.xlu1 %4086  ;;  %v4085_v8 = vpop.xlane.xlu0 %4084 }
 0xa8c   :  { %vm4121_vm10 = vcmp.eq.f32.partialorder %v9463_v60, %v4087_v49  ;;  %vm4120_vm11 = vcmp.eq.f32.partialorder %v9463_v60, %v4085_v8 }
 0xa8d   :  { %v4538_v36 = vsel %vm4121_vm10, 1.0, %v10655_v31  ;;  %v4537_v12 = vsel %vm4120_vm11, 1.0, %v10655_v31 }
 0xa8e   :  { %v4217_v28 = vadd.f32 %v4538_v36, %v3858_v13  ;;  %v4216_v27 = vadd.f32 %v4537_v12, %v3857_v26 }
 0xa8f   :  { %v3014_v3 = vpop.xlane.xlu1 %3013  ;;  %v3012_v14 = vpop.xlane.xlu0 %3011 }
 0xa90   :  { %v4288_v22 = vsel %vm9263_vm15, %v4899_v57, %v4217_v28  ;;  %v4287_v53 = vsel %vm9263_vm15, %v4897_v32, %v4216_v27  ;;  %vm3046_vm14 = vcmp.eq.f32.partialorder %v4936_v15, %v3014_v3  ;;  %vm3045_vm0 = vcmp.eq.f32.partialorder %v4936_v15, %v3012_v14 }
 0xa91   :  { %4320 = vst [vmem:[%s9999_s17 + $0xe8] sm:$0xff] %v4288_v22  ;;  %4319 = vst [vmem:[%s9999_s17 + $0xe0] sm:$0xff] %v4287_v53  ;;  %v4444_v46 = vsel %vm3046_vm14, 1.0, %v10655_v31  ;;  %v4443_v63 = vsel %vm3045_vm0, 1.0, %v10655_v31 }
 0xa93   :  { %v3373_v60 = vpop.xlane.xlu1 %3372  ;;  %v3371_v48 = vpop.xlane.xlu0 %3370 }
 0xa94   :  { %vm3405_vm12 = vcmp.eq.f32.partialorder %v4936_v15, %v3373_v60  ;;  %vm3404_vm13 = vcmp.eq.f32.partialorder %v4936_v15, %v3371_v48 }
 0xa95   :  { %v4476_v40 = vsel %vm3405_vm12, 1.0, %v10655_v31  ;;  %v4475_v24 = vsel %vm3404_vm13, 1.0, %v10655_v31 }
 0xa96   :  { %v3501_v59 = vadd.f32 %v4476_v40, %v4444_v46  ;;  %v3500_v19 = vadd.f32 %v4475_v24, %v4443_v63 }
 0xa97   :  { %v3732_v38 = vpop.xlane.xlu1 %3731  ;;  %v3730_v55 = vpop.xlane.xlu0 %3729 }
 0xa98   :  { %vm3764_vm1 = vcmp.eq.f32.partialorder %v4936_v15, %v3732_v38  ;;  %vm3763_vm2 = vcmp.eq.f32.partialorder %v4936_v15, %v3730_v55 }
 0xa99   :  { %v4508_v7 = vsel %vm3764_vm1, 1.0, %v10655_v31  ;;  %v4507_v47 = vsel %vm3763_vm2, 1.0, %v10655_v31 }
 0xa9a   :  { %v3860_v21 = vadd.f32 %v4508_v7, %v3501_v59  ;;  %v3859_v30 = vadd.f32 %v4507_v47, %v3500_v19 }
 0xa9b   :  { %v4091_v25 = vpop.xlane.xlu1 %4090  ;;  %v4089_v20 = vpop.xlane.xlu0 %4088 }
 0xa9c   :  { %vm4123_vm3 = vcmp.eq.f32.partialorder %v4936_v15, %v4091_v25  ;;  %vm4122_vm4 = vcmp.eq.f32.partialorder %v4936_v15, %v4089_v20 }
 0xa9d   :  { %v4540_v62 = vsel %vm4123_vm3, 1.0, %v10655_v31  ;;  %v4539_v39 = vsel %vm4122_vm4, 1.0, %v10655_v31 }
 0xa9e   :  { %v4219_v4 = vadd.f32 %v4540_v62, %v3860_v21  ;;  %v4218_v61 = vadd.f32 %v4539_v39, %v3859_v30 }
 0xaa0   :  { %v4290_v54 = vsel %vm9263_vm15, %v4903_v43, %v4219_v4  ;;  %v4289_v2 = vsel %vm9263_vm15, %v4901_v33, %v4218_v61 }
 0xaa1   :  { %4322 = vst [vmem:[%s9999_s17 + $0xf8] sm:$0xff] %v4290_v54  ;;  %4321 = vst [vmem:[%s9999_s17 + $0xf0] sm:$0xff] %v4289_v2 }

</bundles_post_ra>
